<compile_context>
chip_gen: v6e
topology: v6e:2x2x1
jax: 0.10.0
libtpu: 0.0.40
codegen_flags: <defaults>
</compile_context>

<pallas_src>
import functools

import jax
import jax.numpy as jnp
from jax.experimental import pallas as pl
from jax.experimental.pallas import tpu as pltpu


LANE = 128     # TPU lane width
D1 = 1024      # hidden width (conv1/conv2 output channels)
MAX_TK = 2048  # K tile for conv1 streaming


def _round_up(x, m):
    return (x + m - 1) // m * m


def _k_tiling(k):
    """Return (tk, k_pad) for the conv1 contraction dim."""
    k128 = _round_up(k, LANE)
    if k128 <= MAX_TK:
        return k128, k128          # single K step, w1 resident
    return MAX_TK, _round_up(k, MAX_TK)


# ----------------------------------------------------------------------------
# Pallas kernel
# ----------------------------------------------------------------------------
def _classifier_head_kernel(nc, x_ref, w1_ref, t1_ref, w2_ref, t2_ref,
                            wh_ref, bh_ref, head_ref, probs_ref, acc_ref):
    """grid = (row_tiles, k_tiles); K axis last ('arbitrary')."""
    k = pl.program_id(1)

    # conv1 partial product, accumulated over the K grid axis (f32 scratch).
    @pl.when(k == 0)
    def _():
        acc_ref[...] = jnp.zeros_like(acc_ref)

    acc_ref[...] += jnp.dot(x_ref[...], w1_ref[...],
                            preferred_element_type=jnp.float32)

    # Epilogue on the last K step: BN1 shift + ReLU -> conv2 -> heads -> softmax.
    @pl.when(k == pl.num_programs(1) - 1)
    def _():
        h = jnp.maximum(acc_ref[...] + t1_ref[...], 0.0)
        h = jnp.dot(h.astype(jnp.bfloat16), w2_ref[...],
                    preferred_element_type=jnp.float32)
        h = jnp.maximum(h + t2_ref[...], 0.0)
        head = jnp.dot(h.astype(jnp.bfloat16), wh_ref[...],
                       preferred_element_type=jnp.float32) + bh_ref[...]

        # softmax(dim=1) over the first nc lanes of the lane-dense head slab;
        # non-class lanes are masked via iota (no unaligned slicing).
        lane = jax.lax.broadcasted_iota(jnp.int32, head.shape, 1)
        is_cls = lane < nc
        masked = jnp.where(is_cls, head, jnp.float32(-1e30))
        m = jnp.max(masked, axis=1, keepdims=True)
        e = jnp.where(is_cls, jnp.exp(masked - m), 0.0)
        denom = jnp.sum(e, axis=1, keepdims=True)
        probs = e * pl.reciprocal(denom, approx=False)   # exact: EUP slot, ~free

        # Lane-dense, unmasked stores (two 128-aligned output slabs).
        head_ref[...] = head
        probs_ref[...] = probs[:, :probs_ref.shape[1]]


def _vmem_limit_bytes(tile_n, tk, h_w, p_w):
    b = 0
    b += 2 * tile_n * tk * 2            # x: 2 buffers, bf16
    b += 2 * tk * D1 * 2                # w1: streamed over K, 2 buffers, bf16
    b += D1 * D1 * 2                    # w2: single buffer (Buffered(1))
    b += D1 * h_w * 2                   # wh: single buffer
    b += (2 * D1 + h_w) * 4             # t1, t2, bh (f32, single buffer)
    b += 2 * tile_n * (h_w + p_w) * 4   # outputs: 2 buffers, f32
    b += tile_n * D1 * 4                # f32 accumulator scratch
    b += tile_n * (D1 * 6 + h_w * 16)   # in-kernel intermediates / casts / masks
    b = int(b * 1.5) + (4 << 20)        # ~50% headroom + slack
    return max(32 << 20, min(b, 64 << 20))


def classifier_head_pallas(pooled_flat, fused, num_classes):
    """pooled_flat: [N, K] f32 (unpadded).
    Returns (head [N, h_w], probs [N, p_w]) f32 lane-dense slabs."""
    w1, t1, w2, t2, wh, bh = fused
    nc = num_classes
    n, k = pooled_flat.shape
    tk, k_pad = _k_tiling(k)
    assert w1.shape[0] == k_pad
    h_w = wh.shape[1]                       # fused head width (mult. of 128)
    p_w = _round_up(nc, LANE)               # probs slab width

    # Row tiling: 256 exploits v6e/v7x 256-wide MXU; 128 otherwise / on v5e.
    tile_n = 256 if n >= 256 else 128
    n_pad = _round_up(max(n, 1), tile_n)

    # Single-pass activation prep: one bf16 cast + one pad (rows and K together).
    x = jnp.pad(pooled_flat.astype(jnp.bfloat16),
                ((0, n_pad - n), (0, k_pad - k)))

    grid = (n_pad // tile_n, k_pad // tk)

    cost = pl.CostEstimate(
        flops=int(2 * n_pad * (k_pad * D1 + D1 * D1 + D1 * h_w)),
        transcendentals=int(n_pad * (nc + 1)),
        bytes_accessed=int(x.size * 2 + w1.size * 2 + w2.size * 2 + wh.size * 2
                           + (t1.size + t2.size + bh.size) * 4
                           + n_pad * (h_w + p_w) * 4))

    # Grid-invariant operands: single-buffered (index map pinned to (0, 0)).
    resident = dict(pipeline_mode=pl.Buffered(1))

    head_out, probs_out = pl.pallas_call(
        functools.partial(_classifier_head_kernel, nc),
        out_shape=(jax.ShapeDtypeStruct((n_pad, h_w), jnp.float32),
                   jax.ShapeDtypeStruct((n_pad, p_w), jnp.float32)),
        grid_spec=pltpu.PrefetchScalarGridSpec(
            num_scalar_prefetch=0,
            grid=grid,
            in_specs=[
                pl.BlockSpec((tile_n, tk), lambda i, kk: (i, kk)),         # x rows
                pl.BlockSpec((tk, D1), lambda i, kk: (kk, 0)),             # w1 (K-streamed)
                pl.BlockSpec((1, D1), lambda i, kk: (0, 0), **resident),   # t1
                pl.BlockSpec((D1, D1), lambda i, kk: (0, 0), **resident),  # w2
                pl.BlockSpec((1, D1), lambda i, kk: (0, 0), **resident),   # t2
                pl.BlockSpec((D1, h_w), lambda i, kk: (0, 0), **resident), # fused head w
                pl.BlockSpec((1, h_w), lambda i, kk: (0, 0), **resident),  # fused head b
            ],
            out_specs=(
                pl.BlockSpec((tile_n, h_w), lambda i, kk: (i, 0)),         # logits+bbox
                pl.BlockSpec((tile_n, p_w), lambda i, kk: (i, 0)),         # probs
            ),
            scratch_shapes=[pltpu.VMEM((tile_n, D1), jnp.float32)],
        ),
        compiler_params=pltpu.CompilerParams(
            dimension_semantics=("parallel", "arbitrary"),
            vmem_limit_bytes=_vmem_limit_bytes(tile_n, tk, h_w, p_w)),
        cost_estimate=cost,
    )(x, w1, t1, w2, t2, wh, bh)
    return head_out[:n], probs_out[:n]


# ----------------------------------------------------------------------------
# pyramid_roi_align in plain JAX (glue: data-dependent gather).
# ----------------------------------------------------------------------------
def _crop_and_resize_level(fmap, boxes, crop):
    """TF-style crop_and_resize. fmap: [C,H,W]; boxes: [N,4] normalized."""
    c, h, w = fmap.shape
    y1, x1, y2, x2 = boxes[:, 0], boxes[:, 1], boxes[:, 2], boxes[:, 3]
    grid = jnp.arange(crop, dtype=jnp.float32)
    if crop > 1:
        ys = y1[:, None] * (h - 1) + grid[None, :] * ((y2 - y1)[:, None] * (h - 1) / (crop - 1))
        xs = x1[:, None] * (w - 1) + grid[None, :] * ((x2 - x1)[:, None] * (w - 1) / (crop - 1))
    else:
        ys = 0.5 * (y1 + y2)[:, None] * (h - 1) * jnp.ones((1, crop), jnp.float32)
        xs = 0.5 * (x1 + x2)[:, None] * (w - 1) * jnp.ones((1, crop), jnp.float32)

    y0f = jnp.floor(ys)
    x0f = jnp.floor(xs)
    y0 = jnp.clip(y0f, 0, h - 1).astype(jnp.int32)
    y1i = jnp.clip(y0f + 1, 0, h - 1).astype(jnp.int32)
    x0 = jnp.clip(x0f, 0, w - 1).astype(jnp.int32)
    x1i = jnp.clip(x0f + 1, 0, w - 1).astype(jnp.int32)
    wy = (ys - y0f)[:, None, :, None]
    wx = (xs - x0f)[:, None, None, :]

    def gather(yi, xi):
        g = fmap[:, yi[:, :, None], xi[:, None, :]]  # [C, N, P, P]
        return jnp.transpose(g, (1, 0, 2, 3))

    v00 = gather(y0, x0)
    v01 = gather(y0, x1i)
    v10 = gather(y1i, x0)
    v11 = gather(y1i, x1i)
    out = (v00 * (1 - wy) * (1 - wx) + v01 * (1 - wy) * wx +
           v10 * wy * (1 - wx) + v11 * wy * wx)

    valid = ((ys >= 0) & (ys <= h - 1))[:, None, :, None] & \
            ((xs >= 0) & (xs <= w - 1))[:, None, None, :]
    return jnp.where(valid, out, 0.0)


def pyramid_roi_align_jax(boxes, feature_maps, pool_size, image_shape):
    """boxes: [N,4]; feature_maps: list of 4 maps [C,H_l,W_l]. Returns [N,C,P,P]."""
    y1, x1, y2, x2 = boxes[:, 0], boxes[:, 1], boxes[:, 2], boxes[:, 3]
    h = y2 - y1
    w = x2 - x1
    image_area = jnp.float32(image_shape[0] * image_shape[1])
    roi_level = 4.0 + jnp.log2(jnp.sqrt(h * w) / (224.0 / jnp.sqrt(image_area)))
    roi_level = jnp.clip(jnp.round(roi_level), 2, 5).astype(jnp.int32)
    level_idx = roi_level - 2

    crops = jnp.stack(
        [_crop_and_resize_level(fm, boxes, pool_size) for fm in feature_maps],
        axis=0)                                                          # [4,N,C,P,P]
    onehot = (level_idx[None, :] == jnp.arange(4)[:, None]).astype(crops.dtype)
    pooled = jnp.sum(crops * onehot[:, :, None, None, None], axis=0)     # [N,C,P,P]
    return pooled


# ----------------------------------------------------------------------------
# Parameter init + fusion + full forward
# ----------------------------------------------------------------------------
def init_params(key, depth, pool_size, num_classes):
    ks = jax.random.split(key, 10)
    p = {}
    p["conv1_w"] = 0.02 * jax.random.normal(ks[0], (1024, depth, pool_size, pool_size), jnp.float32)
    p["conv1_b"] = 0.01 * jax.random.normal(ks[1], (1024,), jnp.float32)
    p["bn1_gamma"] = 1.0 + 0.01 * jax.random.normal(ks[2], (1024,), jnp.float32)
    p["bn1_beta"] = 0.01 * jax.random.normal(ks[3], (1024,), jnp.float32)
    p["bn1_mean"] = jnp.zeros((1024,), jnp.float32)
    p["bn1_var"] = jnp.ones((1024,), jnp.float32)
    p["conv2_w"] = 0.02 * jax.random.normal(ks[4], (1024, 1024, 1, 1), jnp.float32)
    p["conv2_b"] = 0.01 * jax.random.normal(ks[5], (1024,), jnp.float32)
    p["bn2_gamma"] = 1.0 + 0.01 * jax.random.normal(ks[6], (1024,), jnp.float32)
    p["bn2_beta"] = 0.01 * jax.random.normal(ks[7], (1024,), jnp.float32)
    p["bn2_mean"] = jnp.zeros((1024,), jnp.float32)
    p["bn2_var"] = jnp.ones((1024,), jnp.float32)
    p["fc_cls_w"] = 0.02 * jax.random.normal(ks[8], (num_classes, 1024), jnp.float32)
    p["fc_cls_b"] = jnp.zeros((num_classes,), jnp.float32)
    p["fc_box_w"] = 0.02 * jax.random.normal(ks[9], (num_classes * 4, 1024), jnp.float32)
    p["fc_box_b"] = jnp.zeros((num_classes * 4,), jnp.float32)
    return p


def fuse_params(p, depth, pool_size, num_classes, eps=0.001):
    """Fold BN (inference) + conv bias into shifts, fold BN scale into the conv
    weight columns, pad K for the kernel's K-tiling, fuse class+bbox heads into
    one lane-dense weight, and cast all weights to bf16 for HBM streaming."""
    k = depth * pool_size * pool_size
    _, k_pad = _k_tiling(k)
    nc = num_classes

    s1 = p["bn1_gamma"] / jnp.sqrt(p["bn1_var"] + eps)
    t1 = (p["conv1_b"] - p["bn1_mean"]) * s1 + p["bn1_beta"]
    w1 = p["conv1_w"].reshape(1024, k).T * s1[None, :]            # [K, 1024], BN1 folded
    w1 = jnp.pad(w1, ((0, k_pad - k), (0, 0))).astype(jnp.bfloat16)

    s2 = p["bn2_gamma"] / jnp.sqrt(p["bn2_var"] + eps)
    t2 = (p["conv2_b"] - p["bn2_mean"]) * s2 + p["bn2_beta"]
    w2 = (p["conv2_w"].reshape(1024, 1024).T * s2[None, :]).astype(jnp.bfloat16)

    # Fused class + bbox head, zero-padded to a lane-dense width.
    wh = jnp.concatenate([p["fc_cls_w"].T, p["fc_box_w"].T], axis=1)   # [1024, 5*nc]
    bh = jnp.concatenate([p["fc_cls_b"], p["fc_box_b"]])[None, :]      # [1, 5*nc]
    h_pad = _round_up(5 * nc, LANE)
    wh = jnp.pad(wh, ((0, 0), (0, h_pad - 5 * nc))).astype(jnp.bfloat16)
    bh = jnp.pad(bh, ((0, 0), (0, h_pad - 5 * nc))).astype(jnp.float32)

    return (w1, t1[None, :].astype(jnp.float32),
            w2, t2[None, :].astype(jnp.float32),
            wh, bh)


def classifier_forward(feature_maps, rois, fused, pool_size, image_shape, num_classes):
    """feature_maps: list of [1,C,H,W]; rois: [1,N,4].
    Returns [logits [N,nc], probs [N,nc], bbox [N,nc,4]]."""
    boxes = rois[0]                       # squeeze(0), like pyramid_roi_align
    fmaps = [f[0] for f in feature_maps]  # squeeze(0)
    pooled = pyramid_roi_align_jax(boxes, fmaps, pool_size, image_shape)   # [N,C,P,P]
    n = pooled.shape[0]
    x_flat = pooled.reshape(n, -1)                                          # [N, K]

    head, probs = classifier_head_pallas(x_flat, fused, num_classes)
    nc = num_classes
    logits = head[:, :nc]
    bbox = head[:, nc:5 * nc].reshape(n, nc, 4)
    probs = probs[:, :nc]
    return [logits, probs, bbox]


def reference_forward(pooled, p, num_classes, eps=0.001):
    """Pure-JAX f32 reference (matches the PyTorch module in eval mode)."""
    n = pooled.shape[0]
    x = pooled.reshape(n, -1).astype(jnp.float32)
    h = x @ p["conv1_w"].reshape(1024, -1).T + p["conv1_b"][None]
    h = (h - p["bn1_mean"]) / jnp.sqrt(p["bn1_var"] + eps) * p["bn1_gamma"] + p["bn1_beta"]
    h = jnp.maximum(h, 0.0)
    h = h @ p["conv2_w"].reshape(1024, 1024).T + p["conv2_b"][None]
    h = (h - p["bn2_mean"]) / jnp.sqrt(p["bn2_var"] + eps) * p["bn2_gamma"] + p["bn2_beta"]
    h = jnp.maximum(h, 0.0)
    logits = h @ p["fc_cls_w"].T + p["fc_cls_b"][None]
    probs = jax.nn.softmax(logits, axis=1)
    bbox = (h @ p["fc_box_w"].T + p["fc_box_b"][None]).reshape(n, num_classes, 4)
    return logits, probs, bbox


if __name__ == "__main__":
    depth = 16
    pool_size = 7
    image_shape = (128, 128, 3)
    num_classes = 8
    num_boxes = 8

    key = jax.random.PRNGKey(0)
    k_param, k_b1, k_b2, k_f = jax.random.split(key, 4)

    # Deterministic parameters.
    params = init_params(k_param, depth, pool_size, num_classes)
    fused = fuse_params(params, depth, pool_size, num_classes)

    # ROIs: [1, num_boxes, 4] normalized (y1, x1, y2, x2) with y1<y2, x1<x2.
    pa = jax.random.uniform(k_b1, (1, num_boxes, 2), jnp.float32)
    pb = jax.random.uniform(k_b2, (1, num_boxes, 2), jnp.float32)
    y1 = jnp.minimum(pa[..., 0], pb[..., 0])
    y2 = jnp.maximum(pa[..., 0], pb[..., 0]) + 1e-3
    x1 = jnp.minimum(pa[..., 1], pb[..., 1])
    x2 = jnp.maximum(pa[..., 1], pb[..., 1]) + 1e-3
    rois = jnp.stack([y1, x1, y2, x2], axis=-1)  # [1, num_boxes, 4]

    # Feature pyramid P2..P5: [1, depth, H_l, W_l].
    fkeys = jax.random.split(k_f, 4)
    feature_maps = [
        jax.random.normal(fkeys[0], (1, depth, 32, 32), jnp.float32),
        jax.random.normal(fkeys[1], (1, depth, 16, 16), jnp.float32),
        jax.random.normal(fkeys[2], (1, depth, 8, 8), jnp.float32),
        jax.random.normal(fkeys[3], (1, depth, 4, 4), jnp.float32),
    ]

    logits, probs, bbox = classifier_forward(
        feature_maps, rois, fused, pool_size, image_shape, num_classes)
    jax.block_until_ready((logits, probs, bbox))

    assert logits.shape == (num_boxes, num_classes)
    assert probs.shape == (num_boxes, num_classes)
    assert bbox.shape == (num_boxes, num_classes, 4)
    assert bool(jnp.all(jnp.isfinite(logits)))
    # Exact reciprocal -> probabilities sum to 1 tightly.
    assert bool(jnp.allclose(jnp.sum(probs, axis=1), 1.0, atol=1e-4))

    # Soft numerical check against the f32 pure-JAX reference (bf16 weights).
    pooled_ref = pyramid_roi_align_jax(
        rois[0], [f[0] for f in feature_maps], pool_size, image_shape)
    lg_r, pr_r, bb_r = reference_forward(pooled_ref, params, num_classes)
    rel = lambda a, b: float(jnp.linalg.norm(a - b) / (jnp.linalg.norm(b) + 1e-6))
    assert rel(logits, lg_r) < 0.1
    assert rel(bbox, bb_r) < 0.1
    assert float(jnp.max(jnp.abs(probs - pr_r))) < 0.05

    print("KERNEL_OK")
</pallas_src>

<mosaic_0001>
module attributes {stable_mosaic.version = 11 : i64} {
  func.func @_classifier_head_kernel(%arg0: i32, %arg1: i32, %arg2: memref<128x896xbf16, #tpu.memory_space<vmem>>, %arg3: memref<896x1024xbf16, #tpu.memory_space<vmem>>, %arg4: memref<1x1024xf32, #tpu.memory_space<vmem>>, %arg5: memref<1024x1024xbf16, #tpu.memory_space<vmem>>, %arg6: memref<1x1024xf32, #tpu.memory_space<vmem>>, %arg7: memref<1024x128xbf16, #tpu.memory_space<vmem>>, %arg8: memref<1x128xf32, #tpu.memory_space<vmem>>, %arg9: memref<128x128xf32, #tpu.memory_space<vmem>>, %arg10: memref<128x128xf32, #tpu.memory_space<vmem>>, %arg11: memref<128x1024xf32, #tpu.memory_space<vmem>>) attributes {dimension_semantics = [#tpu.dimension_semantics<parallel>, #tpu.dimension_semantics<arbitrary>], iteration_bounds = array<i64: 1, 1>, scalar_prefetch = 0 : i64, scratch_operands = 1 : i64, tpu.core_type = #tpu.core_type<tc>, window_params = [{transform_indices = @transform_0, window_bounds = array<i64: 128, 896>}, {transform_indices = @transform_1, window_bounds = array<i64: 896, 1024>}, {pipeline_mode = #tpu.pipeline_mode<synchronous>, transform_indices = @transform_2, window_bounds = array<i64: 1, 1024>}, {pipeline_mode = #tpu.pipeline_mode<synchronous>, transform_indices = @transform_3, window_bounds = array<i64: 1024, 1024>}, {pipeline_mode = #tpu.pipeline_mode<synchronous>, transform_indices = @transform_4, window_bounds = array<i64: 1, 1024>}, {pipeline_mode = #tpu.pipeline_mode<synchronous>, transform_indices = @transform_5, window_bounds = array<i64: 1024, 128>}, {pipeline_mode = #tpu.pipeline_mode<synchronous>, transform_indices = @transform_6, window_bounds = array<i64: 1, 128>}, {transform_indices = @transform_7, window_bounds = array<i64: 128, 128>}, {transform_indices = @transform_8, window_bounds = array<i64: 128, 128>}]} {
    %c0_i32 = arith.constant 0 : i32
    %0 = arith.cmpi eq, %arg1, %c0_i32 : i32
    %1 = arith.extui %0 : i1 to i32
    %c0_i32_0 = arith.constant 0 : i32
    %2 = arith.cmpi ne, %1, %c0_i32_0 : i32
    scf.if %2 {
      %cst_10 = arith.constant 0.000000e+00 : f32
      %12 = vector.broadcast %cst_10 : f32 to vector<128x1024xf32>
      %c0_11 = arith.constant 0 : index
      %c0_12 = arith.constant 0 : index
      %13 = vector.load %arg11[%c0_11, %c0_12] : memref<128x1024xf32, #tpu.memory_space<vmem>>, vector<128x1024xf32>
      tpu.vector_store %arg11[%c0_11, %c0_12], %12 {strides = array<i32>} : memref<128x1024xf32, #tpu.memory_space<vmem>>, vector<128x1024xf32>,
    } else {
    }
    %c0 = arith.constant 0 : index
    %c0_1 = arith.constant 0 : index
    %3 = vector.load %arg11[%c0, %c0_1] : memref<128x1024xf32, #tpu.memory_space<vmem>>, vector<128x1024xf32>
    %c0_2 = arith.constant 0 : index
    %c0_3 = arith.constant 0 : index
    %4 = vector.load %arg2[%c0_2, %c0_3] : memref<128x896xbf16, #tpu.memory_space<vmem>>, vector<128x896xbf16>
    %c0_4 = arith.constant 0 : index
    %c0_5 = arith.constant 0 : index
    %5 = vector.load %arg3[%c0_4, %c0_5] : memref<896x1024xbf16, #tpu.memory_space<vmem>>, vector<896x1024xbf16>
    %cst = arith.constant dense<0.000000e+00> : vector<128x1024xf32>
    %6 = tpu.matmul %4, %5, %cst {dimension_numbers = #tpu.dot_dimension_numbers<[1], [0], [0], [1], [0, 0, 1, 1], [], []>} : vector<128x896xbf16>, vector<896x1024xbf16>, vector<128x1024xf32> -> vector<128x1024xf32>
    %7 = arith.addf %3, %6 : vector<128x1024xf32>
    %c0_6 = arith.constant 0 : index
    %c0_7 = arith.constant 0 : index
    %8 = vector.load %arg11[%c0_6, %c0_7] : memref<128x1024xf32, #tpu.memory_space<vmem>>, vector<128x1024xf32>
    tpu.vector_store %arg11[%c0_6, %c0_7], %7 {strides = array<i32>} : memref<128x1024xf32, #tpu.memory_space<vmem>>, vector<128x1024xf32>,
    %c0_i32_8 = arith.constant 0 : i32
    %9 = arith.cmpi eq, %arg1, %c0_i32_8 : i32
    %10 = arith.extui %9 : i1 to i32
    %c0_i32_9 = arith.constant 0 : i32
    %11 = arith.cmpi ne, %10, %c0_i32_9 : i32
    scf.if %11 {
      %c0_10 = arith.constant 0 : index
      %c0_11 = arith.constant 0 : index
      %12 = vector.load %arg11[%c0_10, %c0_11] : memref<128x1024xf32, #tpu.memory_space<vmem>>, vector<128x1024xf32>
      %c0_12 = arith.constant 0 : index
      %c0_13 = arith.constant 0 : index
      %13 = vector.load %arg4[%c0_12, %c0_13] : memref<1x1024xf32, #tpu.memory_space<vmem>>, vector<1x1024xf32>
      %14 = vector.broadcast %13 : vector<1x1024xf32> to vector<128x1024xf32>
      %15 = arith.addf %12, %14 : vector<128x1024xf32>
      %cst_14 = arith.constant 0.000000e+00 : f32
      %16 = vector.broadcast %cst_14 : f32 to vector<128x1024xf32>
      %17 = arith.maximumf %15, %16 : vector<128x1024xf32>
      %18 = arith.truncf %17 : vector<128x1024xf32> to vector<128x1024xbf16>
      %c0_15 = arith.constant 0 : index
      %c0_16 = arith.constant 0 : index
      %19 = vector.load %arg5[%c0_15, %c0_16] : memref<1024x1024xbf16, #tpu.memory_space<vmem>>, vector<1024x1024xbf16>
      %cst_17 = arith.constant dense<0.000000e+00> : vector<128x1024xf32>
      %20 = tpu.matmul %18, %19, %cst_17 {dimension_numbers = #tpu.dot_dimension_numbers<[1], [0], [0], [1], [0, 0, 1, 1], [], []>} : vector<128x1024xbf16>, vector<1024x1024xbf16>, vector<128x1024xf32> -> vector<128x1024xf32>
      %c0_18 = arith.constant 0 : index
      %c0_19 = arith.constant 0 : index
      %21 = vector.load %arg6[%c0_18, %c0_19] : memref<1x1024xf32, #tpu.memory_space<vmem>>, vector<1x1024xf32>
      %22 = vector.broadcast %21 : vector<1x1024xf32> to vector<128x1024xf32>
      %23 = arith.addf %20, %22 : vector<128x1024xf32>
      %cst_20 = arith.constant 0.000000e+00 : f32
      %24 = vector.broadcast %cst_20 : f32 to vector<128x1024xf32>
      %25 = arith.maximumf %23, %24 : vector<128x1024xf32>
      %26 = arith.truncf %25 : vector<128x1024xf32> to vector<128x1024xbf16>
      %c0_21 = arith.constant 0 : index
      %c0_22 = arith.constant 0 : index
      %27 = vector.load %arg7[%c0_21, %c0_22] : memref<1024x128xbf16, #tpu.memory_space<vmem>>, vector<1024x128xbf16>
      %cst_23 = arith.constant dense<0.000000e+00> : vector<128x128xf32>
      %28 = tpu.matmul %26, %27, %cst_23 {dimension_numbers = #tpu.dot_dimension_numbers<[1], [0], [0], [1], [0, 0, 1, 1], [], []>} : vector<128x1024xbf16>, vector<1024x128xbf16>, vector<128x128xf32> -> vector<128x128xf32>
      %c0_24 = arith.constant 0 : index
      %c0_25 = arith.constant 0 : index
      %29 = vector.load %arg8[%c0_24, %c0_25] : memref<1x128xf32, #tpu.memory_space<vmem>>, vector<1x128xf32>
      %30 = vector.broadcast %29 : vector<1x128xf32> to vector<128x128xf32>
      %31 = arith.addf %28, %30 : vector<128x128xf32>
      %32 = tpu.iota {dimensions = array<i32: 1>} : vector<128x128xi32>
      %c8_i32 = arith.constant 8 : i32
      %33 = vector.broadcast %c8_i32 : i32 to vector<128x128xi32>
      %34 = arith.cmpi slt, %32, %33 : vector<128x128xi32>
      %cst_26 = arith.constant -1.000000e+30 : f32
      %35 = vector.broadcast %cst_26 : f32 to vector<128x128xf32>
      %36 = arith.select %34, %31, %35 : vector<128x128xi1>, vector<128x128xf32>
      %cst_27 = arith.constant dense<0xFF800000> : vector<128xf32>
      %37 = vector.multi_reduction <maximumf>, %36, %cst_27 [1] : vector<128x128xf32> to vector<128xf32>
      %38 = vector.shape_cast %37 : vector<128xf32> to vector<128x1xf32>
      %39 = vector.broadcast %38 : vector<128x1xf32> to vector<128x128xf32>
      %40 = arith.subf %36, %39 : vector<128x128xf32>
      %41 = math.exp %40 : vector<128x128xf32>
      %cst_28 = arith.constant 0.000000e+00 : f32
      %42 = vector.broadcast %cst_28 : f32 to vector<128x128xf32>
      %43 = arith.select %34, %41, %42 : vector<128x128xi1>, vector<128x128xf32>
      %cst_29 = arith.constant dense<0.000000e+00> : vector<128xf32>
      %44 = vector.multi_reduction <add>, %43, %cst_29 [1] : vector<128x128xf32> to vector<128xf32>
      %45 = vector.shape_cast %44 : vector<128xf32> to vector<128x1xf32>
      %46 = tpu.reciprocal %45 : vector<128x1xf32> -> vector<128x1xf32>
      %47 = vector.broadcast %46 : vector<128x1xf32> to vector<128x128xf32>
      %48 = arith.mulf %43, %47 : vector<128x128xf32>
      %c0_30 = arith.constant 0 : index
      %c0_31 = arith.constant 0 : index
      %49 = vector.load %arg9[%c0_30, %c0_31] : memref<128x128xf32, #tpu.memory_space<vmem>>, vector<128x128xf32>
      tpu.vector_store %arg9[%c0_30, %c0_31], %31 {strides = array<i32>} : memref<128x128xf32, #tpu.memory_space<vmem>>, vector<128x128xf32>,
      %c0_32 = arith.constant 0 : index
      %c0_33 = arith.constant 0 : index
      %50 = vector.load %arg10[%c0_32, %c0_33] : memref<128x128xf32, #tpu.memory_space<vmem>>, vector<128x128xf32>
      tpu.vector_store %arg10[%c0_32, %c0_33], %48 {strides = array<i32>} : memref<128x128xf32, #tpu.memory_space<vmem>>, vector<128x128xf32>,
    } else {
    }
    return
  }
  func.func @transform_0(%arg0: i32, %arg1: i32) -> (i32, i32) {
    %c0_i32 = arith.constant 0 : i32
    return %arg0, %arg1 : i32, i32
  }
  func.func @transform_1(%arg0: i32, %arg1: i32) -> (i32, i32) {
    %c0_i32 = arith.constant 0 : i32
    %c0_i32_0 = arith.constant 0 : i32
    return %arg1, %c0_i32 : i32, i32
  }
  func.func @transform_2(%arg0: i32, %arg1: i32) -> (i32, i32) {
    %c0_i32 = arith.constant 0 : i32
    %c0_i32_0 = arith.constant 0 : i32
    %c0_i32_1 = arith.constant 0 : i32
    return %c0_i32, %c0_i32_0 : i32, i32
  }
  func.func @transform_3(%arg0: i32, %arg1: i32) -> (i32, i32) {
    %c0_i32 = arith.constant 0 : i32
    %c0_i32_0 = arith.constant 0 : i32
    %c0_i32_1 = arith.constant 0 : i32
    return %c0_i32, %c0_i32_0 : i32, i32
  }
  func.func @transform_4(%arg0: i32, %arg1: i32) -> (i32, i32) {
    %c0_i32 = arith.constant 0 : i32
    %c0_i32_0 = arith.constant 0 : i32
    %c0_i32_1 = arith.constant 0 : i32
    return %c0_i32, %c0_i32_0 : i32, i32
  }
  func.func @transform_5(%arg0: i32, %arg1: i32) -> (i32, i32) {
    %c0_i32 = arith.constant 0 : i32
    %c0_i32_0 = arith.constant 0 : i32
    %c0_i32_1 = arith.constant 0 : i32
    return %c0_i32, %c0_i32_0 : i32, i32
  }
  func.func @transform_6(%arg0: i32, %arg1: i32) -> (i32, i32) {
    %c0_i32 = arith.constant 0 : i32
    %c0_i32_0 = arith.constant 0 : i32
    %c0_i32_1 = arith.constant 0 : i32
    return %c0_i32, %c0_i32_0 : i32, i32
  }
  func.func @transform_7(%arg0: i32, %arg1: i32) -> (i32, i32) {
    %c0_i32 = arith.constant 0 : i32
    %c0_i32_0 = arith.constant 0 : i32
    return %arg0, %c0_i32 : i32, i32
  }
  func.func @transform_8(%arg0: i32, %arg1: i32) -> (i32, i32) {
    %c0_i32 = arith.constant 0 : i32
    %c0_i32_0 = arith.constant 0 : i32
    return %arg0, %c0_i32 : i32, i32
  }
}

</mosaic_0001>

<bundles_post_ra>
// kernel: tpu_custom_call.1
= control target key start
LH: loop header
LB: loop body
LE: loop exit
PB: predicated region body
PF: predicated region fallthrough
CT: control target
= control target key end

     0   :  { %14 = vsyncpa [#allocation4], 0  ;;  %s17778_s0 = inlined_call_operand.hbm [shape: bf16[128,896], index: 0, kind: input, shape index: {}]   ;;  %s17779_s1 = inlined_call_operand.hbm [shape: bf16[896,1024], index: 1, kind: input, shape index: {}]   ;;  %s17780_s2 = inlined_call_operand.hbm [shape: f32[1,1024], index: 2, kind: input, shape index: {}]   ;;  %s17781_s3 = inlined_call_operand.hbm [shape: bf16[1024,1024], index: 3, kind: input, shape index: {}]   ;;  %s17782_s4 = inlined_call_operand.hbm [shape: f32[1,1024], index: 4, kind: input, shape index: {}]   ;;  %s17783_s5 = inlined_call_operand.hbm [shape: bf16[1024,128], index: 5, kind: input, shape index: {}]   ;;  %s17784_s6 = inlined_call_operand.hbm [shape: f32[1,128], index: 6, kind: input, shape index: {}]   ;;  %s17785_s7 = inlined_call_operand.hbm [shape: f32[128,128], index: 7, kind: output, shape index: {0}]   ;;  %s17786_s8 = inlined_call_operand.hbm [shape: f32[128,128], index: 8, kind: output, shape index: {1}]  }
   0x1   :  { %15 = vsyncpa [#allocation7], 0 }
   0x2   :  { %16 = vsyncpa [#allocation10], 0 }
   0x3   :  { %17 = vsyncpa [#allocation13], 0 }
   0x4   :  { %18 = vsyncpa [#allocation5], 0 }
   0x5   :  { %19 = vsyncpa [#allocation17], 0  ;;  %s14156_s27 = smov [#allocation6]  }
   0x6   :  { %s37_s28 = sshll.u32 %s14156_s27, 4  ;;  %s38_s28 = int_to_ptr.vmem [resolvable:$true] %s37_s28 }
   0x7   :  { %s13972_s29 = scalar_lea.vmem %s38_s28, 57344  ;;  %p13977_p1 = scmp.lt.s32.totalorder %s38_s28, %s38_s28 }
   0x8   :  { %p13973_p0 = scmp.ne.s32.totalorder %s38_s28, %s13972_s29  ;;  %p13978_p2 = scmp.lt.s32.totalorder %s13972_s29, %s13972_s29 }
   0xa   :  { %p13979_p3 = por %p13978_p2, %p13977_p1 }
   0xc   :  { %p13980_p4 = pnand %p13979_p3, %p13973_p0 }
   0xe   :  { %13983 = shalt.err (!%p13980_p4)
}
   0xf   :  { %s14157_s30 = smov 512   ;;  %s14158_s9 = smov 32  }
  0x10   :  { %43 = dma.hbm_to_vmem [thread:$0]  %s17779_s1, 57344, %s38_s28, [#allocation7], %s14157_s30, %s14157_s30, %s14158_s9  }
  0x11   :  { %s14159_s12 = smov [#allocation9]   ;;  %s14160_s14 = smov [#allocation12]  }
  0x12   :  { %s59_s13 = sshll.u32 %s14159_s12, 4  ;;  %s81_s15 = sshll.u32 %s14160_s14, 4  ;;  %s60_s13 = int_to_ptr.vmem [resolvable:$true] %s59_s13  ;;  %s82_s15 = int_to_ptr.vmem [resolvable:$true] %s81_s15 }
  0x13   :  { %s13992_s16 = scalar_lea.vmem %s60_s13, 65536  ;;  %p13997_p6 = scmp.lt.s32.totalorder %s60_s13, %s60_s13 }
  0x14   :  { %p13993_p5 = scmp.ne.s32.totalorder %s60_s13, %s13992_s16  ;;  %p13998_p7 = scmp.lt.s32.totalorder %s13992_s16, %s13992_s16 }
  0x16   :  { %p13999_p8 = por %p13998_p7, %p13997_p6 }
  0x18   :  { %p14000_p9 = pnand %p13999_p8, %p13993_p5 }
  0x1a   :  { %14003 = shalt.err (!%p14000_p9)
}
  0x1b   :  { %65 = dma.hbm_to_vmem [thread:$0]  %s17781_s3, 65536, %s60_s13, [#allocation10], %s14157_s30, %s14157_s30, %s14158_s9  }
  0x1c   :  { %s14012_s19 = scalar_lea.vmem %s82_s15, 8192  ;;  %p14017_p11 = scmp.lt.s32.totalorder %s82_s15, %s82_s15 }
  0x1d   :  { %p14013_p10 = scmp.ne.s32.totalorder %s82_s15, %s14012_s19  ;;  %p14018_p12 = scmp.lt.s32.totalorder %s14012_s19, %s14012_s19 }
  0x1f   :  { %p14019_p13 = por %p14018_p12, %p14017_p11 }
  0x21   :  { %p14020_p0 = pnand %p14019_p13, %p14013_p10 }
  0x23   :  { %14023 = shalt.err (!%p14020_p0)
}
  0x24   :  { %s14161_s1 = smov 64   ;;  %s14162_s20 = smov 4  }
  0x25   :  { %87 = dma.hbm_to_vmem [thread:$0]  %s17783_s5, 8192, %s82_s15, [#allocation13], %s14161_s1, %s14161_s1, %s14162_s20  }
  0x26   :  { %s14163_s23 = smov [#allocation3]  }
  0x27   :  { %s25_s24 = sshll.u32 %s14163_s23, 4  ;;  %s26_s24 = int_to_ptr.vmem [resolvable:$true] %s25_s24 }
  0x28   :  { %s14032_s25 = scalar_lea.vmem %s26_s24, 7168  ;;  %p14037_p2 = scmp.lt.s32.totalorder %s26_s24, %s26_s24 }
  0x29   :  { %p14033_p1 = scmp.ne.s32.totalorder %s26_s24, %s14032_s25  ;;  %p14038_p3 = scmp.lt.s32.totalorder %s14032_s25, %s14032_s25 }
  0x2b   :  { %p14039_p4 = por %p14038_p3, %p14037_p2 }
  0x2d   :  { %p14040_p5 = pnand %p14039_p4, %p14033_p1 }
  0x2f   :  { %14043 = shalt.err (!%p14040_p5)
}
  0x30   :  { %s14164_s3 = smov 448   ;;  %s14165_s26 = smov 28  }
  0x31   :  { %31 = dma.hbm_to_vmem [thread:$0]  %s17778_s0, 7168, %s26_s24, [#allocation4], %s14164_s3, %s14164_s3, %s14165_s26  }
  0x32   :  { %s14166_s29 = smov [#allocation8]   ;;  %s14167_s9 = smov [#allocation11]  }
  0x33   :  { %s50_s30 = sshll.u32 %s14166_s29, 4  ;;  %s72_s5 = sshll.u32 %s14167_s9, 4  ;;  %s51_s30 = int_to_ptr.vmem [resolvable:$true] %s50_s30  ;;  %s73_s5 = int_to_ptr.vmem [resolvable:$true] %s72_s5 }
  0x34   :  { %s14052_s10 = scalar_lea.vmem %s51_s30, 128  ;;  %p14057_p7 = scmp.lt.s32.totalorder %s51_s30, %s51_s30 }
  0x35   :  { %p14053_p6 = scmp.ne.s32.totalorder %s51_s30, %s14052_s10  ;;  %p14058_p8 = scmp.lt.s32.totalorder %s14052_s10, %s14052_s10 }
  0x37   :  { %p14059_p9 = por %p14058_p8, %p14057_p7 }
  0x39   :  { %p14060_p10 = pnand %p14059_p9, %p14053_p6 }
  0x3b   :  { %14063 = shalt.err (!%p14060_p10)
}
  0x3c   :  { %53 = dma.hbm_to_vmem [thread:$0]  %s17780_s2, 128, %s51_s30, [#allocation7]  }
  0x3d   :  { %s14072_s13 = scalar_lea.vmem %s73_s5, 128  ;;  %p14077_p12 = scmp.lt.s32.totalorder %s73_s5, %s73_s5 }
  0x3e   :  { %p14073_p11 = scmp.ne.s32.totalorder %s73_s5, %s14072_s13  ;;  %p14078_p13 = scmp.lt.s32.totalorder %s14072_s13, %s14072_s13 }
  0x40   :  { %p14079_p0 = por %p14078_p13, %p14077_p12 }
  0x42   :  { %p14080_p1 = pnand %p14079_p0, %p14073_p11 }
  0x44   :  { %14083 = shalt.err (!%p14080_p1)
}
  0x45   :  { %75 = dma.hbm_to_vmem [thread:$0]  %s17782_s4, 128, %s73_s5, [#allocation10]  }
  0x46   :  { %s14168_s15 = smov [#allocation14]  }
  0x47   :  { %s94_s16 = sshll.u32 %s14168_s15, 4  ;;  %s95_s16 = int_to_ptr.vmem [resolvable:$true] %s94_s16 }
  0x48   :  { %s14092_s17 = scalar_lea.vmem %s95_s16, 16  ;;  %s14096_s18 = scalar_lea.vmem %s95_s16, 32 }
  0x49   :  { %p14093_p2 = scmp.ne.s32.totalorder %s95_s16, %s14092_s17  ;;  %p14097_p3 = scmp.lt.s32.totalorder %s95_s16, %s95_s16 }
  0x4a   :  { %p14098_p4 = scmp.lt.s32.totalorder %s14096_s18, %s14092_s17 }
  0x4c   :  { %p14099_p5 = por %p14098_p4, %p14097_p3 }
  0x4e   :  { %p14100_p6 = pnand %p14099_p5, %p14093_p2 }
  0x50   :  { %14103 = shalt.err (!%p14100_p6)
}
  0x51   :  { %97 = dma.hbm_to_vmem [thread:$0]  %s17784_s6, 16, %s95_s16, [#allocation13]  }
  0x52   :  { %14144 = dma.done.wait [#allocation4], 7168  }
  0x53   :  { %14145 = vsyncadd [#allocation4], 4294960128 }
  0x54   :  { %14146 = dma.done.wait [#allocation7], 57472  }
  0x55   :  { %14147 = vsyncadd [#allocation7], 4294909824 }
  0x56   :  { %14148 = dma.done.wait [#allocation10], 65664  }
  0x57   :  { %14149 = vsyncadd [#allocation10], 4294901632 }
  0x58   :  { %14150 = dma.done.wait [#allocation13], 8208  }
  0x59   :  { %14151 = vsyncadd [#allocation13], 4294959088  ;;  %v500_v0 = vld [vmem:[#allocation6 + $0x1c0] sm:$0xff]  ;;  %v13602_v59 = vld [vmem:[#allocation3 + $0xc] ss:$28 sps:$4 sm:$0xff]   ;;  %s14170_s4 = smov [#allocation15]  }
  0x5a   :  { %v504_v1 = vld [vmem:[#allocation6 + $0x1e0] sm:$0xff]  ;;  %3565 = vmatprep.mubr.bf16.mxu1 %v13602_v59  ;;  %s12214_s6 = sshll.u32 %s14170_s4, 4  ;;  %s12215_s6 = int_to_ptr.vmem [resolvable:$true] %s12214_s6 }
  0x5b   :  { %v628_v2 = vld [vmem:[#allocation6 + $0x5c0] sm:$0xff]  ;;  %v12358_v3 = vcombine.high %v500_v0, %v504_v1  ;;  %v12357_v5 = vcombine.low %v500_v0, %v504_v1  ;;  %s14104_s1 = scalar_lea.vmem %s12215_s6, 2048  ;;  %p14109_p8 = scmp.lt.s32.totalorder %s12215_s6, %s12215_s6 }
  0x5c   :  { %v632_v4 = vld [vmem:[#allocation6 + $0x5e0] sm:$0xff]  ;;  %p14105_p7 = scmp.ne.s32.totalorder %s12215_s6, %s14104_s1  ;;  %p14110_p9 = scmp.lt.s32.totalorder %s14104_s1, %s14104_s1 }
  0x5d   :  { %v492_v6 = vld [vmem:[#allocation6 + $0x180] sm:$0xff]  ;;  %v12486_v8 = vcombine.high %v628_v2, %v632_v4  ;;  %v12485_v9 = vcombine.low %v628_v2, %v632_v4  ;;  %3420 = vmatprep.subr.bf16.mxu0 %v12358_v3 }
  0x5e   :  { %v496_v7 = vld [vmem:[#allocation6 + $0x1a0] sm:$0xff]  ;;  %3421 = vmatpush1.bf16.msra.mxu0 %v12357_v5  ;;  %p14111_p10 = por %p14110_p9, %p14109_p8 }
  0x5f   :  { %v12350_v10 = vcombine.high %v492_v6, %v496_v7  ;;  %v620_v11 = vld [vmem:[#allocation6 + $0x580] sm:$0xff]  ;;  %3533 = vmatprep.subr.bf16.mxu1 %v12486_v8  ;;  %v12349_v18 = vcombine.low %v492_v6, %v496_v7 }
  0x60   :  { %v624_v12 = vld [vmem:[#allocation6 + $0x5a0] sm:$0xff]  ;;  %3534 = vmatpush1.bf16.msra.mxu1 %v12485_v9  ;;  %p14112_p11 = pnand %p14111_p10, %p14105_p7 }
  0x61   :  { %v484_v13 = vld [vmem:[#allocation6 + $0x140] sm:$0xff]  ;;  %v12478_v14 = vcombine.high %v620_v11, %v624_v12  ;;  %3422 = vmatprep.subr.bf16.mxu0 %v12350_v10  ;;  %v12477_v19 = vcombine.low %v620_v11, %v624_v12 }
  0x62   :  { %v488_v15 = vld [vmem:[#allocation6 + $0x160] sm:$0xff]  ;;  %3423 = vmatpush1.bf16.msra.mxu0 %v12349_v18 }
  0x63   :  { %v612_v16 = vld [vmem:[#allocation6 + $0x540] sm:$0xff]  ;;  %v12342_v20 = vcombine.high %v484_v13, %v488_v15  ;;  %3535 = vmatprep.subr.bf16.mxu1 %v12478_v14  ;;  %v12341_v26 = vcombine.low %v484_v13, %v488_v15 }
  0x64   :  { %v616_v17 = vld [vmem:[#allocation6 + $0x560] sm:$0xff]  ;;  %3536 = vmatpush1.bf16.msra.mxu1 %v12477_v19 }
  0x65   :  { %v12470_v21 = vcombine.high %v612_v16, %v616_v17  ;;  %v476_v22 = vld [vmem:[#allocation6 + $0x100] sm:$0xff]  ;;  %3424 = vmatprep.subr.bf16.mxu0 %v12342_v20  ;;  %v12469_v27 = vcombine.low %v612_v16, %v616_v17 }
  0x66   :  { %v480_v23 = vld [vmem:[#allocation6 + $0x120] sm:$0xff]  ;;  %3425 = vmatpush1.bf16.msra.mxu0 %v12341_v26 }
  0x67   :  { %v604_v24 = vld [vmem:[#allocation6 + $0x500] sm:$0xff]  ;;  %v12334_v28 = vcombine.high %v476_v22, %v480_v23  ;;  %3537 = vmatprep.subr.bf16.mxu1 %v12470_v21  ;;  %v12333_v34 = vcombine.low %v476_v22, %v480_v23 }
  0x68   :  { %v608_v25 = vld [vmem:[#allocation6 + $0x520] sm:$0xff]  ;;  %3538 = vmatpush1.bf16.msra.mxu1 %v12469_v27 }
  0x69   :  { %v12462_v29 = vcombine.high %v604_v24, %v608_v25  ;;  %v468_v30 = vld [vmem:[#allocation6 + $0xc0] sm:$0xff]  ;;  %3426 = vmatprep.subr.bf16.mxu0 %v12334_v28  ;;  %v12461_v35 = vcombine.low %v604_v24, %v608_v25 }
  0x6a   :  { %v472_v31 = vld [vmem:[#allocation6 + $0xe0] sm:$0xff]  ;;  %3427 = vmatpush1.bf16.msra.mxu0 %v12333_v34 }
  0x6b   :  { %v596_v32 = vld [vmem:[#allocation6 + $0x4c0] sm:$0xff]  ;;  %v12326_v36 = vcombine.high %v468_v30, %v472_v31  ;;  %3539 = vmatprep.subr.bf16.mxu1 %v12462_v29  ;;  %v12325_v42 = vcombine.low %v468_v30, %v472_v31 }
  0x6c   :  { %v600_v33 = vld [vmem:[#allocation6 + $0x4e0] sm:$0xff]  ;;  %3540 = vmatpush1.bf16.msra.mxu1 %v12461_v35 }
  0x6d   :  { %v12454_v37 = vcombine.high %v596_v32, %v600_v33  ;;  %v460_v38 = vld [vmem:[#allocation6 + $0x80] sm:$0xff]  ;;  %3428 = vmatprep.subr.bf16.mxu0 %v12326_v36  ;;  %v12453_v43 = vcombine.low %v596_v32, %v600_v33 }
  0x6e   :  { %v464_v39 = vld [vmem:[#allocation6 + $0xa0] sm:$0xff]  ;;  %3429 = vmatpush1.bf16.msra.mxu0 %v12325_v42 }
  0x6f   :  { %v588_v40 = vld [vmem:[#allocation6 + $0x480] sm:$0xff]  ;;  %v12318_v44 = vcombine.high %v460_v38, %v464_v39  ;;  %3541 = vmatprep.subr.bf16.mxu1 %v12454_v37  ;;  %v12317_v50 = vcombine.low %v460_v38, %v464_v39 }
  0x70   :  { %v592_v41 = vld [vmem:[#allocation6 + $0x4a0] sm:$0xff]  ;;  %3542 = vmatpush1.bf16.msra.mxu1 %v12453_v43 }
  0x71   :  { %v12446_v45 = vcombine.high %v588_v40, %v592_v41  ;;  %v452_v46 = vld [vmem:[#allocation6 + $0x40] sm:$0xff]  ;;  %3430 = vmatprep.subr.bf16.mxu0 %v12318_v44  ;;  %v12445_v52 = vcombine.low %v588_v40, %v592_v41 }
  0x72   :  { %v456_v47 = vld [vmem:[#allocation6 + $0x60] sm:$0xff]  ;;  %3431 = vmatpush1.bf16.msra.mxu0 %v12317_v50 }
  0x73   :  { %v580_v48 = vld [vmem:[#allocation6 + $0x440] sm:$0xff]  ;;  %v12310_v53 = vcombine.high %v452_v46, %v456_v47  ;;  %3543 = vmatprep.subr.bf16.mxu1 %v12446_v45  ;;  %v12309_v60 = vcombine.low %v452_v46, %v456_v47 }
  0x74   :  { %v584_v49 = vld [vmem:[#allocation6 + $0x460] sm:$0xff]  ;;  %3544 = vmatpush1.bf16.msra.mxu1 %v12445_v52 }
  0x75   :  { %v444_v51 = vld [vmem:[#allocation6] sm:$0xff]  ;;  %v12438_v55 = vcombine.high %v580_v48, %v584_v49  ;;  %3432 = vmatprep.subr.bf16.mxu0 %v12310_v53  ;;  %v12437_v61 = vcombine.low %v580_v48, %v584_v49 }
  0x76   :  { %v448_v54 = vld [vmem:[#allocation6 + $0x20] sm:$0xff]  ;;  %3433 = vmatpush1.bf16.msra.mxu0 %v12309_v60 }
  0x77   :  { %v13600_v56 = vld [vmem:[#allocation3 + $0x4] ss:$28 sps:$4 sm:$0xff]   ;;  %v12302_v62 = vcombine.high %v444_v51, %v448_v54  ;;  %3545 = vmatprep.subr.bf16.mxu1 %v12438_v55  ;;  %v12301_v4 = vcombine.low %v444_v51, %v448_v54 }
  0x78   :  { %v572_v57 = vld [vmem:[#allocation6 + $0x400] sm:$0xff]  ;;  %3452 = vmatprep.mubr.bf16.mxu0 %v13600_v56  ;;  %3546 = vmatpush1.bf16.msra.mxu1 %v12437_v61 }
  0x79   :  { %v576_v58 = vld [vmem:[#allocation6 + $0x420] sm:$0xff]  ;;  %3434 = vmatprep.subr.bf16.mxu0 %v12302_v62 }
  0x7a   :  { %v564_v63 = vld [vmem:[#allocation6 + $0x3c0] sm:$0xff]  ;;  %v12430_v1 = vcombine.high %v572_v57, %v576_v58  ;;  %v12429_v5 = vcombine.low %v572_v57, %v576_v58  ;;  %3435 = vmatpush1.bf16.msra.mxu0 %v12301_v4 }
  0x7b   :  { %v568_v0 = vld [vmem:[#allocation6 + $0x3e0] sm:$0xff] }
  0x7c   :  { %v692_v2 = vld [vmem:[#allocation6 + $0x7c0] sm:$0xff]  ;;  %v12422_v6 = vcombine.high %v564_v63, %v568_v0  ;;  %3547 = vmatprep.subr.bf16.mxu1 %v12430_v1  ;;  %v12421_v12 = vcombine.low %v564_v63, %v568_v0 }
  0x7d   :  { %v696_v3 = vld [vmem:[#allocation6 + $0x7e0] sm:$0xff]  ;;  %3548 = vmatpush1.bf16.msra.mxu1 %v12429_v5 }
  0x7e   :  { %v556_v7 = vld [vmem:[#allocation6 + $0x380] sm:$0xff]  ;;  %v12550_v8 = vcombine.high %v692_v2, %v696_v3  ;;  %3436 = vmatprep.subr.bf16.mxu0 %v12422_v6  ;;  %v12549_v13 = vcombine.low %v692_v2, %v696_v3 }
  0x7f   :  { %v560_v9 = vld [vmem:[#allocation6 + $0x3a0] sm:$0xff]  ;;  %3437 = vmatpush2.bf16.msra.mxu0 %v12421_v12 }
  0x80   :  { %v684_v10 = vld [vmem:[#allocation6 + $0x780] sm:$0xff]  ;;  %v12414_v14 = vcombine.high %v556_v7, %v560_v9  ;;  %3549 = vmatprep.subr.bf16.mxu1 %v12550_v8  ;;  %v12413_v20 = vcombine.low %v556_v7, %v560_v9 }
  0x81   :  { %v688_v11 = vld [vmem:[#allocation6 + $0x7a0] sm:$0xff]  ;;  %3550 = vmatpush2.bf16.msra.mxu1 %v12549_v13 }
  0x82   :  { %v12542_v15 = vcombine.high %v684_v10, %v688_v11  ;;  %v548_v16 = vld [vmem:[#allocation6 + $0x340] sm:$0xff]  ;;  %3438 = vmatprep.subr.bf16.mxu0 %v12414_v14  ;;  %v12541_v21 = vcombine.low %v684_v10, %v688_v11 }
  0x83   :  { %v552_v17 = vld [vmem:[#allocation6 + $0x360] sm:$0xff]  ;;  %3439 = vmatpush2.bf16.msra.mxu0 %v12413_v20 }
  0x84   :  { %v676_v18 = vld [vmem:[#allocation6 + $0x740] sm:$0xff]  ;;  %v12406_v22 = vcombine.high %v548_v16, %v552_v17  ;;  %3551 = vmatprep.subr.bf16.mxu1 %v12542_v15  ;;  %v12405_v28 = vcombine.low %v548_v16, %v552_v17  ;;  %v13606_v17 = vld [vmem:[#allocation3 + $0x3c] ss:$28 sps:$4 sm:$0xff]  }
  0x85   :  { %v680_v19 = vld [vmem:[#allocation6 + $0x760] sm:$0xff]  ;;  %3552 = vmatpush2.bf16.msra.mxu1 %v12541_v21 }
  0x86   :  { %v12534_v23 = vcombine.high %v676_v18, %v680_v19  ;;  %v540_v24 = vld [vmem:[#allocation6 + $0x300] sm:$0xff]  ;;  %3440 = vmatprep.subr.bf16.mxu0 %v12406_v22  ;;  %v12533_v29 = vcombine.low %v676_v18, %v680_v19 }
  0x87   :  { %v544_v25 = vld [vmem:[#allocation6 + $0x320] sm:$0xff]  ;;  %3441 = vmatpush2.bf16.msra.mxu0 %v12405_v28 }
  0x88   :  { %v668_v26 = vld [vmem:[#allocation6 + $0x700] sm:$0xff]  ;;  %v12398_v30 = vcombine.high %v540_v24, %v544_v25  ;;  %3553 = vmatprep.subr.bf16.mxu1 %v12534_v23  ;;  %v12397_v36 = vcombine.low %v540_v24, %v544_v25 }
  0x89   :  { %v672_v27 = vld [vmem:[#allocation6 + $0x720] sm:$0xff]  ;;  %3554 = vmatpush2.bf16.msra.mxu1 %v12533_v29 }
  0x8a   :  { %v12526_v31 = vcombine.high %v668_v26, %v672_v27  ;;  %v532_v32 = vld [vmem:[#allocation6 + $0x2c0] sm:$0xff]  ;;  %3442 = vmatprep.subr.bf16.mxu0 %v12398_v30  ;;  %v12525_v37 = vcombine.low %v668_v26, %v672_v27  ;;  %v13610_v30 = vld [vmem:[#allocation3 + $0x38] ss:$28 sps:$4 sm:$0xff]  }
  0x8b   :  { %v536_v33 = vld [vmem:[#allocation6 + $0x2e0] sm:$0xff]  ;;  %3443 = vmatpush2.bf16.msra.mxu0 %v12397_v36  ;;  %v13612_v36 = vld [vmem:[#allocation3 + $0x74] ss:$28 sps:$4 sm:$0xff]  }
  0x8c   :  { %v660_v34 = vld [vmem:[#allocation6 + $0x6c0] sm:$0xff]  ;;  %v12390_v38 = vcombine.high %v532_v32, %v536_v33  ;;  %3555 = vmatprep.subr.bf16.mxu1 %v12526_v31  ;;  %v12389_v44 = vcombine.low %v532_v32, %v536_v33 }
  0x8d   :  { %v664_v35 = vld [vmem:[#allocation6 + $0x6e0] sm:$0xff]  ;;  %3556 = vmatpush2.bf16.msra.mxu1 %v12525_v37  ;;  %v13614_v37 = vld [vmem:[#allocation3 + $0x7c] ss:$28 sps:$4 sm:$0xff]  }
  0x8e   :  { %v12518_v39 = vcombine.high %v660_v34, %v664_v35  ;;  %v524_v40 = vld [vmem:[#allocation6 + $0x280] sm:$0xff]  ;;  %3444 = vmatprep.subr.bf16.mxu0 %v12390_v38  ;;  %v12517_v45 = vcombine.low %v660_v34, %v664_v35 }
  0x8f   :  { %v528_v41 = vld [vmem:[#allocation6 + $0x2a0] sm:$0xff]  ;;  %3445 = vmatpush2.bf16.msra.mxu0 %v12389_v44 }
  0x90   :  { %v652_v42 = vld [vmem:[#allocation6 + $0x680] sm:$0xff]  ;;  %v12382_v46 = vcombine.high %v524_v40, %v528_v41  ;;  %3557 = vmatprep.subr.bf16.mxu1 %v12518_v39  ;;  %v12381_v52 = vcombine.low %v524_v40, %v528_v41 }
  0x91   :  { %v656_v43 = vld [vmem:[#allocation6 + $0x6a0] sm:$0xff]  ;;  %3558 = vmatpush2.bf16.msra.mxu1 %v12517_v45  ;;  %v13616_v45 = vld [vmem:[#allocation3 + $0x70] ss:$28 sps:$4 sm:$0xff]  }
  0x92   :  { %v516_v47 = vld [vmem:[#allocation6 + $0x240] sm:$0xff]  ;;  %v12510_v48 = vcombine.high %v652_v42, %v656_v43  ;;  %3446 = vmatprep.subr.bf16.mxu0 %v12382_v46  ;;  %v12509_v53 = vcombine.low %v652_v42, %v656_v43 }
  0x93   :  { %v520_v49 = vld [vmem:[#allocation6 + $0x260] sm:$0xff]  ;;  %3447 = vmatpush2.bf16.msra.mxu0 %v12381_v52 }
  0x94   :  { %v644_v50 = vld [vmem:[#allocation6 + $0x640] sm:$0xff]  ;;  %v12374_v54 = vcombine.high %v516_v47, %v520_v49  ;;  %3559 = vmatprep.subr.bf16.mxu1 %v12510_v48  ;;  %v12373_v60 = vcombine.low %v516_v47, %v520_v49 }
  0x95   :  { %v648_v51 = vld [vmem:[#allocation6 + $0x660] sm:$0xff]  ;;  %3560 = vmatpush2.bf16.msra.mxu1 %v12509_v53 }
  0x96   :  { %v508_v55 = vld [vmem:[#allocation6 + $0x200] sm:$0xff]  ;;  %v12502_v57 = vcombine.high %v644_v50, %v648_v51  ;;  %3448 = vmatprep.subr.bf16.mxu0 %v12374_v54  ;;  %v12501_v61 = vcombine.low %v644_v50, %v648_v51  ;;  %v13617_v50 = vld [vmem:[#allocation3 + $0x78] ss:$28 sps:$4 sm:$0xff]  }
  0x97   :  { %v512_v56 = vld [vmem:[#allocation6 + $0x220] sm:$0xff]  ;;  %3449 = vmatpush2.bf16.msra.mxu0 %v12373_v60 }
  0x98   :  { %v636_v58 = vld [vmem:[#allocation6 + $0x600] sm:$0xff]  ;;  %v12366_v62 = vcombine.high %v508_v55, %v512_v56  ;;  %3561 = vmatprep.subr.bf16.mxu1 %v12502_v57  ;;  %v12365_v4 = vcombine.low %v508_v55, %v512_v56  ;;  %v13618_v56 = vld [vmem:[#allocation3 + $0xac] ss:$28 sps:$4 sm:$0xff]   ;;  %v13620_v57 = vld [vmem:[#allocation3 + $0xb4] ss:$28 sps:$4 sm:$0xff]  }
  0x99   :  { %v640_v59 = vld [vmem:[#allocation6 + $0x620] sm:$0xff]  ;;  %3562 = vmatpush2.bf16.msra.mxu1 %v12501_v61 }
  0x9a   :  { %v12494_v63 = vcombine.high %v636_v58, %v640_v59  ;;  %v756_v0 = vld [vmem:[#allocation6 + $0x9c0] sm:$0xff]  ;;  %3450 = vmatprep.subr.bf16.mxu0 %v12366_v62  ;;  %v12493_v5 = vcombine.low %v636_v58, %v640_v59 }
  0x9b   :  { %v760_v1 = vld [vmem:[#allocation6 + $0x9e0] sm:$0xff]  ;;  %3451 = vmatpush2.bf16.msra.mxu0 %v12365_v4 }
  0x9c   :  { %v884_v2 = vld [vmem:[#allocation6 + $0xdc0] sm:$0xff]  ;;  %v12614_v6 = vcombine.high %v756_v0, %v760_v1  ;;  %3563 = vmatprep.subr.bf16.mxu1 %v12494_v63  ;;  %v12613_v12 = vcombine.low %v756_v0, %v760_v1 }
  0x9d   :  { %v888_v3 = vld [vmem:[#allocation6 + $0xde0] sm:$0xff]  ;;  %3564 = vmatpush2.bf16.msra.mxu1 %v12493_v5 }
  0x9e   :  { %v12742_v7 = vcombine.high %v884_v2, %v888_v3  ;;  %v748_v8 = vld [vmem:[#allocation6 + $0x980] sm:$0xff]  ;;  %3646 = vmatprep.subr.bf16.mxu0 %v12614_v6  ;;  %v12741_v15 = vcombine.low %v884_v2, %v888_v3  ;;  %v13623_v6 = vld [vmem:[#allocation3 + $0xb0] ss:$28 sps:$4 sm:$0xff]  }
  0x9f   :  { %v752_v9 = vld [vmem:[#allocation6 + $0x9a0] sm:$0xff] }
  0xa0   :  { %v13604_v10 = vld [vmem:[#allocation3] ss:$28 sps:$4 sm:$0xff]   ;;  %v13605_v11 = vld [vmem:[#allocation3 + $0x8] ss:$28 sps:$4 sm:$0xff]   ;;  %v12606_v16 = vcombine.high %v748_v8, %v752_v9  ;;  %3759 = vmatprep.subr.bf16.mxu1 %v12742_v7  ;;  %v12605_v24 = vcombine.low %v748_v8, %v752_v9 }
  0xa1   :  { %v876_v13 = vld [vmem:[#allocation6 + $0xd80] sm:$0xff]  ;;  %3453 = vmatmul.mubr.bf16.vlgmr.msra.gmra.mxu0 %v13604_v10  ;;  %3566 = vmatmul.mubr.bf16.vlgmr.msra.gmra.mxu1 %v13605_v11 }
  0xa2   :  { %v880_v14 = vld [vmem:[#allocation6 + $0xda0] sm:$0xff]  ;;  %3647 = vmatpush1.bf16.msra.mxu0 %v12613_v12  ;;  %3760 = vmatpush1.bf16.msra.mxu1 %v12741_v15 }
  0xa3   :  { %v13608_v18 = vld [vmem:[#allocation3 + $0x44] ss:$28 sps:$4 sm:$0xff]   ;;  %v12734_v21 = vcombine.high %v876_v13, %v880_v14  ;;  %3648 = vmatprep.subr.bf16.mxu0 %v12606_v16  ;;  %v12733_v26 = vcombine.low %v876_v13, %v880_v14  ;;  %3462 = vmatprep.mubr.bf16.mxu0 %v13606_v17  ;;  %v13626_v13 = vld [vmem:[#allocation3 + $0xec] ss:$28 sps:$4 sm:$0xff]  }
  0xa4   :  { %v740_v19 = vld [vmem:[#allocation6 + $0x940] sm:$0xff]  ;;  %3575 = vmatprep.mubr.bf16.mxu1 %v13608_v18 }
  0xa5   :  { %v744_v20 = vld [vmem:[#allocation6 + $0x960] sm:$0xff]  ;;  %3761 = vmatprep.subr.bf16.mxu1 %v12734_v21 }
  0xa6   :  { %v868_v22 = vld [vmem:[#allocation6 + $0xd40] sm:$0xff]  ;;  %v12598_v25 = vcombine.high %v740_v19, %v744_v20  ;;  %3649 = vmatpush1.bf16.msra.mxu0 %v12605_v24  ;;  %v12597_v32 = vcombine.low %v740_v19, %v744_v20  ;;  %3762 = vmatpush1.bf16.msra.mxu1 %v12733_v26  ;;  %v14240_v19 = vld [vmem:[#allocation6 + $0x5c8] sm:$0xff] }
  0xa7   :  { %v872_v23 = vld [vmem:[#allocation6 + $0xd60] sm:$0xff]  ;;  %v14242_v20 = vld [vmem:[#allocation6 + $0x5e8] sm:$0xff] }
  0xa8   :  { %v732_v27 = vld [vmem:[#allocation6 + $0x900] sm:$0xff]  ;;  %v12726_v29 = vcombine.high %v868_v22, %v872_v23  ;;  %3650 = vmatprep.subr.bf16.mxu0 %v12598_v25  ;;  %v12725_v40 = vcombine.low %v868_v22, %v872_v23  ;;  %v12488_v26 = vcombine.high %v14240_v19, %v14242_v20 }
  0xa9   :  { %v736_v28 = vld [vmem:[#allocation6 + $0x920] sm:$0xff]  ;;  %3463 = vmatmul.mubr.bf16.gmra.mxu0 %v13610_v30  ;;  %v13630_v30 = vld [vmem:[#allocation3 + $0x11c] ss:$28 sps:$4 sm:$0xff]  }
  0xaa   :  { %v13611_v31 = vld [vmem:[#allocation3 + $0x40] ss:$28 sps:$4 sm:$0xff]   ;;  %v12590_v35 = vcombine.high %v732_v27, %v736_v28  ;;  %3763 = vmatprep.subr.bf16.mxu1 %v12726_v29  ;;  %3651 = vmatpush1.bf16.msra.mxu0 %v12597_v32  ;;  %v12589_v42 = vcombine.low %v732_v27, %v736_v28  ;;  %v13622_v5 = vld [vmem:[#allocation3 + $0xa8] ss:$28 sps:$4 sm:$0xff]  }
  0xab   :  { %v860_v33 = vld [vmem:[#allocation6 + $0xd00] sm:$0xff]  ;;  %3576 = vmatmul.mubr.bf16.gmra.mxu1 %v13611_v31  ;;  %3472 = vmatprep.mubr.bf16.mxu0 %v13612_v36 }
  0xac   :  { %v864_v34 = vld [vmem:[#allocation6 + $0xd20] sm:$0xff]  ;;  %3652 = vmatprep.subr.bf16.mxu0 %v12590_v35  ;;  %3585 = vmatprep.mubr.bf16.mxu1 %v13614_v37 }
  0xad   :  { %v724_v38 = vld [vmem:[#allocation6 + $0x8c0] sm:$0xff]  ;;  %v12718_v41 = vcombine.high %v860_v33, %v864_v34  ;;  %3764 = vmatpush1.bf16.msra.mxu1 %v12725_v40  ;;  %v12717_v49 = vcombine.low %v860_v33, %v864_v34 }
  0xae   :  { %v728_v39 = vld [vmem:[#allocation6 + $0x8e0] sm:$0xff]  ;;  %3653 = vmatpush1.bf16.msra.mxu0 %v12589_v42  ;;  %v13636_v42 = vld [vmem:[#allocation3 + $0x154] ss:$28 sps:$4 sm:$0xff]  }
  0xaf   :  { %v852_v43 = vld [vmem:[#allocation6 + $0xcc0] sm:$0xff]  ;;  %v12582_v46 = vcombine.high %v724_v38, %v728_v39  ;;  %3765 = vmatprep.subr.bf16.mxu1 %v12718_v41  ;;  %v12581_v53 = vcombine.low %v724_v38, %v728_v39  ;;  %v13634_v38 = vld [vmem:[#allocation3 + $0x118] ss:$28 sps:$4 sm:$0xff]  }
  0xb0   :  { %v856_v44 = vld [vmem:[#allocation6 + $0xce0] sm:$0xff] }
  0xb1   :  { %v716_v47 = vld [vmem:[#allocation6 + $0x880] sm:$0xff]  ;;  %v12710_v51 = vcombine.high %v852_v43, %v856_v44  ;;  %3654 = vmatprep.subr.bf16.mxu0 %v12582_v46  ;;  %3766 = vmatpush1.bf16.msra.mxu1 %v12717_v49  ;;  %v12709_v60 = vcombine.low %v852_v43, %v856_v44  ;;  %v13638_v43 = vld [vmem:[#allocation3 + $0x15c] ss:$28 sps:$4 sm:$0xff]  }
  0xb2   :  { %v720_v48 = vld [vmem:[#allocation6 + $0x8a0] sm:$0xff]  ;;  %3473 = vmatmul.mubr.bf16.gmra.mxu0 %v13616_v45  ;;  %v13641_v49 = vld [vmem:[#allocation3 + $0x158] ss:$28 sps:$4 sm:$0xff]  }
  0xb3   :  { %v844_v52 = vld [vmem:[#allocation6 + $0xc80] sm:$0xff]  ;;  %v12574_v55 = vcombine.high %v716_v47, %v720_v48  ;;  %3767 = vmatprep.subr.bf16.mxu1 %v12710_v51  ;;  %3586 = vmatmul.mubr.bf16.gmra.mxu1 %v13617_v50  ;;  %v12573_v62 = vcombine.low %v716_v47, %v720_v48  ;;  %v13640_v47 = vld [vmem:[#allocation3 + $0x150] ss:$28 sps:$4 sm:$0xff]  }
  0xb4   :  { %v848_v54 = vld [vmem:[#allocation6 + $0xca0] sm:$0xff]  ;;  %3655 = vmatpush1.bf16.msra.mxu0 %v12581_v53  ;;  %3482 = vmatprep.mubr.bf16.mxu0 %v13618_v56 }
  0xb5   :  { %v708_v58 = vld [vmem:[#allocation6 + $0x840] sm:$0xff]  ;;  %v12702_v61 = vcombine.high %v844_v52, %v848_v54  ;;  %3656 = vmatprep.subr.bf16.mxu0 %v12574_v55  ;;  %3595 = vmatprep.mubr.bf16.mxu1 %v13620_v57  ;;  %v12701_v4 = vcombine.low %v844_v52, %v848_v54  ;;  %v13642_v52 = vld [vmem:[#allocation3 + $0x18c] ss:$28 sps:$4 sm:$0xff]   ;;  %v13644_v54 = vld [vmem:[#allocation3 + $0x194] ss:$28 sps:$4 sm:$0xff]  }
  0xb6   :  { %v712_v59 = vld [vmem:[#allocation6 + $0x860] sm:$0xff]  ;;  %3768 = vmatpush1.bf16.msra.mxu1 %v12709_v60 }
  0xb7   :  { %v836_v63 = vld [vmem:[#allocation6 + $0xc40] sm:$0xff]  ;;  %v12566_v1 = vcombine.high %v708_v58, %v712_v59  ;;  %3769 = vmatprep.subr.bf16.mxu1 %v12702_v61  ;;  %v12565_v9 = vcombine.low %v708_v58, %v712_v59 }
  0xb8   :  { %v840_v0 = vld [vmem:[#allocation6 + $0xc60] sm:$0xff]  ;;  %3657 = vmatpush1.bf16.msra.mxu0 %v12573_v62 }
  0xb9   :  { %v700_v2 = vld [vmem:[#allocation6 + $0x800] sm:$0xff]  ;;  %v12694_v8 = vcombine.high %v836_v63, %v840_v0  ;;  %3658 = vmatprep.subr.bf16.mxu0 %v12566_v1  ;;  %v12693_v16 = vcombine.low %v836_v63, %v840_v0  ;;  %v13647_v63 = vld [vmem:[#allocation3 + $0x190] ss:$28 sps:$4 sm:$0xff]  }
  0xba   :  { %v704_v3 = vld [vmem:[#allocation6 + $0x820] sm:$0xff]  ;;  %3770 = vmatpush1.bf16.msra.mxu1 %v12701_v4  ;;  %3483 = vmatmul.mubr.bf16.gmra.mxu0 %v13622_v5  ;;  %v13650_v0 = vld [vmem:[#allocation3 + $0x14] ss:$28 sps:$4 sm:$0xff]   ;;  %v505_v4 = vld [vmem:[#allocation6 + $0x1e8] sm:$0xff] }
  0xbb   :  { %v13624_v7 = vld [vmem:[#allocation3 + $0xe4] ss:$28 sps:$4 sm:$0xff]   ;;  %v12558_v12 = vcombine.high %v700_v2, %v704_v3  ;;  %3771 = vmatprep.subr.bf16.mxu1 %v12694_v8  ;;  %3596 = vmatmul.mubr.bf16.gmra.mxu1 %v13623_v6  ;;  %v12557_v18 = vcombine.low %v700_v2, %v704_v3  ;;  %v501_v3 = vld [vmem:[#allocation6 + $0x1c8] sm:$0xff] }
  0xbc   :  { %v828_v10 = vld [vmem:[#allocation6 + $0xc00] sm:$0xff]  ;;  %3659 = vmatpush1.bf16.msra.mxu0 %v12565_v9  ;;  %3492 = vmatprep.mubr.bf16.mxu0 %v13624_v7  ;;  %v493_v6 = vld [vmem:[#allocation6 + $0x188] sm:$0xff]  ;;  %v12360_v9 = vcombine.high %v501_v3, %v505_v4 }
  0xbd   :  { %v832_v11 = vld [vmem:[#allocation6 + $0xc20] sm:$0xff]  ;;  %3660 = vmatprep.subr.bf16.mxu0 %v12558_v12  ;;  %3605 = vmatprep.mubr.bf16.mxu1 %v13626_v13  ;;  %v497_v7 = vld [vmem:[#allocation6 + $0x1a8] sm:$0xff]  ;;  %v17790_v12 = vmov 0   ;;  %v13651_v13 = vld [vmem:[#allocation3 + $0x18] ss:$28 sps:$4 sm:$0xff]  }
  0xbe   :  { %v820_v14 = vld [vmem:[#allocation6 + $0xbc0] sm:$0xff]  ;;  %v12686_v17 = vcombine.high %v828_v10, %v832_v11  ;;  %3772 = vmatpush1.bf16.msra.mxu1 %v12693_v16  ;;  %v12685_v24 = vcombine.low %v828_v10, %v832_v11  ;;  %v13648_v8 = vld [vmem:[#allocation3 + $0x10] ss:$28 sps:$4 sm:$0xff]   ;;  %v12487_v16 = vcombine.low %v14240_v19, %v14242_v20 }
  0xbf   :  { %v824_v15 = vld [vmem:[#allocation6 + $0xbe0] sm:$0xff]  ;;  %v621_v10 = vld [vmem:[#allocation6 + $0x588] sm:$0xff] }
  0xc0   :  { %v12678_v21 = vcombine.high %v820_v14, %v824_v15  ;;  %v812_v22 = vld [vmem:[#allocation6 + $0xb80] sm:$0xff]  ;;  %3773 = vmatprep.subr.bf16.mxu1 %v12686_v17  ;;  %3661 = vmatpush1.bf16.msra.mxu0 %v12557_v18  ;;  %v12677_v28 = vcombine.low %v820_v14, %v824_v15  ;;  %v625_v11 = vld [vmem:[#allocation6 + $0x5a8] sm:$0xff]  ;;  %v12359_v14 = vcombine.low %v501_v3, %v505_v4 }
  0xc1   :  { %v816_v23 = vld [vmem:[#allocation6 + $0xba0] sm:$0xff]  ;;  %v13652_v15 = vld [vmem:[#allocation3 + $0x4c] ss:$28 sps:$4 sm:$0xff]   ;;  %v12352_v17 = vcombine.high %v493_v6, %v497_v7 }
  0xc2   :  { %v13628_v25 = vld [vmem:[#allocation3 + $0xe0] ss:$28 sps:$4 sm:$0xff]   ;;  %v13629_v27 = vld [vmem:[#allocation3 + $0xe8] ss:$28 sps:$4 sm:$0xff]   ;;  %3662 = vmatprep.subr.bf16.mxu0 %v12678_v21  ;;  %v12670_v29 = vcombine.high %v812_v22, %v816_v23  ;;  %3774 = vmatpush1.bf16.msra.mxu1 %v12685_v24  ;;  %v12669_v34 = vcombine.low %v812_v22, %v816_v23  ;;  %v12480_v23 = vcombine.high %v621_v10, %v625_v11  ;;  %v13655_v19 = vld [vmem:[#allocation3 + $0x50] ss:$28 sps:$4 sm:$0xff]  }
  0xc3   :  { %v13632_v31 = vld [vmem:[#allocation3 + $0x124] ss:$28 sps:$4 sm:$0xff]   ;;  %3493 = vmatmul.mubr.bf16.gmra.mxu0 %v13628_v25  ;;  %3985 = vmatprep.subr.bf16.mxu1 %v12488_v26  ;;  %v485_v18 = vld [vmem:[#allocation6 + $0x148] sm:$0xff]  ;;  %v12351_v25 = vcombine.low %v493_v6, %v497_v7  ;;  %v12479_v26 = vcombine.low %v621_v10, %v625_v11 }
  0xc4   :  { %v804_v32 = vld [vmem:[#allocation6 + $0xb40] sm:$0xff]  ;;  %3606 = vmatmul.mubr.bf16.gmra.mxu1 %v13629_v27  ;;  %3663 = vmatpush2.bf16.msra.mxu0 %v12677_v28  ;;  %v489_v21 = vld [vmem:[#allocation6 + $0x168] sm:$0xff] }
  0xc5   :  { %v808_v33 = vld [vmem:[#allocation6 + $0xb60] sm:$0xff]  ;;  %3664 = vmatprep.subr.bf16.mxu0 %v12670_v29  ;;  %3502 = vmatprep.mubr.bf16.mxu0 %v13630_v30  ;;  %v613_v22 = vld [vmem:[#allocation6 + $0x548] sm:$0xff]  ;;  %v12344_v28 = vcombine.high %v485_v18, %v489_v21 }
  0xc6   :  { %v12662_v35 = vcombine.high %v804_v32, %v808_v33  ;;  %3615 = vmatprep.mubr.bf16.mxu1 %v13632_v31  ;;  %v796_v36 = vld [vmem:[#allocation6 + $0xb00] sm:$0xff]  ;;  %v12661_v40 = vcombine.low %v804_v32, %v808_v33  ;;  %v617_v24 = vld [vmem:[#allocation6 + $0x568] sm:$0xff]  ;;  %v12343_v33 = vcombine.low %v485_v18, %v489_v21 }
  0xc7   :  { %v800_v37 = vld [vmem:[#allocation6 + $0xb20] sm:$0xff]  ;;  %v477_v29 = vld [vmem:[#allocation6 + $0x108] sm:$0xff]  ;;  %v12472_v20 = vcombine.high %v613_v22, %v617_v24 }
  0xc8   :  { %3665 = vmatpush2.bf16.msra.mxu0 %v12669_v34  ;;  %v13635_v39 = vld [vmem:[#allocation3 + $0x120] ss:$28 sps:$4 sm:$0xff]   ;;  %v12654_v41 = vcombine.high %v796_v36, %v800_v37  ;;  %v12653_v46 = vcombine.low %v796_v36, %v800_v37  ;;  %v13646_v60 = vld [vmem:[#allocation3 + $0x188] ss:$28 sps:$4 sm:$0xff]   ;;  %v14252_v21 = vld [vmem:[#allocation3 + $0xf0] ss:$28 sps:$4 sm:$0xff]  }
  0xc9   :  { %3666 = vmatprep.subr.bf16.mxu0 %v12662_v35  ;;  %v788_v44 = vld [vmem:[#allocation6 + $0xac0] sm:$0xff]  ;;  %v481_v30 = vld [vmem:[#allocation6 + $0x128] sm:$0xff]  ;;  %v12471_v35 = vcombine.low %v613_v22, %v617_v24 }
  0xca   :  { %v792_v45 = vld [vmem:[#allocation6 + $0xae0] sm:$0xff]  ;;  %v605_v31 = vld [vmem:[#allocation6 + $0x508] sm:$0xff]  ;;  %v12336_v36 = vcombine.high %v477_v29, %v481_v30 }
  0xcb   :  { %3503 = vmatmul.mubr.bf16.gmra.mxu0 %v13634_v38  ;;  %v12646_v48 = vcombine.high %v788_v44, %v792_v45  ;;  %v780_v50 = vld [vmem:[#allocation6 + $0xa80] sm:$0xff]  ;;  %v12645_v53 = vcombine.low %v788_v44, %v792_v45  ;;  %v609_v32 = vld [vmem:[#allocation6 + $0x528] sm:$0xff] }
  0xcc   :  { %3616 = vmatmul.mubr.bf16.gmra.mxu1 %v13635_v39  ;;  %3667 = vmatpush2.bf16.msra.mxu0 %v12661_v40  ;;  %v784_v51 = vld [vmem:[#allocation6 + $0xaa0] sm:$0xff]  ;;  %v469_v37 = vld [vmem:[#allocation6 + $0xc8] sm:$0xff]  ;;  %v12464_v40 = vcombine.high %v605_v31, %v609_v32 }
  0xcd   :  { %3668 = vmatprep.subr.bf16.mxu0 %v12654_v41  ;;  %3512 = vmatprep.mubr.bf16.mxu0 %v13636_v42  ;;  %v12638_v55 = vcombine.high %v780_v50, %v784_v51  ;;  %v772_v56 = vld [vmem:[#allocation6 + $0xa40] sm:$0xff]  ;;  %v12637_v58 = vcombine.low %v780_v50, %v784_v51  ;;  %v473_v38 = vld [vmem:[#allocation6 + $0xe8] sm:$0xff]  ;;  %v12335_v42 = vcombine.low %v477_v29, %v481_v30 }
  0xce   :  { %3625 = vmatprep.mubr.bf16.mxu1 %v13638_v43  ;;  %v776_v57 = vld [vmem:[#allocation6 + $0xa60] sm:$0xff]  ;;  %v597_v39 = vld [vmem:[#allocation6 + $0x4c8] sm:$0xff]  ;;  %v12463_v43 = vcombine.low %v605_v31, %v609_v32  ;;  %v12328_v45 = vcombine.high %v469_v37, %v473_v38 }
  0xcf   :  { %v764_v59 = vld [vmem:[#allocation6 + $0xa00] sm:$0xff]  ;;  %v12630_v61 = vcombine.high %v772_v56, %v776_v57  ;;  %v12629_v1 = vcombine.low %v772_v56, %v776_v57  ;;  %v601_v41 = vld [vmem:[#allocation6 + $0x4e8] sm:$0xff] }
  0xd0   :  { %3669 = vmatpush2.bf16.msra.mxu0 %v12653_v46  ;;  %v768_v62 = vld [vmem:[#allocation6 + $0xa20] sm:$0xff]  ;;  %v461_v46 = vld [vmem:[#allocation6 + $0x88] sm:$0xff]  ;;  %v12456_v50 = vcombine.high %v597_v39, %v601_v41 }
  0xd1   :  { %3670 = vmatprep.subr.bf16.mxu0 %v12646_v48  ;;  %v12622_v2 = vcombine.high %v764_v59, %v768_v62  ;;  %v12621_v5 = vcombine.low %v764_v59, %v768_v62  ;;  %v13654_v27 = vld [vmem:[#allocation3 + $0x48] ss:$28 sps:$4 sm:$0xff]   ;;  %v13658_v44 = vld [vmem:[#allocation3 + $0x80] ss:$28 sps:$4 sm:$0xff]  }
  0xd2   :  { %v13656_v34 = vld [vmem:[#allocation3 + $0x84] ss:$28 sps:$4 sm:$0xff]   ;;  %v589_v48 = vld [vmem:[#allocation6 + $0x488] sm:$0xff] }
  0xd3   :  { %3513 = vmatmul.mubr.bf16.gmra.mxu0 %v13640_v47  ;;  %v465_v47 = vld [vmem:[#allocation6 + $0xa8] sm:$0xff]  ;;  %v13663_v4 = vld [vmem:[#allocation3 + $0xc0] ss:$28 sps:$4 sm:$0xff]  }
  0xd4   :  { %3626 = vmatmul.mubr.bf16.gmra.mxu1 %v13641_v49  ;;  %3671 = vmatpush2.bf16.msra.mxu0 %v12645_v53  ;;  %v13659_v49 = vld [vmem:[#allocation3 + $0x88] ss:$28 sps:$4 sm:$0xff]   ;;  %v13660_v53 = vld [vmem:[#allocation3 + $0xbc] ss:$28 sps:$4 sm:$0xff]  }
  0xd5   :  { %3672 = vmatprep.subr.bf16.mxu0 %v12638_v55  ;;  %3522 = vmatprep.mubr.bf16.mxu0 %v13642_v52  ;;  %v593_v51 = vld [vmem:[#allocation6 + $0x4a8] sm:$0xff]  ;;  %v12327_v52 = vcombine.low %v469_v37, %v473_v38  ;;  %v12320_v55 = vcombine.high %v461_v46, %v465_v47 }
  0xd6   :  { %3635 = vmatprep.mubr.bf16.mxu1 %v13644_v54  ;;  %v12455_v54 = vcombine.low %v597_v39, %v601_v41  ;;  %v453_v56 = vld [vmem:[#allocation6 + $0x48] sm:$0xff]  ;;  %v12448_v59 = vcombine.high %v589_v48, %v593_v51  ;;  %v12447_v62 = vcombine.low %v589_v48, %v593_v51 }
  0xd7   :  { %v457_v57 = vld [vmem:[#allocation6 + $0x68] sm:$0xff] }
  0xd8   :  { %3673 = vmatpush2.bf16.msra.mxu0 %v12637_v58  ;;  %v581_v58 = vld [vmem:[#allocation6 + $0x448] sm:$0xff]  ;;  %v12311_v7 = vcombine.low %v453_v56, %v457_v57 }
  0xd9   :  { %3674 = vmatprep.subr.bf16.mxu0 %v12630_v61  ;;  %v12319_v61 = vcombine.low %v461_v46, %v465_v47  ;;  %v573_v3 = vld [vmem:[#allocation6 + $0x408] sm:$0xff]  ;;  %v14267_v47 = vld [vmem:[#allocation3 + $0x164] ss:$28 sps:$4 sm:$0xff]  }
  0xda   :  { %v577_v6 = vld [vmem:[#allocation6 + $0x428] sm:$0xff] }
  0xdb   :  { %3523 = vmatmul.mubr.bf16.gmra.mxu0 %v13646_v60  ;;  %v585_v60 = vld [vmem:[#allocation6 + $0x468] sm:$0xff]  ;;  %v12431_v18 = vcombine.low %v573_v3, %v577_v6 }
  0xdc   :  { %3636 = vmatmul.mubr.bf16.gmra.mxu1 %v13647_v63  ;;  %3675 = vmatpush2.bf16.msra.mxu0 %v12629_v1  ;;  %v13662_v63 = vld [vmem:[#allocation3 + $0xb8] ss:$28 sps:$4 sm:$0xff]   ;;  %v445_v1 = vld [vmem:[#allocation6 + $0x8] sm:$0xff] }
  0xdd   :  { %3676 = vmatprep.subr.bf16.mxu0 %v12622_v2  ;;  %3678 = vmatprep.mubr.bf16.mxu0 %v13650_v0  ;;  %v12312_v0 = vcombine.high %v453_v56, %v457_v57  ;;  %v449_v2 = vld [vmem:[#allocation6 + $0x28] sm:$0xff] }
  0xde   :  { %3791 = vmatprep.mubr.bf16.mxu1 %v17790_v12  ;;  %v12304_v10 = vcombine.high %v445_v1, %v449_v2  ;;  %v565_v11 = vld [vmem:[#allocation6 + $0x3c8] sm:$0xff] }
  0xdf   :  { %v561_v24 = vld [vmem:[#allocation6 + $0x3a8] sm:$0xff] }
  0xe0   :  { %3677 = vmatpush2.bf16.msra.mxu0 %v12621_v5  ;;  %v12440_v5 = vcombine.high %v581_v58, %v585_v60  ;;  %v14257_v30 = vld [vmem:[#allocation3 + $0x12c] ss:$28 sps:$4 sm:$0xff]  }
  0xe1   :  { %3872 = vmatprep.subr.bf16.mxu0 %v12360_v9  ;;  %v12439_v9 = vcombine.low %v581_v58, %v585_v60  ;;  %v553_v32 = vld [vmem:[#allocation6 + $0x368] sm:$0xff] }
  0xe2   :  { %v14261_v38 = vld [vmem:[#allocation3 + $0x128] ss:$28 sps:$4 sm:$0xff]  }
  0xe3   :  { %3679 = vmatmul.mubr.bf16.vlgmr.msra.gmra.mxu0 %v13648_v8  ;;  %v13664_v8 = vld [vmem:[#allocation3 + $0xf4] ss:$28 sps:$4 sm:$0xff]   ;;  %v545_v41 = vld [vmem:[#allocation6 + $0x328] sm:$0xff] }
  0xe4   :  { %3792 = vmatmul.mubr.bf16.vlgmr.msra.gmra.mxu1 %v13651_v13  ;;  %3873 = vmatpush1.bf16.msra.mxu0 %v12359_v14  ;;  %v569_v13 = vld [vmem:[#allocation6 + $0x3e8] sm:$0xff] }
  0xe5   :  { %3986 = vmatpush1.bf16.msra.mxu1 %v12487_v16  ;;  %3874 = vmatprep.subr.bf16.mxu0 %v12352_v17  ;;  %v693_v14 = vld [vmem:[#allocation6 + $0x7c8] sm:$0xff]  ;;  %v12303_v17 = vcombine.low %v445_v1, %v449_v2  ;;  %v12424_v22 = vcombine.high %v565_v11, %v569_v13  ;;  %v12423_v29 = vcombine.low %v565_v11, %v569_v13 }
  0xe6   :  { %3987 = vmatprep.subr.bf16.mxu1 %v12480_v23  ;;  %3688 = vmatprep.mubr.bf16.mxu0 %v13652_v15  ;;  %v12432_v15 = vcombine.high %v573_v3, %v577_v6  ;;  %v697_v16 = vld [vmem:[#allocation6 + $0x7e8] sm:$0xff] }
  0xe7   :  { %3801 = vmatprep.mubr.bf16.mxu1 %v17790_v12  ;;  %v557_v23 = vld [vmem:[#allocation6 + $0x388] sm:$0xff]  ;;  %v12551_v31 = vcombine.low %v693_v14, %v697_v16 }
  0xe8   :  { %3875 = vmatpush1.bf16.msra.mxu0 %v12351_v25  ;;  %v685_v25 = vld [vmem:[#allocation6 + $0x788] sm:$0xff] }
  0xe9   :  { %3988 = vmatpush1.bf16.msra.mxu1 %v12479_v26  ;;  %3876 = vmatprep.subr.bf16.mxu0 %v12344_v28  ;;  %v14254_v26 = vld [vmem:[#allocation3 + $0xf8] ss:$28 sps:$4 sm:$0xff]   ;;  %v689_v28 = vld [vmem:[#allocation6 + $0x7a8] sm:$0xff] }
  0xea   :  { %3989 = vmatprep.subr.bf16.mxu1 %v12472_v20  ;;  %v549_v20 = vld [vmem:[#allocation6 + $0x348] sm:$0xff]  ;;  %v12543_v37 = vcombine.low %v685_v25, %v689_v28 }
  0xeb   :  { %3689 = vmatmul.mubr.bf16.gmra.mxu0 %v13654_v27  ;;  %v12552_v27 = vcombine.high %v693_v14, %v697_v16  ;;  %v12408_v39 = vcombine.high %v549_v20, %v553_v32  ;;  %v12407_v46 = vcombine.low %v549_v20, %v553_v32  ;;  %v537_v51 = vld [vmem:[#allocation6 + $0x2e8] sm:$0xff] }
  0xec   :  { %3802 = vmatmul.mubr.bf16.gmra.mxu1 %v13655_v19  ;;  %3877 = vmatpush1.bf16.msra.mxu0 %v12343_v33  ;;  %v12416_v19 = vcombine.high %v557_v23, %v561_v24  ;;  %v677_v33 = vld [vmem:[#allocation6 + $0x748] sm:$0xff] }
  0xed   :  { %3990 = vmatpush1.bf16.msra.mxu1 %v12471_v35  ;;  %3878 = vmatprep.subr.bf16.mxu0 %v12336_v36  ;;  %v681_v35 = vld [vmem:[#allocation6 + $0x768] sm:$0xff]  ;;  %v12415_v36 = vcombine.low %v557_v23, %v561_v24  ;;  %v14285_v23 = vld [vmem:[#allocation3 + $0x1a0] ss:$28 sps:$4 sm:$0xff]  }
  0xee   :  { %3991 = vmatprep.subr.bf16.mxu1 %v12464_v40  ;;  %3698 = vmatprep.mubr.bf16.mxu0 %v13656_v34  ;;  %v12544_v34 = vcombine.high %v685_v25, %v689_v28  ;;  %v541_v40 = vld [vmem:[#allocation6 + $0x308] sm:$0xff]  ;;  %v12535_v48 = vcombine.low %v677_v33, %v681_v35 }
  0xef   :  { %3811 = vmatprep.mubr.bf16.mxu1 %v17790_v12  ;;  %v529_v60 = vld [vmem:[#allocation6 + $0x2a8] sm:$0xff] }
  0xf0   :  { %3879 = vmatpush1.bf16.msra.mxu0 %v12335_v42  ;;  %v669_v42 = vld [vmem:[#allocation6 + $0x708] sm:$0xff] }
  0xf1   :  { %3992 = vmatpush1.bf16.msra.mxu1 %v12463_v43  ;;  %3880 = vmatprep.subr.bf16.mxu0 %v12328_v45  ;;  %v14264_v43 = vld [vmem:[#allocation3 + $0x130] ss:$28 sps:$4 sm:$0xff]  }
  0xf2   :  { %3993 = vmatprep.subr.bf16.mxu1 %v12456_v50  ;;  %v673_v45 = vld [vmem:[#allocation6 + $0x728] sm:$0xff] }
  0xf3   :  { %3699 = vmatmul.mubr.bf16.gmra.mxu0 %v13658_v44  ;;  %v12536_v44 = vcombine.high %v677_v33, %v681_v35  ;;  %v533_v50 = vld [vmem:[#allocation6 + $0x2c8] sm:$0xff]  ;;  %v12527_v56 = vcombine.low %v669_v42, %v673_v45  ;;  %v14289_v35 = vld [vmem:[#allocation3 + $0x4] ss:$28 sps:$4 sm:$0xff]  }
  0xf4   :  { %3812 = vmatmul.mubr.bf16.gmra.mxu1 %v13659_v49  ;;  %3881 = vmatpush1.bf16.msra.mxu0 %v12327_v52  ;;  %v12400_v49 = vcombine.high %v541_v40, %v545_v41  ;;  %v661_v52 = vld [vmem:[#allocation6 + $0x6c8] sm:$0xff]  ;;  %v12392_v57 = vcombine.high %v533_v50, %v537_v51  ;;  %v12391_v1 = vcombine.low %v533_v50, %v537_v51  ;;  %v14295_v50 = vld [vmem:[#allocation3] ss:$28 sps:$4 sm:$0xff]  }
  0xf5   :  { %3994 = vmatpush1.bf16.msra.mxu1 %v12455_v54  ;;  %3882 = vmatprep.subr.bf16.mxu0 %v12320_v55  ;;  %v665_v54 = vld [vmem:[#allocation6 + $0x6e8] sm:$0xff]  ;;  %v12399_v55 = vcombine.low %v541_v40, %v545_v41 }
  0xf6   :  { %3995 = vmatprep.subr.bf16.mxu1 %v12448_v59  ;;  %3708 = vmatprep.mubr.bf16.mxu0 %v13660_v53  ;;  %v12528_v53 = vcombine.high %v669_v42, %v673_v45  ;;  %v12520_v58 = vcombine.high %v661_v52, %v665_v54  ;;  %v525_v59 = vld [vmem:[#allocation6 + $0x288] sm:$0xff]  ;;  %v12519_v2 = vcombine.low %v661_v52, %v665_v54 }
  0xf7   :  { %3821 = vmatprep.mubr.bf16.mxu1 %v17790_v12  ;;  %v12384_v3 = vcombine.high %v525_v59, %v529_v60  ;;  %v517_v6 = vld [vmem:[#allocation6 + $0x248] sm:$0xff] }
  0xf8   :  { %3883 = vmatpush1.bf16.msra.mxu0 %v12319_v61  ;;  %v14273_v61 = vld [vmem:[#allocation3 + $0x160] ss:$28 sps:$4 sm:$0xff]   ;;  %v513_v16 = vld [vmem:[#allocation6 + $0x228] sm:$0xff] }
  0xf9   :  { %3996 = vmatpush1.bf16.msra.mxu1 %v12447_v62  ;;  %3884 = vmatprep.subr.bf16.mxu0 %v12312_v0  ;;  %v653_v62 = vld [vmem:[#allocation6 + $0x688] sm:$0xff] }
  0xfa   :  { %3997 = vmatprep.subr.bf16.mxu1 %v12440_v5  ;;  %v14275_v0 = vld [vmem:[#allocation3 + $0x168] ss:$28 sps:$4 sm:$0xff]   ;;  %v14277_v5 = vld [vmem:[#allocation3 + $0x19c] ss:$28 sps:$4 sm:$0xff]  }
  0xfb   :  { %3709 = vmatmul.mubr.bf16.gmra.mxu0 %v13662_v63  ;;  %v657_v63 = vld [vmem:[#allocation6 + $0x6a8] sm:$0xff] }
  0xfc   :  { %3822 = vmatmul.mubr.bf16.gmra.mxu1 %v13663_v4  ;;  %3885 = vmatpush1.bf16.msra.mxu0 %v12311_v7  ;;  %v12512_v4 = vcombine.high %v653_v62, %v657_v63  ;;  %v521_v7 = vld [vmem:[#allocation6 + $0x268] sm:$0xff]  ;;  %v12511_v11 = vcombine.low %v653_v62, %v657_v63 }
  0xfd   :  { %3998 = vmatpush1.bf16.msra.mxu1 %v12439_v9  ;;  %3886 = vmatprep.subr.bf16.mxu0 %v12304_v10  ;;  %v649_v9 = vld [vmem:[#allocation6 + $0x668] sm:$0xff]  ;;  %v12383_v10 = vcombine.low %v525_v59, %v529_v60  ;;  %v12376_v13 = vcombine.high %v517_v6, %v521_v7  ;;  %v12375_v24 = vcombine.low %v517_v6, %v521_v7  ;;  %v14304_v59 = vld [vmem:[#allocation3 + $0x44] ss:$28 sps:$4 sm:$0xff]  }
  0xfe   :  { %3999 = vmatprep.subr.bf16.mxu1 %v12432_v15  ;;  %3718 = vmatprep.mubr.bf16.mxu0 %v13664_v8  ;;  %v645_v8 = vld [vmem:[#allocation6 + $0x648] sm:$0xff] }
  0xff   :  { %3831 = vmatprep.mubr.bf16.mxu1 %v17790_v12  ;;  %v12504_v14 = vcombine.high %v645_v8, %v649_v9  ;;  %v509_v15 = vld [vmem:[#allocation6 + $0x208] sm:$0xff]  ;;  %v12503_v25 = vcombine.low %v645_v8, %v649_v9  ;;  %v13814_v9 = vld [vmem:[#allocation3 + $0x38] ss:$28 sps:$4 sm:$0xff]  }
 0x100   :  { %3887 = vmatpush1.bf16.msra.mxu0 %v12303_v17  ;;  %v14283_v17 = vld [vmem:[#allocation3 + $0x198] ss:$28 sps:$4 sm:$0xff]   ;;  %v889_v20 = vld [vmem:[#allocation6 + $0xde8] sm:$0xff]  ;;  %v12367_v32 = vcombine.low %v509_v15, %v513_v16 }
 0x101   :  { %4000 = vmatpush1.bf16.msra.mxu1 %v12431_v18  ;;  %3888 = vmatprep.subr.bf16.mxu0 %v12424_v22  ;;  %v637_v18 = vld [vmem:[#allocation6 + $0x608] sm:$0xff] }
 0x102   :  { %4001 = vmatprep.subr.bf16.mxu1 %v12552_v27  ;;  %v641_v22 = vld [vmem:[#allocation6 + $0x628] sm:$0xff]  ;;  %v12368_v27 = vcombine.high %v509_v15, %v513_v16  ;;  %v13816_v16 = vld [vmem:[#allocation3 + $0x74] ss:$28 sps:$4 sm:$0xff]  }
 0x103   :  { %3719 = vmatmul.mubr.bf16.gmra.mxu0 %v14252_v21  ;;  %v12496_v28 = vcombine.high %v637_v18, %v641_v22  ;;  %v12495_v33 = vcombine.low %v637_v18, %v641_v22  ;;  %v14292_v40 = vld [vmem:[#allocation3 + $0xc] ss:$28 sps:$4 sm:$0xff]   ;;  %v13817_v22 = vld [vmem:[#allocation3 + $0x7c] ss:$28 sps:$4 sm:$0xff]  }
 0x104   :  { %3832 = vmatmul.mubr.bf16.gmra.mxu1 %v14254_v26  ;;  %3889 = vmatpush2.bf16.msra.mxu0 %v12423_v29  ;;  %v757_v29 = vld [vmem:[#allocation6 + $0x9c8] sm:$0xff] }
 0x105   :  { %4002 = vmatpush2.bf16.msra.mxu1 %v12551_v31  ;;  %3890 = vmatprep.subr.bf16.mxu0 %v12416_v19  ;;  %v761_v31 = vld [vmem:[#allocation6 + $0x9e8] sm:$0xff] }
 0x106   :  { %4003 = vmatprep.subr.bf16.mxu1 %v12544_v34  ;;  %3728 = vmatprep.mubr.bf16.mxu0 %v14257_v30  ;;  %v885_v19 = vld [vmem:[#allocation6 + $0xdc8] sm:$0xff]  ;;  %v12616_v34 = vcombine.high %v757_v29, %v761_v31  ;;  %v12615_v41 = vcombine.low %v757_v29, %v761_v31 }
 0x107   :  { %3841 = vmatprep.mubr.bf16.mxu1 %v17790_v12  ;;  %v877_v42 = vld [vmem:[#allocation6 + $0xd88] sm:$0xff]  ;;  %v12743_v45 = vcombine.low %v885_v19, %v889_v20 }
 0x108   :  { %3891 = vmatpush2.bf16.msra.mxu0 %v12415_v36  ;;  %v12744_v36 = vcombine.high %v885_v19, %v889_v20  ;;  %v869_v52 = vld [vmem:[#allocation6 + $0xd48] sm:$0xff] }
 0x109   :  { %4004 = vmatpush2.bf16.msra.mxu1 %v12543_v37  ;;  %3892 = vmatprep.subr.bf16.mxu0 %v12408_v39  ;;  %v749_v37 = vld [vmem:[#allocation6 + $0x988] sm:$0xff] }
 0x10a   :  { %4005 = vmatprep.subr.bf16.mxu1 %v12536_v44  ;;  %v753_v39 = vld [vmem:[#allocation6 + $0x9a8] sm:$0xff] }
 0x10b   :  { %3729 = vmatmul.mubr.bf16.gmra.mxu0 %v14261_v38  ;;  %v881_v44 = vld [vmem:[#allocation6 + $0xda8] sm:$0xff] }
 0x10c   :  { %3842 = vmatmul.mubr.bf16.gmra.mxu1 %v14264_v43  ;;  %3893 = vmatpush2.bf16.msra.mxu0 %v12407_v46  ;;  %v12608_v46 = vcombine.high %v749_v37, %v753_v39  ;;  %v12736_v51 = vcombine.high %v877_v42, %v881_v44  ;;  %v14298_v54 = vld [vmem:[#allocation3 + $0x8] ss:$28 sps:$4 sm:$0xff]  }
 0x10d   :  { %4006 = vmatpush2.bf16.msra.mxu1 %v12535_v48  ;;  %3894 = vmatprep.subr.bf16.mxu0 %v12400_v49  ;;  %v741_v48 = vld [vmem:[#allocation6 + $0x948] sm:$0xff] }
 0x10e   :  { %4007 = vmatprep.subr.bf16.mxu1 %v12528_v53  ;;  %3738 = vmatprep.mubr.bf16.mxu0 %v14267_v47  ;;  %v745_v49 = vld [vmem:[#allocation6 + $0x968] sm:$0xff] }
 0x10f   :  { %3851 = vmatprep.mubr.bf16.mxu1 %v17790_v12  ;;  %v873_v53 = vld [vmem:[#allocation6 + $0xd68] sm:$0xff] }
 0x110   :  { %3895 = vmatpush2.bf16.msra.mxu0 %v12399_v55  ;;  %v12607_v55 = vcombine.low %v749_v37, %v753_v39  ;;  %v733_v60 = vld [vmem:[#allocation6 + $0x908] sm:$0xff]  ;;  %v12728_v63 = vcombine.high %v869_v52, %v873_v53  ;;  %v12727_v8 = vcombine.low %v869_v52, %v873_v53  ;;  %v13819_v39 = vld [vmem:[#allocation3 + $0x78] ss:$28 sps:$4 sm:$0xff]  }
 0x111   :  { %4008 = vmatpush2.bf16.msra.mxu1 %v12527_v56  ;;  %3896 = vmatprep.subr.bf16.mxu0 %v12392_v57  ;;  %v12600_v56 = vcombine.high %v741_v48, %v745_v49  ;;  %v12735_v57 = vcombine.low %v877_v42, %v881_v44  ;;  %v737_v62 = vld [vmem:[#allocation6 + $0x928] sm:$0xff] }
 0x112   :  { %4009 = vmatprep.subr.bf16.mxu1 %v12520_v58  ;;  %v14301_v58 = vld [vmem:[#allocation3 + $0x3c] ss:$28 sps:$4 sm:$0xff]   ;;  %v725_v6 = vld [vmem:[#allocation6 + $0x8c8] sm:$0xff] }
 0x113   :  { %3739 = vmatmul.mubr.bf16.gmra.mxu0 %v14273_v61  ;;  %v729_v7 = vld [vmem:[#allocation6 + $0x8e8] sm:$0xff] }
 0x114   :  { %3852 = vmatmul.mubr.bf16.gmra.mxu1 %v14275_v0  ;;  %3897 = vmatpush2.bf16.msra.mxu0 %v12391_v1  ;;  %v12599_v1 = vcombine.low %v741_v48, %v745_v49  ;;  %v857_v15 = vld [vmem:[#allocation6 + $0xce8] sm:$0xff]  ;;  %v12584_v18 = vcombine.high %v725_v6, %v729_v7  ;;  %v12583_v29 = vcombine.low %v725_v6, %v729_v7  ;;  %v13821_v48 = vld [vmem:[#allocation3 + $0xb4] ss:$28 sps:$4 sm:$0xff]  }
 0x115   :  { %4010 = vmatpush2.bf16.msra.mxu1 %v12519_v2  ;;  %3898 = vmatprep.subr.bf16.mxu0 %v12384_v3  ;;  %v861_v2 = vld [vmem:[#allocation6 + $0xd08] sm:$0xff]  ;;  %v14307_v7 = vld [vmem:[#allocation6 + $0x5d0] sm:$0xff] }
 0x116   :  { %4011 = vmatprep.subr.bf16.mxu1 %v12512_v4  ;;  %3748 = vmatprep.mubr.bf16.mxu0 %v14277_v5  ;;  %v865_v3 = vld [vmem:[#allocation6 + $0xd28] sm:$0xff]  ;;  %v12592_v4 = vcombine.high %v733_v60, %v737_v62 }
 0x117   :  { %3861 = vmatprep.mubr.bf16.mxu1 %v17790_v12  ;;  %v845_v31 = vld [vmem:[#allocation6 + $0xc88] sm:$0xff] }
 0x118   :  { %3899 = vmatpush2.bf16.msra.mxu0 %v12383_v10  ;;  %v12720_v10 = vcombine.high %v861_v2, %v865_v3  ;;  %v849_v19 = vld [vmem:[#allocation6 + $0xca8] sm:$0xff] }
 0x119   :  { %4012 = vmatpush2.bf16.msra.mxu1 %v12511_v11  ;;  %3900 = vmatprep.subr.bf16.mxu0 %v12376_v13  ;;  %v13815_v11 = vld [vmem:[#allocation3 + $0x40] ss:$28 sps:$4 sm:$0xff]   ;;  %v12591_v13 = vcombine.low %v733_v60, %v737_v62  ;;  %v12704_v37 = vcombine.high %v845_v31, %v849_v19  ;;  %v837_v42 = vld [vmem:[#allocation6 + $0xc48] sm:$0xff]  ;;  %v12703_v52 = vcombine.low %v845_v31, %v849_v19 }
 0x11a   :  { %4013 = vmatprep.subr.bf16.mxu1 %v12504_v14  ;;  %v853_v14 = vld [vmem:[#allocation6 + $0xcc8] sm:$0xff]  ;;  %v13828_v31 = vld [vmem:[#allocation3 + $0x11c] ss:$28 sps:$4 sm:$0xff]  }
 0x11b   :  { %3749 = vmatmul.mubr.bf16.gmra.mxu0 %v14283_v17  ;;  %v841_v44 = vld [vmem:[#allocation6 + $0xc68] sm:$0xff] }
 0x11c   :  { %3862 = vmatmul.mubr.bf16.gmra.mxu1 %v14285_v23  ;;  %3901 = vmatpush2.bf16.msra.mxu0 %v12375_v24  ;;  %v717_v24 = vld [vmem:[#allocation6 + $0x888] sm:$0xff]  ;;  %v12696_v53 = vcombine.high %v837_v42, %v841_v44 }
 0x11d   :  { %4014 = vmatpush2.bf16.msra.mxu1 %v12503_v25  ;;  %3902 = vmatprep.subr.bf16.mxu0 %v12368_v27  ;;  %v721_v25 = vld [vmem:[#allocation6 + $0x8a8] sm:$0xff]  ;;  %v12719_v27 = vcombine.low %v861_v2, %v865_v3 }
 0x11e   :  { %4015 = vmatprep.subr.bf16.mxu1 %v12496_v28  ;;  %3904 = vmatprep.mubr.bf16.mxu0 %v14289_v35  ;;  %v12712_v28 = vcombine.high %v853_v14, %v857_v15  ;;  %v12576_v20 = vcombine.high %v717_v24, %v721_v25  ;;  %v701_v49 = vld [vmem:[#allocation6 + $0x808] sm:$0xff] }
 0x11f   :  { %4017 = vmatprep.mubr.bf16.mxu1 %v14292_v40  ;;  %v821_v62 = vld [vmem:[#allocation6 + $0xbc8] sm:$0xff] }
 0x120   :  { %3903 = vmatpush2.bf16.msra.mxu0 %v12367_v32  ;;  %v709_v32 = vld [vmem:[#allocation6 + $0x848] sm:$0xff] }
 0x121   :  { %4016 = vmatpush2.bf16.msra.mxu1 %v12495_v33  ;;  %4098 = vmatprep.subr.bf16.mxu0 %v12616_v34  ;;  %v713_v33 = vld [vmem:[#allocation6 + $0x868] sm:$0xff]  ;;  %v12711_v34 = vcombine.low %v853_v14, %v857_v15 }
 0x122   :  { %4211 = vmatprep.subr.bf16.mxu1 %v12744_v36  ;;  %v13818_v36 = vld [vmem:[#allocation3 + $0x70] ss:$28 sps:$4 sm:$0xff]   ;;  %v13822_v2 = vld [vmem:[#allocation3 + $0xa8] ss:$28 sps:$4 sm:$0xff]  }
 0x123   :  { %3905 = vmatmul.mubr.bf16.vlgmr.msra.gmra.mxu0 %v14295_v50  ;;  %v817_v14 = vld [vmem:[#allocation6 + $0xba8] sm:$0xff] }
 0x124   :  { %4018 = vmatmul.mubr.bf16.vlgmr.msra.gmra.mxu1 %v14298_v54  ;;  %4099 = vmatpush1.bf16.msra.mxu0 %v12615_v41  ;;  %v12575_v41 = vcombine.low %v717_v24, %v721_v25  ;;  %v805_v24 = vld [vmem:[#allocation6 + $0xb48] sm:$0xff] }
 0x125   :  { %4212 = vmatpush1.bf16.msra.mxu1 %v12743_v45  ;;  %4100 = vmatprep.subr.bf16.mxu0 %v12608_v46  ;;  %v13820_v45 = vld [vmem:[#allocation3 + $0xac] ss:$28 sps:$4 sm:$0xff]   ;;  %v12568_v46 = vcombine.high %v709_v32, %v713_v33 }
 0x126   :  { %3914 = vmatprep.mubr.bf16.mxu0 %v14301_v58  ;;  %4027 = vmatprep.mubr.bf16.mxu1 %v14304_v59  ;;  %v809_v25 = vld [vmem:[#allocation6 + $0xb68] sm:$0xff] }
 0x127   :  { %4213 = vmatprep.subr.bf16.mxu1 %v12736_v51  ;;  %v705_v51 = vld [vmem:[#allocation6 + $0x828] sm:$0xff]  ;;  %v12664_v19 = vcombine.high %v805_v24, %v809_v25 }
 0x128   :  { %4101 = vmatpush1.bf16.msra.mxu0 %v12607_v55  ;;  %v12567_v55 = vcombine.low %v709_v32, %v713_v33  ;;  %v12560_v60 = vcombine.high %v701_v49, %v705_v51  ;;  %v12559_v6 = vcombine.low %v701_v49, %v705_v51  ;;  %v797_v32 = vld [vmem:[#allocation6 + $0xb08] sm:$0xff] }
 0x129   :  { %4102 = vmatprep.subr.bf16.mxu0 %v12600_v56  ;;  %4214 = vmatpush1.bf16.msra.mxu1 %v12735_v57  ;;  %v829_v56 = vld [vmem:[#allocation6 + $0xc08] sm:$0xff] }
 0x12a   :  { %4215 = vmatprep.subr.bf16.mxu1 %v12728_v63  ;;  %v833_v57 = vld [vmem:[#allocation6 + $0xc28] sm:$0xff] }
 0x12b   :  { %3915 = vmatmul.mubr.bf16.gmra.mxu0 %v13814_v9  ;;  %v825_v63 = vld [vmem:[#allocation6 + $0xbe8] sm:$0xff]  ;;  %v12688_v3 = vcombine.high %v829_v56, %v833_v57  ;;  %v13824_v9 = vld [vmem:[#allocation3 + $0xe4] ss:$28 sps:$4 sm:$0xff]   ;;  %v12687_v15 = vcombine.low %v829_v56, %v833_v57 }
 0x12c   :  { %4028 = vmatmul.mubr.bf16.gmra.mxu1 %v13815_v11  ;;  %4103 = vmatpush1.bf16.msra.mxu0 %v12599_v1  ;;  %v12695_v1 = vcombine.low %v837_v42, %v841_v44  ;;  %v13825_v11 = vld [vmem:[#allocation3 + $0xec] ss:$28 sps:$4 sm:$0xff]   ;;  %v13831_v42 = vld [vmem:[#allocation3 + $0x120] ss:$28 sps:$4 sm:$0xff]  }
 0x12d   :  { %4104 = vmatprep.subr.bf16.mxu0 %v12592_v4  ;;  %3924 = vmatprep.mubr.bf16.mxu0 %v13816_v16  ;;  %v13823_v4 = vld [vmem:[#allocation3 + $0xb0] ss:$28 sps:$4 sm:$0xff]  }
 0x12e   :  { %4037 = vmatprep.mubr.bf16.mxu1 %v13817_v22  ;;  %4216 = vmatpush1.bf16.msra.mxu1 %v12727_v8  ;;  %v14309_v8 = vld [vmem:[#allocation6 + $0x5f0] sm:$0xff]  ;;  %v801_v33 = vld [vmem:[#allocation6 + $0xb28] sm:$0xff] }
 0x12f   :  { %4217 = vmatprep.subr.bf16.mxu1 %v12720_v10  ;;  %v12680_v10 = vcombine.high %v821_v62, %v825_v63  ;;  %v12490_v16 = vcombine.high %v14307_v7, %v14309_v8  ;;  %v12655_v44 = vcombine.low %v797_v32, %v801_v33  ;;  %v781_v49 = vld [vmem:[#allocation6 + $0xa88] sm:$0xff] }
 0x130   :  { %4105 = vmatpush1.bf16.msra.mxu0 %v12591_v13  ;;  %v813_v13 = vld [vmem:[#allocation6 + $0xb88] sm:$0xff] }
 0x131   :  { %4106 = vmatprep.subr.bf16.mxu0 %v12584_v18  ;;  %v12679_v18 = vcombine.low %v821_v62, %v825_v63  ;;  %v12672_v22 = vcombine.high %v813_v13, %v817_v14  ;;  %v785_v51 = vld [vmem:[#allocation6 + $0xaa8] sm:$0xff] }
 0x132   :  { %4218 = vmatpush1.bf16.msra.mxu1 %v12719_v27  ;;  %v13826_v27 = vld [vmem:[#allocation3 + $0xe0] ss:$28 sps:$4 sm:$0xff]   ;;  %v777_v56 = vld [vmem:[#allocation6 + $0xa68] sm:$0xff]  ;;  %v12639_v62 = vcombine.low %v781_v49, %v785_v51 }
 0x133   :  { %3925 = vmatmul.mubr.bf16.gmra.mxu0 %v13818_v36  ;;  %4219 = vmatprep.subr.bf16.mxu1 %v12712_v28  ;;  %v13827_v28 = vld [vmem:[#allocation3 + $0xe8] ss:$28 sps:$4 sm:$0xff]   ;;  %v12656_v36 = vcombine.high %v797_v32, %v801_v33  ;;  %v13834_v57 = vld [vmem:[#allocation3 + $0x150] ss:$28 sps:$4 sm:$0xff]  }
 0x134   :  { %4038 = vmatmul.mubr.bf16.gmra.mxu1 %v13819_v39  ;;  %4107 = vmatpush1.bf16.msra.mxu0 %v12583_v29  ;;  %v12671_v29 = vcombine.low %v813_v13, %v817_v14  ;;  %v793_v39 = vld [vmem:[#allocation6 + $0xae8] sm:$0xff]  ;;  %v490_v32 = vld [vmem:[#allocation6 + $0x170] sm:$0xff] }
 0x135   :  { %4108 = vmatprep.subr.bf16.mxu0 %v12576_v20  ;;  %3934 = vmatprep.mubr.bf16.mxu0 %v13820_v45  ;;  %v13829_v20 = vld [vmem:[#allocation3 + $0x124] ss:$28 sps:$4 sm:$0xff]   ;;  %v13832_v45 = vld [vmem:[#allocation3 + $0x154] ss:$28 sps:$4 sm:$0xff]   ;;  %v13836_v63 = vld [vmem:[#allocation3 + $0x18c] ss:$28 sps:$4 sm:$0xff]  }
 0x136   :  { %4047 = vmatprep.mubr.bf16.mxu1 %v13821_v48  ;;  %4220 = vmatpush1.bf16.msra.mxu1 %v12711_v34  ;;  %v12663_v34 = vcombine.low %v805_v24, %v809_v25  ;;  %v13833_v48 = vld [vmem:[#allocation3 + $0x15c] ss:$28 sps:$4 sm:$0xff]   ;;  %v13838_v13 = vld [vmem:[#allocation3 + $0x188] ss:$28 sps:$4 sm:$0xff]   ;;  %v13839_v14 = vld [vmem:[#allocation3 + $0x190] ss:$28 sps:$4 sm:$0xff]  }
 0x137   :  { %4221 = vmatprep.subr.bf16.mxu1 %v12704_v37  ;;  %v789_v37 = vld [vmem:[#allocation6 + $0xac8] sm:$0xff]  ;;  %v498_v24 = vld [vmem:[#allocation6 + $0x1b0] sm:$0xff] }
 0x138   :  { %4109 = vmatpush1.bf16.msra.mxu0 %v12575_v41  ;;  %v13830_v41 = vld [vmem:[#allocation3 + $0x118] ss:$28 sps:$4 sm:$0xff]  }
 0x139   :  { %4110 = vmatprep.subr.bf16.mxu0 %v12568_v46  ;;  %v12648_v46 = vcombine.high %v789_v37, %v793_v39  ;;  %v622_v25 = vld [vmem:[#allocation6 + $0x590] sm:$0xff] }
 0x13a   :  { %4222 = vmatpush1.bf16.msra.mxu1 %v12703_v52  ;;  %v12647_v52 = vcombine.low %v789_v37, %v793_v39  ;;  %v618_v37 = vld [vmem:[#allocation6 + $0x570] sm:$0xff] }
 0x13b   :  { %3935 = vmatmul.mubr.bf16.gmra.mxu0 %v13822_v2  ;;  %4223 = vmatprep.subr.bf16.mxu1 %v12696_v53  ;;  %v12640_v53 = vcombine.high %v781_v49, %v785_v51  ;;  %v13837_v2 = vld [vmem:[#allocation3 + $0x194] ss:$28 sps:$4 sm:$0xff]  }
 0x13c   :  { %4048 = vmatmul.mubr.bf16.gmra.mxu1 %v13823_v4  ;;  %4111 = vmatpush1.bf16.msra.mxu0 %v12567_v55  ;;  %v773_v55 = vld [vmem:[#allocation6 + $0xa48] sm:$0xff]  ;;  %v478_v51 = vld [vmem:[#allocation6 + $0x110] sm:$0xff] }
 0x13d   :  { %4112 = vmatprep.subr.bf16.mxu0 %v12560_v60  ;;  %3944 = vmatprep.mubr.bf16.mxu0 %v13824_v9  ;;  %v13835_v60 = vld [vmem:[#allocation3 + $0x158] ss:$28 sps:$4 sm:$0xff]   ;;  %v769_v4 = vld [vmem:[#allocation6 + $0xa28] sm:$0xff] }
 0x13e   :  { %4057 = vmatprep.mubr.bf16.mxu1 %v13825_v11  ;;  %4224 = vmatpush1.bf16.msra.mxu1 %v12695_v1  ;;  %v12632_v1 = vcombine.high %v773_v55, %v777_v56  ;;  %v506_v11 = vld [vmem:[#allocation6 + $0x1f0] sm:$0xff] }
 0x13f   :  { %4225 = vmatprep.subr.bf16.mxu1 %v12688_v3  ;;  %v765_v3 = vld [vmem:[#allocation6 + $0xa08] sm:$0xff] }
 0x140   :  { %4113 = vmatpush1.bf16.msra.mxu0 %v12559_v6  ;;  %v12631_v6 = vcombine.low %v773_v55, %v777_v56  ;;  %v12624_v9 = vcombine.high %v765_v3, %v769_v4  ;;  %v606_v56 = vld [vmem:[#allocation6 + $0x510] sm:$0xff] }
 0x141   :  { %4114 = vmatprep.subr.bf16.mxu0 %v12680_v10  ;;  %v502_v10 = vld [vmem:[#allocation6 + $0x1d0] sm:$0xff] }
 0x142   :  { %4226 = vmatpush1.bf16.msra.mxu1 %v12687_v15  ;;  %v12623_v15 = vcombine.low %v765_v3, %v769_v4 }
 0x143   :  { %3945 = vmatmul.mubr.bf16.gmra.mxu0 %v13826_v27  ;;  %4437 = vmatprep.subr.bf16.mxu1 %v12490_v16  ;;  %v13840_v16 = vld [vmem:[#allocation3 + $0x14] ss:$28 sps:$4 sm:$0xff]  }
 0x144   :  { %4058 = vmatmul.mubr.bf16.gmra.mxu1 %v13827_v28  ;;  %4115 = vmatpush2.bf16.msra.mxu0 %v12679_v18  ;;  %v12362_v18 = vcombine.high %v502_v10, %v506_v11  ;;  %v626_v27 = vld [vmem:[#allocation6 + $0x5b0] sm:$0xff]  ;;  %v12361_v28 = vcombine.low %v502_v10, %v506_v11 }
 0x145   :  { %4116 = vmatprep.subr.bf16.mxu0 %v12672_v22  ;;  %3954 = vmatprep.mubr.bf16.mxu0 %v13828_v31  ;;  %v494_v22 = vld [vmem:[#allocation6 + $0x190] sm:$0xff] }
 0x146   :  { %4067 = vmatprep.mubr.bf16.mxu1 %v13829_v20  ;;  %v12354_v31 = vcombine.high %v494_v22, %v498_v24  ;;  %v486_v20 = vld [vmem:[#allocation6 + $0x150] sm:$0xff] }
 0x147   :  { %v474_v10 = vld [vmem:[#allocation6 + $0xf0] sm:$0xff] }
 0x148   :  { %4117 = vmatpush2.bf16.msra.mxu0 %v12671_v29  ;;  %v12489_v29 = vcombine.low %v14307_v7, %v14309_v8  ;;  %v12481_v7 = vcombine.low %v622_v25, %v626_v27  ;;  %v12346_v8 = vcombine.high %v486_v20, %v490_v32 }
 0x149   :  { %4118 = vmatprep.subr.bf16.mxu0 %v12664_v19  ;;  %v12482_v19 = vcombine.high %v622_v25, %v626_v27 }
 0x14b   :  { %3955 = vmatmul.mubr.bf16.gmra.mxu0 %v13830_v41  ;;  %v13842_v41 = vld [vmem:[#allocation3 + $0x18] ss:$28 sps:$4 sm:$0xff]  }
 0x14c   :  { %4068 = vmatmul.mubr.bf16.gmra.mxu1 %v13831_v42  ;;  %4119 = vmatpush2.bf16.msra.mxu0 %v12663_v34  ;;  %v13841_v34 = vld [vmem:[#allocation3 + $0x10] ss:$28 sps:$4 sm:$0xff]   ;;  %v12353_v42 = vcombine.low %v494_v22, %v498_v24 }
 0x14d   :  { %4120 = vmatprep.subr.bf16.mxu0 %v12656_v36  ;;  %3964 = vmatprep.mubr.bf16.mxu0 %v13832_v45  ;;  %v614_v36 = vld [vmem:[#allocation6 + $0x550] sm:$0xff] }
 0x14e   :  { %4077 = vmatprep.mubr.bf16.mxu1 %v13833_v48  ;;  %v13843_v48 = vld [vmem:[#allocation3 + $0x4c] ss:$28 sps:$4 sm:$0xff]   ;;  %v12474_v49 = vcombine.high %v614_v36, %v618_v37 }
 0x14f   :  { %v13845_v22 = vld [vmem:[#allocation3 + $0x50] ss:$28 sps:$4 sm:$0xff]  }
 0x150   :  { %4121 = vmatpush2.bf16.msra.mxu0 %v12655_v44 }
 0x151   :  { %4122 = vmatprep.subr.bf16.mxu0 %v12648_v46 }
 0x153   :  { %3965 = vmatmul.mubr.bf16.gmra.mxu0 %v13834_v57  ;;  %v610_v57 = vld [vmem:[#allocation6 + $0x530] sm:$0xff] }
 0x154   :  { %4078 = vmatmul.mubr.bf16.gmra.mxu1 %v13835_v60  ;;  %4123 = vmatpush2.bf16.msra.mxu0 %v12647_v52  ;;  %v482_v52 = vld [vmem:[#allocation6 + $0x130] sm:$0xff] }
 0x155   :  { %4124 = vmatprep.subr.bf16.mxu0 %v12640_v53  ;;  %3974 = vmatprep.mubr.bf16.mxu0 %v13836_v63  ;;  %v12338_v3 = vcombine.high %v478_v51, %v482_v52  ;;  %v12337_v24 = vcombine.low %v478_v51, %v482_v52  ;;  %v454_v51 = vld [vmem:[#allocation6 + $0x50] sm:$0xff] }
 0x156   :  { %4087 = vmatprep.mubr.bf16.mxu1 %v13837_v2  ;;  %v12473_v2 = vcombine.low %v614_v36, %v618_v37  ;;  %v590_v37 = vld [vmem:[#allocation6 + $0x490] sm:$0xff] }
 0x157   :  { %v458_v52 = vld [vmem:[#allocation6 + $0x70] sm:$0xff] }
 0x158   :  { %4125 = vmatpush2.bf16.msra.mxu0 %v12639_v62  ;;  %v12345_v62 = vcombine.low %v486_v20, %v490_v32  ;;  %v462_v32 = vld [vmem:[#allocation6 + $0x90] sm:$0xff] }
 0x159   :  { %4126 = vmatprep.subr.bf16.mxu0 %v12632_v1 }
 0x15b   :  { %3975 = vmatmul.mubr.bf16.gmra.mxu0 %v13838_v13 }
 0x15c   :  { %4088 = vmatmul.mubr.bf16.gmra.mxu1 %v13839_v14  ;;  %4127 = vmatpush2.bf16.msra.mxu0 %v12631_v6  ;;  %v12466_v6 = vcombine.high %v606_v56, %v610_v57  ;;  %v13844_v14 = vld [vmem:[#allocation3 + $0x48] ss:$28 sps:$4 sm:$0xff]  }
 0x15d   :  { %4128 = vmatprep.subr.bf16.mxu0 %v12624_v9  ;;  %4130 = vmatprep.mubr.bf16.mxu0 %v13840_v16  ;;  %v470_v9 = vld [vmem:[#allocation6 + $0xd0] sm:$0xff] }
 0x15e   :  { %4243 = vmatprep.mubr.bf16.mxu1 %v17790_v12  ;;  %v602_v16 = vld [vmem:[#allocation6 + $0x4f0] sm:$0xff] }
 0x160   :  { %4129 = vmatpush2.bf16.msra.mxu0 %v12623_v15  ;;  %v598_v15 = vld [vmem:[#allocation6 + $0x4d0] sm:$0xff] }
 0x161   :  { %4324 = vmatprep.subr.bf16.mxu0 %v12362_v18  ;;  %v3454_v33 = vpop.f32.mrf.mxu0  ;;  %v3567_v39 = vpop.f32.mrf.mxu1  ;;  %v12458_v20 = vcombine.high %v598_v15, %v602_v16 }
 0x162   :  { %v14316_v44 = vadd.f32 %v3567_v39, %v3454_v33  ;;  %v466_v33 = vld [vmem:[#allocation6 + $0xb0] sm:$0xff] }
 0x163   :  { %4131 = vmatmul.mubr.bf16.vlgmr.msra.gmra.mxu0 %v13841_v34  ;;  %v3456_v45 = vpop.f32.mrf.mxu0  ;;  %v3569_v46 = vpop.f32.mrf.mxu1  ;;  %v594_v39 = vld [vmem:[#allocation6 + $0x4b0] sm:$0xff] }
 0x164   :  { %4244 = vmatmul.mubr.bf16.vlgmr.msra.gmra.mxu1 %v13842_v41  ;;  %4325 = vmatpush1.bf16.msra.mxu0 %v12361_v28  ;;  %v14318_v53 = vadd.f32 %v3569_v46, %v3456_v45  ;;  %v12465_v28 = vcombine.low %v606_v56, %v610_v57  ;;  %v12322_v46 = vcombine.high %v462_v32, %v466_v33  ;;  %v13847_v57 = vld [vmem:[#allocation3 + $0x80] ss:$28 sps:$4 sm:$0xff]  }
 0x165   :  { %4438 = vmatpush1.bf16.msra.mxu1 %v12489_v29  ;;  %4326 = vmatprep.subr.bf16.mxu0 %v12354_v31  ;;  %v3458_v55 = vpop.f32.mrf.mxu0  ;;  %v3571_v60 = vpop.f32.mrf.mxu1  ;;  %v12330_v29 = vcombine.high %v470_v9, %v474_v10 }
 0x166   :  { %4439 = vmatprep.subr.bf16.mxu1 %v12482_v19  ;;  %4140 = vmatprep.mubr.bf16.mxu0 %v13843_v48  ;;  %v14321_v63 = vadd.f32 %v3571_v60, %v3458_v55  ;;  %v13846_v19 = vld [vmem:[#allocation3 + $0x84] ss:$28 sps:$4 sm:$0xff]   ;;  %v582_v60 = vld [vmem:[#allocation6 + $0x450] sm:$0xff] }
 0x167   :  { %4253 = vmatprep.mubr.bf16.mxu1 %v17790_v12  ;;  %v3460_v1 = vpop.f32.mrf.mxu0  ;;  %v3573_v4 = vpop.f32.mrf.mxu1 }
 0x168   :  { %4327 = vmatpush1.bf16.msra.mxu0 %v12353_v42  ;;  %v14323_v11 = vadd.f32 %v3573_v4, %v3460_v1  ;;  %v12329_v42 = vcombine.low %v470_v9, %v474_v10  ;;  %v12449_v9 = vcombine.low %v590_v37, %v594_v39  ;;  %v12314_v10 = vcombine.high %v454_v51, %v458_v52 }
 0x169   :  { %4440 = vmatpush1.bf16.msra.mxu1 %v12481_v7  ;;  %4328 = vmatprep.subr.bf16.mxu0 %v12346_v8  ;;  %v3464_v13 = vpop.f32.mrf.mxu0  ;;  %v12457_v8 = vcombine.low %v598_v15, %v602_v16  ;;  %v446_v16 = vld [vmem:[#allocation6 + $0x10] sm:$0xff] }
 0x16a   :  { %4441 = vmatprep.subr.bf16.mxu1 %v12474_v49  ;;  %v12450_v49 = vcombine.high %v590_v37, %v594_v39  ;;  %v566_v39 = vld [vmem:[#allocation6 + $0x3d0] sm:$0xff] }
 0x16b   :  { %4141 = vmatmul.mubr.bf16.gmra.mxu0 %v13844_v14  ;;  %v3577_v18 = vpop.f32.mrf.mxu1  ;;  %v3466_v27 = vpop.f32.mrf.mxu0  ;;  %v13849_v14 = vld [vmem:[#allocation3 + $0xbc] ss:$28 sps:$4 sm:$0xff]  }
 0x16c   :  { %4254 = vmatmul.mubr.bf16.gmra.mxu1 %v13845_v22  ;;  %4329 = vmatpush1.bf16.msra.mxu0 %v12345_v62  ;;  %v14325_v25 = vadd.f32 %v3577_v18, %v3464_v13  ;;  %v586_v62 = vld [vmem:[#allocation6 + $0x470] sm:$0xff] }
 0x16d   :  { %4442 = vmatpush1.bf16.msra.mxu1 %v12473_v2  ;;  %4330 = vmatprep.subr.bf16.mxu0 %v12338_v3  ;;  %v3579_v31 = vpop.f32.mrf.mxu1  ;;  %v3468_v36 = vpop.f32.mrf.mxu0  ;;  %v13848_v2 = vld [vmem:[#allocation3 + $0x88] ss:$28 sps:$4 sm:$0xff]   ;;  %v12321_v3 = vcombine.low %v462_v32, %v466_v33  ;;  %v12442_v15 = vcombine.high %v582_v60, %v586_v62  ;;  %v450_v18 = vld [vmem:[#allocation6 + $0x30] sm:$0xff]  ;;  %v12441_v32 = vcombine.low %v582_v60, %v586_v62 }
 0x16e   :  { %4443 = vmatprep.subr.bf16.mxu1 %v12466_v6  ;;  %4150 = vmatprep.mubr.bf16.mxu0 %v13846_v19  ;;  %v14327_v34 = vadd.f32 %v3579_v31, %v3466_v27  ;;  %v574_v27 = vld [vmem:[#allocation6 + $0x410] sm:$0xff]  ;;  %v12313_v31 = vcombine.low %v454_v51, %v458_v52  ;;  %v12306_v33 = vcombine.high %v446_v16, %v450_v18  ;;  %v13851_v51 = vld [vmem:[#allocation3 + $0xc0] ss:$28 sps:$4 sm:$0xff]  }
 0x16f   :  { %4263 = vmatprep.mubr.bf16.mxu1 %v17790_v12  ;;  %v3581_v41 = vpop.f32.mrf.mxu1  ;;  %v3470_v7 = vpop.f32.mrf.mxu0  ;;  %v12305_v52 = vcombine.low %v446_v16, %v450_v18 }
 0x170   :  { %4331 = vmatpush1.bf16.msra.mxu0 %v12337_v24  ;;  %v14330_v45 = vadd.f32 %v3581_v41, %v3468_v36  ;;  %v570_v41 = vld [vmem:[#allocation6 + $0x3f0] sm:$0xff] }
 0x171   :  { %4444 = vmatpush1.bf16.msra.mxu1 %v12465_v28  ;;  %4332 = vmatprep.subr.bf16.mxu0 %v12330_v29  ;;  %v3583_v48 = vpop.f32.mrf.mxu1  ;;  %v578_v28 = vld [vmem:[#allocation6 + $0x430] sm:$0xff]  ;;  %v12426_v62 = vcombine.high %v566_v39, %v570_v41  ;;  %v12425_v18 = vcombine.low %v566_v39, %v570_v41 }
 0x172   :  { %4445 = vmatprep.subr.bf16.mxu1 %v12458_v20  ;;  %v14332_v55 = vadd.f32 %v3583_v48, %v3470_v7  ;;  %v3474_v56 = vpop.f32.mrf.mxu0  ;;  %v12434_v37 = vcombine.high %v574_v27, %v578_v28  ;;  %v698_v48 = vld [vmem:[#allocation6 + $0x7f0] sm:$0xff]  ;;  %v12433_v60 = vcombine.low %v574_v27, %v578_v28 }
 0x173   :  { %4151 = vmatmul.mubr.bf16.gmra.mxu0 %v13847_v57  ;;  %v3587_v1 = vpop.f32.mrf.mxu1 }
 0x174   :  { %4264 = vmatmul.mubr.bf16.gmra.mxu1 %v13848_v2  ;;  %4333 = vmatpush1.bf16.msra.mxu0 %v12329_v42  ;;  %v14334_v4 = vadd.f32 %v3587_v1, %v3474_v56  ;;  %v3476_v6 = vpop.f32.mrf.mxu0  ;;  %v13852_v2 = vld [vmem:[#allocation3 + $0xf4] ss:$28 sps:$4 sm:$0xff]  }
 0x175   :  { %4446 = vmatpush1.bf16.msra.mxu1 %v12457_v8  ;;  %4334 = vmatprep.subr.bf16.mxu0 %v12322_v46  ;;  %v3589_v13 = vpop.f32.mrf.mxu1  ;;  %v13850_v8 = vld [vmem:[#allocation3 + $0xb8] ss:$28 sps:$4 sm:$0xff]  }
 0x176   :  { %4447 = vmatprep.subr.bf16.mxu1 %v12450_v49  ;;  %4160 = vmatprep.mubr.bf16.mxu0 %v13849_v14  ;;  %v14336_v22 = vadd.f32 %v3589_v13, %v3476_v6  ;;  %v3478_v24 = vpop.f32.mrf.mxu0  ;;  %v694_v46 = vld [vmem:[#allocation6 + $0x7d0] sm:$0xff] }
 0x177   :  { %4273 = vmatprep.mubr.bf16.mxu1 %v17790_v12  ;;  %v3591_v29 = vpop.f32.mrf.mxu1  ;;  %v558_v6 = vld [vmem:[#allocation6 + $0x390] sm:$0xff]  ;;  %v12553_v28 = vcombine.low %v694_v46, %v698_v48 }
 0x178   :  { %4335 = vmatpush1.bf16.msra.mxu0 %v12321_v3  ;;  %v14339_v19 = vadd.f32 %v3591_v29, %v3478_v24  ;;  %v3480_v20 = vpop.f32.mrf.mxu0  ;;  %v12554_v3 = vcombine.high %v694_v46, %v698_v48  ;;  %v686_v14 = vld [vmem:[#allocation6 + $0x790] sm:$0xff] }
 0x179   :  { %4448 = vmatpush1.bf16.msra.mxu1 %v12449_v9  ;;  %4336 = vmatprep.subr.bf16.mxu0 %v12314_v10  ;;  %v3593_v36 = vpop.f32.mrf.mxu1  ;;  %v562_v9 = vld [vmem:[#allocation6 + $0x3b0] sm:$0xff] }
 0x17a   :  { %4449 = vmatprep.subr.bf16.mxu1 %v12442_v15  ;;  %v14341_v42 = vadd.f32 %v3593_v36, %v3480_v20  ;;  %v3484_v7 = vpop.f32.mrf.mxu0  ;;  %v690_v15 = vld [vmem:[#allocation6 + $0x7b0] sm:$0xff]  ;;  %v12418_v29 = vcombine.high %v558_v6, %v562_v9  ;;  %v12417_v41 = vcombine.low %v558_v6, %v562_v9 }
 0x17b   :  { %4161 = vmatmul.mubr.bf16.gmra.mxu0 %v13850_v8  ;;  %v3597_v49 = vpop.f32.mrf.mxu1  ;;  %v12546_v20 = vcombine.high %v686_v14, %v690_v15  ;;  %v682_v8 = vld [vmem:[#allocation6 + $0x770] sm:$0xff]  ;;  %v12545_v48 = vcombine.low %v686_v14, %v690_v15 }
 0x17c   :  { %4274 = vmatmul.mubr.bf16.gmra.mxu1 %v13851_v51  ;;  %4337 = vmatpush1.bf16.msra.mxu0 %v12313_v31  ;;  %v14343_v56 = vadd.f32 %v3597_v49, %v3484_v7  ;;  %v3486_v57 = vpop.f32.mrf.mxu0  ;;  %v678_v7 = vld [vmem:[#allocation6 + $0x750] sm:$0xff] }
 0x17d   :  { %4450 = vmatpush1.bf16.msra.mxu1 %v12441_v32  ;;  %4338 = vmatprep.subr.bf16.mxu0 %v12306_v33  ;;  %v3599_v1 = vpop.f32.mrf.mxu1  ;;  %v550_v32 = vld [vmem:[#allocation6 + $0x350] sm:$0xff]  ;;  %v12537_v14 = vcombine.low %v678_v7, %v682_v8 }
 0x17e   :  { %4451 = vmatprep.subr.bf16.mxu1 %v12434_v37  ;;  %4170 = vmatprep.mubr.bf16.mxu0 %v13852_v2  ;;  %v14345_v10 = vadd.f32 %v3599_v1, %v3486_v57  ;;  %v3488_v13 = vpop.f32.mrf.mxu0  ;;  %v554_v33 = vld [vmem:[#allocation6 + $0x370] sm:$0xff]  ;;  %v12538_v57 = vcombine.high %v678_v7, %v682_v8 }
 0x17f   :  { %4283 = vmatprep.mubr.bf16.mxu1 %v17790_v12  ;;  %v3601_v16 = vpop.f32.mrf.mxu1  ;;  %v12410_v51 = vcombine.high %v550_v32, %v554_v33  ;;  %v674_v2 = vld [vmem:[#allocation6 + $0x730] sm:$0xff]  ;;  %v12409_v6 = vcombine.low %v550_v32, %v554_v33 }
 0x180   :  { %4339 = vmatpush1.bf16.msra.mxu0 %v12305_v52  ;;  %v14348_v24 = vadd.f32 %v3601_v16, %v3488_v13  ;;  %v3490_v27 = vpop.f32.mrf.mxu0 }
 0x181   :  { %4452 = vmatpush1.bf16.msra.mxu1 %v12433_v60  ;;  %4340 = vmatprep.subr.bf16.mxu0 %v12426_v62  ;;  %v3603_v31 = vpop.f32.mrf.mxu1  ;;  %v546_v60 = vld [vmem:[#allocation6 + $0x330] sm:$0xff] }
 0x182   :  { %4453 = vmatprep.subr.bf16.mxu1 %v12554_v3  ;;  %v14350_v36 = vadd.f32 %v3603_v31, %v3490_v27  ;;  %v538_v27 = vld [vmem:[#allocation6 + $0x2f0] sm:$0xff] }
 0x183   :  { %v3494_v37 = vpop.f32.mrf.mxu0  ;;  %4171 = vmatmul.mubr.bf16.gmra.mxu0 %v14252_v21  ;;  %v542_v21 = vld [vmem:[#allocation6 + $0x310] sm:$0xff] }
 0x184   :  { %v3607_v39 = vpop.f32.mrf.mxu1  ;;  %4284 = vmatmul.mubr.bf16.gmra.mxu1 %v14254_v26  ;;  %4341 = vmatpush2.bf16.msra.mxu0 %v12425_v18  ;;  %v670_v26 = vld [vmem:[#allocation6 + $0x710] sm:$0xff]  ;;  %v12401_v33 = vcombine.low %v542_v21, %v546_v60 }
 0x185   :  { %v14354_v49 = vadd.f32 %v3607_v39, %v3494_v37  ;;  %4454 = vmatpush2.bf16.msra.mxu1 %v12553_v28  ;;  %v3496_v46 = vpop.f32.mrf.mxu0  ;;  %4342 = vmatprep.subr.bf16.mxu0 %v12418_v29  ;;  %v12530_v16 = vcombine.high %v670_v26, %v674_v2  ;;  %v534_v18 = vld [vmem:[#allocation6 + $0x2d0] sm:$0xff]  ;;  %v12529_v8 = vcombine.low %v670_v26, %v674_v2 }
 0x186   :  { %v3609_v52 = vpop.f32.mrf.mxu1  ;;  %4455 = vmatprep.subr.bf16.mxu1 %v12546_v20  ;;  %4180 = vmatprep.mubr.bf16.mxu0 %v14257_v30  ;;  %v12402_v30 = vcombine.high %v542_v21, %v546_v60  ;;  %v662_v31 = vld [vmem:[#allocation6 + $0x6d0] sm:$0xff]  ;;  %v12394_v39 = vcombine.high %v534_v18, %v538_v27  ;;  %v12393_v60 = vcombine.low %v534_v18, %v538_v27 }
 0x187   :  { %v14357_v62 = vadd.f32 %v3609_v52, %v3496_v46  ;;  %v3498_v1 = vpop.f32.mrf.mxu0  ;;  %4293 = vmatprep.mubr.bf16.mxu1 %v17790_v12  ;;  %v666_v20 = vld [vmem:[#allocation6 + $0x6f0] sm:$0xff] }
 0x188   :  { %v3611_v3 = vpop.f32.mrf.mxu1  ;;  %4343 = vmatpush2.bf16.msra.mxu0 %v12417_v41  ;;  %v12522_v46 = vcombine.high %v662_v31, %v666_v20  ;;  %v12521_v2 = vcombine.low %v662_v31, %v666_v20 }
 0x189   :  { %v14360_v9 = vadd.f32 %v3611_v3, %v3498_v1  ;;  %4456 = vmatpush2.bf16.msra.mxu1 %v12545_v48  ;;  %v3500_v13 = vpop.f32.mrf.mxu0  ;;  %4344 = vmatprep.subr.bf16.mxu0 %v12410_v51  ;;  %v530_v48 = vld [vmem:[#allocation6 + $0x2b0] sm:$0xff] }
 0x18a   :  { %v3613_v15 = vpop.f32.mrf.mxu1  ;;  %4457 = vmatprep.subr.bf16.mxu1 %v12538_v57  ;;  %v658_v57 = vld [vmem:[#allocation6 + $0x6b0] sm:$0xff] }
 0x18b   :  { %v14362_v28 = vadd.f32 %v3613_v15, %v3500_v13  ;;  %v3504_v29 = vpop.f32.mrf.mxu0  ;;  %4181 = vmatmul.mubr.bf16.gmra.mxu0 %v14261_v38  ;;  %v526_v38 = vld [vmem:[#allocation6 + $0x290] sm:$0xff] }
 0x18c   :  { %v3617_v32 = vpop.f32.mrf.mxu1  ;;  %4294 = vmatmul.mubr.bf16.gmra.mxu1 %v14264_v43  ;;  %4345 = vmatpush2.bf16.msra.mxu0 %v12409_v6  ;;  %v654_v43 = vld [vmem:[#allocation6 + $0x690] sm:$0xff]  ;;  %v12385_v27 = vcombine.low %v526_v38, %v530_v48 }
 0x18d   :  { %v14366_v37 = vadd.f32 %v3617_v32, %v3504_v29  ;;  %4458 = vmatpush2.bf16.msra.mxu1 %v12537_v14  ;;  %v3506_v7 = vpop.f32.mrf.mxu0  ;;  %4346 = vmatprep.subr.bf16.mxu0 %v12402_v30  ;;  %v12514_v6 = vcombine.high %v654_v43, %v658_v57  ;;  %v518_v13 = vld [vmem:[#allocation6 + $0x250] sm:$0xff]  ;;  %v12513_v20 = vcombine.low %v654_v43, %v658_v57 }
 0x18e   :  { %v3619_v41 = vpop.f32.mrf.mxu1  ;;  %4459 = vmatprep.subr.bf16.mxu1 %v12530_v16  ;;  %4190 = vmatprep.mubr.bf16.mxu0 %v14267_v47  ;;  %v12386_v47 = vcombine.high %v526_v38, %v530_v48  ;;  %v522_v14 = vld [vmem:[#allocation6 + $0x270] sm:$0xff] }
 0x18f   :  { %v14369_v51 = vadd.f32 %v3619_v41, %v3506_v7  ;;  %v3508_v52 = vpop.f32.mrf.mxu0  ;;  %4303 = vmatprep.mubr.bf16.mxu1 %v17790_v12  ;;  %v646_v16 = vld [vmem:[#allocation6 + $0x650] sm:$0xff] }
 0x190   :  { %v3621_v21 = vpop.f32.mrf.mxu1  ;;  %4347 = vmatpush2.bf16.msra.mxu0 %v12401_v33  ;;  %v650_v29 = vld [vmem:[#allocation6 + $0x670] sm:$0xff]  ;;  %v12378_v33 = vcombine.high %v518_v13, %v522_v14 }
 0x191   :  { %v14372_v1 = vadd.f32 %v3621_v21, %v3508_v52  ;;  %4460 = vmatpush2.bf16.msra.mxu1 %v12529_v8  ;;  %v3510_v26 = vpop.f32.mrf.mxu0  ;;  %4348 = vmatprep.subr.bf16.mxu0 %v12394_v39  ;;  %v12506_v8 = vcombine.high %v646_v16, %v650_v29  ;;  %v514_v39 = vld [vmem:[#allocation6 + $0x230] sm:$0xff]  ;;  %v12377_v52 = vcombine.low %v518_v13, %v522_v14 }
 0x192   :  { %v3623_v3 = vpop.f32.mrf.mxu1  ;;  %4461 = vmatprep.subr.bf16.mxu1 %v12522_v46  ;;  %v642_v38 = vld [vmem:[#allocation6 + $0x630] sm:$0xff]  ;;  %v12505_v57 = vcombine.low %v646_v16, %v650_v29 }
 0x193   :  { %v14374_v30 = vadd.f32 %v3623_v3, %v3510_v26  ;;  %v3514_v15 = vpop.f32.mrf.mxu0  ;;  %4191 = vmatmul.mubr.bf16.gmra.mxu0 %v14273_v61  ;;  %v510_v61 = vld [vmem:[#allocation6 + $0x210] sm:$0xff] }
 0x194   :  { %v3627_v18 = vpop.f32.mrf.mxu1  ;;  %4304 = vmatmul.mubr.bf16.gmra.mxu1 %v14275_v0  ;;  %4349 = vmatpush2.bf16.msra.mxu0 %v12393_v60  ;;  %v638_v0 = vld [vmem:[#allocation6 + $0x610] sm:$0xff]  ;;  %v17787_v60 = vlaneseq }
 0x195   :  { %v14378_v32 = vadd.f32 %v3627_v18, %v3514_v15  ;;  %4462 = vmatpush2.bf16.msra.mxu1 %v12521_v2  ;;  %v3516_v31 = vpop.f32.mrf.mxu0  ;;  %4350 = vmatprep.subr.bf16.mxu0 %v12386_v47  ;;  %v12498_v2 = vcombine.high %v638_v0, %v642_v38  ;;  %v758_v47 = vld [vmem:[#allocation6 + $0x9d0] sm:$0xff] }
 0x196   :  { %v3629_v7 = vpop.f32.mrf.mxu1  ;;  %4463 = vmatprep.subr.bf16.mxu1 %v12514_v6  ;;  %4200 = vmatprep.mubr.bf16.mxu0 %v14277_v5  ;;  %v12370_v5 = vcombine.high %v510_v61, %v514_v39  ;;  %v762_v3 = vld [vmem:[#allocation6 + $0x9f0] sm:$0xff] }
 0x197   :  { %v14381_v41 = vadd.f32 %v3629_v7, %v3516_v31  ;;  %v3518_v46 = vpop.f32.mrf.mxu0  ;;  %4313 = vmatprep.mubr.bf16.mxu1 %v17790_v12  ;;  %v886_v18 = vld [vmem:[#allocation6 + $0xdd0] sm:$0xff]  ;;  %v12497_v31 = vcombine.low %v638_v0, %v642_v38 }
 0x198   :  { %v3631_v48 = vpop.f32.mrf.mxu1  ;;  %4351 = vmatpush2.bf16.msra.mxu0 %v12385_v27  ;;  %v890_v13 = vld [vmem:[#allocation6 + $0xdf0] sm:$0xff]  ;;  %v12369_v27 = vcombine.low %v510_v61, %v514_v39 }
 0x199   :  { %v14384_v21 = vadd.f32 %v3631_v48, %v3518_v46  ;;  %4464 = vmatpush2.bf16.msra.mxu1 %v12513_v20  ;;  %v3520_v43 = vpop.f32.mrf.mxu0  ;;  %4352 = vmatprep.subr.bf16.mxu0 %v12378_v33  ;;  %v14393_v20 = vshrl.u32 %v17787_v60, 7  ;;  %v12618_v33 = vcombine.high %v758_v47, %v762_v3  ;;  %v754_v46 = vld [vmem:[#allocation6 + $0x9b0] sm:$0xff]  ;;  %v12617_v48 = vcombine.low %v758_v47, %v762_v3  ;;  %v13895_v60 = vld [vmem:[#allocation3 + $0x128] ss:$28 sps:$4 sm:$0xff]  }
 0x19a   :  { %v3633_v26 = vpop.f32.mrf.mxu1  ;;  %4465 = vmatprep.subr.bf16.mxu1 %v12506_v8  ;;  %v750_v8 = vld [vmem:[#allocation6 + $0x990] sm:$0xff] }
 0x19b   :  { %v14386_v6 = vadd.f32 %v3633_v26, %v3520_v43  ;;  %v3524_v15 = vpop.f32.mrf.mxu0  ;;  %4201 = vmatmul.mubr.bf16.gmra.mxu0 %v14283_v17  ;;  %17915 = vst [vmem:[#allocation24_spill] sm:$0xff] %v14393_v20  ;;  %v12746_v17 = vcombine.high %v886_v18, %v890_v13  ;;  %v878_v0 = vld [vmem:[#allocation6 + $0xd90] sm:$0xff]  ;;  %v17788_v47 = vsub.s32 1, %v14393_v20 }
 0x19c   :  { %v3637_v14 = vpop.f32.mrf.mxu1  ;;  %4314 = vmatmul.mubr.bf16.gmra.mxu1 %v14285_v23  ;;  %4353 = vmatpush2.bf16.msra.mxu0 %v12377_v52  ;;  %v882_v38 = vld [vmem:[#allocation6 + $0xdb0] sm:$0xff] }
 0x19d   :  { %v14390_v16 = vadd.f32 %v3637_v14, %v3524_v15  ;;  %4466 = vmatpush2.bf16.msra.mxu1 %v12505_v57  ;;  %v3526_v29 = vpop.f32.mrf.mxu0  ;;  %4354 = vmatprep.subr.bf16.mxu0 %v12370_v5  ;;  %v17789_v57 = vsub.s32 0, %v14393_v20  ;;  %v12610_v5 = vcombine.high %v750_v8, %v754_v46  ;;  %v742_v15 = vld [vmem:[#allocation6 + $0x950] sm:$0xff]  ;;  %v12738_v3 = vcombine.high %v878_v0, %v882_v38 }
 0x19e   :  { %v3639_v7 = vpop.f32.mrf.mxu1  ;;  %4467 = vmatprep.subr.bf16.mxu1 %v12498_v2  ;;  %4356 = vmatprep.mubr.bf16.mxu0 %v14289_v35  ;;  %v12745_v35 = vcombine.low %v886_v18, %v890_v13  ;;  %v5615_v2 = vld [vmem:[#allocation8] sm:$0xff]  ;;  %v746_v14 = vld [vmem:[#allocation6 + $0x970] sm:$0xff] }
 0x19f   :  { %v14396_v23 = vadd.f32 %v3639_v7, %v3526_v29  ;;  %v3528_v61 = vpop.f32.mrf.mxu0  ;;  %4469 = vmatprep.mubr.bf16.mxu1 %v14292_v40  ;;  %v14406_v29 = vld [vmem:[#allocation6 + $0xd50] sm:$0xff]  ;;  %v14414_v7 = vrot.slane %v5615_v2, %v17789_v57 }
 0x1a0   :  { %v3641_v39 = vpop.f32.mrf.mxu1  ;;  %4355 = vmatpush2.bf16.msra.mxu0 %v12369_v27 }
 0x1a1   :  { %v14399_v52 = vadd.f32 %v3641_v39, %v3528_v61  ;;  %4468 = vmatpush2.bf16.msra.mxu1 %v12497_v31  ;;  %v3530_v43 = vpop.f32.mrf.mxu0  ;;  %4550 = vmatprep.subr.bf16.mxu0 %v12618_v33  ;;  %v14408_v31 = vld [vmem:[#allocation6 + $0xd70] sm:$0xff]  ;;  %v12609_v33 = vcombine.low %v750_v8, %v754_v46  ;;  %v12737_v61 = vcombine.low %v878_v0, %v882_v38 }
 0x1a2   :  { %v3643_v26 = vpop.f32.mrf.mxu1  ;;  %4663 = vmatprep.subr.bf16.mxu1 %v12746_v17  ;;  %v12730_v8 = vcombine.high %v14406_v29, %v14408_v31  ;;  %v14427_v46 = vrot.slane %v5615_v2, %v17788_v47  ;;  %v663_v47 = vld [vmem:[#allocation6 + $0x6d8] sm:$0xff] }
 0x1a3   :  { %v14402_v40 = vadd.f32 %v3643_v26, %v3530_v43  ;;  %v3680_v27 = vpop.f32.mrf.mxu0  ;;  %4357 = vmatmul.mubr.bf16.vlgmr.msra.gmra.mxu0 %v14295_v50  ;;  %v12602_v50 = vcombine.high %v742_v15, %v746_v14 }
 0x1a4   :  { %v3681_v18 = vadd.f32 %v3680_v27, %v14316_v44  ;;  %v3793_v13 = vpop.f32.mrf.mxu1  ;;  %4470 = vmatmul.mubr.bf16.vlgmr.msra.gmra.mxu1 %v14298_v54  ;;  %4551 = vmatpush1.bf16.msra.mxu0 %v12617_v48  ;;  %v14419_v54 = vld [vmem:[#allocation6 + $0x910] sm:$0xff] }
 0x1a5   :  { %v3682_v17 = vpop.f32.mrf.mxu0  ;;  %4664 = vmatpush1.bf16.msra.mxu1 %v12745_v35  ;;  %4552 = vmatprep.subr.bf16.mxu0 %v12610_v5  ;;  %v14421_v44 = vld [vmem:[#allocation6 + $0x930] sm:$0xff] }
 0x1a6   :  { %v3794_v39 = vadd.f32 %v3793_v13, %v3681_v18  ;;  %v3683_v43 = vadd.f32 %v3682_v17, %v14318_v53  ;;  %v3795_v26 = vpop.f32.mrf.mxu1  ;;  %4366 = vmatprep.mubr.bf16.mxu0 %v14301_v58  ;;  %4479 = vmatprep.mubr.bf16.mxu1 %v14304_v59  ;;  %v12601_v58 = vcombine.low %v742_v15, %v746_v14  ;;  %v14430_v59 = vld [vmem:[#allocation6 + $0xd10] sm:$0xff] }
 0x1a7   :  { %v3684_v48 = vpop.f32.mrf.mxu0  ;;  %4665 = vmatprep.subr.bf16.mxu1 %v12738_v3  ;;  %v14432_v35 = vld [vmem:[#allocation6 + $0xd30] sm:$0xff]  ;;  %v12594_v2 = vcombine.high %v14419_v54, %v14421_v44  ;;  %v12729_v15 = vcombine.low %v14406_v29, %v14408_v31 }
 0x1a8   :  { %v3796_v0 = vadd.f32 %v3795_v26, %v3683_v43  ;;  %v3685_v53 = vadd.f32 %v3684_v48, %v14321_v63  ;;  %v3797_v38 = vpop.f32.mrf.mxu1  ;;  %4553 = vmatpush1.bf16.msra.mxu0 %v12609_v33  ;;  %v5657_v5 = vadd.f32 %v14414_v7, %v3794_v39  ;;  %v14438_v63 = vld [vmem:[#allocation6 + $0x8d0] sm:$0xff] }
 0x1a9   :  { %v3686_v27 = vpop.f32.mrf.mxu0  ;;  %4554 = vmatprep.subr.bf16.mxu0 %v12602_v50  ;;  %4666 = vmatpush1.bf16.msra.mxu1 %v12737_v61  ;;  %v14440_v33 = vld [vmem:[#allocation6 + $0x8f0] sm:$0xff]  ;;  %v12593_v61 = vcombine.low %v14419_v54, %v14421_v44 }
 0x1aa   :  { %v3798_v18 = vadd.f32 %v3797_v38, %v3685_v53  ;;  %v3687_v3 = vadd.f32 %v3686_v27, %v14323_v11  ;;  %v3799_v13 = vpop.f32.mrf.mxu1  ;;  %4667 = vmatprep.subr.bf16.mxu1 %v12730_v8  ;;  %v5658_v14 = vadd.f32 %v14427_v46, %v3796_v0  ;;  %v13853_v50 = vld [vmem:[#allocation3 + $0x38] ss:$28 sps:$4 sm:$0xff]   ;;  %v12722_v11 = vcombine.high %v14430_v59, %v14432_v35  ;;  %v13854_v53 = vld [vmem:[#allocation3 + $0x40] ss:$28 sps:$4 sm:$0xff]  }
 0x1ab   :  { %v3690_v17 = vpop.f32.mrf.mxu0  ;;  %4367 = vmatmul.mubr.bf16.gmra.mxu0 %v13853_v50  ;;  %v14451_v29 = vld [vmem:[#allocation6 + $0xcd0] sm:$0xff]  ;;  %v5785_v8 = vmax.f32 %v5657_v5, 0.0  ;;  %v12586_v44 = vcombine.high %v14438_v63, %v14440_v33  ;;  %v12721_v38 = vcombine.low %v14430_v59, %v14432_v35  ;;  %v12585_v50 = vcombine.low %v14438_v63, %v14440_v33 }
 0x1ac   :  { %v5665_v39 = vadd.f32 %v14414_v7, %v3798_v18  ;;  %v3800_v43 = vadd.f32 %v3799_v13, %v3687_v3  ;;  %v3691_v26 = vadd.f32 %v3690_v17, %v14325_v25  ;;  %v3803_v48 = vpop.f32.mrf.mxu1  ;;  %4480 = vmatmul.mubr.bf16.gmra.mxu1 %v13854_v53  ;;  %4555 = vmatpush1.bf16.msra.mxu0 %v12601_v58  ;;  %v14453_v31 = vld [vmem:[#allocation6 + $0xcf0] sm:$0xff]  ;;  %v13856_v13 = vld [vmem:[#allocation3 + $0x7c] ss:$28 sps:$4 sm:$0xff]   ;;  %v5786_v35 = vmax.f32 %v5658_v14, 0.0 }
 0x1ad   :  { %v3692_v0 = vpop.f32.mrf.mxu0  ;;  %4556 = vmatprep.subr.bf16.mxu0 %v12594_v2  ;;  %v13855_v54 = vld [vmem:[#allocation3 + $0x74] ss:$28 sps:$4 sm:$0xff]   ;;  %4489 = vmatprep.mubr.bf16.mxu1 %v13856_v13  ;;  %v12714_v59 = vcombine.high %v14451_v29, %v14453_v31 }
 0x1ae   :  { %4376 = vmatprep.mubr.bf16.mxu0 %v13855_v54  ;;  %v5793_v25 = vmax.f32 %v5665_v39, 0.0  ;;  %v5666_v27 = vadd.f32 %v14427_v46, %v3800_v43  ;;  %v3804_v18 = vadd.f32 %v3803_v48, %v3691_v26  ;;  %v3693_v58 = vadd.f32 %v3692_v0, %v14327_v34  ;;  %v3805_v3 = vpop.f32.mrf.mxu1  ;;  %4668 = vmatpush1.bf16.msra.mxu1 %v12729_v15  ;;  %v14461_v5 = vld [vmem:[#allocation6 + $0x890] sm:$0xff] }
 0x1af   :  { %v14463_v2 = vld [vmem:[#allocation6 + $0x8b0] sm:$0xff]  ;;  %v3694_v17 = vpop.f32.mrf.mxu0  ;;  %4669 = vmatprep.subr.bf16.mxu1 %v12722_v11 }
 0x1b0   :  { %v14469_v39 = vpack.c.bf16 %v5793_v25, %v5785_v8  ;;  %v5794_v34 = vmax.f32 %v5666_v27, 0.0  ;;  %v3806_v43 = vadd.f32 %v3805_v3, %v3693_v58  ;;  %v3807_v26 = vpop.f32.mrf.mxu1  ;;  %4557 = vmatpush1.bf16.msra.mxu0 %v12593_v61  ;;  %v14471_v15 = vld [vmem:[#allocation6 + $0xc90] sm:$0xff]  ;;  %v3695_v53 = vadd.f32 %v3694_v17, %v14330_v45 }
 0x1b1   :  { %v14473_v48 = vld [vmem:[#allocation6 + $0xcb0] sm:$0xff]  ;;  %v3696_v0 = vpop.f32.mrf.mxu0  ;;  %4558 = vmatprep.subr.bf16.mxu0 %v12586_v44  ;;  %v12578_v63 = vcombine.high %v14461_v5, %v14463_v2  ;;  %v12577_v8 = vcombine.low %v14461_v5, %v14463_v2  ;;  %v12713_v45 = vcombine.low %v14451_v29, %v14453_v31  ;;  %v5673_v44 = vadd.f32 %v14414_v7, %v3804_v18 }
 0x1b2   :  { %17916 = vst [vmem:[#allocation25_spill] sm:$0xff] %v14469_v39  ;;  %v14478_v33 = vpack.c.bf16 %v5794_v34, %v5786_v35  ;;  %v3697_v14 = vadd.f32 %v3696_v0, %v14332_v55  ;;  %v3809_v11 = vpop.f32.mrf.mxu1  ;;  %v14483_v61 = vld [vmem:[#allocation6 + $0x850] sm:$0xff]  ;;  %4670 = vmatpush1.bf16.msra.mxu1 %v12721_v38  ;;  %v3808_v25 = vadd.f32 %v3807_v26, %v3695_v53 }
 0x1b3   :  { %v14485_v54 = vld [vmem:[#allocation6 + $0x870] sm:$0xff]  ;;  %v3700_v27 = vpop.f32.mrf.mxu0  ;;  %4671 = vmatprep.subr.bf16.mxu1 %v12714_v59  ;;  %v12706_v55 = vcombine.high %v14471_v15, %v14473_v48  ;;  %v5674_v3 = vadd.f32 %v14427_v46, %v3806_v43  ;;  %v13859_v59 = vld [vmem:[#allocation3 + $0xac] ss:$28 sps:$4 sm:$0xff]  }
 0x1b4   :  { %17917 = vst [vmem:[#allocation26_spill] sm:$0xff] %v14478_v33  ;;  %v13857_v58 = vld [vmem:[#allocation3 + $0x70] ss:$28 sps:$4 sm:$0xff]   ;;  %v3810_v13 = vadd.f32 %v3809_v11, %v3697_v14  ;;  %v3701_v5 = vadd.f32 %v3700_v27, %v14334_v4  ;;  %v3813_v2 = vpop.f32.mrf.mxu1  ;;  %v13858_v38 = vld [vmem:[#allocation3 + $0x78] ss:$28 sps:$4 sm:$0xff]   ;;  %4559 = vmatpush1.bf16.msra.mxu0 %v12585_v50  ;;  %v5681_v18 = vadd.f32 %v14414_v7, %v3808_v25 }
 0x1b5   :  { %4377 = vmatmul.mubr.bf16.gmra.mxu0 %v13857_v58  ;;  %4490 = vmatmul.mubr.bf16.gmra.mxu1 %v13858_v38  ;;  %v14494_v29 = vld [vmem:[#allocation6 + $0xc50] sm:$0xff]  ;;  %v3702_v17 = vpop.f32.mrf.mxu0  ;;  %v12570_v35 = vcombine.high %v14483_v61, %v14485_v54  ;;  %v12705_v4 = vcombine.low %v14471_v15, %v14473_v48  ;;  %v12569_v27 = vcombine.low %v14483_v61, %v14485_v54  ;;  %v5802_v48 = vmax.f32 %v5674_v3, 0.0 }
 0x1b6   :  { %v14496_v31 = vld [vmem:[#allocation6 + $0xc70] sm:$0xff]  ;;  %4560 = vmatprep.subr.bf16.mxu0 %v12578_v63  ;;  %4386 = vmatprep.mubr.bf16.mxu0 %v13859_v59  ;;  %v5682_v34 = vadd.f32 %v14427_v46, %v3810_v13  ;;  %v3814_v43 = vadd.f32 %v3813_v2, %v3701_v5  ;;  %v3703_v50 = vadd.f32 %v3702_v17, %v14336_v22  ;;  %v3815_v26 = vpop.f32.mrf.mxu1  ;;  %v5801_v63 = vmax.f32 %v5673_v44, 0.0 }
 0x1b7   :  { %v13860_v53 = vld [vmem:[#allocation3 + $0xb4] ss:$28 sps:$4 sm:$0xff]   ;;  %4672 = vmatpush1.bf16.msra.mxu1 %v12713_v45  ;;  %v5809_v11 = vmax.f32 %v5681_v18, 0.0  ;;  %v3704_v25 = vpop.f32.mrf.mxu0  ;;  %v12698_v15 = vcombine.high %v14494_v29, %v14496_v31  ;;  %v12697_v17 = vcombine.low %v14494_v29, %v14496_v31  ;;  %v14540_v29 = vld [vmem:[#allocation6 + $0x5d8] sm:$0xff] }
 0x1b8   :  { %4499 = vmatprep.mubr.bf16.mxu1 %v13860_v53  ;;  %v14505_v0 = vld [vmem:[#allocation6 + $0x810] sm:$0xff]  ;;  %4673 = vmatprep.subr.bf16.mxu1 %v12706_v55  ;;  %v5810_v22 = vmax.f32 %v5682_v34, 0.0  ;;  %v3816_v58 = vadd.f32 %v3815_v26, %v3703_v50  ;;  %v3705_v13 = vadd.f32 %v3704_v25, %v14339_v19  ;;  %v3817_v5 = vpop.f32.mrf.mxu1  ;;  %v5689_v19 = vadd.f32 %v14414_v7, %v3814_v43  ;;  %v13861_v34 = vld [vmem:[#allocation3 + $0xa8] ss:$28 sps:$4 sm:$0xff]   ;;  %v14542_v31 = vld [vmem:[#allocation6 + $0x5f8] sm:$0xff] }
 0x1b9   :  { %v14507_v14 = vld [vmem:[#allocation6 + $0x830] sm:$0xff]  ;;  %4561 = vmatpush1.bf16.msra.mxu0 %v12577_v8  ;;  %v14518_v44 = vpack.c.bf16 %v5809_v11, %v5801_v63  ;;  %v3706_v38 = vpop.f32.mrf.mxu0  ;;  %v13863_v25 = vld [vmem:[#allocation3 + $0xe4] ss:$28 sps:$4 sm:$0xff]  }
 0x1ba   :  { %v14514_v2 = vld [vmem:[#allocation6 + $0xc10] sm:$0xff]  ;;  %4562 = vmatprep.subr.bf16.mxu0 %v12570_v35  ;;  %v12562_v61 = vcombine.high %v14505_v0, %v14507_v14  ;;  %v14526_v3 = vpack.c.bf16 %v5810_v22, %v5802_v48  ;;  %v3818_v8 = vadd.f32 %v3817_v5, %v3705_v13  ;;  %v3819_v18 = vpop.f32.mrf.mxu1  ;;  %v3707_v59 = vadd.f32 %v3706_v38, %v14341_v42  ;;  %v13864_v5 = vld [vmem:[#allocation3 + $0xec] ss:$28 sps:$4 sm:$0xff]  }
 0x1bb   :  { %v14516_v45 = vld [vmem:[#allocation6 + $0xc30] sm:$0xff]  ;;  %4674 = vmatpush1.bf16.msra.mxu1 %v12705_v4  ;;  %v3710_v35 = vpop.f32.mrf.mxu0  ;;  %v12561_v50 = vcombine.low %v14505_v0, %v14507_v14  ;;  %v5690_v0 = vadd.f32 %v14427_v46, %v3816_v58 }
 0x1bc   :  { %v14522_v54 = vld [vmem:[#allocation6 + $0xbd0] sm:$0xff]  ;;  %17918 = vst [vmem:[#allocation27_spill] sm:$0xff] %v14526_v3  ;;  %4675 = vmatprep.subr.bf16.mxu1 %v12698_v15  ;;  %v12690_v26 = vcombine.high %v14514_v2, %v14516_v45  ;;  %v5697_v43 = vadd.f32 %v14414_v7, %v3818_v8  ;;  %v3711_v53 = vadd.f32 %v3710_v35, %v14343_v56  ;;  %v3823_v4 = vpop.f32.mrf.mxu1  ;;  %v5817_v15 = vmax.f32 %v5689_v19, 0.0 }
 0x1bd   :  { %v14524_v55 = vld [vmem:[#allocation6 + $0xbf0] sm:$0xff]  ;;  %4387 = vmatmul.mubr.bf16.gmra.mxu0 %v13861_v34  ;;  %v3820_v14 = vadd.f32 %v3819_v18, %v3707_v59  ;;  %v3712_v11 = vpop.f32.mrf.mxu0  ;;  %v12689_v56 = vcombine.low %v14514_v2, %v14516_v45  ;;  %v5818_v35 = vmax.f32 %v5690_v0, 0.0 }
 0x1be   :  { %v13862_v63 = vld [vmem:[#allocation3 + $0xb0] ss:$28 sps:$4 sm:$0xff]   ;;  %4563 = vmatpush1.bf16.msra.mxu0 %v12569_v27  ;;  %v12682_v42 = vcombine.high %v14522_v54, %v14524_v55  ;;  %4396 = vmatprep.mubr.bf16.mxu0 %v13863_v25  ;;  %v5825_v48 = vmax.f32 %v5697_v43, 0.0  ;;  %v3824_v27 = vadd.f32 %v3823_v4, %v3711_v53  ;;  %v3713_v22 = vadd.f32 %v3712_v11, %v14345_v10  ;;  %v3825_v13 = vpop.f32.mrf.mxu1 }
 0x1bf   :  { %4500 = vmatmul.mubr.bf16.gmra.mxu1 %v13862_v63  ;;  %4564 = vmatprep.subr.bf16.mxu0 %v12562_v61  ;;  %v814_v38 = vld [vmem:[#allocation6 + $0xb90] sm:$0xff]  ;;  %v5698_v58 = vadd.f32 %v14427_v46, %v3820_v14  ;;  %v3714_v18 = vpop.f32.mrf.mxu0  ;;  %v12492_v61 = vcombine.high %v14540_v29, %v14542_v31  ;;  %v12681_v10 = vcombine.low %v14522_v54, %v14524_v55  ;;  %v13865_v54 = vld [vmem:[#allocation3 + $0xe0] ss:$28 sps:$4 sm:$0xff]  }
 0x1c0   :  { %4509 = vmatprep.mubr.bf16.mxu1 %v13864_v5  ;;  %v818_v8 = vld [vmem:[#allocation6 + $0xbb0] sm:$0xff]  ;;  %4676 = vmatpush1.bf16.msra.mxu1 %v12697_v17  ;;  %v14551_v59 = vpack.c.bf16 %v5825_v48, %v5817_v15  ;;  %v3826_v2 = vadd.f32 %v3825_v13, %v3713_v22  ;;  %v3715_v45 = vadd.f32 %v3714_v18, %v14348_v24  ;;  %v3827_v19 = vpop.f32.mrf.mxu1  ;;  %v13867_v22 = vld [vmem:[#allocation3 + $0x11c] ss:$28 sps:$4 sm:$0xff]  }
 0x1c1   :  { %4677 = vmatprep.subr.bf16.mxu1 %v12690_v26  ;;  %v5826_v34 = vmax.f32 %v5698_v58, 0.0  ;;  %v5705_v17 = vadd.f32 %v14414_v7, %v3824_v27  ;;  %v3716_v43 = vpop.f32.mrf.mxu0  ;;  %v12674_v26 = vcombine.high %v814_v38, %v818_v8  ;;  %v806_v14 = vld [vmem:[#allocation6 + $0xb50] sm:$0xff]  ;;  %v12673_v55 = vcombine.low %v814_v38, %v818_v8 }
 0x1c2   :  { %17919 = vst [vmem:[#allocation28_spill] sm:$0xff] %v14551_v59  ;;  %4565 = vmatpush1.bf16.msra.mxu0 %v12561_v50  ;;  %v3828_v53 = vadd.f32 %v3827_v19, %v3715_v45  ;;  %v3717_v4 = vadd.f32 %v3716_v43, %v14350_v36  ;;  %v3829_v63 = vpop.f32.mrf.mxu1  ;;  %v810_v11 = vld [vmem:[#allocation6 + $0xb70] sm:$0xff]  ;;  %v5706_v50 = vadd.f32 %v14427_v46, %v3826_v2  ;;  %v13866_v36 = vld [vmem:[#allocation3 + $0xe8] ss:$28 sps:$4 sm:$0xff]   ;;  %v13908_v59 = vld [vmem:[#allocation3 + $0x3c] ss:$28 sps:$4 sm:$0xff]  }
 0x1c3   :  { %4566 = vmatprep.subr.bf16.mxu0 %v12682_v42  ;;  %v14558_v24 = vpack.c.bf16 %v5826_v34, %v5818_v35  ;;  %v3720_v25 = vpop.f32.mrf.mxu0  ;;  %v5833_v27 = vmax.f32 %v5705_v17, 0.0  ;;  %v12666_v13 = vcombine.high %v806_v14, %v810_v11  ;;  %v802_v2 = vld [vmem:[#allocation6 + $0xb30] sm:$0xff]  ;;  %v12665_v19 = vcombine.low %v806_v14, %v810_v11 }
 0x1c4   :  { %4678 = vmatpush1.bf16.msra.mxu1 %v12689_v56  ;;  %v5713_v0 = vadd.f32 %v14414_v7, %v3828_v53  ;;  %v3830_v42 = vadd.f32 %v3829_v63, %v3717_v4  ;;  %v3721_v15 = vadd.f32 %v3720_v25, %v14354_v49  ;;  %v3833_v48 = vpop.f32.mrf.mxu1  ;;  %v798_v49 = vld [vmem:[#allocation6 + $0xb10] sm:$0xff] }
 0x1c5   :  { %4397 = vmatmul.mubr.bf16.gmra.mxu0 %v13865_v54  ;;  %4889 = vmatprep.subr.bf16.mxu1 %v12492_v61  ;;  %v3722_v56 = vpop.f32.mrf.mxu0  ;;  %v13868_v61 = vld [vmem:[#allocation3 + $0x124] ss:$28 sps:$4 sm:$0xff]   ;;  %v12658_v4 = vcombine.high %v798_v49, %v802_v2  ;;  %v790_v54 = vld [vmem:[#allocation6 + $0xad0] sm:$0xff] }
 0x1c6   :  { %4567 = vmatpush2.bf16.msra.mxu0 %v12681_v10  ;;  %4406 = vmatprep.mubr.bf16.mxu0 %v13867_v22  ;;  %v5841_v5 = vmax.f32 %v5713_v0, 0.0  ;;  %v5714_v58 = vadd.f32 %v14427_v46, %v3830_v42  ;;  %v3834_v38 = vadd.f32 %v3833_v48, %v3721_v15  ;;  %v3723_v8 = vadd.f32 %v3722_v56, %v14357_v62  ;;  %v3835_v18 = vpop.f32.mrf.mxu1  ;;  %v794_v0 = vld [vmem:[#allocation6 + $0xaf0] sm:$0xff] }
 0x1c7   :  { %4510 = vmatmul.mubr.bf16.gmra.mxu1 %v13866_v36  ;;  %4568 = vmatprep.subr.bf16.mxu0 %v12674_v26  ;;  %v3724_v45 = vpop.f32.mrf.mxu0  ;;  %v5834_v10 = vmax.f32 %v5706_v50, 0.0  ;;  %v13869_v42 = vld [vmem:[#allocation3 + $0x118] ss:$28 sps:$4 sm:$0xff]   ;;  %v12657_v15 = vcombine.low %v798_v49, %v802_v2 }
 0x1c8   :  { %4519 = vmatprep.mubr.bf16.mxu1 %v13868_v61  ;;  %v14565_v35 = vpack.c.bf16 %v5841_v5, %v5833_v27  ;;  %v5842_v34 = vmax.f32 %v5714_v58, 0.0  ;;  %v3836_v17 = vadd.f32 %v3835_v18, %v3723_v8  ;;  %v3837_v43 = vpop.f32.mrf.mxu1  ;;  %v3725_v26 = vadd.f32 %v3724_v45, %v14360_v9  ;;  %v13870_v27 = vld [vmem:[#allocation3 + $0x120] ss:$28 sps:$4 sm:$0xff]   ;;  %v13871_v22 = vld [vmem:[#allocation3 + $0x154] ss:$28 sps:$4 sm:$0xff]  }
 0x1c9   :  { %v3726_v53 = vpop.f32.mrf.mxu0  ;;  %v5721_v14 = vadd.f32 %v14414_v7, %v3834_v38  ;;  %v13872_v18 = vld [vmem:[#allocation3 + $0x15c] ss:$28 sps:$4 sm:$0xff]   ;;  %v786_v61 = vld [vmem:[#allocation6 + $0xab0] sm:$0xff] }
 0x1ca   :  { %17920 = vst [vmem:[#allocation29_spill] sm:$0xff] %v14565_v35  ;;  %4569 = vmatpush2.bf16.msra.mxu0 %v12673_v55  ;;  %v14568_v62 = vpack.c.bf16 %v5842_v34, %v5834_v10  ;;  %v3727_v63 = vadd.f32 %v3726_v53, %v14362_v28  ;;  %v3839_v25 = vpop.f32.mrf.mxu1  ;;  %v3838_v11 = vadd.f32 %v3837_v43, %v3725_v26 }
 0x1cb   :  { %4570 = vmatprep.subr.bf16.mxu0 %v12666_v13  ;;  %v3730_v50 = vpop.f32.mrf.mxu0  ;;  %v5722_v55 = vadd.f32 %v14427_v46, %v3836_v17  ;;  %v12650_v13 = vcombine.high %v790_v54, %v794_v0  ;;  %v5849_v49 = vmax.f32 %v5721_v14, 0.0 }
 0x1cc   :  { %17921 = vst [vmem:[#allocation30_spill] sm:$0xff] %v14568_v62  ;;  %v3840_v9 = vadd.f32 %v3839_v25, %v3727_v63  ;;  %v3731_v48 = vadd.f32 %v3730_v50, %v14366_v37  ;;  %v3843_v36 = vpop.f32.mrf.mxu1  ;;  %v5729_v28 = vadd.f32 %v14414_v7, %v3838_v11  ;;  %v782_v37 = vld [vmem:[#allocation6 + $0xa90] sm:$0xff] }
 0x1cd   :  { %4407 = vmatmul.mubr.bf16.gmra.mxu0 %v13869_v42  ;;  %v3732_v56 = vpop.f32.mrf.mxu0  ;;  %v5850_v10 = vmax.f32 %v5722_v55, 0.0  ;;  %v774_v50 = vld [vmem:[#allocation6 + $0xa50] sm:$0xff] }
 0x1ce   :  { %4571 = vmatpush2.bf16.msra.mxu0 %v12665_v19  ;;  %4416 = vmatprep.mubr.bf16.mxu0 %v13871_v22  ;;  %v5730_v5 = vadd.f32 %v14427_v46, %v3840_v9  ;;  %v3844_v58 = vadd.f32 %v3843_v36, %v3731_v48  ;;  %v3733_v38 = vadd.f32 %v3732_v56, %v14369_v51  ;;  %v3845_v8 = vpop.f32.mrf.mxu1  ;;  %v5857_v2 = vmax.f32 %v5729_v28, 0.0  ;;  %v13873_v55 = vld [vmem:[#allocation3 + $0x150] ss:$28 sps:$4 sm:$0xff]   ;;  %v13874_v48 = vld [vmem:[#allocation3 + $0x158] ss:$28 sps:$4 sm:$0xff]  }
 0x1cf   :  { %4520 = vmatmul.mubr.bf16.gmra.mxu1 %v13870_v27  ;;  %4572 = vmatprep.subr.bf16.mxu0 %v12658_v4  ;;  %v3734_v45 = vpop.f32.mrf.mxu0  ;;  %v12649_v19 = vcombine.low %v790_v54, %v794_v0  ;;  %v12642_v51 = vcombine.high %v782_v37, %v786_v61  ;;  %v778_v54 = vld [vmem:[#allocation6 + $0xa70] sm:$0xff]  ;;  %v12641_v36 = vcombine.low %v782_v37, %v786_v61  ;;  %v13875_v22 = vld [vmem:[#allocation3 + $0x18c] ss:$28 sps:$4 sm:$0xff]  }
 0x1d0   :  { %4529 = vmatprep.mubr.bf16.mxu1 %v13872_v18  ;;  %v5858_v34 = vmax.f32 %v5730_v5, 0.0  ;;  %v3846_v17 = vadd.f32 %v3845_v8, %v3733_v38  ;;  %v3735_v43 = vadd.f32 %v3734_v45, %v14372_v1  ;;  %v3847_v26 = vpop.f32.mrf.mxu1  ;;  %v14578_v53 = vpack.c.bf16 %v5857_v2, %v5849_v49  ;;  %v766_v18 = vld [vmem:[#allocation6 + $0xa10] sm:$0xff] }
 0x1d1   :  { %v3736_v4 = vpop.f32.mrf.mxu0  ;;  %v5737_v25 = vadd.f32 %v14414_v7, %v3844_v58  ;;  %v770_v49 = vld [vmem:[#allocation6 + $0xa30] sm:$0xff] }
 0x1d2   :  { %4573 = vmatpush2.bf16.msra.mxu0 %v12657_v15  ;;  %17922 = vst [vmem:[#allocation31_spill] sm:$0xff] %v14578_v53  ;;  %v14580_v63 = vpack.c.bf16 %v5858_v34, %v5850_v10  ;;  %v3848_v14 = vadd.f32 %v3847_v26, %v3735_v43  ;;  %v3849_v11 = vpop.f32.mrf.mxu1  ;;  %v3737_v0 = vadd.f32 %v3736_v4, %v14374_v30  ;;  %v887_v53 = vld [vmem:[#allocation6 + $0xdd8] sm:$0xff] }
 0x1d3   :  { %4574 = vmatprep.subr.bf16.mxu0 %v12650_v13  ;;  %v3740_v42 = vpop.f32.mrf.mxu0  ;;  %v5738_v27 = vadd.f32 %v14427_v46, %v3846_v17  ;;  %v12634_v30 = vcombine.high %v774_v50, %v778_v54  ;;  %v5865_v13 = vmax.f32 %v5737_v25, 0.0  ;;  %v12633_v34 = vcombine.low %v774_v50, %v778_v54  ;;  %v13877_v50 = vld [vmem:[#allocation3 + $0x188] ss:$28 sps:$4 sm:$0xff]  }
 0x1d4   :  { %17923 = vst [vmem:[#allocation32_spill] sm:$0xff] %v14580_v63  ;;  %v5745_v1 = vadd.f32 %v14414_v7, %v3848_v14  ;;  %v3741_v15 = vadd.f32 %v3740_v42, %v14378_v32  ;;  %v3853_v9 = vpop.f32.mrf.mxu1  ;;  %v3850_v28 = vadd.f32 %v3849_v11, %v3737_v0  ;;  %v13876_v32 = vld [vmem:[#allocation3 + $0x194] ss:$28 sps:$4 sm:$0xff]   ;;  %v12626_v4 = vcombine.high %v766_v18, %v770_v49  ;;  %v14594_v11 = vld [vmem:[#allocation6 + $0x1d8] sm:$0xff] }
 0x1d5   :  { %4417 = vmatmul.mubr.bf16.gmra.mxu0 %v13873_v55  ;;  %v3742_v56 = vpop.f32.mrf.mxu0  ;;  %v5866_v17 = vmax.f32 %v5738_v27, 0.0  ;;  %v507_v0 = vld [vmem:[#allocation6 + $0x1f8] sm:$0xff]  ;;  %v12625_v54 = vcombine.low %v766_v18, %v770_v49 }
 0x1d6   :  { %4575 = vmatpush2.bf16.msra.mxu0 %v12649_v19  ;;  %4426 = vmatprep.mubr.bf16.mxu0 %v13875_v22  ;;  %v5873_v5 = vmax.f32 %v5745_v1, 0.0  ;;  %v3854_v58 = vadd.f32 %v3853_v9, %v3741_v15  ;;  %v3743_v38 = vadd.f32 %v3742_v56, %v14381_v41  ;;  %v3855_v8 = vpop.f32.mrf.mxu1  ;;  %v5746_v37 = vadd.f32 %v14427_v46, %v3850_v28  ;;  %v13879_v28 = vld [vmem:[#allocation3 + $0x14] ss:$28 sps:$4 sm:$0xff]   ;;  %v14606_v18 = vld [vmem:[#allocation6 + $0x598] sm:$0xff] }
 0x1d7   :  { %4530 = vmatmul.mubr.bf16.gmra.mxu1 %v13874_v48  ;;  %4576 = vmatprep.subr.bf16.mxu0 %v12642_v51  ;;  %v3744_v61 = vpop.f32.mrf.mxu0  ;;  %v12364_v56 = vcombine.high %v14594_v11, %v507_v0  ;;  %v627_v49 = vld [vmem:[#allocation6 + $0x5b8] sm:$0xff] }
 0x1d8   :  { %4539 = vmatprep.mubr.bf16.mxu1 %v13876_v32  ;;  %v14589_v2 = vpack.c.bf16 %v5873_v5, %v5865_v13  ;;  %v3856_v45 = vadd.f32 %v3855_v8, %v3743_v38  ;;  %v3745_v19 = vadd.f32 %v3744_v61, %v14384_v21  ;;  %v3857_v10 = vpop.f32.mrf.mxu1  ;;  %v5874_v43 = vmax.f32 %v5746_v37, 0.0  ;;  %v499_v38 = vld [vmem:[#allocation6 + $0x1b8] sm:$0xff] }
 0x1d9   :  { %v5753_v41 = vadd.f32 %v14414_v7, %v3854_v58  ;;  %v3746_v26 = vpop.f32.mrf.mxu0  ;;  %v12363_v32 = vcombine.low %v14594_v11, %v507_v0 }
 0x1da   :  { %17924 = vst [vmem:[#allocation33_spill] sm:$0xff] %v14589_v2  ;;  %4577 = vmatpush2.bf16.msra.mxu0 %v12641_v36  ;;  %v3858_v51 = vadd.f32 %v3857_v10, %v3745_v19  ;;  %v3747_v25 = vadd.f32 %v3746_v26, %v14386_v6  ;;  %v3859_v14 = vpop.f32.mrf.mxu1  ;;  %v14596_v42 = vpack.c.bf16 %v5874_v43, %v5866_v17  ;;  %v13878_v36 = vld [vmem:[#allocation3 + $0x190] ss:$28 sps:$4 sm:$0xff]  }
 0x1db   :  { %4578 = vmatprep.subr.bf16.mxu0 %v12634_v30  ;;  %v5754_v21 = vadd.f32 %v14427_v46, %v3856_v45  ;;  %v3750_v55 = vpop.f32.mrf.mxu0  ;;  %v5881_v6 = vmax.f32 %v5753_v41, 0.0  ;;  %v12491_v17 = vcombine.low %v14540_v29, %v14542_v31  ;;  %v615_v29 = vld [vmem:[#allocation6 + $0x558] sm:$0xff] }
 0x1dc   :  { %17925 = vst [vmem:[#allocation34_spill] sm:$0xff] %v14596_v42  ;;  %v5761_v1 = vadd.f32 %v14414_v7, %v3858_v51  ;;  %v3860_v15 = vadd.f32 %v3859_v14, %v3747_v25  ;;  %v3751_v9 = vadd.f32 %v3750_v55, %v14390_v16  ;;  %v3863_v48 = vpop.f32.mrf.mxu1  ;;  %v495_v16 = vld [vmem:[#allocation6 + $0x198] sm:$0xff]  ;;  %v12484_v51 = vcombine.high %v14606_v18, %v627_v49 }
 0x1dd   :  { %4427 = vmatmul.mubr.bf16.gmra.mxu0 %v13877_v50  ;;  %v3752_v27 = vpop.f32.mrf.mxu0  ;;  %v5882_v37 = vmax.f32 %v5754_v21, 0.0  ;;  %v12356_v43 = vcombine.high %v495_v16, %v499_v38  ;;  %v14617_v25 = vld [vmem:[#allocation6 + $0x158] sm:$0xff]  ;;  %v13880_v21 = vld [vmem:[#allocation3 + $0x10] ss:$28 sps:$4 sm:$0xff]   ;;  %v12355_v55 = vcombine.low %v495_v16, %v499_v38 }
 0x1de   :  { %4579 = vmatpush2.bf16.msra.mxu0 %v12633_v34  ;;  %4582 = vmatprep.mubr.bf16.mxu0 %v13879_v28  ;;  %v5889_v22 = vmax.f32 %v5761_v1, 0.0  ;;  %v5762_v30 = vadd.f32 %v14427_v46, %v3860_v15  ;;  %v3864_v13 = vadd.f32 %v3863_v48, %v3751_v9  ;;  %v3753_v5 = vadd.f32 %v3752_v27, %v14396_v23  ;;  %v3865_v58 = vpop.f32.mrf.mxu1  ;;  %v14619_v14 = vld [vmem:[#allocation6 + $0x178] sm:$0xff] }
 0x1df   :  { %4540 = vmatmul.mubr.bf16.gmra.mxu1 %v13878_v36  ;;  %4580 = vmatprep.subr.bf16.mxu0 %v12626_v4  ;;  %v3754_v8 = vpop.f32.mrf.mxu0  ;;  %v619_v31 = vld [vmem:[#allocation6 + $0x578] sm:$0xff]  ;;  %v12483_v15 = vcombine.low %v14606_v18, %v627_v49 }
 0x1e0   :  { %4695 = vmatprep.mubr.bf16.mxu1 %v17790_v12  ;;  %v14608_v61 = vpack.c.bf16 %v5889_v22, %v5881_v6  ;;  %v5890_v45 = vmax.f32 %v5762_v30, 0.0  ;;  %v3866_v19 = vadd.f32 %v3865_v58, %v3753_v5  ;;  %v3867_v10 = vpop.f32.mrf.mxu1  ;;  %v3755_v23 = vadd.f32 %v3754_v8, %v14399_v52  ;;  %v13881_v1 = vld [vmem:[#allocation3 + $0x18] ss:$28 sps:$4 sm:$0xff]  }
 0x1e1   :  { %v3756_v34 = vpop.f32.mrf.mxu0  ;;  %v5769_v11 = vadd.f32 %v14414_v7, %v3864_v13  ;;  %v12348_v6 = vcombine.high %v14617_v25, %v14619_v14  ;;  %v12476_v22 = vcombine.high %v615_v29, %v619_v31  ;;  %v479_v30 = vld [vmem:[#allocation6 + $0x118] sm:$0xff] }
 0x1e2   :  { %17926 = vst [vmem:[#allocation35_spill] sm:$0xff] %v14608_v61  ;;  %4581 = vmatpush2.bf16.msra.mxu0 %v12625_v54  ;;  %v14613_v41 = vpack.c.bf16 %v5890_v45, %v5882_v37  ;;  %v3757_v26 = vadd.f32 %v3756_v34, %v14402_v40  ;;  %v3869_v4 = vpop.f32.mrf.mxu1  ;;  %v3868_v52 = vadd.f32 %v3867_v10, %v3755_v23  ;;  %v483_v13 = vld [vmem:[#allocation6 + $0x138] sm:$0xff] }
 0x1e3   :  { %4776 = vmatprep.subr.bf16.mxu0 %v12364_v56  ;;  %v3906_v0 = vpop.f32.mrf.mxu0  ;;  %v5770_v50 = vadd.f32 %v14427_v46, %v3866_v19  ;;  %v13882_v56 = vld [vmem:[#allocation3 + $0x4c] ss:$28 sps:$4 sm:$0xff]   ;;  %v5897_v5 = vmax.f32 %v5769_v11, 0.0  ;;  %v607_v38 = vld [vmem:[#allocation6 + $0x518] sm:$0xff]  ;;  %v12475_v37 = vcombine.low %v615_v29, %v619_v31  ;;  %v12340_v23 = vcombine.high %v479_v30, %v483_v13 }
 0x1e4   :  { %17927 = vst [vmem:[#allocation36_spill] sm:$0xff] %v14613_v41  ;;  %v3870_v54 = vadd.f32 %v3869_v4, %v3757_v26  ;;  %v4019_v40 = vpop.f32.mrf.mxu1  ;;  %v5777_v9 = vadd.f32 %v14414_v7, %v3868_v52  ;;  %v611_v8 = vld [vmem:[#allocation6 + $0x538] sm:$0xff] }
 0x1e5   :  { %4583 = vmatmul.mubr.bf16.vlgmr.msra.gmra.mxu0 %v13880_v21  ;;  %v14625_v48 = vadd.f32 %v4019_v40, %v3906_v0  ;;  %v3908_v36 = vpop.f32.mrf.mxu0  ;;  %v471_v26 = vld [vmem:[#allocation6 + $0xd8] sm:$0xff]  ;;  %v13884_v21 = vld [vmem:[#allocation3 + $0x50] ss:$28 sps:$4 sm:$0xff]  }
 0x1e6   :  { %4777 = vmatpush1.bf16.msra.mxu0 %v12363_v32  ;;  %v5778_v27 = vadd.f32 %v14427_v46, %v3870_v54  ;;  %v4021_v28 = vpop.f32.mrf.mxu1  ;;  %4592 = vmatprep.mubr.bf16.mxu0 %v13882_v56  ;;  %v5905_v58 = vmax.f32 %v5777_v9, 0.0  ;;  %v5898_v32 = vmax.f32 %v5770_v50, 0.0  ;;  %v12347_v46 = vcombine.low %v14617_v25, %v14619_v14  ;;  %v475_v4 = vld [vmem:[#allocation6 + $0xf8] sm:$0xff]  ;;  %v13883_v25 = vld [vmem:[#allocation3 + $0x48] ss:$28 sps:$4 sm:$0xff]  }
 0x1e7   :  { %4696 = vmatmul.mubr.bf16.vlgmr.msra.gmra.mxu1 %v13881_v1  ;;  %4778 = vmatprep.subr.bf16.mxu0 %v12356_v43  ;;  %v14630_v7 = vadd.f32 %v4021_v28, %v3908_v36  ;;  %v3910_v16 = vpop.f32.mrf.mxu0  ;;  %v12468_v43 = vcombine.high %v607_v38, %v611_v8  ;;  %v599_v14 = vld [vmem:[#allocation6 + $0x4d8] sm:$0xff]  ;;  %v12467_v50 = vcombine.low %v607_v38, %v611_v8  ;;  %v13885_v1 = vld [vmem:[#allocation3 + $0x84] ss:$28 sps:$4 sm:$0xff]  }
 0x1e8   :  { %4890 = vmatpush1.bf16.msra.mxu1 %v12491_v17  ;;  %4705 = vmatprep.mubr.bf16.mxu1 %v17790_v12  ;;  %v5906_v18 = vmax.f32 %v5778_v27, 0.0  ;;  %v4023_v49 = vpop.f32.mrf.mxu1  ;;  %v14635_v45 = vpack.c.bf16 %v5905_v58, %v5897_v5  ;;  %v603_v52 = vld [vmem:[#allocation6 + $0x4f8] sm:$0xff]  ;;  %v12332_v54 = vcombine.high %v471_v26, %v475_v4 }
 0x1e9   :  { %4891 = vmatprep.subr.bf16.mxu1 %v12484_v51  ;;  %v14637_v19 = vadd.f32 %v4023_v49, %v3910_v16  ;;  %v3912_v10 = vpop.f32.mrf.mxu0  ;;  %v463_v9 = vld [vmem:[#allocation6 + $0x98] sm:$0xff]  ;;  %v12459_v58 = vcombine.low %v599_v14, %v603_v52 }
 0x1ea   :  { %4779 = vmatpush1.bf16.msra.mxu0 %v12355_v55  ;;  %17928 = vst [vmem:[#allocation37_spill] sm:$0xff] %v14635_v45  ;;  %v14639_v34 = vpack.c.bf16 %v5906_v18, %v5898_v32  ;;  %v4025_v17 = vpop.f32.mrf.mxu1  ;;  %v12339_v55 = vcombine.low %v479_v30, %v483_v13  ;;  %v467_v36 = vld [vmem:[#allocation6 + $0xb8] sm:$0xff]  ;;  %v12331_v30 = vcombine.low %v471_v26, %v475_v4 }
 0x1eb   :  { %4780 = vmatprep.subr.bf16.mxu0 %v12348_v6  ;;  %v14641_v51 = vadd.f32 %v4025_v17, %v3912_v10  ;;  %v3916_v11 = vpop.f32.mrf.mxu0  ;;  %v591_v28 = vld [vmem:[#allocation6 + $0x498] sm:$0xff]  ;;  %v12324_v16 = vcombine.high %v463_v9, %v467_v36  ;;  %v12323_v26 = vcombine.low %v463_v9, %v467_v36 }
 0x1ec   :  { %4892 = vmatpush1.bf16.msra.mxu1 %v12483_v15  ;;  %17929 = vst [vmem:[#allocation38_spill] sm:$0xff] %v14639_v34  ;;  %v4029_v0 = vpop.f32.mrf.mxu1  ;;  %v12460_v15 = vcombine.high %v599_v14, %v603_v52  ;;  %v595_v56 = vld [vmem:[#allocation6 + $0x4b8] sm:$0xff] }
 0x1ed   :  { %4893 = vmatprep.subr.bf16.mxu1 %v12476_v22  ;;  %4593 = vmatmul.mubr.bf16.gmra.mxu0 %v13883_v25  ;;  %v14643_v29 = vadd.f32 %v4029_v0, %v3916_v11  ;;  %v3918_v31 = vpop.f32.mrf.mxu0  ;;  %v12452_v8 = vcombine.high %v591_v28, %v595_v56  ;;  %v455_v32 = vld [vmem:[#allocation6 + $0x58] sm:$0xff]  ;;  %v12451_v25 = vcombine.low %v591_v28, %v595_v56 }
 0x1ee   :  { %4781 = vmatpush1.bf16.msra.mxu0 %v12347_v46  ;;  %v4031_v40 = vpop.f32.mrf.mxu1  ;;  %4602 = vmatprep.mubr.bf16.mxu0 %v13885_v1  ;;  %v459_v18 = vld [vmem:[#allocation6 + $0x78] sm:$0xff] }
 0x1ef   :  { %4706 = vmatmul.mubr.bf16.gmra.mxu1 %v13884_v21  ;;  %4782 = vmatprep.subr.bf16.mxu0 %v12340_v23  ;;  %v14645_v6 = vadd.f32 %v4031_v40, %v3918_v31  ;;  %v3920_v27 = vpop.f32.mrf.mxu0  ;;  %v583_v10 = vld [vmem:[#allocation6 + $0x458] sm:$0xff]  ;;  %v12316_v14 = vcombine.high %v455_v32, %v459_v18  ;;  %v12315_v9 = vcombine.low %v455_v32, %v459_v18 }
 0x1f0   :  { %4894 = vmatpush1.bf16.msra.mxu1 %v12475_v37  ;;  %4715 = vmatprep.mubr.bf16.mxu1 %v17790_v12  ;;  %v4033_v22 = vpop.f32.mrf.mxu1  ;;  %v13886_v37 = vld [vmem:[#allocation3 + $0x80] ss:$28 sps:$4 sm:$0xff]   ;;  %v13901_v42 = vld [vmem:[#allocation3 + $0x198] ss:$28 sps:$4 sm:$0xff]  }
 0x1f1   :  { %4895 = vmatprep.subr.bf16.mxu1 %v12468_v43  ;;  %v14648_v13 = vadd.f32 %v4033_v22, %v3920_v27  ;;  %v3922_v5 = vpop.f32.mrf.mxu0  ;;  %v587_v23 = vld [vmem:[#allocation6 + $0x478] sm:$0xff]  ;;  %v13887_v43 = vld [vmem:[#allocation3 + $0x88] ss:$28 sps:$4 sm:$0xff]  }
 0x1f2   :  { %4783 = vmatpush1.bf16.msra.mxu0 %v12339_v55  ;;  %v4035_v38 = vpop.f32.mrf.mxu1  ;;  %v13888_v0 = vld [vmem:[#allocation3 + $0xbc] ss:$28 sps:$4 sm:$0xff]   ;;  %v12444_v21 = vcombine.high %v583_v10, %v587_v23  ;;  %v12443_v28 = vcombine.low %v583_v10, %v587_v23 }
 0x1f3   :  { %4784 = vmatprep.subr.bf16.mxu0 %v12332_v54  ;;  %v14650_v49 = vadd.f32 %v4035_v38, %v3922_v5  ;;  %v3926_v46 = vpop.f32.mrf.mxu0  ;;  %v447_v55 = vld [vmem:[#allocation6 + $0x18] sm:$0xff] }
 0x1f4   :  { %4896 = vmatpush1.bf16.msra.mxu1 %v12467_v50  ;;  %v4039_v17 = vpop.f32.mrf.mxu1  ;;  %v451_v31 = vld [vmem:[#allocation6 + $0x38] sm:$0xff] }
 0x1f5   :  { %4897 = vmatprep.subr.bf16.mxu1 %v12460_v15  ;;  %4603 = vmatmul.mubr.bf16.gmra.mxu0 %v13886_v37  ;;  %v14652_v4 = vadd.f32 %v4039_v17, %v3926_v46  ;;  %v3928_v11 = vpop.f32.mrf.mxu0  ;;  %v575_v40 = vld [vmem:[#allocation6 + $0x418] sm:$0xff]  ;;  %v12308_v56 = vcombine.high %v447_v55, %v451_v31  ;;  %v12307_v17 = vcombine.low %v447_v55, %v451_v31 }
 0x1f6   :  { %4785 = vmatpush1.bf16.msra.mxu0 %v12331_v30  ;;  %v4041_v52 = vpop.f32.mrf.mxu1  ;;  %4612 = vmatprep.mubr.bf16.mxu0 %v13888_v0  ;;  %v579_v1 = vld [vmem:[#allocation6 + $0x438] sm:$0xff] }
 0x1f7   :  { %4716 = vmatmul.mubr.bf16.gmra.mxu1 %v13887_v43  ;;  %4786 = vmatprep.subr.bf16.mxu0 %v12324_v16  ;;  %v14654_v50 = vadd.f32 %v4041_v52, %v3928_v11  ;;  %v3930_v54 = vpop.f32.mrf.mxu0  ;;  %v12436_v30 = vcombine.high %v575_v40, %v579_v1  ;;  %v567_v5 = vld [vmem:[#allocation6 + $0x3d8] sm:$0xff]  ;;  %v12435_v23 = vcombine.low %v575_v40, %v579_v1 }
 0x1f8   :  { %4898 = vmatpush1.bf16.msra.mxu1 %v12459_v58  ;;  %4725 = vmatprep.mubr.bf16.mxu1 %v17790_v12  ;;  %v4043_v15 = vpop.f32.mrf.mxu1  ;;  %v571_v58 = vld [vmem:[#allocation6 + $0x3f8] sm:$0xff] }
 0x1f9   :  { %4899 = vmatprep.subr.bf16.mxu1 %v12452_v8  ;;  %v14657_v36 = vadd.f32 %v4043_v15, %v3930_v54  ;;  %v3932_v27 = vpop.f32.mrf.mxu0  ;;  %v13889_v8 = vld [vmem:[#allocation3 + $0xb8] ss:$28 sps:$4 sm:$0xff]   ;;  %v13890_v18 = vld [vmem:[#allocation3 + $0xc0] ss:$28 sps:$4 sm:$0xff]  }
 0x1fa   :  { %4787 = vmatpush1.bf16.msra.mxu0 %v12323_v26  ;;  %v4045_v22 = vpop.f32.mrf.mxu1  ;;  %v695_v46 = vld [vmem:[#allocation6 + $0x7d8] sm:$0xff]  ;;  %v12428_v26 = vcombine.high %v567_v5, %v571_v58 }
 0x1fb   :  { %4788 = vmatprep.subr.bf16.mxu0 %v12316_v14  ;;  %v14659_v16 = vadd.f32 %v4045_v22, %v3932_v27  ;;  %v3936_v38 = vpop.f32.mrf.mxu0  ;;  %v699_v37 = vld [vmem:[#allocation6 + $0x7f8] sm:$0xff] }
 0x1fc   :  { %4900 = vmatpush1.bf16.msra.mxu1 %v12451_v25  ;;  %v4049_v32 = vpop.f32.mrf.mxu1  ;;  %v13891_v25 = vld [vmem:[#allocation3 + $0xf4] ss:$28 sps:$4 sm:$0xff]   ;;  %v12556_v14 = vcombine.high %v695_v46, %v699_v37  ;;  %v559_v52 = vld [vmem:[#allocation6 + $0x398] sm:$0xff]  ;;  %v12555_v1 = vcombine.low %v695_v46, %v699_v37 }
 0x1fd   :  { %4901 = vmatprep.subr.bf16.mxu1 %v12444_v21  ;;  %4613 = vmatmul.mubr.bf16.gmra.mxu0 %v13889_v8  ;;  %v14661_v43 = vadd.f32 %v4049_v32, %v3936_v38  ;;  %v3938_v10 = vpop.f32.mrf.mxu0  ;;  %v563_v0 = vld [vmem:[#allocation6 + $0x3b8] sm:$0xff] }
 0x1fe   :  { %4789 = vmatpush1.bf16.msra.mxu0 %v12315_v9  ;;  %v4051_v11 = vpop.f32.mrf.mxu1  ;;  %4622 = vmatprep.mubr.bf16.mxu0 %v13891_v25  ;;  %v687_v55 = vld [vmem:[#allocation6 + $0x798] sm:$0xff]  ;;  %v12427_v9 = vcombine.low %v567_v5, %v571_v58 }
 0x1ff   :  { %4726 = vmatmul.mubr.bf16.gmra.mxu1 %v13890_v18  ;;  %4790 = vmatprep.subr.bf16.mxu0 %v12308_v56  ;;  %v14663_v21 = vadd.f32 %v4051_v11, %v3938_v10  ;;  %v3940_v54 = vpop.f32.mrf.mxu0  ;;  %v691_v31 = vld [vmem:[#allocation6 + $0x7b8] sm:$0xff]  ;;  %v13892_v18 = vld [vmem:[#allocation3 + $0xf0] ss:$28 sps:$4 sm:$0xff]  }
 0x200   :  { %4902 = vmatpush1.bf16.msra.mxu1 %v12443_v28  ;;  %4735 = vmatprep.mubr.bf16.mxu1 %v17790_v12  ;;  %v4053_v15 = vpop.f32.mrf.mxu1  ;;  %v12420_v28 = vcombine.high %v559_v52, %v563_v0  ;;  %v12548_v22 = vcombine.high %v687_v55, %v691_v31  ;;  %v555_v38 = vld [vmem:[#allocation6 + $0x378] sm:$0xff]  ;;  %v12547_v37 = vcombine.low %v687_v55, %v691_v31 }
 0x201   :  { %4903 = vmatprep.subr.bf16.mxu1 %v12436_v30  ;;  %v14666_v27 = vadd.f32 %v4053_v15, %v3940_v54  ;;  %v3942_v40 = vpop.f32.mrf.mxu0  ;;  %v551_v30 = vld [vmem:[#allocation6 + $0x358] sm:$0xff] }
 0x202   :  { %4791 = vmatpush1.bf16.msra.mxu0 %v12307_v17  ;;  %v4055_v56 = vpop.f32.mrf.mxu1  ;;  %v679_v10 = vld [vmem:[#allocation6 + $0x758] sm:$0xff]  ;;  %v12412_v11 = vcombine.high %v551_v30, %v555_v38 }
 0x203   :  { %4792 = vmatprep.subr.bf16.mxu0 %v12428_v26  ;;  %v14668_v8 = vadd.f32 %v4055_v56, %v3942_v40  ;;  %v3946_v32 = vpop.f32.mrf.mxu0  ;;  %v683_v17 = vld [vmem:[#allocation6 + $0x778] sm:$0xff] }
 0x204   :  { %4904 = vmatpush1.bf16.msra.mxu1 %v12435_v23  ;;  %v4059_v5 = vpop.f32.mrf.mxu1  ;;  %v13893_v58 = vld [vmem:[#allocation3 + $0xf8] ss:$28 sps:$4 sm:$0xff]   ;;  %v12419_v23 = vcombine.low %v559_v52, %v563_v0  ;;  %v12540_v54 = vcombine.high %v679_v10, %v683_v17  ;;  %v12539_v31 = vcombine.low %v679_v10, %v683_v17  ;;  %v13898_v34 = vld [vmem:[#allocation3 + $0x160] ss:$28 sps:$4 sm:$0xff]  }
 0x205   :  { %4905 = vmatprep.subr.bf16.mxu1 %v12556_v14  ;;  %4623 = vmatmul.mubr.bf16.gmra.mxu0 %v13892_v18  ;;  %v14670_v26 = vadd.f32 %v4059_v5, %v3946_v32  ;;  %v3948_v46 = vpop.f32.mrf.mxu0  ;;  %v13894_v14 = vld [vmem:[#allocation3 + $0x12c] ss:$28 sps:$4 sm:$0xff]   ;;  %v543_v15 = vld [vmem:[#allocation6 + $0x318] sm:$0xff] }
 0x206   :  { %4793 = vmatpush2.bf16.msra.mxu0 %v12427_v9  ;;  %v4061_v25 = vpop.f32.mrf.mxu1  ;;  %4632 = vmatprep.mubr.bf16.mxu0 %v13894_v14  ;;  %v547_v40 = vld [vmem:[#allocation6 + $0x338] sm:$0xff] }
 0x207   :  { %4736 = vmatmul.mubr.bf16.gmra.mxu1 %v13893_v58  ;;  %4794 = vmatprep.subr.bf16.mxu0 %v12420_v28  ;;  %v14672_v56 = vadd.f32 %v4061_v25, %v3948_v46  ;;  %v3950_v18 = vpop.f32.mrf.mxu0  ;;  %v671_v52 = vld [vmem:[#allocation6 + $0x718] sm:$0xff] }
 0x208   :  { %4906 = vmatpush2.bf16.msra.mxu1 %v12555_v1  ;;  %4745 = vmatprep.mubr.bf16.mxu1 %v17790_v12  ;;  %v675_v0 = vld [vmem:[#allocation6 + $0x738] sm:$0xff]  ;;  %v4063_v9 = vpop.f32.mrf.mxu1  ;;  %v12411_v1 = vcombine.low %v551_v30, %v555_v38  ;;  %v13896_v38 = vld [vmem:[#allocation3 + $0x130] ss:$28 sps:$4 sm:$0xff]  }
 0x209   :  { %4907 = vmatprep.subr.bf16.mxu1 %v12548_v22  ;;  %v14675_v28 = vadd.f32 %v4063_v9, %v3950_v18  ;;  %v3952_v55 = vpop.f32.mrf.mxu0  ;;  %v12404_v22 = vcombine.high %v543_v15, %v547_v40  ;;  %v12532_v5 = vcombine.high %v671_v52, %v675_v0  ;;  %v535_v58 = vld [vmem:[#allocation6 + $0x2d8] sm:$0xff]  ;;  %v12531_v17 = vcombine.low %v671_v52, %v675_v0  ;;  %v13897_v9 = vld [vmem:[#allocation3 + $0x164] ss:$28 sps:$4 sm:$0xff]  }
 0x20a   :  { %4795 = vmatpush2.bf16.msra.mxu0 %v12419_v23  ;;  %v4065_v32 = vpop.f32.mrf.mxu1  ;;  %v539_v46 = vld [vmem:[#allocation6 + $0x2f8] sm:$0xff] }
 0x20b   :  { %4796 = vmatprep.subr.bf16.mxu0 %v12412_v11  ;;  %v14677_v25 = vadd.f32 %v4065_v32, %v3952_v55  ;;  %v3956_v14 = vpop.f32.mrf.mxu0  ;;  %v667_v23 = vld [vmem:[#allocation6 + $0x6f8] sm:$0xff] }
 0x20c   :  { %4908 = vmatpush2.bf16.msra.mxu1 %v12547_v37  ;;  %v4069_v30 = vpop.f32.mrf.mxu1  ;;  %v12403_v37 = vcombine.low %v543_v15, %v547_v40  ;;  %v12524_v55 = vcombine.high %v663_v47, %v667_v23  ;;  %v531_v32 = vld [vmem:[#allocation6 + $0x2b8] sm:$0xff]  ;;  %v12523_v0 = vcombine.low %v663_v47, %v667_v23 }
 0x20d   :  { %4909 = vmatprep.subr.bf16.mxu1 %v12540_v54  ;;  %4633 = vmatmul.mubr.bf16.gmra.mxu0 %v13895_v60  ;;  %v14679_v11 = vadd.f32 %v4069_v30, %v3956_v14  ;;  %v3958_v10 = vpop.f32.mrf.mxu0  ;;  %v12396_v54 = vcombine.high %v535_v58, %v539_v46  ;;  %v527_v60 = vld [vmem:[#allocation6 + $0x298] sm:$0xff] }
 0x20e   :  { %4797 = vmatpush2.bf16.msra.mxu0 %v12411_v1  ;;  %v4071_v18 = vpop.f32.mrf.mxu1  ;;  %4642 = vmatprep.mubr.bf16.mxu0 %v13897_v9  ;;  %v655_v15 = vld [vmem:[#allocation6 + $0x698] sm:$0xff] }
 0x20f   :  { %4746 = vmatmul.mubr.bf16.gmra.mxu1 %v13896_v38  ;;  %4798 = vmatprep.subr.bf16.mxu0 %v12404_v22  ;;  %v14681_v57 = vadd.f32 %v4071_v18, %v3958_v10  ;;  %v3960_v12 = vpop.f32.mrf.mxu0  ;;  %v17930_v38 = vmov 0   ;;  %v659_v40 = vld [vmem:[#allocation6 + $0x6b8] sm:$0xff] }
 0x210   :  { %4910 = vmatpush2.bf16.msra.mxu1 %v12539_v31  ;;  %4755 = vmatprep.mubr.bf16.mxu1 %v17930_v38  ;;  %v4073_v1 = vpop.f32.mrf.mxu1  ;;  %v12395_v31 = vcombine.low %v535_v58, %v539_v46  ;;  %v12516_v30 = vcombine.high %v655_v15, %v659_v40  ;;  %v519_v10 = vld [vmem:[#allocation6 + $0x258] sm:$0xff]  ;;  %v12387_v46 = vcombine.low %v527_v60, %v531_v32 }
 0x211   :  { %4911 = vmatprep.subr.bf16.mxu1 %v12532_v5  ;;  %v14684_v22 = vadd.f32 %v4073_v1, %v3960_v12  ;;  %v3962_v52 = vpop.f32.mrf.mxu0  ;;  %v12388_v5 = vcombine.high %v527_v60, %v531_v32  ;;  %v523_v18 = vld [vmem:[#allocation6 + $0x278] sm:$0xff]  ;;  %v13899_v12 = vld [vmem:[#allocation3 + $0x168] ss:$28 sps:$4 sm:$0xff]   ;;  %v12515_v23 = vcombine.low %v655_v15, %v659_v40 }
 0x212   :  { %4799 = vmatpush2.bf16.msra.mxu0 %v12403_v37  ;;  %v4075_v14 = vpop.f32.mrf.mxu1  ;;  %v647_v61 = vld [vmem:[#allocation6 + $0x658] sm:$0xff] }
 0x213   :  { %4800 = vmatprep.subr.bf16.mxu0 %v12396_v54  ;;  %v14686_v9 = vadd.f32 %v4075_v14, %v3962_v52  ;;  %v3966_v45 = vpop.f32.mrf.mxu0  ;;  %v651_v37 = vld [vmem:[#allocation6 + $0x678] sm:$0xff]  ;;  %v12380_v54 = vcombine.high %v519_v10, %v523_v18 }
 0x214   :  { %4912 = vmatpush2.bf16.msra.mxu1 %v12531_v17  ;;  %v4079_v58 = vpop.f32.mrf.mxu1  ;;  %v13900_v1 = vld [vmem:[#allocation3 + $0x19c] ss:$28 sps:$4 sm:$0xff]   ;;  %v12508_v52 = vcombine.high %v647_v61, %v651_v37  ;;  %v12507_v40 = vcombine.low %v647_v61, %v651_v37 }
 0x215   :  { %4913 = vmatprep.subr.bf16.mxu1 %v12524_v55  ;;  %4643 = vmatmul.mubr.bf16.gmra.mxu0 %v13898_v34  ;;  %v14688_v17 = vadd.f32 %v4079_v58, %v3966_v45  ;;  %v3968_v47 = vpop.f32.mrf.mxu0  ;;  %v511_v34 = vld [vmem:[#allocation6 + $0x218] sm:$0xff] }
 0x216   :  { %4801 = vmatpush2.bf16.msra.mxu0 %v12395_v31  ;;  %v4081_v55 = vpop.f32.mrf.mxu1  ;;  %4652 = vmatprep.mubr.bf16.mxu0 %v13900_v1  ;;  %v515_v14 = vld [vmem:[#allocation6 + $0x238] sm:$0xff]  ;;  %v12379_v31 = vcombine.low %v519_v10, %v523_v18 }
 0x217   :  { %4756 = vmatmul.mubr.bf16.gmra.mxu1 %v13899_v12  ;;  %4802 = vmatprep.subr.bf16.mxu0 %v12388_v5  ;;  %v14690_v41 = vadd.f32 %v4081_v55, %v3968_v47  ;;  %v3970_v2 = vpop.f32.mrf.mxu0  ;;  %v639_v60 = vld [vmem:[#allocation6 + $0x618] sm:$0xff]  ;;  %v12372_v5 = vcombine.high %v511_v34, %v515_v14  ;;  %v12371_v18 = vcombine.low %v511_v34, %v515_v14 }
 0x218   :  { %4914 = vmatpush2.bf16.msra.mxu1 %v12523_v0  ;;  %4765 = vmatprep.mubr.bf16.mxu1 %v17930_v38  ;;  %v643_v45 = vld [vmem:[#allocation6 + $0x638] sm:$0xff]  ;;  %v4083_v32 = vpop.f32.mrf.mxu1 }
 0x219   :  { %4915 = vmatprep.subr.bf16.mxu1 %v12516_v30  ;;  %v14693_v0 = vadd.f32 %v4083_v32, %v3970_v2  ;;  %v3972_v15 = vpop.f32.mrf.mxu0  ;;  %v12500_v58 = vcombine.high %v639_v60, %v643_v45  ;;  %v759_v12 = vld [vmem:[#allocation6 + $0x9d8] sm:$0xff]  ;;  %v12499_v37 = vcombine.low %v639_v60, %v643_v45  ;;  %v13903_v32 = vld [vmem:[#allocation3 + $0x4] ss:$28 sps:$4 sm:$0xff]   ;;  %v17803_v45 = vsub.s32 2, %v14393_v20 }
 0x21a   :  { %4803 = vmatpush2.bf16.msra.mxu0 %v12387_v46  ;;  %v4085_v30 = vpop.f32.mrf.mxu1  ;;  %v763_v47 = vld [vmem:[#allocation6 + $0x9f8] sm:$0xff] }
 0x21b   :  { %4804 = vmatprep.subr.bf16.mxu0 %v12380_v54  ;;  %v14695_v55 = vadd.f32 %v4085_v30, %v3972_v15  ;;  %v3976_v1 = vpop.f32.mrf.mxu0  ;;  %v891_v46 = vld [vmem:[#allocation6 + $0xdf8] sm:$0xff]  ;;  %v12620_v54 = vcombine.high %v759_v12, %v763_v47  ;;  %v12619_v14 = vcombine.low %v759_v12, %v763_v47 }
 0x21c   :  { %4916 = vmatpush2.bf16.msra.mxu1 %v12515_v23  ;;  %v4089_v10 = vpop.f32.mrf.mxu1  ;;  %v13902_v2 = vld [vmem:[#allocation3 + $0x1a0] ss:$28 sps:$4 sm:$0xff]   ;;  %v12748_v15 = vcombine.high %v887_v53, %v891_v46 }
 0x21d   :  { %4917 = vmatprep.subr.bf16.mxu1 %v12508_v52  ;;  %4653 = vmatmul.mubr.bf16.gmra.mxu0 %v13901_v42  ;;  %v14697_v23 = vadd.f32 %v4089_v10, %v3976_v1  ;;  %v3978_v61 = vpop.f32.mrf.mxu0  ;;  %v751_v42 = vld [vmem:[#allocation6 + $0x998] sm:$0xff] }
 0x21e   :  { %4805 = vmatpush2.bf16.msra.mxu0 %v12379_v31  ;;  %v4091_v52 = vpop.f32.mrf.mxu1  ;;  %4808 = vmatprep.mubr.bf16.mxu0 %v13903_v32  ;;  %v755_v30 = vld [vmem:[#allocation6 + $0x9b8] sm:$0xff] }
 0x21f   :  { %4766 = vmatmul.mubr.bf16.gmra.mxu1 %v13902_v2  ;;  %4806 = vmatprep.subr.bf16.mxu0 %v12372_v5  ;;  %v14699_v63 = vadd.f32 %v4091_v52, %v3978_v61  ;;  %v3980_v35 = vpop.f32.mrf.mxu0  ;;  %v13904_v2 = vld [vmem:[#allocation3 + $0xc] ss:$28 sps:$4 sm:$0xff]   ;;  %v879_v31 = vld [vmem:[#allocation6 + $0xd98] sm:$0xff]  ;;  %v12612_v1 = vcombine.high %v751_v42, %v755_v30 }
 0x220   :  { %4918 = vmatpush2.bf16.msra.mxu1 %v12507_v40  ;;  %4921 = vmatprep.mubr.bf16.mxu1 %v13904_v2  ;;  %v4093_v34 = vpop.f32.mrf.mxu1  ;;  %v883_v40 = vld [vmem:[#allocation6 + $0xdb8] sm:$0xff] }
 0x221   :  { %4919 = vmatprep.subr.bf16.mxu1 %v12500_v58  ;;  %v14701_v5 = vadd.f32 %v4093_v34, %v3980_v35  ;;  %v3982_v60 = vpop.f32.mrf.mxu0  ;;  %v12747_v58 = vcombine.low %v887_v53, %v891_v46  ;;  %v14704_v61 = vld [vmem:[#allocation6 + $0x958] sm:$0xff]  ;;  %v13907_v34 = vld [vmem:[#allocation8] sm:$0xff]  ;;  %v12739_v35 = vcombine.low %v879_v31, %v883_v40 }
 0x222   :  { %4807 = vmatpush2.bf16.msra.mxu0 %v12371_v18  ;;  %v4095_v10 = vpop.f32.mrf.mxu1  ;;  %v14706_v52 = vld [vmem:[#allocation6 + $0x978] sm:$0xff]  ;;  %v12740_v18 = vcombine.high %v879_v31, %v883_v40 }
 0x223   :  { %5002 = vmatprep.subr.bf16.mxu0 %v12620_v54  ;;  %v14708_v32 = vadd.f32 %v4095_v10, %v3982_v60  ;;  %v4132_v12 = vpop.f32.mrf.mxu0  ;;  %v13905_v47 = vld [vmem:[#allocation3] ss:$28 sps:$4 sm:$0xff]   ;;  %v13906_v54 = vld [vmem:[#allocation3 + $0x8] ss:$28 sps:$4 sm:$0xff]   ;;  %v14718_v60 = vrot.slane %v13907_v34, %v17803_v45 }
 0x224   :  { %4920 = vmatpush2.bf16.msra.mxu1 %v12499_v37  ;;  %v14711_v37 = vld [vmem:[#allocation6 + $0xd58] sm:$0xff]  ;;  %v4133_v53 = vadd.f32 %v4132_v12, %v14625_v48  ;;  %v4245_v46 = vpop.f32.mrf.mxu1 }
 0x225   :  { %5115 = vmatprep.subr.bf16.mxu1 %v12748_v15  ;;  %4809 = vmatmul.mubr.bf16.vlgmr.msra.gmra.mxu0 %v13905_v47  ;;  %v14713_v2 = vld [vmem:[#allocation6 + $0xd78] sm:$0xff]  ;;  %v12611_v15 = vcombine.low %v751_v42, %v755_v30  ;;  %v4134_v10 = vpop.f32.mrf.mxu0  ;;  %v12604_v47 = vcombine.high %v14704_v61, %v14706_v52 }
 0x226   :  { %5003 = vmatpush1.bf16.msra.mxu0 %v12619_v14  ;;  %v4246_v62 = vadd.f32 %v4245_v46, %v4133_v53  ;;  %v4135_v48 = vadd.f32 %v4134_v10, %v14630_v7  ;;  %v4247_v12 = vpop.f32.mrf.mxu1  ;;  %4818 = vmatprep.mubr.bf16.mxu0 %v13908_v59  ;;  %v13909_v14 = vld [vmem:[#allocation3 + $0x44] ss:$28 sps:$4 sm:$0xff]   ;;  %v14723_v42 = vld [vmem:[#allocation6 + $0x918] sm:$0xff]  ;;  %v12603_v59 = vcombine.low %v14704_v61, %v14706_v52 }
 0x227   :  { %4922 = vmatmul.mubr.bf16.vlgmr.msra.gmra.mxu1 %v13906_v54  ;;  %5004 = vmatprep.subr.bf16.mxu0 %v12612_v1  ;;  %v14725_v30 = vld [vmem:[#allocation6 + $0x938] sm:$0xff]  ;;  %v17931_v1 = vsub.s32 3, %v14393_v20  ;;  %v4136_v31 = vpop.f32.mrf.mxu0  ;;  %v12731_v61 = vcombine.low %v14711_v37, %v14713_v2 }
 0x228   :  { %5116 = vmatpush1.bf16.msra.mxu1 %v12747_v58  ;;  %4931 = vmatprep.mubr.bf16.mxu1 %v13909_v14  ;;  %v12732_v58 = vcombine.high %v14711_v37, %v14713_v2  ;;  %v4248_v40 = vadd.f32 %v4247_v12, %v4135_v48  ;;  %v4137_v7 = vadd.f32 %v4136_v31, %v14637_v19  ;;  %v4249_v53 = vpop.f32.mrf.mxu1  ;;  %v14736_v46 = vld [vmem:[#allocation6 + $0xd18] sm:$0xff] }
 0x229   :  { %v14731_v54 = vrot.slane %v13907_v34, %v17931_v1  ;;  %5117 = vmatprep.subr.bf16.mxu1 %v12740_v18  ;;  %v14738_v10 = vld [vmem:[#allocation6 + $0xd38] sm:$0xff]  ;;  %v5659_v14 = vadd.f32 %v14718_v60, %v4246_v62  ;;  %v4138_v45 = vpop.f32.mrf.mxu0  ;;  %v12596_v18 = vcombine.high %v14723_v42, %v14725_v30 }
 0x22a   :  { %5005 = vmatpush1.bf16.msra.mxu0 %v12611_v15  ;;  %v4250_v34 = vadd.f32 %v4249_v53, %v4137_v7  ;;  %v4139_v19 = vadd.f32 %v4138_v45, %v14641_v51  ;;  %v4251_v48 = vpop.f32.mrf.mxu1  ;;  %v14744_v15 = vld [vmem:[#allocation6 + $0x8d8] sm:$0xff]  ;;  %v12724_v51 = vcombine.high %v14736_v46, %v14738_v10 }
 0x22b   :  { %5006 = vmatprep.subr.bf16.mxu0 %v12604_v47  ;;  %v14746_v12 = vld [vmem:[#allocation6 + $0x8f8] sm:$0xff]  ;;  %v5660_v62 = vadd.f32 %v14731_v54, %v4248_v40  ;;  %v4142_v52 = vpop.f32.mrf.mxu0 }
 0x22c   :  { %5118 = vmatpush1.bf16.msra.mxu1 %v12739_v35  ;;  %v13910_v47 = vld [vmem:[#allocation3 + $0x38] ss:$28 sps:$4 sm:$0xff]   ;;  %v12595_v35 = vcombine.low %v14723_v42, %v14725_v30  ;;  %v5667_v45 = vadd.f32 %v14718_v60, %v4250_v34  ;;  %v4252_v1 = vadd.f32 %v4251_v48, %v4139_v19  ;;  %v4143_v31 = vadd.f32 %v4142_v52, %v14643_v29  ;;  %v4255_v7 = vpop.f32.mrf.mxu1  ;;  %v13911_v53 = vld [vmem:[#allocation3 + $0x40] ss:$28 sps:$4 sm:$0xff]  }
 0x22d   :  { %5119 = vmatprep.subr.bf16.mxu1 %v12732_v58  ;;  %4819 = vmatmul.mubr.bf16.gmra.mxu0 %v13910_v47  ;;  %v14757_v37 = vld [vmem:[#allocation6 + $0xcd8] sm:$0xff]  ;;  %v5787_v58 = vmax.f32 %v5659_v14, 0.0  ;;  %v4144_v40 = vpop.f32.mrf.mxu0  ;;  %v13912_v42 = vld [vmem:[#allocation3 + $0x74] ss:$28 sps:$4 sm:$0xff]   ;;  %v12588_v30 = vcombine.high %v14744_v15, %v14746_v12  ;;  %v12723_v34 = vcombine.low %v14736_v46, %v14738_v10  ;;  %v5788_v10 = vmax.f32 %v5660_v62, 0.0 }
 0x22e   :  { %5007 = vmatpush1.bf16.msra.mxu0 %v12603_v59  ;;  %v14759_v2 = vld [vmem:[#allocation6 + $0xcf8] sm:$0xff]  ;;  %4828 = vmatprep.mubr.bf16.mxu0 %v13912_v42  ;;  %v5795_v29 = vmax.f32 %v5667_v45, 0.0  ;;  %v5668_v19 = vadd.f32 %v14731_v54, %v4252_v1  ;;  %v4256_v48 = vadd.f32 %v4255_v7, %v4143_v31  ;;  %v4145_v59 = vadd.f32 %v4144_v40, %v14645_v6  ;;  %v4257_v52 = vpop.f32.mrf.mxu1 }
 0x22f   :  { %4932 = vmatmul.mubr.bf16.gmra.mxu1 %v13911_v53  ;;  %5008 = vmatprep.subr.bf16.mxu0 %v12596_v18  ;;  %v13913_v47 = vld [vmem:[#allocation3 + $0x7c] ss:$28 sps:$4 sm:$0xff]   ;;  %v4146_v53 = vpop.f32.mrf.mxu0  ;;  %v12587_v42 = vcombine.low %v14744_v15, %v14746_v12  ;;  %v12716_v46 = vcombine.high %v14757_v37, %v14759_v2 }
 0x230   :  { %4941 = vmatprep.mubr.bf16.mxu1 %v13913_v47  ;;  %5120 = vmatpush1.bf16.msra.mxu1 %v12731_v61  ;;  %v14767_v14 = vld [vmem:[#allocation6 + $0x898] sm:$0xff]  ;;  %v14775_v45 = vpack.c.bf16 %v5795_v29, %v5787_v58  ;;  %v5796_v6 = vmax.f32 %v5668_v19, 0.0  ;;  %v4258_v1 = vadd.f32 %v4257_v52, %v4145_v59  ;;  %v4259_v31 = vpop.f32.mrf.mxu1  ;;  %v4147_v40 = vadd.f32 %v4146_v53, %v14648_v13  ;;  %v13914_v52 = vld [vmem:[#allocation3 + $0x70] ss:$28 sps:$4 sm:$0xff]  }
 0x231   :  { %v14769_v18 = vld [vmem:[#allocation6 + $0x8b8] sm:$0xff]  ;;  %5121 = vmatprep.subr.bf16.mxu1 %v12724_v51  ;;  %v4148_v47 = vpop.f32.mrf.mxu0  ;;  %v12715_v13 = vcombine.low %v14757_v37, %v14759_v2 }
 0x232   :  { %17932 = vst [vmem:[#allocation39_spill] sm:$0xff] %v14775_v45  ;;  %5009 = vmatpush1.bf16.msra.mxu0 %v12595_v35  ;;  %v14777_v61 = vld [vmem:[#allocation6 + $0xc98] sm:$0xff]  ;;  %v12580_v15 = vcombine.high %v14767_v14, %v14769_v18  ;;  %v14784_v12 = vpack.c.bf16 %v5796_v6, %v5788_v10  ;;  %v4149_v62 = vadd.f32 %v4148_v47, %v14650_v49  ;;  %v4261_v51 = vpop.f32.mrf.mxu1 }
 0x233   :  { %v14779_v7 = vld [vmem:[#allocation6 + $0xcb8] sm:$0xff]  ;;  %5010 = vmatprep.subr.bf16.mxu0 %v12588_v30  ;;  %v12579_v58 = vcombine.low %v14767_v14, %v14769_v18  ;;  %v5675_v30 = vadd.f32 %v14718_v60, %v4256_v48  ;;  %v4260_v19 = vadd.f32 %v4259_v31, %v4147_v40  ;;  %v4152_v59 = vpop.f32.mrf.mxu0  ;;  %v5676_v14 = vadd.f32 %v14731_v54, %v4258_v1 }
 0x234   :  { %17933 = vst [vmem:[#allocation40_spill] sm:$0xff] %v14784_v12  ;;  %v14789_v35 = vld [vmem:[#allocation6 + $0x858] sm:$0xff]  ;;  %5122 = vmatpush1.bf16.msra.mxu1 %v12723_v34  ;;  %v12708_v49 = vcombine.high %v14777_v61, %v14779_v7  ;;  %v4262_v18 = vadd.f32 %v4261_v51, %v4149_v62  ;;  %v4153_v53 = vadd.f32 %v4152_v59, %v14652_v4  ;;  %v4265_v10 = vpop.f32.mrf.mxu1  ;;  %v13917_v62 = vld [vmem:[#allocation3 + $0xb4] ss:$28 sps:$4 sm:$0xff]  }
 0x235   :  { %v14791_v29 = vld [vmem:[#allocation6 + $0x878] sm:$0xff]  ;;  %4829 = vmatmul.mubr.bf16.gmra.mxu0 %v13914_v52  ;;  %5123 = vmatprep.subr.bf16.mxu1 %v12716_v46  ;;  %v5683_v48 = vadd.f32 %v14718_v60, %v4260_v19  ;;  %v4154_v6 = vpop.f32.mrf.mxu0  ;;  %v13916_v46 = vld [vmem:[#allocation3 + $0xac] ss:$28 sps:$4 sm:$0xff]   ;;  %v12707_v4 = vcombine.low %v14777_v61, %v14779_v7  ;;  %v5804_v7 = vmax.f32 %v5676_v14, 0.0 }
 0x236   :  { %v13915_v34 = vld [vmem:[#allocation3 + $0x78] ss:$28 sps:$4 sm:$0xff]   ;;  %5011 = vmatpush1.bf16.msra.mxu0 %v12587_v42  ;;  %4838 = vmatprep.mubr.bf16.mxu0 %v13916_v46  ;;  %v12572_v1 = vcombine.high %v14789_v35, %v14791_v29  ;;  %v5684_v31 = vadd.f32 %v14731_v54, %v4262_v18  ;;  %v4266_v40 = vadd.f32 %v4265_v10, %v4153_v53  ;;  %v4267_v47 = vpop.f32.mrf.mxu1 }
 0x237   :  { %4942 = vmatmul.mubr.bf16.gmra.mxu1 %v13915_v34  ;;  %v14800_v37 = vld [vmem:[#allocation6 + $0xc58] sm:$0xff]  ;;  %5012 = vmatprep.subr.bf16.mxu0 %v12580_v15  ;;  %v4155_v42 = vadd.f32 %v4154_v6, %v14654_v50  ;;  %v5803_v15 = vmax.f32 %v5675_v30, 0.0  ;;  %v5811_v59 = vmax.f32 %v5683_v48, 0.0  ;;  %v4156_v52 = vpop.f32.mrf.mxu0  ;;  %v12571_v34 = vcombine.low %v14789_v35, %v14791_v29 }
 0x238   :  { %v14802_v2 = vld [vmem:[#allocation6 + $0xc78] sm:$0xff]  ;;  %4951 = vmatprep.mubr.bf16.mxu1 %v13917_v62  ;;  %5124 = vmatpush1.bf16.msra.mxu1 %v12715_v13  ;;  %v5812_v50 = vmax.f32 %v5684_v31, 0.0  ;;  %v4157_v53 = vadd.f32 %v4156_v52, %v14657_v36  ;;  %v4269_v10 = vpop.f32.mrf.mxu1  ;;  %v5691_v36 = vadd.f32 %v14718_v60, %v4266_v40  ;;  %v13919_v52 = vld [vmem:[#allocation3 + $0xb0] ss:$28 sps:$4 sm:$0xff]  }
 0x239   :  { %v14811_v51 = vld [vmem:[#allocation6 + $0x818] sm:$0xff]  ;;  %5125 = vmatprep.subr.bf16.mxu1 %v12708_v49  ;;  %v12700_v61 = vcombine.high %v14800_v37, %v14802_v2  ;;  %v4268_v18 = vadd.f32 %v4267_v47, %v4155_v42  ;;  %v14824_v30 = vpack.c.bf16 %v5811_v59, %v5803_v15  ;;  %v4158_v48 = vpop.f32.mrf.mxu0  ;;  %v12699_v31 = vcombine.low %v14800_v37, %v14802_v2  ;;  %v13918_v47 = vld [vmem:[#allocation3 + $0xa8] ss:$28 sps:$4 sm:$0xff]  }
 0x23a   :  { %v14813_v19 = vld [vmem:[#allocation6 + $0x838] sm:$0xff]  ;;  %5013 = vmatpush1.bf16.msra.mxu0 %v12579_v58  ;;  %v14832_v14 = vpack.c.bf16 %v5812_v50, %v5804_v7  ;;  %v4270_v58 = vadd.f32 %v4269_v10, %v4157_v53  ;;  %v4271_v46 = vpop.f32.mrf.mxu1  ;;  %v4159_v42 = vadd.f32 %v4158_v48, %v14659_v16  ;;  %v14846_v37 = vld [vmem:[#allocation9 + $0x5c0] sm:$0xff]  ;;  %v13920_v7 = vld [vmem:[#allocation3 + $0xe4] ss:$28 sps:$4 sm:$0xff]   ;;  %v5819_v50 = vmax.f32 %v5691_v36, 0.0 }
 0x23b   :  { %v14820_v6 = vld [vmem:[#allocation6 + $0xc18] sm:$0xff]  ;;  %17934 = vst [vmem:[#allocation41_spill] sm:$0xff] %v14824_v30  ;;  %5014 = vmatprep.subr.bf16.mxu0 %v12572_v1  ;;  %v12564_v35 = vcombine.high %v14811_v51, %v14813_v19  ;;  %v4162_v1 = vpop.f32.mrf.mxu0  ;;  %v12563_v62 = vcombine.low %v14811_v51, %v14813_v19  ;;  %v14848_v2 = vld [vmem:[#allocation9 + $0x5e0] sm:$0xff]  ;;  %v5692_v51 = vadd.f32 %v14731_v54, %v4268_v18 }
 0x23c   :  { %v14822_v13 = vld [vmem:[#allocation6 + $0xc38] sm:$0xff]  ;;  %17935 = vst [vmem:[#allocation42_spill] sm:$0xff] %v14832_v14  ;;  %5126 = vmatpush1.bf16.msra.mxu1 %v12707_v4  ;;  %v5699_v40 = vadd.f32 %v14718_v60, %v4270_v58  ;;  %v4163_v59 = vadd.f32 %v4162_v1, %v14661_v43  ;;  %v4275_v4 = vpop.f32.mrf.mxu1  ;;  %v4272_v19 = vadd.f32 %v4271_v46, %v4159_v42  ;;  %v13921_v58 = vld [vmem:[#allocation3 + $0xec] ss:$28 sps:$4 sm:$0xff]  }
 0x23d   :  { %v14828_v29 = vld [vmem:[#allocation6 + $0xbd8] sm:$0xff]  ;;  %4839 = vmatmul.mubr.bf16.gmra.mxu0 %v13918_v47  ;;  %5127 = vmatprep.subr.bf16.mxu1 %v12700_v61  ;;  %v12692_v15 = vcombine.high %v14820_v6, %v14822_v13  ;;  %v4164_v61 = vpop.f32.mrf.mxu0  ;;  %v12691_v43 = vcombine.low %v14820_v6, %v14822_v13 }
 0x23e   :  { %v14830_v49 = vld [vmem:[#allocation6 + $0xbf8] sm:$0xff]  ;;  %5015 = vmatpush1.bf16.msra.mxu0 %v12571_v34  ;;  %4848 = vmatprep.mubr.bf16.mxu0 %v13920_v7  ;;  %v5827_v53 = vmax.f32 %v5699_v40, 0.0  ;;  %v4276_v34 = vadd.f32 %v4275_v4, %v4163_v59  ;;  %v4165_v10 = vadd.f32 %v4164_v61, %v14663_v21  ;;  %v4277_v48 = vpop.f32.mrf.mxu1  ;;  %v5700_v18 = vadd.f32 %v14731_v54, %v4272_v19 }
 0x23f   :  { %4952 = vmatmul.mubr.bf16.gmra.mxu1 %v13919_v52  ;;  %v12684_v16 = vcombine.high %v14828_v29, %v14830_v49  ;;  %5016 = vmatprep.subr.bf16.mxu0 %v12564_v35  ;;  %v815_v1 = vld [vmem:[#allocation6 + $0xb98] sm:$0xff]  ;;  %v4166_v46 = vpop.f32.mrf.mxu0  ;;  %v12934_v35 = vcombine.high %v14846_v37, %v14848_v2  ;;  %v12683_v21 = vcombine.low %v14828_v29, %v14830_v49  ;;  %v5820_v40 = vmax.f32 %v5692_v51, 0.0 }
 0x240   :  { %4961 = vmatprep.mubr.bf16.mxu1 %v13921_v58  ;;  %v819_v47 = vld [vmem:[#allocation6 + $0xbb8] sm:$0xff]  ;;  %5128 = vmatpush1.bf16.msra.mxu1 %v12699_v31  ;;  %v14857_v42 = vpack.c.bf16 %v5827_v53, %v5819_v50  ;;  %v4278_v6 = vadd.f32 %v4277_v48, %v4165_v10  ;;  %v4167_v13 = vadd.f32 %v4166_v46, %v14666_v27  ;;  %v4279_v36 = vpop.f32.mrf.mxu1  ;;  %v5828_v59 = vmax.f32 %v5700_v18, 0.0 }
 0x241   :  { %5129 = vmatprep.subr.bf16.mxu1 %v12692_v15  ;;  %v5707_v31 = vadd.f32 %v14718_v60, %v4276_v34  ;;  %v4168_v4 = vpop.f32.mrf.mxu0  ;;  %v12676_v15 = vcombine.high %v815_v1, %v819_v47  ;;  %v807_v7 = vld [vmem:[#allocation6 + $0xb58] sm:$0xff]  ;;  %v12675_v49 = vcombine.low %v815_v1, %v819_v47 }
 0x242   :  { %17936 = vst [vmem:[#allocation43_spill] sm:$0xff] %v14857_v42  ;;  %5017 = vmatpush1.bf16.msra.mxu0 %v12563_v62  ;;  %v4280_v52 = vadd.f32 %v4279_v36, %v4167_v13  ;;  %v4169_v19 = vadd.f32 %v4168_v4, %v14668_v8  ;;  %v4281_v61 = vpop.f32.mrf.mxu1  ;;  %v811_v50 = vld [vmem:[#allocation6 + $0xb78] sm:$0xff]  ;;  %v14864_v27 = vpack.c.bf16 %v5828_v59, %v5820_v40  ;;  %v13923_v8 = vld [vmem:[#allocation3 + $0xe8] ss:$28 sps:$4 sm:$0xff]  }
 0x243   :  { %5018 = vmatprep.subr.bf16.mxu0 %v12684_v16  ;;  %v5708_v62 = vadd.f32 %v14731_v54, %v4278_v6  ;;  %v4172_v53 = vpop.f32.mrf.mxu0  ;;  %v13922_v29 = vld [vmem:[#allocation3 + $0xe0] ss:$28 sps:$4 sm:$0xff]   ;;  %v5835_v48 = vmax.f32 %v5707_v31, 0.0  ;;  %v12668_v18 = vcombine.high %v807_v7, %v811_v50  ;;  %v12667_v59 = vcombine.low %v807_v7, %v811_v50 }
 0x244   :  { %5130 = vmatpush1.bf16.msra.mxu1 %v12691_v43  ;;  %17937 = vst [vmem:[#allocation44_spill] sm:$0xff] %v14864_v27  ;;  %v5715_v51 = vadd.f32 %v14718_v60, %v4280_v52  ;;  %v4282_v16 = vadd.f32 %v4281_v61, %v4169_v19  ;;  %v4173_v34 = vadd.f32 %v4172_v53, %v14670_v26  ;;  %v4285_v10 = vpop.f32.mrf.mxu1  ;;  %v13924_v58 = vld [vmem:[#allocation3 + $0x11c] ss:$28 sps:$4 sm:$0xff]   ;;  %v13925_v13 = vld [vmem:[#allocation3 + $0x124] ss:$28 sps:$4 sm:$0xff]  }
 0x245   :  { %4849 = vmatmul.mubr.bf16.gmra.mxu0 %v13922_v29  ;;  %9204 = vmatprep.subr.bf16.mxu1 %v12934_v35  ;;  %v4174_v43 = vpop.f32.mrf.mxu0  ;;  %v799_v26 = vld [vmem:[#allocation6 + $0xb18] sm:$0xff] }
 0x246   :  { %5019 = vmatpush2.bf16.msra.mxu0 %v12683_v21  ;;  %4858 = vmatprep.mubr.bf16.mxu0 %v13924_v58  ;;  %v5843_v46 = vmax.f32 %v5715_v51, 0.0  ;;  %v5716_v6 = vadd.f32 %v14731_v54, %v4282_v16  ;;  %v4286_v1 = vadd.f32 %v4285_v10, %v4173_v34  ;;  %v4175_v47 = vadd.f32 %v4174_v43, %v14672_v56  ;;  %v4287_v35 = vpop.f32.mrf.mxu1  ;;  %v803_v36 = vld [vmem:[#allocation6 + $0xb38] sm:$0xff] }
 0x247   :  { %4962 = vmatmul.mubr.bf16.gmra.mxu1 %v13923_v8  ;;  %5020 = vmatprep.subr.bf16.mxu0 %v12676_v15  ;;  %v4176_v40 = vpop.f32.mrf.mxu0  ;;  %v5836_v21 = vmax.f32 %v5708_v62, 0.0  ;;  %v12660_v53 = vcombine.high %v799_v26, %v803_v36  ;;  %v791_v16 = vld [vmem:[#allocation6 + $0xad8] sm:$0xff]  ;;  %v12659_v8 = vcombine.low %v799_v26, %v803_v36 }
 0x248   :  { %4971 = vmatprep.mubr.bf16.mxu1 %v13925_v13  ;;  %v14871_v31 = vpack.c.bf16 %v5843_v46, %v5835_v48  ;;  %v5844_v4 = vmax.f32 %v5716_v6, 0.0  ;;  %v4288_v15 = vadd.f32 %v4287_v35, %v4175_v47  ;;  %v4289_v52 = vpop.f32.mrf.mxu1  ;;  %v4177_v19 = vadd.f32 %v4176_v40, %v14675_v28  ;;  %v795_v34 = vld [vmem:[#allocation6 + $0xaf8] sm:$0xff]  ;;  %v13928_v46 = vld [vmem:[#allocation3 + $0x154] ss:$28 sps:$4 sm:$0xff]  }
 0x249   :  { %v4178_v61 = vpop.f32.mrf.mxu0  ;;  %v5723_v7 = vadd.f32 %v14718_v60, %v4286_v1  ;;  %v13926_v10 = vld [vmem:[#allocation3 + $0x118] ss:$28 sps:$4 sm:$0xff]   ;;  %v13927_v58 = vld [vmem:[#allocation3 + $0x120] ss:$28 sps:$4 sm:$0xff]   ;;  %v12652_v6 = vcombine.high %v791_v16, %v795_v34 }
 0x24a   :  { %17938 = vst [vmem:[#allocation45_spill] sm:$0xff] %v14871_v31  ;;  %5021 = vmatpush2.bf16.msra.mxu0 %v12675_v49  ;;  %v14874_v56 = vpack.c.bf16 %v5844_v4, %v5836_v21  ;;  %v4179_v29 = vadd.f32 %v4178_v61, %v14677_v25  ;;  %v4291_v51 = vpop.f32.mrf.mxu1  ;;  %v4290_v50 = vadd.f32 %v4289_v52, %v4177_v19  ;;  %v13929_v26 = vld [vmem:[#allocation3 + $0x15c] ss:$28 sps:$4 sm:$0xff]  }
 0x24b   :  { %5022 = vmatprep.subr.bf16.mxu0 %v12668_v18  ;;  %v4182_v62 = vpop.f32.mrf.mxu0  ;;  %v5724_v49 = vadd.f32 %v14731_v54, %v4288_v15  ;;  %v787_v36 = vld [vmem:[#allocation6 + $0xab8] sm:$0xff]  ;;  %v5851_v40 = vmax.f32 %v5723_v7, 0.0  ;;  %v12651_v4 = vcombine.low %v791_v16, %v795_v34 }
 0x24c   :  { %17939 = vst [vmem:[#allocation46_spill] sm:$0xff] %v14874_v56  ;;  %v4292_v28 = vadd.f32 %v4291_v51, %v4179_v29  ;;  %v4183_v48 = vadd.f32 %v4182_v62, %v14679_v11  ;;  %v4295_v43 = vpop.f32.mrf.mxu1  ;;  %v5731_v25 = vadd.f32 %v14718_v60, %v4290_v50  ;;  %v783_v11 = vld [vmem:[#allocation6 + $0xa98] sm:$0xff] }
 0x24d   :  { %4859 = vmatmul.mubr.bf16.gmra.mxu0 %v13926_v10  ;;  %v4184_v18 = vpop.f32.mrf.mxu0  ;;  %v5852_v15 = vmax.f32 %v5724_v49, 0.0  ;;  %v779_v16 = vld [vmem:[#allocation6 + $0xa78] sm:$0xff] }
 0x24e   :  { %5023 = vmatpush2.bf16.msra.mxu0 %v12667_v59  ;;  %4868 = vmatprep.mubr.bf16.mxu0 %v13928_v46  ;;  %v5732_v1 = vadd.f32 %v14731_v54, %v4292_v28  ;;  %v4296_v47 = vadd.f32 %v4295_v43, %v4183_v48  ;;  %v4185_v35 = vadd.f32 %v4184_v18, %v14681_v57  ;;  %v4297_v13 = vpop.f32.mrf.mxu1  ;;  %v5859_v21 = vmax.f32 %v5731_v25, 0.0  ;;  %v775_v28 = vld [vmem:[#allocation6 + $0xa58] sm:$0xff]  ;;  %v13930_v48 = vld [vmem:[#allocation3 + $0x150] ss:$28 sps:$4 sm:$0xff]  }
 0x24f   :  { %4972 = vmatmul.mubr.bf16.gmra.mxu1 %v13927_v58  ;;  %5024 = vmatprep.subr.bf16.mxu0 %v12660_v53  ;;  %v4186_v59 = vpop.f32.mrf.mxu0  ;;  %v12644_v57 = vcombine.high %v783_v11, %v787_v36  ;;  %v13931_v58 = vld [vmem:[#allocation3 + $0x158] ss:$28 sps:$4 sm:$0xff]   ;;  %v12643_v25 = vcombine.low %v783_v11, %v787_v36 }
 0x250   :  { %4981 = vmatprep.mubr.bf16.mxu1 %v13929_v26  ;;  %v5860_v52 = vmax.f32 %v5732_v1, 0.0  ;;  %v4298_v19 = vadd.f32 %v4297_v13, %v4185_v35  ;;  %v4187_v61 = vadd.f32 %v4186_v59, %v14684_v22  ;;  %v4299_v53 = vpop.f32.mrf.mxu1  ;;  %v14884_v29 = vpack.c.bf16 %v5859_v21, %v5851_v40  ;;  %v13932_v1 = vld [vmem:[#allocation3 + $0x18c] ss:$28 sps:$4 sm:$0xff]   ;;  %v767_v21 = vld [vmem:[#allocation6 + $0xa18] sm:$0xff] }
 0x251   :  { %v4188_v51 = vpop.f32.mrf.mxu0  ;;  %v5739_v62 = vadd.f32 %v14718_v60, %v4296_v47  ;;  %v771_v59 = vld [vmem:[#allocation6 + $0xa38] sm:$0xff] }
 0x252   :  { %5025 = vmatpush2.bf16.msra.mxu0 %v12659_v8  ;;  %17940 = vst [vmem:[#allocation47_spill] sm:$0xff] %v14884_v29  ;;  %v14886_v50 = vpack.c.bf16 %v5860_v52, %v5852_v15  ;;  %v4300_v7 = vadd.f32 %v4299_v53, %v4187_v61  ;;  %v4301_v10 = vpop.f32.mrf.mxu1  ;;  %v4189_v34 = vadd.f32 %v4188_v51, %v14686_v9 }
 0x253   :  { %5026 = vmatprep.subr.bf16.mxu0 %v12652_v6  ;;  %v4192_v49 = vpop.f32.mrf.mxu0  ;;  %v5740_v18 = vadd.f32 %v14731_v54, %v4298_v19  ;;  %v12636_v9 = vcombine.high %v775_v28, %v779_v16  ;;  %v5867_v47 = vmax.f32 %v5739_v62, 0.0  ;;  %v12635_v61 = vcombine.low %v775_v28, %v779_v16  ;;  %v13934_v28 = vld [vmem:[#allocation3 + $0x188] ss:$28 sps:$4 sm:$0xff]  }
 0x254   :  { %17941 = vst [vmem:[#allocation48_spill] sm:$0xff] %v14886_v50  ;;  %v5747_v22 = vadd.f32 %v14718_v60, %v4300_v7  ;;  %v4193_v8 = vadd.f32 %v4192_v49, %v14688_v17  ;;  %v4305_v43 = vpop.f32.mrf.mxu1  ;;  %v4302_v46 = vadd.f32 %v4301_v10, %v4189_v34  ;;  %v13933_v17 = vld [vmem:[#allocation3 + $0x194] ss:$28 sps:$4 sm:$0xff]   ;;  %v12628_v62 = vcombine.high %v767_v21, %v771_v59  ;;  %v14900_v49 = vld [vmem:[#allocation9 + $0x1c0] sm:$0xff] }
 0x255   :  { %4869 = vmatmul.mubr.bf16.gmra.mxu0 %v13930_v48  ;;  %v4194_v6 = vpop.f32.mrf.mxu0  ;;  %v5868_v53 = vmax.f32 %v5740_v18, 0.0  ;;  %v6037_v48 = vld [vmem:[#allocation9 + $0x1e0] sm:$0xff]  ;;  %v12627_v16 = vcombine.low %v767_v21, %v771_v59 }
 0x256   :  { %5027 = vmatpush2.bf16.msra.mxu0 %v12651_v4  ;;  %4878 = vmatprep.mubr.bf16.mxu0 %v13932_v1  ;;  %v5875_v35 = vmax.f32 %v5747_v22, 0.0  ;;  %v4306_v13 = vadd.f32 %v4305_v43, %v4193_v8  ;;  %v4195_v26 = vadd.f32 %v4194_v6, %v14690_v41  ;;  %v4307_v40 = vpop.f32.mrf.mxu1  ;;  %v5748_v11 = vadd.f32 %v14731_v54, %v4302_v46  ;;  %v13935_v46 = vld [vmem:[#allocation3 + $0x190] ss:$28 sps:$4 sm:$0xff]  }
 0x257   :  { %4982 = vmatmul.mubr.bf16.gmra.mxu1 %v13931_v58  ;;  %5028 = vmatprep.subr.bf16.mxu0 %v12644_v57  ;;  %v4196_v36 = vpop.f32.mrf.mxu0  ;;  %v13936_v1 = vld [vmem:[#allocation3 + $0x14] ss:$28 sps:$4 sm:$0xff]   ;;  %v12805_v59 = vcombine.low %v14900_v49, %v6037_v48 }
 0x258   :  { %4991 = vmatprep.mubr.bf16.mxu1 %v13933_v17  ;;  %v14895_v4 = vpack.c.bf16 %v5875_v35, %v5867_v47  ;;  %v4308_v15 = vadd.f32 %v4307_v40, %v4195_v26  ;;  %v4197_v52 = vadd.f32 %v4196_v36, %v14693_v0  ;;  %v4309_v19 = vpop.f32.mrf.mxu1  ;;  %v5876_v51 = vmax.f32 %v5748_v11, 0.0  ;;  %v6029_v17 = vld [vmem:[#allocation9 + $0x1a0] sm:$0xff] }
 0x259   :  { %v5755_v41 = vadd.f32 %v14718_v60, %v4306_v13  ;;  %v4198_v57 = vpop.f32.mrf.mxu0  ;;  %v14912_v11 = vld [vmem:[#allocation9 + $0x580] sm:$0xff] }
 0x25a   :  { %17942 = vst [vmem:[#allocation49_spill] sm:$0xff] %v14895_v4  ;;  %5029 = vmatpush2.bf16.msra.mxu0 %v12643_v25  ;;  %v4310_v7 = vadd.f32 %v4309_v19, %v4197_v52  ;;  %v4199_v10 = vadd.f32 %v4198_v57, %v14695_v55  ;;  %v4311_v34 = vpop.f32.mrf.mxu1  ;;  %v14902_v22 = vpack.c.bf16 %v5876_v51, %v5868_v53  ;;  %v6157_v36 = vld [vmem:[#allocation9 + $0x5a0] sm:$0xff] }
 0x25b   :  { %5030 = vmatprep.subr.bf16.mxu0 %v12636_v9  ;;  %v5756_v0 = vadd.f32 %v14731_v54, %v4308_v15  ;;  %v4202_v8 = vpop.f32.mrf.mxu0  ;;  %v5883_v55 = vmax.f32 %v5755_v41, 0.0  ;;  %v12806_v9 = vcombine.high %v14900_v49, %v6037_v48  ;;  %v12933_v41 = vcombine.low %v14846_v37, %v14848_v2  ;;  %v14923_v49 = vld [vmem:[#allocation9 + $0x140] sm:$0xff] }
 0x25c   :  { %17943 = vst [vmem:[#allocation50_spill] sm:$0xff] %v14902_v22  ;;  %v5763_v43 = vadd.f32 %v14718_v60, %v4310_v7  ;;  %v4312_v58 = vadd.f32 %v4311_v34, %v4199_v10  ;;  %v4203_v25 = vadd.f32 %v4202_v8, %v14697_v23  ;;  %v4315_v18 = vpop.f32.mrf.mxu1  ;;  %v6025_v23 = vld [vmem:[#allocation9 + $0x180] sm:$0xff]  ;;  %v12926_v34 = vcombine.high %v14912_v11, %v6157_v36 }
 0x25d   :  { %4879 = vmatmul.mubr.bf16.gmra.mxu0 %v13934_v28  ;;  %v4204_v6 = vpop.f32.mrf.mxu0  ;;  %v5884_v15 = vmax.f32 %v5756_v0, 0.0  ;;  %v12798_v57 = vcombine.high %v6025_v23, %v6029_v17  ;;  %v14925_v48 = vld [vmem:[#allocation9 + $0x160] sm:$0xff] }
 0x25e   :  { %5031 = vmatpush2.bf16.msra.mxu0 %v12635_v61  ;;  %5034 = vmatprep.mubr.bf16.mxu0 %v13936_v1  ;;  %v5891_v47 = vmax.f32 %v5763_v43, 0.0  ;;  %v5764_v35 = vadd.f32 %v14731_v54, %v4312_v58  ;;  %v4316_v13 = vadd.f32 %v4315_v18, %v4203_v25  ;;  %v4205_v26 = vadd.f32 %v4204_v6, %v14699_v63  ;;  %v4317_v40 = vpop.f32.mrf.mxu1  ;;  %v13937_v28 = vld [vmem:[#allocation3 + $0x10] ss:$28 sps:$4 sm:$0xff]   ;;  %v13938_v25 = vld [vmem:[#allocation3 + $0x18] ss:$28 sps:$4 sm:$0xff]  }
 0x25f   :  { %4992 = vmatmul.mubr.bf16.gmra.mxu1 %v13935_v46  ;;  %5032 = vmatprep.subr.bf16.mxu0 %v12628_v62  ;;  %v4206_v21 = vpop.f32.mrf.mxu0  ;;  %v6145_v37 = vld [vmem:[#allocation9 + $0x540] sm:$0xff]  ;;  %v12925_v18 = vcombine.low %v14912_v11, %v6157_v36  ;;  %v12790_v1 = vcombine.high %v14923_v49, %v14925_v48 }
 0x260   :  { %5147 = vmatprep.mubr.bf16.mxu1 %v17930_v38  ;;  %v14914_v52 = vpack.c.bf16 %v5891_v47, %v5883_v55  ;;  %v5892_v19 = vmax.f32 %v5764_v35, 0.0  ;;  %v4318_v61 = vadd.f32 %v4317_v40, %v4205_v26  ;;  %v4319_v53 = vpop.f32.mrf.mxu1  ;;  %v4207_v63 = vadd.f32 %v4206_v21, %v14701_v5  ;;  %v6149_v2 = vld [vmem:[#allocation9 + $0x560] sm:$0xff] }
 0x261   :  { %v4208_v51 = vpop.f32.mrf.mxu0  ;;  %v5771_v0 = vadd.f32 %v14718_v60, %v4316_v13  ;;  %v13939_v35 = vld [vmem:[#allocation3 + $0x4c] ss:$28 sps:$4 sm:$0xff]   ;;  %v12918_v13 = vcombine.high %v6145_v37, %v6149_v2 }
 0x262   :  { %17944 = vst [vmem:[#allocation51_spill] sm:$0xff] %v14914_v52  ;;  %5033 = vmatpush2.bf16.msra.mxu0 %v12627_v16  ;;  %v14919_v62 = vpack.c.bf16 %v5892_v19, %v5884_v15  ;;  %v4209_v7 = vadd.f32 %v4208_v51, %v14708_v32  ;;  %v4321_v10 = vpop.f32.mrf.mxu1  ;;  %v4320_v5 = vadd.f32 %v4319_v53, %v4207_v63  ;;  %v6009_v26 = vld [vmem:[#allocation9 + $0x100] sm:$0xff] }
 0x263   :  { %9091 = vmatprep.subr.bf16.mxu0 %v12806_v9  ;;  %v4358_v8 = vpop.f32.mrf.mxu0  ;;  %v12797_v16 = vcombine.low %v6025_v23, %v6029_v17  ;;  %v5772_v43 = vadd.f32 %v14731_v54, %v4318_v61  ;;  %v6013_v40 = vld [vmem:[#allocation9 + $0x120] sm:$0xff]  ;;  %v5899_v23 = vmax.f32 %v5771_v0, 0.0  ;;  %v12917_v61 = vcombine.low %v6145_v37, %v6149_v2 }
 0x264   :  { %17945 = vst [vmem:[#allocation52_spill] sm:$0xff] %v14919_v62  ;;  %v4322_v58 = vadd.f32 %v4321_v10, %v4209_v7  ;;  %v4471_v32 = vpop.f32.mrf.mxu1  ;;  %v5779_v46 = vadd.f32 %v14718_v60, %v4320_v5  ;;  %v6141_v11 = vld [vmem:[#allocation9 + $0x520] sm:$0xff]  ;;  %v12781_v2 = vcombine.low %v6009_v26, %v6013_v40 }
 0x265   :  { %5035 = vmatmul.mubr.bf16.vlgmr.msra.gmra.mxu0 %v13937_v28  ;;  %v14931_v55 = vadd.f32 %v4471_v32, %v4358_v8  ;;  %v4360_v6 = vpop.f32.mrf.mxu0  ;;  %v5900_v36 = vmax.f32 %v5772_v43, 0.0  ;;  %v6005_v0 = vld [vmem:[#allocation9 + $0xe0] sm:$0xff] }
 0x266   :  { %9092 = vmatpush1.bf16.msra.mxu0 %v12805_v59  ;;  %v5780_v9 = vadd.f32 %v14731_v54, %v4322_v58  ;;  %v4473_v47 = vpop.f32.mrf.mxu1  ;;  %5044 = vmatprep.mubr.bf16.mxu0 %v13939_v35  ;;  %v5907_v17 = vmax.f32 %v5779_v46, 0.0  ;;  %v6137_v59 = vld [vmem:[#allocation9 + $0x500] sm:$0xff]  ;;  %v12789_v54 = vcombine.low %v14923_v49, %v14925_v48  ;;  %v13942_v46 = vld [vmem:[#allocation3 + $0x84] ss:$28 sps:$4 sm:$0xff]  }
 0x267   :  { %5148 = vmatmul.mubr.bf16.vlgmr.msra.gmra.mxu1 %v13938_v25  ;;  %9093 = vmatprep.subr.bf16.mxu0 %v12798_v57  ;;  %v14936_v60 = vadd.f32 %v4473_v47, %v4360_v6  ;;  %v4362_v21 = vpop.f32.mrf.mxu0  ;;  %v12910_v10 = vcombine.high %v6137_v59, %v6141_v11  ;;  %v13940_v49 = vld [vmem:[#allocation3 + $0x48] ss:$28 sps:$4 sm:$0xff]   ;;  %v13941_v37 = vld [vmem:[#allocation3 + $0x50] ss:$28 sps:$4 sm:$0xff]   ;;  %v12909_v32 = vcombine.low %v6137_v59, %v6141_v11 }
 0x268   :  { %9205 = vmatpush1.bf16.msra.mxu1 %v12933_v41  ;;  %5157 = vmatprep.mubr.bf16.mxu1 %v17930_v38  ;;  %v5908_v15 = vmax.f32 %v5780_v9, 0.0  ;;  %v4475_v19 = vpop.f32.mrf.mxu1  ;;  %v14941_v53 = vpack.c.bf16 %v5907_v17, %v5899_v23  ;;  %v12782_v41 = vcombine.high %v6009_v26, %v6013_v40  ;;  %v6129_v48 = vld [vmem:[#allocation9 + $0x4c0] sm:$0xff] }
 0x269   :  { %9206 = vmatprep.subr.bf16.mxu1 %v12926_v34  ;;  %v14943_v63 = vadd.f32 %v4475_v19, %v4362_v21  ;;  %v4364_v51 = vpop.f32.mrf.mxu0  ;;  %v6001_v34 = vld [vmem:[#allocation9 + $0xc0] sm:$0xff] }
 0x26a   :  { %9094 = vmatpush1.bf16.msra.mxu0 %v12797_v16  ;;  %17946 = vst [vmem:[#allocation53_spill] sm:$0xff] %v14941_v53  ;;  %v14945_v57 = vpack.c.bf16 %v5908_v15, %v5900_v36  ;;  %v4477_v7 = vpop.f32.mrf.mxu1  ;;  %v6133_v28 = vld [vmem:[#allocation9 + $0x4e0] sm:$0xff]  ;;  %v12774_v25 = vcombine.high %v6001_v34, %v6005_v0  ;;  %v12773_v23 = vcombine.low %v6001_v34, %v6005_v0 }
 0x26b   :  { %9095 = vmatprep.subr.bf16.mxu0 %v12790_v1  ;;  %v14947_v5 = vadd.f32 %v4477_v7, %v4364_v51  ;;  %v4368_v8 = vpop.f32.mrf.mxu0  ;;  %v12902_v6 = vcombine.high %v6129_v48, %v6133_v28  ;;  %v5993_v1 = vld [vmem:[#allocation9 + $0x80] sm:$0xff]  ;;  %v12901_v59 = vcombine.low %v6129_v48, %v6133_v28 }
 0x26c   :  { %9207 = vmatpush1.bf16.msra.mxu1 %v12925_v18  ;;  %17947 = vst [vmem:[#allocation54_spill] sm:$0xff] %v14945_v57  ;;  %v4481_v16 = vpop.f32.mrf.mxu1  ;;  %v5997_v9 = vld [vmem:[#allocation9 + $0xa0] sm:$0xff] }
 0x26d   :  { %9208 = vmatprep.subr.bf16.mxu1 %v12918_v13  ;;  %5045 = vmatmul.mubr.bf16.gmra.mxu0 %v13940_v49  ;;  %v14949_v43 = vadd.f32 %v4481_v16, %v4368_v8  ;;  %v4370_v58 = vpop.f32.mrf.mxu0  ;;  %v6121_v13 = vld [vmem:[#allocation9 + $0x480] sm:$0xff]  ;;  %v12766_v11 = vcombine.high %v5993_v1, %v5997_v9  ;;  %v12765_v8 = vcombine.low %v5993_v1, %v5997_v9 }
 0x26e   :  { %9096 = vmatpush1.bf16.msra.mxu0 %v12789_v54  ;;  %v4483_v18 = vpop.f32.mrf.mxu1  ;;  %5054 = vmatprep.mubr.bf16.mxu0 %v13942_v46  ;;  %v6125_v26 = vld [vmem:[#allocation9 + $0x4a0] sm:$0xff] }
 0x26f   :  { %5158 = vmatmul.mubr.bf16.gmra.mxu1 %v13941_v37  ;;  %9097 = vmatprep.subr.bf16.mxu0 %v12782_v41  ;;  %v14951_v47 = vadd.f32 %v4483_v18, %v4370_v58  ;;  %v4372_v35 = vpop.f32.mrf.mxu0  ;;  %v12894_v15 = vcombine.high %v6121_v13, %v6125_v26  ;;  %v5985_v19 = vld [vmem:[#allocation9 + $0x40] sm:$0xff]  ;;  %v13943_v41 = vld [vmem:[#allocation3 + $0x80] ss:$28 sps:$4 sm:$0xff]   ;;  %v12893_v28 = vcombine.low %v6121_v13, %v6125_v26 }
 0x270   :  { %9209 = vmatpush1.bf16.msra.mxu1 %v12917_v61  ;;  %5167 = vmatprep.mubr.bf16.mxu1 %v17930_v38  ;;  %v4485_v40 = vpop.f32.mrf.mxu1  ;;  %v5989_v54 = vld [vmem:[#allocation9 + $0x60] sm:$0xff] }
 0x271   :  { %9210 = vmatprep.subr.bf16.mxu1 %v12910_v10  ;;  %v14954_v17 = vadd.f32 %v4485_v40, %v4372_v35  ;;  %v4374_v21 = vpop.f32.mrf.mxu0  ;;  %v6113_v7 = vld [vmem:[#allocation9 + $0x440] sm:$0xff]  ;;  %v12758_v16 = vcombine.high %v5985_v19, %v5989_v54  ;;  %v12757_v35 = vcombine.low %v5985_v19, %v5989_v54  ;;  %v13947_v54 = vld [vmem:[#allocation3 + $0xc0] ss:$28 sps:$4 sm:$0xff]  }
 0x272   :  { %9098 = vmatpush1.bf16.msra.mxu0 %v12781_v2  ;;  %v4487_v36 = vpop.f32.mrf.mxu1  ;;  %v6117_v10 = vld [vmem:[#allocation9 + $0x460] sm:$0xff]  ;;  %v13945_v2 = vld [vmem:[#allocation3 + $0xbc] ss:$28 sps:$4 sm:$0xff]  }
 0x273   :  { %9099 = vmatprep.subr.bf16.mxu0 %v12774_v25  ;;  %v14956_v61 = vadd.f32 %v4487_v36, %v4374_v21  ;;  %v13944_v0 = vld [vmem:[#allocation3 + $0x88] ss:$28 sps:$4 sm:$0xff]   ;;  %v12886_v58 = vcombine.high %v6113_v7, %v6117_v10  ;;  %v12885_v26 = vcombine.low %v6113_v7, %v6117_v10 }
 0x274   :  { %9211 = vmatpush1.bf16.msra.mxu1 %v12909_v32  ;;  %v5977_v32 = vld [vmem:[#allocation9] sm:$0xff] }
 0x275   :  { %9212 = vmatprep.subr.bf16.mxu1 %v12902_v6  ;;  %v4378_v51 = vpop.f32.mrf.mxu0  ;;  %5055 = vmatmul.mubr.bf16.gmra.mxu0 %v13943_v41  ;;  %v4491_v34 = vpop.f32.mrf.mxu1  ;;  %v5981_v25 = vld [vmem:[#allocation9 + $0x20] sm:$0xff]  ;;  %v13946_v41 = vld [vmem:[#allocation3 + $0xb8] ss:$28 sps:$4 sm:$0xff]  }
 0x276   :  { %9100 = vmatpush1.bf16.msra.mxu0 %v12773_v23  ;;  %v14958_v49 = vadd.f32 %v4491_v34, %v4378_v51  ;;  %5064 = vmatprep.mubr.bf16.mxu0 %v13945_v2  ;;  %v6105_v6 = vld [vmem:[#allocation9 + $0x400] sm:$0xff]  ;;  %v12750_v23 = vcombine.high %v5977_v32, %v5981_v25 }
 0x277   :  { %5168 = vmatmul.mubr.bf16.gmra.mxu1 %v13944_v0  ;;  %v4380_v48 = vpop.f32.mrf.mxu0  ;;  %9101 = vmatprep.subr.bf16.mxu0 %v12766_v11  ;;  %v4493_v37 = vpop.f32.mrf.mxu1  ;;  %v6109_v1 = vld [vmem:[#allocation9 + $0x420] sm:$0xff] }
 0x278   :  { %9213 = vmatpush1.bf16.msra.mxu1 %v12901_v59  ;;  %v14960_v18 = vadd.f32 %v4493_v37, %v4380_v48  ;;  %5177 = vmatprep.mubr.bf16.mxu1 %v17930_v38  ;;  %v12878_v59 = vcombine.high %v6105_v6, %v6109_v1  ;;  %v6097_v11 = vld [vmem:[#allocation9 + $0x3c0] sm:$0xff]  ;;  %v12877_v10 = vcombine.low %v6105_v6, %v6109_v1  ;;  %v13948_v37 = vld [vmem:[#allocation3 + $0xf4] ss:$28 sps:$4 sm:$0xff]  }
 0x279   :  { %9214 = vmatprep.subr.bf16.mxu1 %v12894_v15  ;;  %v4382_v46 = vpop.f32.mrf.mxu0  ;;  %v4495_v9 = vpop.f32.mrf.mxu1  ;;  %v6101_v36 = vld [vmem:[#allocation9 + $0x3e0] sm:$0xff] }
 0x27a   :  { %9102 = vmatpush1.bf16.msra.mxu0 %v12765_v8  ;;  %v14963_v40 = vadd.f32 %v4495_v9, %v4382_v46  ;;  %v6225_v34 = vld [vmem:[#allocation9 + $0x7c0] sm:$0xff]  ;;  %v12749_v8 = vcombine.low %v5977_v32, %v5981_v25 }
 0x27b   :  { %v4384_v13 = vpop.f32.mrf.mxu0  ;;  %9103 = vmatprep.subr.bf16.mxu0 %v12758_v16  ;;  %v4497_v21 = vpop.f32.mrf.mxu1  ;;  %v6229_v0 = vld [vmem:[#allocation9 + $0x7e0] sm:$0xff] }
 0x27c   :  { %9215 = vmatpush1.bf16.msra.mxu1 %v12893_v28  ;;  %v14965_v15 = vadd.f32 %v4497_v21, %v4384_v13  ;;  %v12870_v28 = vcombine.high %v6097_v11, %v6101_v36  ;;  %v12998_v2 = vcombine.high %v6225_v34, %v6229_v0  ;;  %v6093_v46 = vld [vmem:[#allocation9 + $0x3a0] sm:$0xff]  ;;  %v12997_v1 = vcombine.low %v6225_v34, %v6229_v0 }
 0x27d   :  { %9216 = vmatprep.subr.bf16.mxu1 %v12886_v58  ;;  %v4388_v51 = vpop.f32.mrf.mxu0  ;;  %5065 = vmatmul.mubr.bf16.gmra.mxu0 %v13946_v41  ;;  %v6089_v58 = vld [vmem:[#allocation9 + $0x380] sm:$0xff] }
 0x27e   :  { %9104 = vmatpush1.bf16.msra.mxu0 %v12757_v35  ;;  %5074 = vmatprep.mubr.bf16.mxu0 %v13948_v37  ;;  %v6217_v32 = vld [vmem:[#allocation9 + $0x780] sm:$0xff]  ;;  %v12862_v21 = vcombine.high %v6089_v58, %v6093_v46 }
 0x27f   :  { %v4501_v19 = vpop.f32.mrf.mxu1  ;;  %5178 = vmatmul.mubr.bf16.gmra.mxu1 %v13947_v54  ;;  %v4390_v7 = vpop.f32.mrf.mxu0  ;;  %9105 = vmatprep.subr.bf16.mxu0 %v12750_v23  ;;  %v6221_v25 = vld [vmem:[#allocation9 + $0x7a0] sm:$0xff] }
 0x280   :  { %v14967_v48 = vadd.f32 %v4501_v19, %v4388_v51  ;;  %9217 = vmatpush1.bf16.msra.mxu1 %v12885_v26  ;;  %5187 = vmatprep.mubr.bf16.mxu1 %v17930_v38  ;;  %v12869_v26 = vcombine.low %v6097_v11, %v6101_v36  ;;  %v12990_v51 = vcombine.high %v6217_v32, %v6221_v25  ;;  %v6081_v41 = vld [vmem:[#allocation9 + $0x340] sm:$0xff]  ;;  %v13950_v36 = vld [vmem:[#allocation3 + $0xf8] ss:$28 sps:$4 sm:$0xff]  }
 0x281   :  { %v4503_v16 = vpop.f32.mrf.mxu1  ;;  %9218 = vmatprep.subr.bf16.mxu1 %v12878_v59  ;;  %v4392_v13 = vpop.f32.mrf.mxu0  ;;  %v6085_v19 = vld [vmem:[#allocation9 + $0x360] sm:$0xff]  ;;  %v12989_v0 = vcombine.low %v6217_v32, %v6221_v25 }
 0x282   :  { %v14969_v9 = vadd.f32 %v4503_v16, %v4390_v7  ;;  %9106 = vmatpush1.bf16.msra.mxu0 %v12749_v8  ;;  %v13949_v16 = vld [vmem:[#allocation3 + $0xf0] ss:$28 sps:$4 sm:$0xff]   ;;  %v13952_v52 = vld [vmem:[#allocation3 + $0x128] ss:$28 sps:$4 sm:$0xff]  }
 0x283   :  { %v4505_v35 = vpop.f32.mrf.mxu1  ;;  %v4394_v6 = vpop.f32.mrf.mxu0  ;;  %9107 = vmatprep.subr.bf16.mxu0 %v12870_v28  ;;  %v6209_v37 = vld [vmem:[#allocation9 + $0x740] sm:$0xff] }
 0x284   :  { %v14972_v23 = vadd.f32 %v4505_v35, %v4392_v13  ;;  %9219 = vmatpush1.bf16.msra.mxu1 %v12877_v10  ;;  %v6213_v8 = vld [vmem:[#allocation9 + $0x760] sm:$0xff]  ;;  %v12861_v10 = vcombine.low %v6089_v58, %v6093_v46 }
 0x285   :  { %v4507_v59 = vpop.f32.mrf.mxu1  ;;  %9220 = vmatprep.subr.bf16.mxu1 %v12998_v2  ;;  %v4398_v7 = vpop.f32.mrf.mxu0  ;;  %5075 = vmatmul.mubr.bf16.gmra.mxu0 %v13949_v16  ;;  %v12854_v2 = vcombine.high %v6081_v41, %v6085_v19  ;;  %v13951_v35 = vld [vmem:[#allocation3 + $0x12c] ss:$28 sps:$4 sm:$0xff]   ;;  %v12981_v25 = vcombine.low %v6209_v37, %v6213_v8 }
 0x286   :  { %v14974_v54 = vadd.f32 %v4507_v59, %v4394_v6  ;;  %9108 = vmatpush2.bf16.msra.mxu0 %v12869_v26  ;;  %5084 = vmatprep.mubr.bf16.mxu0 %v13951_v35  ;;  %v12982_v6 = vcombine.high %v6209_v37, %v6213_v8  ;;  %v6073_v59 = vld [vmem:[#allocation9 + $0x300] sm:$0xff] }
 0x287   :  { %v4511_v11 = vpop.f32.mrf.mxu1  ;;  %5188 = vmatmul.mubr.bf16.gmra.mxu1 %v13950_v36  ;;  %v4400_v34 = vpop.f32.mrf.mxu0  ;;  %9109 = vmatprep.subr.bf16.mxu0 %v12862_v21  ;;  %v6077_v16 = vld [vmem:[#allocation9 + $0x320] sm:$0xff] }
 0x288   :  { %v14976_v28 = vadd.f32 %v4511_v11, %v4398_v7  ;;  %9221 = vmatpush2.bf16.msra.mxu1 %v12997_v1  ;;  %5197 = vmatprep.mubr.bf16.mxu1 %v17930_v38  ;;  %v6201_v58 = vld [vmem:[#allocation9 + $0x700] sm:$0xff]  ;;  %v12853_v1 = vcombine.low %v6081_v41, %v6085_v19  ;;  %v12845_v19 = vcombine.low %v6073_v59, %v6077_v16 }
 0x289   :  { %v4513_v13 = vpop.f32.mrf.mxu1  ;;  %9222 = vmatprep.subr.bf16.mxu1 %v12990_v51  ;;  %v4402_v57 = vpop.f32.mrf.mxu0  ;;  %v6205_v46 = vld [vmem:[#allocation9 + $0x720] sm:$0xff]  ;;  %v12846_v51 = vcombine.high %v6073_v59, %v6077_v16 }
 0x28a   :  { %v14978_v53 = vadd.f32 %v4513_v13, %v4400_v34  ;;  %9110 = vmatpush2.bf16.msra.mxu0 %v12861_v10  ;;  %v12974_v11 = vcombine.high %v6201_v58, %v6205_v46  ;;  %v6065_v36 = vld [vmem:[#allocation9 + $0x2c0] sm:$0xff]  ;;  %v12973_v8 = vcombine.low %v6201_v58, %v6205_v46 }
 0x28b   :  { %v4515_v26 = vpop.f32.mrf.mxu1  ;;  %v4404_v32 = vpop.f32.mrf.mxu0  ;;  %9111 = vmatprep.subr.bf16.mxu0 %v12854_v2  ;;  %v6069_v34 = vld [vmem:[#allocation9 + $0x2e0] sm:$0xff] }
 0x28c   :  { %v14981_v21 = vadd.f32 %v4515_v26, %v4402_v57  ;;  %9223 = vmatpush2.bf16.msra.mxu1 %v12989_v0  ;;  %v6193_v62 = vld [vmem:[#allocation9 + $0x6c0] sm:$0xff]  ;;  %v12838_v2 = vcombine.high %v6065_v36, %v6069_v34  ;;  %v13954_v26 = vld [vmem:[#allocation3 + $0x164] ss:$28 sps:$4 sm:$0xff]  }
 0x28d   :  { %v4517_v7 = vpop.f32.mrf.mxu1  ;;  %9224 = vmatprep.subr.bf16.mxu1 %v12982_v6  ;;  %v4408_v35 = vpop.f32.mrf.mxu0  ;;  %5085 = vmatmul.mubr.bf16.gmra.mxu0 %v13952_v52  ;;  %v6197_v10 = vld [vmem:[#allocation9 + $0x6e0] sm:$0xff] }
 0x28e   :  { %v14983_v13 = vadd.f32 %v4517_v7, %v4404_v32  ;;  %v13953_v57 = vld [vmem:[#allocation3 + $0x130] ss:$28 sps:$4 sm:$0xff]   ;;  %9112 = vmatpush2.bf16.msra.mxu0 %v12853_v1  ;;  %5094 = vmatprep.mubr.bf16.mxu0 %v13954_v26  ;;  %v12966_v32 = vcombine.high %v6193_v62, %v6197_v10  ;;  %v12965_v46 = vcombine.low %v6193_v62, %v6197_v10 }
 0x28f   :  { %v4521_v41 = vpop.f32.mrf.mxu1  ;;  %5198 = vmatmul.mubr.bf16.gmra.mxu1 %v13953_v57  ;;  %v4410_v37 = vpop.f32.mrf.mxu0  ;;  %9113 = vmatprep.subr.bf16.mxu0 %v12846_v51  ;;  %v6057_v52 = vld [vmem:[#allocation9 + $0x280] sm:$0xff] }
 0x290   :  { %17948 = vst [vmem:[#allocation55_spill] sm:$0xff] %v14983_v13  ;;  %v14985_v0 = vadd.f32 %v4521_v41, %v4408_v35  ;;  %9225 = vmatpush2.bf16.msra.mxu1 %v12981_v25  ;;  %v6061_v7 = vld [vmem:[#allocation9 + $0x2a0] sm:$0xff]  ;;  %5207 = vmatprep.mubr.bf16.mxu1 %v17930_v38  ;;  %v12837_v25 = vcombine.low %v6065_v36, %v6069_v34 }
 0x291   :  { %v4523_v6 = vpop.f32.mrf.mxu1  ;;  %9226 = vmatprep.subr.bf16.mxu1 %v12974_v11  ;;  %v4412_v13 = vpop.f32.mrf.mxu0  ;;  %v6185_v59 = vld [vmem:[#allocation9 + $0x680] sm:$0xff]  ;;  %v12830_v11 = vcombine.high %v6057_v52, %v6061_v7 }
 0x292   :  { %17949 = vst [vmem:[#allocation56_spill] sm:$0xff] %v14985_v0  ;;  %v14987_v4 = vadd.f32 %v4523_v6, %v4410_v37  ;;  %v6189_v16 = vld [vmem:[#allocation9 + $0x6a0] sm:$0xff]  ;;  %9114 = vmatpush2.bf16.msra.mxu0 %v12845_v19 }
 0x293   :  { %v4525_v1 = vpop.f32.mrf.mxu1  ;;  %v4414_v58 = vpop.f32.mrf.mxu0  ;;  %9115 = vmatprep.subr.bf16.mxu0 %v12838_v2  ;;  %v12958_v41 = vcombine.high %v6185_v59, %v6189_v16  ;;  %v6049_v57 = vld [vmem:[#allocation9 + $0x240] sm:$0xff]  ;;  %v12957_v10 = vcombine.low %v6185_v59, %v6189_v16 }
 0x294   :  { %17950 = vst [vmem:[#allocation57_spill] sm:$0xff] %v14987_v4  ;;  %v14990_v51 = vadd.f32 %v4525_v1, %v4412_v13  ;;  %9227 = vmatpush2.bf16.msra.mxu1 %v12973_v8  ;;  %v6053_v37 = vld [vmem:[#allocation9 + $0x260] sm:$0xff]  ;;  %v13955_v4 = vld [vmem:[#allocation3 + $0x160] ss:$28 sps:$4 sm:$0xff]   ;;  %v12829_v13 = vcombine.low %v6057_v52, %v6061_v7 }
 0x295   :  { %v4527_v35 = vpop.f32.mrf.mxu1  ;;  %9228 = vmatprep.subr.bf16.mxu1 %v12966_v32  ;;  %v4418_v26 = vpop.f32.mrf.mxu0  ;;  %5095 = vmatmul.mubr.bf16.gmra.mxu0 %v13955_v4  ;;  %v6177_v0 = vld [vmem:[#allocation9 + $0x640] sm:$0xff]  ;;  %v12822_v2 = vcombine.high %v6049_v57, %v6053_v37  ;;  %v13957_v1 = vld [vmem:[#allocation3 + $0x19c] ss:$28 sps:$4 sm:$0xff]   ;;  %v12821_v7 = vcombine.low %v6049_v57, %v6053_v37 }
 0x296   :  { %v14992_v6 = vadd.f32 %v4527_v35, %v4414_v58  ;;  %v6181_v19 = vld [vmem:[#allocation9 + $0x660] sm:$0xff]  ;;  %9116 = vmatpush2.bf16.msra.mxu0 %v12837_v25  ;;  %5104 = vmatprep.mubr.bf16.mxu0 %v13957_v1 }
 0x297   :  { %v4531_v36 = vpop.f32.mrf.mxu1  ;;  %v13956_v34 = vld [vmem:[#allocation3 + $0x168] ss:$28 sps:$4 sm:$0xff]   ;;  %v4420_v62 = vpop.f32.mrf.mxu0  ;;  %9117 = vmatprep.subr.bf16.mxu0 %v12830_v11  ;;  %v12950_v58 = vcombine.high %v6177_v0, %v6181_v19  ;;  %v12949_v16 = vcombine.low %v6177_v0, %v6181_v19 }
 0x298   :  { %5208 = vmatmul.mubr.bf16.gmra.mxu1 %v13956_v34  ;;  %v14994_v8 = vadd.f32 %v4531_v36, %v4418_v26  ;;  %v6041_v34 = vld [vmem:[#allocation9 + $0x200] sm:$0xff] }
 0x299   :  { %9229 = vmatpush2.bf16.msra.mxu1 %v12965_v46  ;;  %v4533_v32 = vpop.f32.mrf.mxu1  ;;  %v4422_v35 = vpop.f32.mrf.mxu0  ;;  %5217 = vmatprep.mubr.bf16.mxu1 %v17930_v38  ;;  %v6045_v25 = vld [vmem:[#allocation9 + $0x220] sm:$0xff] }
 0x29a   :  { %17951 = vst [vmem:[#allocation58_spill] sm:$0xff] %v14994_v8  ;;  %9230 = vmatprep.subr.bf16.mxu1 %v12958_v41  ;;  %v14996_v4 = vadd.f32 %v4533_v32, %v4420_v62  ;;  %9118 = vmatpush2.bf16.msra.mxu0 %v12829_v13  ;;  %v6169_v46 = vld [vmem:[#allocation9 + $0x600] sm:$0xff]  ;;  %v12814_v36 = vcombine.high %v6041_v34, %v6045_v25 }
 0x29b   :  { %v4535_v52 = vpop.f32.mrf.mxu1  ;;  %v6173_v26 = vld [vmem:[#allocation9 + $0x620] sm:$0xff]  ;;  %v4424_v59 = vpop.f32.mrf.mxu0  ;;  %9119 = vmatprep.subr.bf16.mxu0 %v12822_v2 }
 0x29c   :  { %17952 = vst [vmem:[#allocation59_spill] sm:$0xff] %v14996_v4  ;;  %v14999_v11 = vadd.f32 %v4535_v52, %v4422_v35  ;;  %v6289_v62 = vld [vmem:[#allocation9 + $0x9c0] sm:$0xff]  ;;  %v13958_v4 = vld [vmem:[#allocation3 + $0x198] ss:$28 sps:$4 sm:$0xff]   ;;  %v12942_v13 = vcombine.high %v6169_v46, %v6173_v26  ;;  %v13959_v35 = vld [vmem:[#allocation3 + $0x1a0] ss:$28 sps:$4 sm:$0xff]   ;;  %v12941_v19 = vcombine.low %v6169_v46, %v6173_v26 }
 0x29d   :  { %9231 = vmatpush2.bf16.msra.mxu1 %v12957_v10  ;;  %v4537_v41 = vpop.f32.mrf.mxu1  ;;  %v6293_v32 = vld [vmem:[#allocation9 + $0x9e0] sm:$0xff]  ;;  %v4428_v38 = vpop.f32.mrf.mxu0  ;;  %5105 = vmatmul.mubr.bf16.gmra.mxu0 %v13958_v4  ;;  %v12813_v10 = vcombine.low %v6041_v34, %v6045_v25  ;;  %v17817_v26 = vsub.s32 4, %v14393_v20 }
 0x29e   :  { %9232 = vmatprep.subr.bf16.mxu1 %v12950_v58  ;;  %v15001_v1 = vadd.f32 %v4537_v41, %v4424_v59  ;;  %v6417_v57 = vld [vmem:[#allocation9 + $0xdc0] sm:$0xff]  ;;  %9120 = vmatpush2.bf16.msra.mxu0 %v12821_v7  ;;  %v13062_v58 = vcombine.high %v6289_v62, %v6293_v32 }
 0x29f   :  { %v6421_v37 = vld [vmem:[#allocation9 + $0xde0] sm:$0xff]  ;;  %v4541_v8 = vpop.f32.mrf.mxu1  ;;  %9123 = vmatprep.mubr.bf16.mxu0 %v14478_v33  ;;  %v4430_v0 = vpop.f32.mrf.mxu0  ;;  %9121 = vmatprep.subr.bf16.mxu0 %v12814_v36 }
 0x2a0   :  { %5218 = vmatmul.mubr.bf16.gmra.mxu1 %v13959_v35  ;;  %v15003_v2 = vadd.f32 %v4541_v8, %v4428_v38  ;;  %v13190_v4 = vcombine.high %v6417_v57, %v6421_v37  ;;  %v6281_v35 = vld [vmem:[#allocation9 + $0x980] sm:$0xff] }
 0x2a1   :  { %9233 = vmatpush2.bf16.msra.mxu1 %v12949_v16  ;;  %9236 = vmatprep.mubr.bf16.mxu1 %v14784_v12  ;;  %v4543_v52 = vpop.f32.mrf.mxu1  ;;  %v4432_v41 = vpop.f32.mrf.mxu0  ;;  %v6285_v7 = vld [vmem:[#allocation9 + $0x9a0] sm:$0xff]  ;;  %v13061_v16 = vcombine.low %v6289_v62, %v6293_v32 }
 0x2a2   :  { %v15007_v59 = vadd.f32 %v4543_v52, %v4430_v0  ;;  %9234 = vmatprep.subr.bf16.mxu1 %v12942_v13  ;;  %9122 = vmatpush2.bf16.msra.mxu0 %v12813_v10  ;;  %v6409_v8 = vld [vmem:[#allocation9 + $0xd80] sm:$0xff]  ;;  %v13054_v12 = vcombine.high %v6281_v35, %v6285_v7  ;;  %v13189_v13 = vcombine.low %v6417_v57, %v6421_v37  ;;  %v13960_v57 = vld [vmem:[#allocation8] sm:$0xff] }
 0x2a3   :  { %v4545_v34 = vpop.f32.mrf.mxu1  ;;  %v6413_v25 = vld [vmem:[#allocation9 + $0xda0] sm:$0xff]  ;;  %v4434_v46 = vpop.f32.mrf.mxu0  ;;  %9317 = vmatprep.subr.bf16.mxu0 %v13062_v58  ;;  %v15029_v37 = vrot.slane %v13960_v57, %v17817_v26 }
 0x2a4   :  { %v15009_v38 = vadd.f32 %v4545_v34, %v4432_v41  ;;  %v15012_v0 = vld [vmem:[#allocation9 + $0x940] sm:$0xff]  ;;  %v13182_v41 = vcombine.high %v6409_v8, %v6413_v25  ;;  %v13181_v26 = vcombine.low %v6409_v8, %v6413_v25 }
 0x2a5   :  { %9235 = vmatpush2.bf16.msra.mxu1 %v12941_v19  ;;  %v4547_v36 = vpop.f32.mrf.mxu1  ;;  %v15014_v52 = vld [vmem:[#allocation9 + $0x960] sm:$0xff]  ;;  %v4584_v10 = vpop.f32.mrf.mxu0  ;;  %9124 = vmatmul.mubr.bf16.vlgmr.msra.gmra.mxu0 %v14469_v39  ;;  %v17953_v39 = vsub.s32 5, %v14393_v20 }
 0x2a6   :  { %9430 = vmatprep.subr.bf16.mxu1 %v13190_v4  ;;  %v15016_v33 = vadd.f32 %v4547_v36, %v4434_v46  ;;  %v4585_v34 = vadd.f32 %v4584_v10, %v14931_v55  ;;  %9133 = vmatprep.mubr.bf16.mxu0 %v14526_v3  ;;  %v15023_v32 = vld [vmem:[#allocation9 + $0xd40] sm:$0xff]  ;;  %v13053_v46 = vcombine.low %v6281_v35, %v6285_v7 }
 0x2a7   :  { %v4697_v62 = vpop.f32.mrf.mxu1  ;;  %v15025_v58 = vld [vmem:[#allocation9 + $0xd60] sm:$0xff]  ;;  %9318 = vmatpush1.bf16.msra.mxu0 %v13061_v16  ;;  %v4586_v4 = vpop.f32.mrf.mxu0  ;;  %v13046_v55 = vcombine.high %v15012_v0, %v15014_v52  ;;  %v13045_v8 = vcombine.low %v15012_v0, %v15014_v52 }
 0x2a8   :  { %9237 = vmatmul.mubr.bf16.vlgmr.msra.gmra.mxu1 %v14775_v45  ;;  %v4698_v36 = vadd.f32 %v4697_v62, %v4585_v34  ;;  %v4587_v10 = vadd.f32 %v4586_v4, %v14936_v60  ;;  %9319 = vmatprep.subr.bf16.mxu0 %v13054_v12  ;;  %v15035_v45 = vld [vmem:[#allocation9 + $0x900] sm:$0xff]  ;;  %v13174_v35 = vcombine.high %v15023_v32, %v15025_v58 }
 0x2a9   :  { %9246 = vmatprep.mubr.bf16.mxu1 %v14832_v14  ;;  %v4699_v19 = vpop.f32.mrf.mxu1  ;;  %v15037_v3 = vld [vmem:[#allocation9 + $0x920] sm:$0xff]  ;;  %9431 = vmatpush1.bf16.msra.mxu1 %v13189_v13  ;;  %v15041_v14 = vrot.slane %v13960_v57, %v17953_v39  ;;  %v4588_v16 = vpop.f32.mrf.mxu0  ;;  %v13173_v25 = vcombine.low %v15023_v32, %v15025_v58 }
 0x2aa   :  { %9432 = vmatprep.subr.bf16.mxu1 %v13182_v41  ;;  %v4700_v7 = vadd.f32 %v4699_v19, %v4587_v10  ;;  %v4589_v60 = vadd.f32 %v4588_v16, %v14943_v63  ;;  %v15046_v12 = vld [vmem:[#allocation9 + $0xd00] sm:$0xff]  ;;  %v13038_v39 = vcombine.high %v15035_v45, %v15037_v3  ;;  %v5661_v19 = vadd.f32 %v15029_v37, %v4698_v36 }
 0x2ab   :  { %v4701_v34 = vpop.f32.mrf.mxu1  ;;  %v15048_v62 = vld [vmem:[#allocation9 + $0xd20] sm:$0xff]  ;;  %9320 = vmatpush1.bf16.msra.mxu0 %v13053_v46  ;;  %v4590_v13 = vpop.f32.mrf.mxu0 }
 0x2ac   :  { %v4702_v41 = vadd.f32 %v4701_v34, %v4589_v60  ;;  %v4591_v63 = vadd.f32 %v4590_v13, %v14947_v5  ;;  %9321 = vmatprep.subr.bf16.mxu0 %v13046_v55  ;;  %v15058_v4 = vld [vmem:[#allocation9 + $0x8c0] sm:$0xff]  ;;  %v5662_v0 = vadd.f32 %v15041_v14, %v4700_v7  ;;  %v13166_v32 = vcombine.high %v15046_v12, %v15048_v62 }
 0x2ad   :  { %v4703_v57 = vpop.f32.mrf.mxu1  ;;  %v15060_v46 = vld [vmem:[#allocation9 + $0x8e0] sm:$0xff]  ;;  %9433 = vmatpush1.bf16.msra.mxu1 %v13181_v26  ;;  %v4594_v52 = vpop.f32.mrf.mxu0  ;;  %9134 = vmatmul.mubr.bf16.gmra.mxu0 %v14518_v44  ;;  %v5789_v60 = vmax.f32 %v5661_v19, 0.0 }
 0x2ae   :  { %9434 = vmatprep.subr.bf16.mxu1 %v13174_v35  ;;  %v5669_v58 = vadd.f32 %v15029_v37, %v4702_v41  ;;  %v4704_v36 = vadd.f32 %v4703_v57, %v4591_v63  ;;  %v4595_v5 = vadd.f32 %v4594_v52, %v14949_v43  ;;  %9143 = vmatprep.mubr.bf16.mxu0 %v14558_v24  ;;  %v15070_v26 = vld [vmem:[#allocation9 + $0xcc0] sm:$0xff] }
 0x2af   :  { %v4707_v55 = vpop.f32.mrf.mxu1  ;;  %v15072_v10 = vld [vmem:[#allocation9 + $0xce0] sm:$0xff]  ;;  %9322 = vmatpush1.bf16.msra.mxu0 %v13045_v8  ;;  %v4596_v16 = vpop.f32.mrf.mxu0  ;;  %v13037_v35 = vcombine.low %v15035_v45, %v15037_v3  ;;  %v13030_v7 = vcombine.high %v15058_v4, %v15060_v46  ;;  %v13165_v43 = vcombine.low %v15046_v12, %v15048_v62  ;;  %v5790_v12 = vmax.f32 %v5662_v0, 0.0 }
 0x2b0   :  { %9247 = vmatmul.mubr.bf16.gmra.mxu1 %v14824_v30  ;;  %v5797_v34 = vmax.f32 %v5669_v58, 0.0  ;;  %v5670_v13 = vadd.f32 %v15041_v14, %v4704_v36  ;;  %v4597_v41 = vadd.f32 %v4596_v16, %v14951_v47  ;;  %9323 = vmatprep.subr.bf16.mxu0 %v13038_v39  ;;  %v15083_v57 = vld [vmem:[#allocation9 + $0x880] sm:$0xff]  ;;  %v4708_v3 = vadd.f32 %v4707_v55, %v4595_v5 }
 0x2b1   :  { %9256 = vmatprep.mubr.bf16.mxu1 %v14864_v27  ;;  %v4709_v63 = vpop.f32.mrf.mxu1  ;;  %v15085_v8 = vld [vmem:[#allocation9 + $0x8a0] sm:$0xff]  ;;  %9435 = vmatpush1.bf16.msra.mxu1 %v13173_v25  ;;  %v4598_v45 = vpop.f32.mrf.mxu0  ;;  %v13158_v52 = vcombine.high %v15070_v26, %v15072_v10 }
 0x2b2   :  { %9436 = vmatprep.subr.bf16.mxu1 %v13166_v32  ;;  %v15089_v62 = vpack.c.bf16 %v5797_v34, %v5789_v60  ;;  %v5798_v19 = vmax.f32 %v5670_v13, 0.0  ;;  %v4710_v58 = vadd.f32 %v4709_v63, %v4597_v41  ;;  %v15091_v47 = vld [vmem:[#allocation9 + $0xc80] sm:$0xff]  ;;  %v4599_v16 = vadd.f32 %v4598_v45, %v14954_v17  ;;  %v17956_v63 = vld [vmem:[#allocation28_spill] sm:$0xff] }
 0x2b3   :  { %v4711_v36 = vpop.f32.mrf.mxu1  ;;  %v15093_v39 = vld [vmem:[#allocation9 + $0xca0] sm:$0xff]  ;;  %9324 = vmatpush1.bf16.msra.mxu0 %v13037_v35  ;;  %v4600_v25 = vpop.f32.mrf.mxu0  ;;  %v13029_v32 = vcombine.low %v15058_v4, %v15060_v46  ;;  %v13021_v5 = vcombine.low %v15083_v57, %v15085_v8  ;;  %v13022_v0 = vcombine.high %v15083_v57, %v15085_v8  ;;  %v13157_v4 = vcombine.low %v15070_v26, %v15072_v10 }
 0x2b4   :  { %17954 = vst [vmem:[#allocation60_spill] sm:$0xff] %v15089_v62  ;;  %v15102_v55 = vpack.c.bf16 %v5798_v19, %v5790_v12  ;;  %v4601_v60 = vadd.f32 %v4600_v25, %v14956_v61  ;;  %9325 = vmatprep.subr.bf16.mxu0 %v13030_v7  ;;  %v15105_v13 = vld [vmem:[#allocation9 + $0x840] sm:$0xff]  ;;  %v5677_v46 = vadd.f32 %v15029_v37, %v4708_v3  ;;  %v15123_v3 = vld [vmem:[#allocation9 + $0x5c8] sm:$0xff] }
 0x2b5   :  { %v4713_v34 = vpop.f32.mrf.mxu1  ;;  %v15107_v17 = vld [vmem:[#allocation9 + $0x860] sm:$0xff]  ;;  %9437 = vmatpush1.bf16.msra.mxu1 %v13165_v43  ;;  %v4712_v35 = vadd.f32 %v4711_v36, %v4599_v16  ;;  %v4604_v41 = vpop.f32.mrf.mxu0  ;;  %9144 = vmatmul.mubr.bf16.gmra.mxu0 %v17956_v63  ;;  %v13150_v61 = vcombine.high %v15091_v47, %v15093_v39  ;;  %v5678_v7 = vadd.f32 %v15041_v14, %v4710_v58 }
 0x2b6   :  { %17955 = vst [vmem:[#allocation61_spill] sm:$0xff] %v15102_v55  ;;  %9438 = vmatprep.subr.bf16.mxu1 %v13158_v52  ;;  %v15115_v57 = vld [vmem:[#allocation9 + $0xc40] sm:$0xff]  ;;  %v4714_v8 = vadd.f32 %v4713_v34, %v4601_v60  ;;  %v4605_v43 = vadd.f32 %v4604_v41, %v14958_v49  ;;  %v15125_v52 = vld [vmem:[#allocation9 + $0x5e8] sm:$0xff]  ;;  %v13014_v49 = vcombine.high %v15105_v13, %v15107_v17 }
 0x2b7   :  { %v4717_v45 = vpop.f32.mrf.mxu1  ;;  %v17957_v26 = vld [vmem:[#allocation30_spill] sm:$0xff]  ;;  %v5685_v12 = vadd.f32 %v15029_v37, %v4712_v35  ;;  %9326 = vmatpush1.bf16.msra.mxu0 %v13029_v32  ;;  %v4606_v19 = vpop.f32.mrf.mxu0  ;;  %v13149_v58 = vcombine.low %v15091_v47, %v15093_v39  ;;  %v5805_v32 = vmax.f32 %v5677_v46, 0.0  ;;  %v5806_v39 = vmax.f32 %v5678_v7, 0.0 }
 0x2b8   :  { %9257 = vmatmul.mubr.bf16.gmra.mxu1 %v14857_v42  ;;  %9153 = vmatprep.mubr.bf16.mxu0 %v17957_v26  ;;  %v15121_v10 = vld [vmem:[#allocation9 + $0xc60] sm:$0xff]  ;;  %v5686_v36 = vadd.f32 %v15041_v14, %v4714_v8  ;;  %v4718_v16 = vadd.f32 %v4717_v45, %v4605_v43  ;;  %v4607_v25 = vadd.f32 %v4606_v19, %v14960_v18 }
 0x2b9   :  { %9266 = vmatprep.mubr.bf16.mxu1 %v14874_v56  ;;  %v4719_v60 = vpop.f32.mrf.mxu1  ;;  %9327 = vmatprep.subr.bf16.mxu0 %v13022_v0  ;;  %v15135_v34 = vld [vmem:[#allocation9 + $0x800] sm:$0xff]  ;;  %v5813_v41 = vmax.f32 %v5685_v12, 0.0  ;;  %v4608_v56 = vpop.f32.mrf.mxu0  ;;  %v13142_v42 = vcombine.high %v15115_v57, %v15121_v10  ;;  %v13013_v43 = vcombine.low %v15105_v13, %v15107_v17 }
 0x2ba   :  { %v15137_v35 = vld [vmem:[#allocation9 + $0x820] sm:$0xff]  ;;  %9439 = vmatpush1.bf16.msra.mxu1 %v13157_v4  ;;  %v5814_v8 = vmax.f32 %v5686_v36, 0.0  ;;  %v4609_v18 = vadd.f32 %v4608_v56, %v14963_v40  ;;  %v13141_v56 = vcombine.low %v15115_v57, %v15121_v10  ;;  %v5693_v13 = vadd.f32 %v15029_v37, %v4718_v16 }
 0x2bb   :  { %9440 = vmatprep.subr.bf16.mxu1 %v13150_v61  ;;  %v4721_v0 = vpop.f32.mrf.mxu1  ;;  %v15146_v45 = vld [vmem:[#allocation9 + $0xc00] sm:$0xff]  ;;  %v15150_v46 = vpack.c.bf16 %v5813_v41, %v5805_v32  ;;  %v4720_v61 = vadd.f32 %v4719_v60, %v4607_v25  ;;  %9328 = vmatpush1.bf16.msra.mxu0 %v13021_v5  ;;  %v4610_v12 = vpop.f32.mrf.mxu0  ;;  %v13006_v19 = vcombine.high %v15135_v34, %v15137_v35  ;;  %v17960_v60 = vld [vmem:[#allocation29_spill] sm:$0xff] }
 0x2bc   :  { %v15148_v4 = vld [vmem:[#allocation9 + $0xc20] sm:$0xff]  ;;  %v15160_v40 = vpack.c.bf16 %v5814_v8, %v5806_v39  ;;  %v4722_v17 = vadd.f32 %v4721_v0, %v4609_v18  ;;  %9329 = vmatprep.subr.bf16.mxu0 %v13014_v49  ;;  %v4611_v5 = vadd.f32 %v4610_v12, %v14965_v15  ;;  %v13005_v41 = vcombine.low %v15135_v34, %v15137_v35  ;;  %v17961_v49 = vld [vmem:[#allocation32_spill] sm:$0xff] }
 0x2bd   :  { %17958 = vst [vmem:[#allocation28_spill] sm:$0xff] %v15150_v46  ;;  %v15154_v7 = vld [vmem:[#allocation9 + $0xbc0] sm:$0xff]  ;;  %v4723_v32 = vpop.f32.mrf.mxu1  ;;  %v4614_v25 = vpop.f32.mrf.mxu0  ;;  %9154 = vmatmul.mubr.bf16.gmra.mxu0 %v17960_v60  ;;  %v13134_v57 = vcombine.high %v15146_v45, %v15148_v4  ;;  %v5821_v18 = vmax.f32 %v5693_v13, 0.0 }
 0x2be   :  { %v15156_v36 = vld [vmem:[#allocation9 + $0xbe0] sm:$0xff]  ;;  %17959 = vst [vmem:[#allocation30_spill] sm:$0xff] %v15160_v40  ;;  %9441 = vmatpush1.bf16.msra.mxu1 %v13149_v58  ;;  %v5701_v10 = vadd.f32 %v15029_v37, %v4722_v17  ;;  %v4615_v16 = vadd.f32 %v4614_v25, %v14967_v48  ;;  %9163 = vmatprep.mubr.bf16.mxu0 %v17961_v49 }
 0x2bf   :  { %9442 = vmatprep.subr.bf16.mxu1 %v13142_v42  ;;  %v4727_v39 = vpop.f32.mrf.mxu1  ;;  %v13126_v15 = vcombine.high %v15154_v7, %v15156_v36  ;;  %v15175_v58 = vld [vmem:[#allocation9 + $0xfc0] sm:$0xff]  ;;  %v5694_v42 = vadd.f32 %v15041_v14, %v4720_v61  ;;  %v4724_v34 = vadd.f32 %v4723_v32, %v4611_v5  ;;  %9330 = vmatpush1.bf16.msra.mxu0 %v13013_v43  ;;  %v4616_v35 = vpop.f32.mrf.mxu0 }
 0x2c0   :  { %9267 = vmatmul.mubr.bf16.gmra.mxu1 %v14871_v31  ;;  %v15177_v8 = vld [vmem:[#allocation9 + $0xfe0] sm:$0xff]  ;;  %v13133_v48 = vcombine.low %v15146_v45, %v15148_v4  ;;  %v5829_v0 = vmax.f32 %v5701_v10, 0.0  ;;  %v4728_v12 = vadd.f32 %v4727_v39, %v4615_v16  ;;  %v4617_v17 = vadd.f32 %v4616_v35, %v14969_v9  ;;  %9331 = vmatprep.subr.bf16.mxu0 %v13006_v19 }
 0x2c1   :  { %9276 = vmatprep.mubr.bf16.mxu1 %v14886_v50  ;;  %v4729_v25 = vpop.f32.mrf.mxu1  ;;  %v15184_v47 = vld [vmem:[#allocation9 + $0xb80] sm:$0xff]  ;;  %v5702_v61 = vadd.f32 %v15041_v14, %v4724_v34  ;;  %v4618_v32 = vpop.f32.mrf.mxu0  ;;  %v13254_v43 = vcombine.high %v15175_v58, %v15177_v8  ;;  %v13125_v19 = vcombine.low %v15154_v7, %v15156_v36  ;;  %v13253_v34 = vcombine.low %v15175_v58, %v15177_v8 }
 0x2c2   :  { %v15186_v31 = vld [vmem:[#allocation9 + $0xba0] sm:$0xff]  ;;  %9443 = vmatpush1.bf16.msra.mxu1 %v13141_v56  ;;  %v15191_v45 = vpack.c.bf16 %v5829_v0, %v5821_v18  ;;  %v4730_v4 = vadd.f32 %v4729_v25, %v4617_v17  ;;  %v4619_v13 = vadd.f32 %v4618_v32, %v14972_v23  ;;  %v5822_v56 = vmax.f32 %v5694_v42, 0.0 }
 0x2c3   :  { %9444 = vmatprep.subr.bf16.mxu1 %v13134_v57  ;;  %v4731_v9 = vpop.f32.mrf.mxu1  ;;  %v15196_v5 = vld [vmem:[#allocation9 + $0xf80] sm:$0xff]  ;;  %v5830_v16 = vmax.f32 %v5702_v61, 0.0  ;;  %9332 = vmatpush1.bf16.msra.mxu0 %v13005_v41  ;;  %v4620_v57 = vpop.f32.mrf.mxu0  ;;  %v13118_v39 = vcombine.high %v15184_v47, %v15186_v31  ;;  %v5709_v23 = vadd.f32 %v15029_v37, %v4728_v12 }
 0x2c4   :  { %17962 = vst [vmem:[#allocation62_spill] sm:$0xff] %v15191_v45  ;;  %v15198_v10 = vld [vmem:[#allocation9 + $0xfa0] sm:$0xff]  ;;  %v4732_v35 = vadd.f32 %v4731_v9, %v4619_v13  ;;  %v4621_v18 = vadd.f32 %v4620_v57, %v14974_v54  ;;  %9333 = vmatprep.subr.bf16.mxu0 %v13126_v15  ;;  %v5710_v42 = vadd.f32 %v15041_v14, %v4730_v4 }
 0x2c5   :  { %v4733_v7 = vpop.f32.mrf.mxu1  ;;  %v15206_v36 = vld [vmem:[#allocation9 + $0xb40] sm:$0xff]  ;;  %v15210_v41 = vpack.c.bf16 %v5830_v16, %v5822_v56  ;;  %v4624_v17 = vpop.f32.mrf.mxu0  ;;  %v13246_v58 = vcombine.high %v15196_v5, %v15198_v10  ;;  %v13117_v4 = vcombine.low %v15184_v47, %v15186_v31  ;;  %v5837_v9 = vmax.f32 %v5709_v23, 0.0 }
 0x2c6   :  { %v15208_v0 = vld [vmem:[#allocation9 + $0xb60] sm:$0xff]  ;;  %9445 = vmatpush1.bf16.msra.mxu1 %v13133_v48  ;;  %v5717_v54 = vadd.f32 %v15029_v37, %v4732_v35  ;;  %v4734_v8 = vadd.f32 %v4733_v7, %v4621_v18  ;;  %v4625_v15 = vadd.f32 %v4624_v17, %v14976_v28  ;;  %v13245_v28 = vcombine.low %v15196_v5, %v15198_v10 }
 0x2c7   :  { %17963 = vst [vmem:[#allocation63_spill] sm:$0xff] %v15210_v41  ;;  %v17964_v25 = vld [vmem:[#allocation31_spill] sm:$0xff]  ;;  %9446 = vmatprep.subr.bf16.mxu1 %v13254_v43  ;;  %v4737_v12 = vpop.f32.mrf.mxu1  ;;  %v17965_v48 = vld [vmem:[#allocation34_spill] sm:$0xff]  ;;  %9334 = vmatpush2.bf16.msra.mxu0 %v13125_v19  ;;  %v4626_v43 = vpop.f32.mrf.mxu0  ;;  %v13110_v13 = vcombine.high %v15206_v36, %v15208_v0  ;;  %v5838_v5 = vmax.f32 %v5710_v42, 0.0 }
 0x2c8   :  { %9164 = vmatmul.mubr.bf16.gmra.mxu0 %v17964_v25  ;;  %9277 = vmatmul.mubr.bf16.gmra.mxu1 %v14884_v29  ;;  %v15220_v61 = vld [vmem:[#allocation9 + $0xf40] sm:$0xff]  ;;  %v5845_v56 = vmax.f32 %v5717_v54, 0.0  ;;  %v5718_v16 = vadd.f32 %v15041_v14, %v4734_v8  ;;  %v4627_v57 = vadd.f32 %v4626_v43, %v14978_v53  ;;  %v4738_v31 = vadd.f32 %v4737_v12, %v4625_v15 }
 0x2c9   :  { %9173 = vmatprep.mubr.bf16.mxu0 %v17965_v48  ;;  %v15222_v32 = vld [vmem:[#allocation9 + $0xf60] sm:$0xff]  ;;  %9286 = vmatprep.mubr.bf16.mxu1 %v14902_v22  ;;  %v4739_v35 = vpop.f32.mrf.mxu1  ;;  %v4628_v47 = vpop.f32.mrf.mxu0 }
 0x2ca   :  { %9335 = vmatprep.subr.bf16.mxu0 %v13118_v39  ;;  %v15233_v18 = vld [vmem:[#allocation9 + $0xb00] sm:$0xff]  ;;  %9447 = vmatpush2.bf16.msra.mxu1 %v13253_v34  ;;  %v13238_v7 = vcombine.high %v15220_v61, %v15222_v32  ;;  %v15239_v10 = vpack.c.bf16 %v5845_v56, %v5837_v9  ;;  %v5846_v23 = vmax.f32 %v5718_v16, 0.0  ;;  %v4740_v17 = vadd.f32 %v4739_v35, %v4627_v57  ;;  %v17969_v35 = vld [vmem:[#allocation33_spill] sm:$0xff] }
 0x2cb   :  { %v15235_v19 = vld [vmem:[#allocation9 + $0xb20] sm:$0xff]  ;;  %9448 = vmatprep.subr.bf16.mxu1 %v13246_v58  ;;  %v4741_v54 = vpop.f32.mrf.mxu1  ;;  %v4629_v8 = vadd.f32 %v4628_v47, %v14981_v21  ;;  %9336 = vmatpush2.bf16.msra.mxu0 %v13117_v4  ;;  %v4630_v34 = vpop.f32.mrf.mxu0  ;;  %v13109_v58 = vcombine.low %v15206_v36, %v15208_v0  ;;  %v13237_v36 = vcombine.low %v15220_v61, %v15222_v32  ;;  %v17970_v47 = vld [vmem:[#allocation56_spill] sm:$0xff] }
 0x2cc   :  { %17966 = vst [vmem:[#allocation64_spill] sm:$0xff] %v15239_v10  ;;  %v15241_v53 = vld [vmem:[#allocation9 + $0xf00] sm:$0xff]  ;;  %v13101_v15 = vcombine.low %v15233_v18, %v15235_v19  ;;  %v13102_v42 = vcombine.high %v15233_v18, %v15235_v19  ;;  %v15252_v12 = vpack.c.bf16 %v5846_v23, %v5838_v5  ;;  %9337 = vmatprep.subr.bf16.mxu0 %v13110_v13 }
 0x2cd   :  { %v15243_v39 = vld [vmem:[#allocation9 + $0xf20] sm:$0xff]  ;;  %v4743_v56 = vpop.f32.mrf.mxu1  ;;  %v5725_v0 = vadd.f32 %v15029_v37, %v4738_v31  ;;  %v4742_v4 = vadd.f32 %v4741_v54, %v4629_v8  ;;  %v4634_v57 = vpop.f32.mrf.mxu0  ;;  %v5726_v13 = vadd.f32 %v15041_v14, %v4740_v17 }
 0x2ce   :  { %17967 = vst [vmem:[#allocation65_spill] sm:$0xff] %v15252_v12  ;;  %v17968_v43 = vld [vmem:[#allocation55_spill] sm:$0xff]  ;;  %9449 = vmatpush2.bf16.msra.mxu1 %v13245_v28  ;;  %v13230_v18 = vcombine.high %v15241_v53, %v15243_v39  ;;  %v4635_v5 = vadd.f32 %v4634_v57, %v17970_v47  ;;  %v17971_v28 = vld [vmem:[#allocation49_spill] sm:$0xff]  ;;  %v13229_v8 = vcombine.low %v15241_v53, %v15243_v39 }
 0x2cf   :  { %v4631_v9 = vadd.f32 %v4630_v34, %v17968_v43  ;;  %v15255_v16 = vld [vmem:[#allocation9 + $0xac0] sm:$0xff]  ;;  %9450 = vmatprep.subr.bf16.mxu1 %v13238_v7  ;;  %v4747_v23 = vpop.f32.mrf.mxu1  ;;  %v17972_v34 = vld [vmem:[#allocation36_spill] sm:$0xff]  ;;  %v5733_v31 = vadd.f32 %v15029_v37, %v4742_v4  ;;  %9338 = vmatpush2.bf16.msra.mxu0 %v13109_v58  ;;  %v4636_v54 = vpop.f32.mrf.mxu0  ;;  %v5853_v58 = vmax.f32 %v5725_v0, 0.0  ;;  %v5854_v53 = vmax.f32 %v5726_v13, 0.0 }
 0x2d0   :  { %v15257_v21 = vld [vmem:[#allocation9 + $0xae0] sm:$0xff]  ;;  %9174 = vmatmul.mubr.bf16.gmra.mxu0 %v17969_v35  ;;  %9287 = vmatmul.mubr.bf16.gmra.mxu1 %v17971_v28  ;;  %v17973_v7 = vld [vmem:[#allocation52_spill] sm:$0xff] }
 0x2d1   :  { %v4744_v19 = vadd.f32 %v4743_v56, %v4631_v9  ;;  %9183 = vmatprep.mubr.bf16.mxu0 %v17972_v34  ;;  %v15269_v61 = vld [vmem:[#allocation9 + $0xec0] sm:$0xff]  ;;  %9296 = vmatprep.mubr.bf16.mxu1 %v17973_v7  ;;  %v13094_v17 = vcombine.high %v15255_v16, %v15257_v21  ;;  %v4748_v9 = vadd.f32 %v4747_v23, %v4635_v5  ;;  %v17974_v56 = vld [vmem:[#allocation57_spill] sm:$0xff]  ;;  %v4749_v47 = vpop.f32.mrf.mxu1  ;;  %v5861_v7 = vmax.f32 %v5733_v31, 0.0  ;;  %v4638_v22 = vpop.f32.mrf.mxu0 }
 0x2d2   :  { %v15271_v32 = vld [vmem:[#allocation9 + $0xee0] sm:$0xff]  ;;  %v4637_v57 = vadd.f32 %v4636_v54, %v17974_v56  ;;  %9339 = vmatprep.subr.bf16.mxu0 %v13102_v42  ;;  %9451 = vmatpush2.bf16.msra.mxu1 %v13237_v36  ;;  %v13093_v42 = vcombine.low %v15255_v16, %v15257_v21 }
 0x2d3   :  { %v5734_v43 = vadd.f32 %v15041_v14, %v4744_v19  ;;  %v15281_v28 = vld [vmem:[#allocation9 + $0xa80] sm:$0xff]  ;;  %9452 = vmatprep.subr.bf16.mxu1 %v13230_v18  ;;  %v13222_v29 = vcombine.high %v15269_v61, %v15271_v32  ;;  %v4639_v19 = vadd.f32 %v4638_v22, %v14990_v51  ;;  %v4751_v5 = vpop.f32.mrf.mxu1  ;;  %v15294_v36 = vpack.c.bf16 %v5861_v7, %v5853_v58  ;;  %v4640_v18 = vpop.f32.mrf.mxu0 }
 0x2d4   :  { %v15283_v4 = vld [vmem:[#allocation9 + $0xaa0] sm:$0xff]  ;;  %v4750_v0 = vadd.f32 %v4749_v47, %v4637_v57  ;;  %9340 = vmatpush2.bf16.msra.mxu0 %v13101_v15  ;;  %v13221_v22 = vcombine.low %v15269_v61, %v15271_v32  ;;  %v5741_v16 = vadd.f32 %v15029_v37, %v4748_v9  ;;  %v4641_v15 = vadd.f32 %v4640_v18, %v14992_v6 }
 0x2d5   :  { %v5862_v39 = vmax.f32 %v5734_v43, 0.0  ;;  %v15290_v23 = vld [vmem:[#allocation9 + $0xe80] sm:$0xff]  ;;  %17975 = vst [vmem:[#allocation55_spill] sm:$0xff] %v15294_v36  ;;  %v13086_v31 = vcombine.high %v15281_v28, %v15283_v4  ;;  %v4752_v21 = vadd.f32 %v4751_v5, %v4639_v19  ;;  %v4753_v7 = vpop.f32.mrf.mxu1  ;;  %9341 = vmatprep.subr.bf16.mxu0 %v13094_v17  ;;  %v4644_v56 = vpop.f32.mrf.mxu0  ;;  %v13085_v47 = vcombine.low %v15281_v28, %v15283_v4 }
 0x2d6   :  { %v15292_v54 = vld [vmem:[#allocation9 + $0xea0] sm:$0xff]  ;;  %9453 = vmatpush2.bf16.msra.mxu1 %v13229_v8  ;;  %v4754_v28 = vadd.f32 %v4753_v7, %v4641_v15 }
 0x2d7   :  { %v15298_v13 = vld [vmem:[#allocation9 + $0xa40] sm:$0xff]  ;;  %v15304_v51 = vpack.c.bf16 %v5862_v39, %v5854_v53  ;;  %9454 = vmatprep.subr.bf16.mxu1 %v13222_v29  ;;  %v13214_v61 = vcombine.high %v15290_v23, %v15292_v54  ;;  %v5749_v32 = vadd.f32 %v15029_v37, %v4752_v21  ;;  %v4757_v53 = vpop.f32.mrf.mxu1  ;;  %v5742_v29 = vadd.f32 %v15041_v14, %v4750_v0  ;;  %v4646_v5 = vpop.f32.mrf.mxu0 }
 0x2d8   :  { %v15300_v43 = vld [vmem:[#allocation9 + $0xa60] sm:$0xff]  ;;  %9342 = vmatpush2.bf16.msra.mxu0 %v13093_v42  ;;  %v13213_v18 = vcombine.low %v15290_v23, %v15292_v54  ;;  %v5869_v21 = vmax.f32 %v5741_v16, 0.0  ;;  %v5750_v0 = vadd.f32 %v15041_v14, %v4754_v28 }
 0x2d9   :  { %17976 = vst [vmem:[#allocation56_spill] sm:$0xff] %v15304_v51  ;;  %v17977_v57 = vld [vmem:[#allocation35_spill] sm:$0xff]  ;;  %v17978_v58 = vld [vmem:[#allocation58_spill] sm:$0xff]  ;;  %v13078_v6 = vcombine.high %v15298_v13, %v15300_v43  ;;  %v4759_v27 = vpop.f32.mrf.mxu1  ;;  %9343 = vmatprep.subr.bf16.mxu0 %v13086_v31  ;;  %v4648_v7 = vpop.f32.mrf.mxu0  ;;  %v13077_v31 = vcombine.low %v15298_v13, %v15300_v43 }
 0x2da   :  { %9184 = vmatmul.mubr.bf16.gmra.mxu0 %v17977_v57  ;;  %v4645_v9 = vadd.f32 %v4644_v56, %v17978_v58  ;;  %v17979_v39 = vld [vmem:[#allocation51_spill] sm:$0xff]  ;;  %v17980_v17 = vld [vmem:[#allocation38_spill] sm:$0xff]  ;;  %v5877_v56 = vmax.f32 %v5749_v32, 0.0  ;;  %9455 = vmatpush2.bf16.msra.mxu1 %v13221_v22  ;;  %v4649_v16 = vadd.f32 %v4648_v7, %v14999_v11  ;;  %v5878_v22 = vmax.f32 %v5750_v0, 0.0  ;;  %v17986_v7 = vld [vmem:[#allocation53_spill] sm:$0xff] }
 0x2db   :  { %9297 = vmatmul.mubr.bf16.gmra.mxu1 %v17979_v39  ;;  %9193 = vmatprep.mubr.bf16.mxu0 %v17980_v17  ;;  %v15319_v8 = vld [vmem:[#allocation9 + $0xe40] sm:$0xff]  ;;  %v4761_v15 = vpop.f32.mrf.mxu1  ;;  %v6034_v13 = vld [vmem:[#allocation9 + $0x1c8] sm:$0xff] }
 0x2dc   :  { %v15321_v19 = vld [vmem:[#allocation9 + $0xe60] sm:$0xff]  ;;  %v4758_v58 = vadd.f32 %v4757_v53, %v4645_v9  ;;  %9456 = vmatprep.subr.bf16.mxu1 %v13214_v61  ;;  %v15335_v23 = vpack.c.bf16 %v5877_v56, %v5869_v21  ;;  %v5870_v53 = vmax.f32 %v5742_v29, 0.0  ;;  %9344 = vmatpush2.bf16.msra.mxu0 %v13085_v47  ;;  %v6038_v43 = vld [vmem:[#allocation9 + $0x1e8] sm:$0xff]  ;;  %v17985_v56 = vld [vmem:[#allocation37_spill] sm:$0xff] }
 0x2dd   :  { %v17981_v4 = vld [vmem:[#allocation54_spill] sm:$0xff]  ;;  %v17982_v39 = vld [vmem:[#allocation59_spill] sm:$0xff]  ;;  %v13206_v42 = vcombine.high %v15319_v8, %v15321_v19  ;;  %v13205_v28 = vcombine.low %v15319_v8, %v15321_v19  ;;  %9345 = vmatprep.subr.bf16.mxu0 %v13078_v6 }
 0x2de   :  { %9306 = vmatprep.mubr.bf16.mxu1 %v17981_v4  ;;  %v4647_v50 = vadd.f32 %v4646_v5, %v17982_v39  ;;  %v15328_v30 = vld [vmem:[#allocation9 + $0xa00] sm:$0xff]  ;;  %17983 = vst [vmem:[#allocation57_spill] sm:$0xff] %v15335_v23  ;;  %v4650_v39 = vpop.f32.mrf.mxu0  ;;  %v4763_v5 = vpop.f32.mrf.mxu1  ;;  %9457 = vmatpush2.bf16.msra.mxu1 %v13213_v18  ;;  %v15346_v29 = vpack.c.bf16 %v5878_v22, %v5870_v53 }
 0x2df   :  { %v15330_v17 = vld [vmem:[#allocation9 + $0xa20] sm:$0xff]  ;;  %v4651_v11 = vadd.f32 %v4650_v39, %v15001_v1  ;;  %9458 = vmatprep.subr.bf16.mxu1 %v13206_v42 }
 0x2e0   :  { %v4760_v54 = vadd.f32 %v4759_v27, %v4647_v50  ;;  %v6425_v32 = vld [vmem:[#allocation9 + $0xe00] sm:$0xff]  ;;  %v13070_v61 = vcombine.high %v15328_v30, %v15330_v17  ;;  %v5757_v27 = vadd.f32 %v15029_v37, %v4758_v58  ;;  %v4762_v50 = vadd.f32 %v4761_v15, %v4649_v16  ;;  %17984 = vst [vmem:[#allocation58_spill] sm:$0xff] %v15346_v29  ;;  %v4654_v21 = vpop.f32.mrf.mxu0  ;;  %v4767_v1 = vpop.f32.mrf.mxu1 }
 0x2e1   :  { %v6429_v9 = vld [vmem:[#allocation9 + $0xe20] sm:$0xff]  ;;  %v4764_v19 = vadd.f32 %v4763_v5, %v4651_v11  ;;  %v4655_v58 = vadd.f32 %v4654_v21, %v15003_v2  ;;  %9346 = vmatpush2.bf16.msra.mxu0 %v13077_v31  ;;  %v13069_v18 = vcombine.low %v15328_v30, %v15330_v17  ;;  %v6026_v11 = vld [vmem:[#allocation9 + $0x188] sm:$0xff]  ;;  %v12936_v31 = vcombine.high %v15123_v3, %v15125_v52 }
 0x2e2   :  { %v5758_v47 = vadd.f32 %v15041_v14, %v4760_v54  ;;  %9194 = vmatmul.mubr.bf16.gmra.mxu0 %v17985_v56  ;;  %v13198_v0 = vcombine.high %v6425_v32, %v6429_v9  ;;  %v5765_v8 = vadd.f32 %v15029_v37, %v4762_v50  ;;  %v4656_v6 = vpop.f32.mrf.mxu0  ;;  %v12808_v54 = vcombine.high %v6034_v13, %v6038_v43  ;;  %v4769_v39 = vpop.f32.mrf.mxu1  ;;  %v6030_v5 = vld [vmem:[#allocation9 + $0x1a8] sm:$0xff] }
 0x2e3   :  { %9307 = vmatmul.mubr.bf16.gmra.mxu1 %v17986_v7  ;;  %9349 = vmatprep.mubr.bf16.mxu0 %v15102_v55  ;;  %v13197_v16 = vcombine.low %v6425_v32, %v6429_v9  ;;  %v5885_v15 = vmax.f32 %v5757_v27, 0.0  ;;  %v5766_v53 = vadd.f32 %v15041_v14, %v4764_v19  ;;  %v4657_v22 = vadd.f32 %v4656_v6, %v15007_v59  ;;  %v6018_v6 = vld [vmem:[#allocation9 + $0x148] sm:$0xff] }
 0x2e4   :  { %v5893_v42 = vmax.f32 %v5765_v8, 0.0  ;;  %9347 = vmatprep.subr.bf16.mxu0 %v13070_v61  ;;  %9459 = vmatpush2.bf16.msra.mxu1 %v13205_v28  ;;  %v4768_v2 = vadd.f32 %v4767_v1, %v4655_v58  ;;  %v4658_v50 = vpop.f32.mrf.mxu0  ;;  %v5886_v30 = vmax.f32 %v5758_v47, 0.0  ;;  %v4771_v27 = vpop.f32.mrf.mxu1  ;;  %v12807_v61 = vcombine.low %v6034_v13, %v6038_v43  ;;  %v6094_v7 = vld [vmem:[#allocation9 + $0x3a8] sm:$0xff] }
 0x2e5   :  { %9460 = vmatprep.subr.bf16.mxu1 %v13198_v0  ;;  %v5894_v32 = vmax.f32 %v5766_v53, 0.0  ;;  %v4770_v9 = vadd.f32 %v4769_v39, %v4657_v22  ;;  %v4659_v21 = vadd.f32 %v4658_v50, %v15009_v38  ;;  %9348 = vmatpush2.bf16.msra.mxu0 %v13069_v18  ;;  %v12800_v0 = vcombine.high %v6026_v11, %v6030_v5  ;;  %v6046_v56 = vld [vmem:[#allocation9 + $0x228] sm:$0xff] }
 0x2e6   :  { %v15360_v17 = vpack.c.bf16 %v5893_v42, %v5885_v15  ;;  %v4660_v59 = vpop.f32.mrf.mxu0  ;;  %v4773_v19 = vpop.f32.mrf.mxu1  ;;  %9543 = vmatprep.subr.bf16.mxu0 %v12808_v54  ;;  %v5773_v47 = vadd.f32 %v15029_v37, %v4768_v2  ;;  %v6022_v15 = vld [vmem:[#allocation9 + $0x168] sm:$0xff]  ;;  %v12799_v54 = vcombine.low %v6026_v11, %v6030_v5 }
 0x2e7   :  { %v15363_v28 = vpack.c.bf16 %v5894_v32, %v5886_v30  ;;  %v4661_v8 = vadd.f32 %v4660_v59, %v15016_v33  ;;  %v4772_v58 = vadd.f32 %v4771_v27, %v4659_v21  ;;  %v5774_v38 = vadd.f32 %v15041_v14, %v4770_v9  ;;  %v6010_v30 = vld [vmem:[#allocation9 + $0x108] sm:$0xff] }
 0x2e8   :  { %17987 = vst [vmem:[#allocation59_spill] sm:$0xff] %v15360_v17  ;;  %9461 = vmatpush2.bf16.msra.mxu1 %v13197_v16  ;;  %v4810_v1 = vpop.f32.mrf.mxu0  ;;  %v4923_v42 = vpop.f32.mrf.mxu1  ;;  %v12792_v22 = vcombine.high %v6018_v6, %v6022_v15  ;;  %v5901_v39 = vmax.f32 %v5773_v47, 0.0  ;;  %v6014_v32 = vld [vmem:[#allocation9 + $0x128] sm:$0xff] }
 0x2e9   :  { %17988 = vst [vmem:[#allocation66_spill] sm:$0xff] %v15363_v28  ;;  %9656 = vmatprep.subr.bf16.mxu1 %v12936_v31  ;;  %v4774_v18 = vadd.f32 %v4773_v19, %v4661_v8  ;;  %v5781_v13 = vadd.f32 %v15029_v37, %v4772_v58  ;;  %v15370_v33 = vadd.f32 %v4923_v42, %v4810_v1  ;;  %v5902_v37 = vmax.f32 %v5774_v38, 0.0  ;;  %v6006_v47 = vld [vmem:[#allocation9 + $0xe8] sm:$0xff] }
 0x2ea   :  { %9350 = vmatmul.mubr.bf16.vlgmr.msra.gmra.mxu0 %v15089_v62  ;;  %v4812_v43 = vpop.f32.mrf.mxu0  ;;  %v4925_v53 = vpop.f32.mrf.mxu1  ;;  %v12784_v8 = vcombine.high %v6010_v30, %v6014_v32 }
 0x2eb   :  { %9359 = vmatprep.mubr.bf16.mxu0 %v15160_v40  ;;  %9544 = vmatpush1.bf16.msra.mxu0 %v12807_v61  ;;  %v5782_v16 = vadd.f32 %v15041_v14, %v4774_v18  ;;  %v5909_v2 = vmax.f32 %v5781_v13, 0.0  ;;  %v15374_v50 = vadd.f32 %v4925_v53, %v4812_v43  ;;  %v12791_v14 = vcombine.low %v6018_v6, %v6022_v15  ;;  %v5994_v43 = vld [vmem:[#allocation9 + $0x88] sm:$0xff] }
 0x2ec   :  { %9545 = vmatprep.subr.bf16.mxu0 %v12800_v0  ;;  %v4814_v31 = vpop.f32.mrf.mxu0  ;;  %v4927_v27 = vpop.f32.mrf.mxu1  ;;  %v6002_v0 = vld [vmem:[#allocation9 + $0xc8] sm:$0xff]  ;;  %v12783_v18 = vcombine.low %v6010_v30, %v6014_v32 }
 0x2ed   :  { %v5910_v9 = vmax.f32 %v5782_v16, 0.0  ;;  %v15376_v21 = vpack.c.bf16 %v5909_v2, %v5901_v39  ;;  %v15378_v59 = vadd.f32 %v4927_v27, %v4814_v31  ;;  %v12776_v15 = vcombine.high %v6002_v0, %v6006_v47  ;;  %v5986_v32 = vld [vmem:[#allocation9 + $0x48] sm:$0xff] }
 0x2ee   :  { %v15380_v11 = vpop.f32.mrf.mxu0  ;;  %v15384_v61 = vpop.f32.mrf.mxu1  ;;  %v12775_v39 = vcombine.low %v6002_v0, %v6006_v47  ;;  %v6062_v40 = vld [vmem:[#allocation9 + $0x2a8] sm:$0xff] }
 0x2ef   :  { %17989 = vst [vmem:[#allocation67_spill] sm:$0xff] %v15376_v21  ;;  %9546 = vmatpush1.bf16.msra.mxu0 %v12799_v54  ;;  %v15382_v5 = vpack.c.bf16 %v5910_v9, %v5902_v37  ;;  %v5998_v54 = vld [vmem:[#allocation9 + $0xa8] sm:$0xff] }
 0x2f0   :  { %9547 = vmatprep.subr.bf16.mxu0 %v12792_v22  ;;  %v4820_v19 = vpop.f32.mrf.mxu0  ;;  %v4933_v58 = vpop.f32.mrf.mxu1  ;;  %v12768_v31 = vcombine.high %v5994_v43, %v5998_v54  ;;  %v5990_v37 = vld [vmem:[#allocation9 + $0x68] sm:$0xff] }
 0x2f1   :  { %17990 = vst [vmem:[#allocation68_spill] sm:$0xff] %v15382_v5  ;;  %v15387_v1 = vadd.f32 %v4933_v58, %v4820_v19  ;;  %v12760_v0 = vcombine.high %v5986_v32, %v5990_v37 }
 0x2f2   :  { %9360 = vmatmul.mubr.bf16.gmra.mxu0 %v15150_v46  ;;  %v4822_v38 = vpop.f32.mrf.mxu0  ;;  %v4935_v6 = vpop.f32.mrf.mxu1 }
 0x2f3   :  { %9369 = vmatprep.mubr.bf16.mxu0 %v15210_v41  ;;  %9548 = vmatpush1.bf16.msra.mxu0 %v12791_v14  ;;  %v15390_v42 = vadd.f32 %v4935_v6, %v4822_v38  ;;  %v5978_v38 = vld [vmem:[#allocation9 + $0x8] sm:$0xff] }
 0x2f4   :  { %9549 = vmatprep.subr.bf16.mxu0 %v12784_v8  ;;  %v4824_v13 = vpop.f32.mrf.mxu0  ;;  %v4937_v16 = vpop.f32.mrf.mxu1  ;;  %v12767_v8 = vcombine.low %v5994_v43, %v5998_v54  ;;  %v6098_v54 = vld [vmem:[#allocation9 + $0x3c8] sm:$0xff] }
 0x2f5   :  { %v15392_v53 = vadd.f32 %v4937_v16, %v4824_v13  ;;  %v12759_v16 = vcombine.low %v5986_v32, %v5990_v37 }
 0x2f6   :  { %v15394_v22 = vpop.f32.mrf.mxu0  ;;  %v15396_v2 = vpop.f32.mrf.mxu1 }
 0x2f7   :  { %9550 = vmatpush1.bf16.msra.mxu0 %v12783_v18  ;;  %v5982_v18 = vld [vmem:[#allocation9 + $0x28] sm:$0xff] }
 0x2f8   :  { %9551 = vmatprep.subr.bf16.mxu0 %v12776_v15  ;;  %v4830_v30 = vpop.f32.mrf.mxu0  ;;  %v4943_v9 = vpop.f32.mrf.mxu1 }
 0x2f9   :  { %v15399_v27 = vadd.f32 %v4943_v9, %v4830_v30 }
 0x2fa   :  { %9370 = vmatmul.mubr.bf16.gmra.mxu0 %v15191_v45  ;;  %v4832_v14 = vpop.f32.mrf.mxu0  ;;  %v4945_v19 = vpop.f32.mrf.mxu1  ;;  %v6078_v45 = vld [vmem:[#allocation9 + $0x328] sm:$0xff] }
 0x2fb   :  { %9379 = vmatprep.mubr.bf16.mxu0 %v15252_v12  ;;  %9552 = vmatpush1.bf16.msra.mxu0 %v12775_v39  ;;  %v15402_v47 = vadd.f32 %v4945_v19, %v4832_v14  ;;  %v12752_v39 = vcombine.high %v5978_v38, %v5982_v18 }
 0x2fc   :  { %9553 = vmatprep.subr.bf16.mxu0 %v12768_v31  ;;  %v4834_v58 = vpop.f32.mrf.mxu0  ;;  %v4947_v6 = vpop.f32.mrf.mxu1  ;;  %v6102_v31 = vld [vmem:[#allocation9 + $0x3e8] sm:$0xff] }
 0x2fd   :  { %v15404_v15 = vadd.f32 %v4947_v6, %v4834_v58  ;;  %v12872_v32 = vcombine.high %v6098_v54, %v6102_v31  ;;  %v6090_v6 = vld [vmem:[#allocation9 + $0x388] sm:$0xff] }
 0x2fe   :  { %v15406_v13 = vpop.f32.mrf.mxu0  ;;  %v15408_v30 = vpop.f32.mrf.mxu1 }
 0x2ff   :  { %9554 = vmatpush1.bf16.msra.mxu0 %v12767_v8  ;;  %v12751_v8 = vcombine.low %v5978_v38, %v5982_v18  ;;  %v6082_v18 = vld [vmem:[#allocation9 + $0x348] sm:$0xff] }
 0x300   :  { %9555 = vmatprep.subr.bf16.mxu0 %v12760_v0  ;;  %v4840_v43 = vpop.f32.mrf.mxu0  ;;  %v4953_v9 = vpop.f32.mrf.mxu1 }
 0x301   :  { %v15411_v14 = vadd.f32 %v4953_v9, %v4840_v43  ;;  %v12871_v43 = vcombine.low %v6098_v54, %v6102_v31 }
 0x302   :  { %9380 = vmatmul.mubr.bf16.gmra.mxu0 %v15239_v10  ;;  %v4842_v19 = vpop.f32.mrf.mxu0  ;;  %v4955_v58 = vpop.f32.mrf.mxu1 }
 0x303   :  { %9389 = vmatprep.mubr.bf16.mxu0 %v15304_v51  ;;  %9556 = vmatpush1.bf16.msra.mxu0 %v12759_v16  ;;  %v15414_v37 = vadd.f32 %v4955_v58, %v4842_v19  ;;  %v12864_v16 = vcombine.high %v6090_v6, %v6094_v7 }
 0x304   :  { %9557 = vmatprep.subr.bf16.mxu0 %v12752_v39  ;;  %v4844_v0 = vpop.f32.mrf.mxu0  ;;  %v4957_v4 = vpop.f32.mrf.mxu1  ;;  %v6086_v39 = vld [vmem:[#allocation9 + $0x368] sm:$0xff] }
 0x305   :  { %v15416_v12 = vadd.f32 %v4957_v4, %v4844_v0  ;;  %v12856_v54 = vcombine.high %v6082_v18, %v6086_v39  ;;  %v6074_v0 = vld [vmem:[#allocation9 + $0x308] sm:$0xff] }
 0x306   :  { %v15418_v10 = vpop.f32.mrf.mxu0  ;;  %v15420_v9 = vpop.f32.mrf.mxu1 }
 0x307   :  { %9558 = vmatpush1.bf16.msra.mxu0 %v12751_v8  ;;  %v12863_v8 = vcombine.low %v6090_v6, %v6094_v7  ;;  %v6066_v6 = vld [vmem:[#allocation9 + $0x2c8] sm:$0xff] }
 0x308   :  { %9559 = vmatprep.subr.bf16.mxu0 %v12872_v32  ;;  %v4850_v38 = vpop.f32.mrf.mxu0  ;;  %v4963_v51 = vpop.f32.mrf.mxu1 }
 0x309   :  { %v15423_v19 = vadd.f32 %v4963_v51, %v4850_v38  ;;  %v12855_v51 = vcombine.low %v6082_v18, %v6086_v39 }
 0x30a   :  { %9390 = vmatmul.mubr.bf16.gmra.mxu0 %v15294_v36  ;;  %v4852_v4 = vpop.f32.mrf.mxu0  ;;  %v4965_v58 = vpop.f32.mrf.mxu1 }
 0x30b   :  { %9399 = vmatprep.mubr.bf16.mxu0 %v15346_v29  ;;  %9560 = vmatpush2.bf16.msra.mxu0 %v12871_v43  ;;  %v15426_v31 = vadd.f32 %v4965_v58, %v4852_v4  ;;  %v12848_v43 = vcombine.high %v6074_v0, %v6078_v45 }
 0x30c   :  { %9561 = vmatprep.subr.bf16.mxu0 %v12864_v16  ;;  %v4854_v32 = vpop.f32.mrf.mxu0  ;;  %v4967_v41 = vpop.f32.mrf.mxu1  ;;  %v6070_v16 = vld [vmem:[#allocation9 + $0x2e8] sm:$0xff] }
 0x30d   :  { %v15428_v46 = vadd.f32 %v4967_v41, %v4854_v32  ;;  %v12840_v18 = vcombine.high %v6066_v6, %v6070_v16  ;;  %v6058_v32 = vld [vmem:[#allocation9 + $0x288] sm:$0xff] }
 0x30e   :  { %v15430_v36 = vpop.f32.mrf.mxu0  ;;  %v15432_v38 = vpop.f32.mrf.mxu1 }
 0x30f   :  { %9562 = vmatpush2.bf16.msra.mxu0 %v12863_v8  ;;  %v12847_v8 = vcombine.low %v6074_v0, %v6078_v45  ;;  %v6050_v0 = vld [vmem:[#allocation9 + $0x248] sm:$0xff] }
 0x310   :  { %9563 = vmatprep.subr.bf16.mxu0 %v12856_v54  ;;  %v4860_v7 = vpop.f32.mrf.mxu0  ;;  %v4973_v29 = vpop.f32.mrf.mxu1 }
 0x311   :  { %v15435_v4 = vadd.f32 %v4973_v29, %v4860_v7  ;;  %v12839_v29 = vcombine.low %v6066_v6, %v6070_v16 }
 0x312   :  { %9400 = vmatmul.mubr.bf16.gmra.mxu0 %v15335_v23  ;;  %v4862_v41 = vpop.f32.mrf.mxu0  ;;  %v4975_v58 = vpop.f32.mrf.mxu1 }
 0x313   :  { %9409 = vmatprep.mubr.bf16.mxu0 %v15363_v28  ;;  %9564 = vmatpush2.bf16.msra.mxu0 %v12855_v51  ;;  %v15438_v39 = vadd.f32 %v4975_v58, %v4862_v41  ;;  %v12832_v51 = vcombine.high %v6058_v32, %v6062_v40 }
 0x314   :  { %9565 = vmatprep.subr.bf16.mxu0 %v12848_v43  ;;  %v4864_v54 = vpop.f32.mrf.mxu0  ;;  %v4977_v62 = vpop.f32.mrf.mxu1  ;;  %v6054_v43 = vld [vmem:[#allocation9 + $0x268] sm:$0xff] }
 0x315   :  { %v15440_v55 = vadd.f32 %v4977_v62, %v4864_v54  ;;  %v12824_v6 = vcombine.high %v6050_v0, %v6054_v43  ;;  %v6042_v54 = vld [vmem:[#allocation9 + $0x208] sm:$0xff] }
 0x316   :  { %v15442_v23 = vpop.f32.mrf.mxu0  ;;  %v15444_v7 = vpop.f32.mrf.mxu1 }
 0x317   :  { %17991 = vst [vmem:[#allocation69_spill] sm:$0xff] %v15440_v55  ;;  %9566 = vmatpush2.bf16.msra.mxu0 %v12847_v8  ;;  %17992 = vst [vmem:[#allocation70_spill] sm:$0xff] %v15442_v23  ;;  %v12831_v8 = vcombine.low %v6058_v32, %v6062_v40  ;;  %v6290_v32 = vld [vmem:[#allocation9 + $0x9c8] sm:$0xff] }
 0x318   :  { %17993 = vst [vmem:[#allocation71_spill] sm:$0xff] %v15444_v7  ;;  %9567 = vmatprep.subr.bf16.mxu0 %v12840_v18  ;;  %v4870_v45 = vpop.f32.mrf.mxu0  ;;  %v4983_v28 = vpop.f32.mrf.mxu1  ;;  %v6258_v55 = vld [vmem:[#allocation9 + $0x8c8] sm:$0xff] }
 0x319   :  { %v15447_v41 = vadd.f32 %v4983_v28, %v4870_v45  ;;  %v12823_v28 = vcombine.low %v6050_v0, %v6054_v43 }
 0x31a   :  { %9410 = vmatmul.mubr.bf16.gmra.mxu0 %v15360_v17  ;;  %v4872_v62 = vpop.f32.mrf.mxu0  ;;  %v4985_v58 = vpop.f32.mrf.mxu1 }
 0x31b   :  { %17994 = vst [vmem:[#allocation72_spill] sm:$0xff] %v15447_v41  ;;  %9419 = vmatprep.mubr.bf16.mxu0 %v15382_v5  ;;  %9568 = vmatpush2.bf16.msra.mxu0 %v12839_v29  ;;  %v15450_v16 = vadd.f32 %v4985_v58, %v4872_v62  ;;  %v12816_v29 = vcombine.high %v6042_v54, %v6046_v56  ;;  %v18000_v58 = vld [vmem:[#allocation26_spill] sm:$0xff] }
 0x31c   :  { %9569 = vmatprep.subr.bf16.mxu0 %v12832_v51  ;;  %v4874_v18 = vpop.f32.mrf.mxu0  ;;  %v4987_v57 = vpop.f32.mrf.mxu1  ;;  %v6294_v51 = vld [vmem:[#allocation9 + $0x9e8] sm:$0xff] }
 0x31d   :  { %17995 = vst [vmem:[#allocation73_spill] sm:$0xff] %v15450_v16  ;;  %v15452_v7 = vadd.f32 %v4987_v57, %v4874_v18  ;;  %v13064_v0 = vcombine.high %v6290_v32, %v6294_v51 }
 0x31e   :  { %v15454_v17 = vpop.f32.mrf.mxu0  ;;  %v15456_v45 = vpop.f32.mrf.mxu1 }
 0x31f   :  { %17996 = vst [vmem:[#allocation74_spill] sm:$0xff] %v15452_v7  ;;  %9570 = vmatpush2.bf16.msra.mxu0 %v12831_v8  ;;  %17997 = vst [vmem:[#allocation75_spill] sm:$0xff] %v15454_v17  ;;  %v12815_v8 = vcombine.low %v6042_v54, %v6046_v56  ;;  %v6282_v7 = vld [vmem:[#allocation9 + $0x988] sm:$0xff] }
 0x320   :  { %17998 = vst [vmem:[#allocation76_spill] sm:$0xff] %v15456_v45  ;;  %9571 = vmatprep.subr.bf16.mxu0 %v12824_v6  ;;  %v4880_v40 = vpop.f32.mrf.mxu0  ;;  %v4993_v5 = vpop.f32.mrf.mxu1  ;;  %v6286_v45 = vld [vmem:[#allocation9 + $0x9a8] sm:$0xff] }
 0x321   :  { %v15459_v62 = vadd.f32 %v4993_v5, %v4880_v40  ;;  %v13063_v5 = vcombine.low %v6290_v32, %v6294_v51  ;;  %v17870_v40 = vsub.s32 6, %v14393_v20  ;;  %v13056_v56 = vcombine.high %v6282_v7, %v6286_v45 }
 0x322   :  { %9420 = vmatmul.mubr.bf16.gmra.mxu0 %v15376_v21  ;;  %v4882_v57 = vpop.f32.mrf.mxu0  ;;  %v4995_v18 = vpop.f32.mrf.mxu1  ;;  %v13055_v51 = vcombine.low %v6282_v7, %v6286_v45  ;;  %v18007_v7 = vsub.s32 7, %v14393_v20 }
 0x323   :  { %17999 = vst [vmem:[#allocation77_spill] sm:$0xff] %v15459_v62  ;;  %9572 = vmatpush2.bf16.msra.mxu0 %v12823_v28  ;;  %9575 = vmatprep.mubr.bf16.mxu0 %v18000_v58  ;;  %v15462_v43 = vadd.f32 %v4995_v18, %v4882_v57  ;;  %v6278_v57 = vld [vmem:[#allocation9 + $0x968] sm:$0xff] }
 0x324   :  { %9573 = vmatprep.subr.bf16.mxu0 %v12816_v29  ;;  %v4884_v6 = vpop.f32.mrf.mxu0  ;;  %v4997_v17 = vpop.f32.mrf.mxu1  ;;  %v6274_v29 = vld [vmem:[#allocation9 + $0x948] sm:$0xff] }
 0x325   :  { %18001 = vst [vmem:[#allocation78_spill] sm:$0xff] %v15462_v43  ;;  %v15464_v16 = vadd.f32 %v4997_v17, %v4884_v6  ;;  %v18005_v43 = vld [vmem:[#allocation25_spill] sm:$0xff]  ;;  %v6270_v62 = vld [vmem:[#allocation9 + $0x928] sm:$0xff]  ;;  %v4930_v17 = vadd.f32 %v15384_v61, %v15380_v11 }
 0x326   :  { %v15466_v21 = vpop.f32.mrf.mxu0  ;;  %v15468_v28 = vpop.f32.mrf.mxu1  ;;  %v6262_v11 = vld [vmem:[#allocation9 + $0x8e8] sm:$0xff] }
 0x327   :  { %18002 = vst [vmem:[#allocation79_spill] sm:$0xff] %v15464_v16  ;;  %9574 = vmatpush2.bf16.msra.mxu0 %v12815_v8  ;;  %18003 = vst [vmem:[#allocation80_spill] sm:$0xff] %v15466_v21  ;;  %v18006_v8 = vld [vmem:[#allocation27_spill] sm:$0xff]  ;;  %v13961_v16 = vld [vmem:[#allocation8] sm:$0xff] }
 0x328   :  { %18004 = vst [vmem:[#allocation81_spill] sm:$0xff] %v15468_v28  ;;  %9769 = vmatprep.subr.bf16.mxu0 %v13064_v0  ;;  %v5036_v54 = vpop.f32.mrf.mxu0  ;;  %v5149_v58 = vpop.f32.mrf.mxu1  ;;  %v15477_v0 = vrot.slane %v13961_v16, %v17870_v40  ;;  %v15484_v45 = vrot.slane %v13961_v16, %v18007_v7  ;;  %v6250_v7 = vld [vmem:[#allocation9 + $0x888] sm:$0xff] }
 0x329   :  { %v5037_v18 = vadd.f32 %v5036_v54, %v15370_v33  ;;  %v13048_v33 = vcombine.high %v6274_v29, %v6278_v57 }
 0x32a   :  { %9576 = vmatmul.mubr.bf16.vlgmr.msra.gmra.mxu0 %v18005_v43  ;;  %v5038_v32 = vpop.f32.mrf.mxu0  ;;  %v5151_v21 = vpop.f32.mrf.mxu1  ;;  %v6266_v43 = vld [vmem:[#allocation9 + $0x908] sm:$0xff] }
 0x32b   :  { %9585 = vmatprep.mubr.bf16.mxu0 %v18006_v8  ;;  %9770 = vmatpush1.bf16.msra.mxu0 %v13063_v5  ;;  %v5150_v6 = vadd.f32 %v5149_v58, %v5037_v18  ;;  %v5039_v28 = vadd.f32 %v5038_v32, %v15374_v50  ;;  %v13047_v50 = vcombine.low %v6274_v29, %v6278_v57 }
 0x32c   :  { %9771 = vmatprep.subr.bf16.mxu0 %v13056_v56  ;;  %v5040_v54 = vpop.f32.mrf.mxu0  ;;  %v5153_v18 = vpop.f32.mrf.mxu1  ;;  %v13040_v23 = vcombine.high %v6266_v43, %v6270_v62  ;;  %v13039_v29 = vcombine.low %v6266_v43, %v6270_v62  ;;  %v13032_v57 = vcombine.high %v6258_v55, %v6262_v11 }
 0x32d   :  { %v5152_v5 = vadd.f32 %v5151_v21, %v5039_v28  ;;  %v5041_v58 = vadd.f32 %v5040_v54, %v15378_v59  ;;  %v5663_v56 = vadd.f32 %v15477_v0, %v5150_v6 }
 0x32e   :  { %v5042_v40 = vpop.f32.mrf.mxu0  ;;  %v5155_v41 = vpop.f32.mrf.mxu1 }
 0x32f   :  { %9772 = vmatpush1.bf16.msra.mxu0 %v13055_v51  ;;  %v5154_v32 = vadd.f32 %v5153_v18, %v5041_v58  ;;  %v5043_v8 = vadd.f32 %v5042_v40, %v4930_v17  ;;  %v5664_v61 = vadd.f32 %v15484_v45, %v5152_v5  ;;  %v5791_v17 = vmax.f32 %v5663_v56, 0.0  ;;  %v6254_v58 = vld [vmem:[#allocation9 + $0x8a8] sm:$0xff] }
 0x330   :  { %9773 = vmatprep.subr.bf16.mxu0 %v13048_v33  ;;  %v5046_v21 = vpop.f32.mrf.mxu0  ;;  %v5159_v51 = vpop.f32.mrf.mxu1 }
 0x331   :  { %v5671_v16 = vadd.f32 %v15477_v0, %v5154_v32  ;;  %v5156_v28 = vadd.f32 %v5155_v41, %v5043_v8  ;;  %v5047_v59 = vadd.f32 %v5046_v21, %v15387_v1  ;;  %v4940_v1 = vadd.f32 %v15396_v2, %v15394_v22  ;;  %v15499_v32 = vld [vmem:[#allocation9 + $0x588] sm:$0xff] }
 0x332   :  { %9586 = vmatmul.mubr.bf16.gmra.mxu0 %v14518_v44  ;;  %v5048_v40 = vpop.f32.mrf.mxu0  ;;  %v5161_v5 = vpop.f32.mrf.mxu1  ;;  %v5792_v18 = vmax.f32 %v5664_v61, 0.0  ;;  %v15501_v21 = vld [vmem:[#allocation9 + $0x5a8] sm:$0xff]  ;;  %v13024_v61 = vcombine.high %v6250_v7, %v6254_v58 }
 0x333   :  { %9595 = vmatprep.mubr.bf16.mxu0 %v14558_v24  ;;  %9774 = vmatpush1.bf16.msra.mxu0 %v13047_v50  ;;  %v5799_v6 = vmax.f32 %v5671_v16, 0.0  ;;  %v5672_v33 = vadd.f32 %v15484_v45, %v5156_v28  ;;  %v5049_v54 = vadd.f32 %v5048_v40, %v15390_v42  ;;  %v5160_v41 = vadd.f32 %v5159_v51, %v5047_v59  ;;  %v15506_v59 = vld [vmem:[#allocation9 + $0x848] sm:$0xff] }
 0x334   :  { %9775 = vmatprep.subr.bf16.mxu0 %v13040_v23  ;;  %v5050_v8 = vpop.f32.mrf.mxu0  ;;  %v5163_v56 = vpop.f32.mrf.mxu1  ;;  %v13031_v16 = vcombine.low %v6258_v55, %v6262_v11  ;;  %v15508_v51 = vld [vmem:[#allocation9 + $0x868] sm:$0xff] }
 0x335   :  { %v15497_v50 = vpack.c.bf16 %v5799_v6, %v5791_v17  ;;  %v5800_v62 = vmax.f32 %v5672_v33, 0.0  ;;  %v5162_v43 = vadd.f32 %v5161_v5, %v5049_v54  ;;  %v5051_v42 = vadd.f32 %v5050_v8, %v15392_v53 }
 0x336   :  { %v5052_v23 = vpop.f32.mrf.mxu0  ;;  %v5165_v28 = vpop.f32.mrf.mxu1  ;;  %v5679_v40 = vadd.f32 %v15477_v0, %v5160_v41  ;;  %v12928_v53 = vcombine.high %v15499_v32, %v15501_v21  ;;  %v13023_v5 = vcombine.low %v6250_v7, %v6254_v58  ;;  %v12927_v7 = vcombine.low %v15499_v32, %v15501_v21  ;;  %v6146_v58 = vld [vmem:[#allocation9 + $0x548] sm:$0xff] }
 0x337   :  { %18008 = vst [vmem:[#allocation82_spill] sm:$0xff] %v15497_v50  ;;  %9776 = vmatpush1.bf16.msra.mxu0 %v13039_v29  ;;  %v15504_v22 = vpack.c.bf16 %v5800_v62, %v5792_v18  ;;  %v5053_v2 = vadd.f32 %v5052_v23, %v4940_v1  ;;  %v5164_v17 = vadd.f32 %v5163_v56, %v5051_v42  ;;  %v6150_v23 = vld [vmem:[#allocation9 + $0x568] sm:$0xff] }
 0x338   :  { %9777 = vmatprep.subr.bf16.mxu0 %v13032_v57  ;;  %v5056_v6 = vpop.f32.mrf.mxu0  ;;  %v5680_v29 = vadd.f32 %v15484_v45, %v5162_v43  ;;  %v5169_v33 = vpop.f32.mrf.mxu1  ;;  %v13016_v1 = vcombine.high %v15506_v59, %v15508_v51  ;;  %v5807_v62 = vmax.f32 %v5679_v40, 0.0  ;;  %v18010_v56 = vcombine.low %v15123_v3, %v15125_v52  ;;  %v15538_v21 = vld [vmem:[#allocation9 + $0x508] sm:$0xff] }
 0x339   :  { %18009 = vst [vmem:[#allocation83_spill] sm:$0xff] %v15504_v22  ;;  %v5166_v55 = vadd.f32 %v5165_v28, %v5053_v2  ;;  %v5057_v11 = vadd.f32 %v5056_v6, %v15399_v27  ;;  %9462 = vmatprep.mubr.bf16.mxu1 %v15504_v22  ;;  %v5687_v57 = vadd.f32 %v15477_v0, %v5164_v17  ;;  %v15530_v17 = vld [vmem:[#allocation9 + $0x808] sm:$0xff] }
 0x33a   :  { %9596 = vmatmul.mubr.bf16.gmra.mxu0 %v17956_v63  ;;  %v5058_v54 = vpop.f32.mrf.mxu0  ;;  %v5171_v18 = vpop.f32.mrf.mxu1  ;;  %9463 = vmatmul.mubr.bf16.vlgmr.msra.gmra.mxu1 %v15497_v50  ;;  %v4950_v40 = vadd.f32 %v15408_v30, %v15406_v13  ;;  %v13015_v32 = vcombine.low %v15506_v59, %v15508_v51  ;;  %v12920_v13 = vcombine.high %v6146_v58, %v6150_v23  ;;  %v15545_v30 = vld [vmem:[#allocation9 + $0xbc8] sm:$0xff] }
 0x33b   :  { %9605 = vmatprep.mubr.bf16.mxu0 %v17957_v26  ;;  %9778 = vmatpush1.bf16.msra.mxu0 %v13031_v16  ;;  %v5688_v41 = vadd.f32 %v15484_v45, %v5166_v55  ;;  %v5170_v8 = vadd.f32 %v5169_v33, %v5057_v11  ;;  %v5059_v27 = vadd.f32 %v5058_v54, %v15402_v47  ;;  %v5815_v43 = vmax.f32 %v5687_v57, 0.0  ;;  %v15547_v33 = vld [vmem:[#allocation9 + $0xbe8] sm:$0xff] }
 0x33c   :  { %9779 = vmatprep.subr.bf16.mxu0 %v13024_v61  ;;  %9657 = vmatpush1.bf16.msra.mxu1 %v18010_v56  ;;  %v5060_v42 = vpop.f32.mrf.mxu0  ;;  %v5808_v16 = vmax.f32 %v5680_v29, 0.0  ;;  %v5173_v28 = vpop.f32.mrf.mxu1  ;;  %v6238_v61 = vld [vmem:[#allocation9 + $0x828] sm:$0xff]  ;;  %v12919_v59 = vcombine.low %v6146_v58, %v6150_v23 }
 0x33d   :  { %v5816_v2 = vmax.f32 %v5688_v41, 0.0  ;;  %v5061_v47 = vadd.f32 %v5060_v42, %v15404_v15  ;;  %9658 = vmatprep.subr.bf16.mxu1 %v12928_v53  ;;  %v15534_v3 = vpack.c.bf16 %v5815_v43, %v5807_v62  ;;  %v5172_v52 = vadd.f32 %v5171_v18, %v5059_v27  ;;  %v15540_v29 = vld [vmem:[#allocation9 + $0x528] sm:$0xff] }
 0x33e   :  { %v5062_v6 = vpop.f32.mrf.mxu0  ;;  %v5695_v53 = vadd.f32 %v15477_v0, %v5170_v8  ;;  %v5175_v11 = vpop.f32.mrf.mxu1  ;;  %v13007_v51 = vcombine.low %v15530_v17, %v6238_v61  ;;  %v15557_v18 = vld [vmem:[#allocation9 + $0x4c8] sm:$0xff] }
 0x33f   :  { %18011 = vst [vmem:[#allocation84_spill] sm:$0xff] %v15534_v3  ;;  %9780 = vmatpush1.bf16.msra.mxu0 %v13023_v5  ;;  %v15542_v15 = vpack.c.bf16 %v5816_v2, %v5808_v16  ;;  %v5174_v55 = vadd.f32 %v5173_v28, %v5061_v47  ;;  %v5063_v57 = vadd.f32 %v5062_v6, %v4950_v40  ;;  %v15559_v62 = vld [vmem:[#allocation9 + $0x4e8] sm:$0xff] }
 0x340   :  { %9781 = vmatprep.subr.bf16.mxu0 %v13016_v1  ;;  %9659 = vmatpush1.bf16.msra.mxu1 %v12927_v7  ;;  %v5066_v54 = vpop.f32.mrf.mxu0  ;;  %v13008_v5 = vcombine.high %v15530_v17, %v6238_v61  ;;  %v5179_v27 = vpop.f32.mrf.mxu1  ;;  %v12912_v1 = vcombine.high %v15538_v21, %v15540_v29  ;;  %v5696_v43 = vadd.f32 %v15484_v45, %v5172_v52  ;;  %v5823_v7 = vmax.f32 %v5695_v53, 0.0  ;;  %v15572_v40 = vld [vmem:[#allocation9 + $0xb88] sm:$0xff] }
 0x341   :  { %18012 = vst [vmem:[#allocation85_spill] sm:$0xff] %v15542_v15  ;;  %v5703_v41 = vadd.f32 %v15477_v0, %v5174_v55  ;;  %v5067_v8 = vadd.f32 %v5066_v54, %v15411_v14  ;;  %9472 = vmatprep.mubr.bf16.mxu1 %v15542_v15  ;;  %v5176_v56 = vadd.f32 %v5175_v11, %v5063_v57  ;;  %v15579_v55 = vld [vmem:[#allocation9 + $0xba8] sm:$0xff] }
 0x342   :  { %9606 = vmatmul.mubr.bf16.gmra.mxu0 %v17960_v60  ;;  %v5068_v42 = vpop.f32.mrf.mxu0  ;;  %v13128_v14 = vcombine.high %v15545_v30, %v15547_v33  ;;  %v5181_v2 = vpop.f32.mrf.mxu1  ;;  %9473 = vmatmul.mubr.bf16.gmra.mxu1 %v15534_v3  ;;  %v12911_v17 = vcombine.low %v15538_v21, %v15540_v29  ;;  %v12904_v61 = vcombine.high %v15557_v18, %v15559_v62  ;;  %v15581_v11 = vld [vmem:[#allocation9 + $0x488] sm:$0xff]  ;;  %v5824_v29 = vmax.f32 %v5696_v43, 0.0 }
 0x343   :  { %9615 = vmatprep.mubr.bf16.mxu0 %v17961_v49  ;;  %9782 = vmatpush1.bf16.msra.mxu0 %v13015_v32  ;;  %v5831_v58 = vmax.f32 %v5703_v41, 0.0  ;;  %v5180_v23 = vadd.f32 %v5179_v27, %v5067_v8  ;;  %v5069_v16 = vadd.f32 %v5068_v42, %v15414_v37  ;;  %v5704_v47 = vadd.f32 %v15484_v45, %v5176_v56  ;;  %v15583_v21 = vld [vmem:[#allocation9 + $0x4a8] sm:$0xff] }
 0x344   :  { %9660 = vmatprep.subr.bf16.mxu1 %v12920_v13  ;;  %v5070_v28 = vpop.f32.mrf.mxu0  ;;  %9783 = vmatprep.subr.bf16.mxu0 %v13008_v5  ;;  %v4960_v37 = vadd.f32 %v15420_v9, %v15418_v10  ;;  %v5183_v53 = vpop.f32.mrf.mxu1  ;;  %v13127_v10 = vcombine.low %v15545_v30, %v15547_v33  ;;  %v12903_v5 = vcombine.low %v15557_v18, %v15559_v62  ;;  %v15600_v18 = vld [vmem:[#allocation9 + $0xb48] sm:$0xff] }
 0x345   :  { %9661 = vmatpush1.bf16.msra.mxu1 %v12919_v59  ;;  %v15576_v52 = vpack.c.bf16 %v5831_v58, %v5823_v7  ;;  %v5182_v6 = vadd.f32 %v5181_v2, %v5069_v16  ;;  %v5071_v32 = vadd.f32 %v5070_v28, %v15416_v12  ;;  %v5832_v13 = vmax.f32 %v5704_v47, 0.0  ;;  %v15602_v62 = vld [vmem:[#allocation9 + $0xb68] sm:$0xff] }
 0x346   :  { %9662 = vmatprep.subr.bf16.mxu1 %v12912_v1  ;;  %v5072_v57 = vpop.f32.mrf.mxu0  ;;  %v5711_v9 = vadd.f32 %v15477_v0, %v5180_v23  ;;  %v5185_v12 = vpop.f32.mrf.mxu1  ;;  %v12896_v30 = vcombine.high %v15581_v11, %v15583_v21  ;;  %v12895_v7 = vcombine.low %v15581_v11, %v15583_v21  ;;  %v6114_v47 = vld [vmem:[#allocation9 + $0x448] sm:$0xff] }
 0x347   :  { %18013 = vst [vmem:[#allocation86_spill] sm:$0xff] %v15576_v52  ;;  %9784 = vmatpush1.bf16.msra.mxu0 %v13007_v51  ;;  %v5184_v54 = vadd.f32 %v5183_v53, %v5071_v32  ;;  %v5073_v59 = vadd.f32 %v5072_v57, %v4960_v37  ;;  %v15590_v41 = vpack.c.bf16 %v5832_v13, %v5824_v29  ;;  %v6118_v28 = vld [vmem:[#allocation9 + $0x468] sm:$0xff] }
 0x348   :  { %9785 = vmatprep.subr.bf16.mxu0 %v13128_v14  ;;  %v5712_v8 = vadd.f32 %v15484_v45, %v5182_v6  ;;  %v5076_v27 = vpop.f32.mrf.mxu0  ;;  %v13120_v51 = vcombine.high %v15572_v40, %v15579_v55  ;;  %v5189_v56 = vpop.f32.mrf.mxu1  ;;  %v13119_v14 = vcombine.low %v15572_v40, %v15579_v55  ;;  %v13112_v37 = vcombine.high %v15600_v18, %v15602_v62  ;;  %v15617_v6 = vld [vmem:[#allocation9 + $0xb08] sm:$0xff] }
 0x349   :  { %18014 = vst [vmem:[#allocation87_spill] sm:$0xff] %v15590_v41  ;;  %9663 = vmatpush1.bf16.msra.mxu1 %v12911_v17  ;;  %v5719_v33 = vadd.f32 %v15477_v0, %v5184_v54  ;;  %v5186_v1 = vadd.f32 %v5185_v12, %v5073_v59  ;;  %v5077_v43 = vadd.f32 %v5076_v27, %v15423_v19  ;;  %v5839_v19 = vmax.f32 %v5711_v9, 0.0  ;;  %v15619_v32 = vld [vmem:[#allocation9 + $0xb28] sm:$0xff] }
 0x34a   :  { %9616 = vmatmul.mubr.bf16.gmra.mxu0 %v17964_v25  ;;  %9664 = vmatprep.subr.bf16.mxu1 %v12904_v61  ;;  %v5078_v42 = vpop.f32.mrf.mxu0  ;;  %v5191_v2 = vpop.f32.mrf.mxu1  ;;  %v4970_v17 = vadd.f32 %v15432_v38, %v15430_v36  ;;  %v15623_v29 = vld [vmem:[#allocation9 + $0x408] sm:$0xff]  ;;  %v13111_v57 = vcombine.low %v15600_v18, %v15602_v62  ;;  %v12887_v12 = vcombine.low %v6114_v47, %v6118_v28 }
 0x34b   :  { %9482 = vmatprep.mubr.bf16.mxu1 %v15590_v41  ;;  %9625 = vmatprep.mubr.bf16.mxu0 %v17965_v48  ;;  %v5847_v58 = vmax.f32 %v5719_v33, 0.0  ;;  %v5720_v23 = vadd.f32 %v15484_v45, %v5186_v1  ;;  %v5079_v16 = vadd.f32 %v5078_v42, %v15426_v31  ;;  %v5190_v61 = vadd.f32 %v5189_v56, %v5077_v43  ;;  %v15625_v36 = vld [vmem:[#allocation9 + $0x428] sm:$0xff] }
 0x34c   :  { %9786 = vmatpush2.bf16.msra.mxu0 %v13127_v10  ;;  %9483 = vmatmul.mubr.bf16.gmra.mxu1 %v15576_v52  ;;  %v5080_v40 = vpop.f32.mrf.mxu0  ;;  %v5840_v31 = vmax.f32 %v5712_v8, 0.0  ;;  %v5193_v21 = vpop.f32.mrf.mxu1  ;;  %v12888_v10 = vcombine.high %v6114_v47, %v6118_v28  ;;  %v15641_v56 = vld [vmem:[#allocation9 + $0xac8] sm:$0xff] }
 0x34d   :  { %9665 = vmatpush1.bf16.msra.mxu1 %v12903_v5  ;;  %9787 = vmatprep.subr.bf16.mxu0 %v13120_v51  ;;  %v15621_v53 = vpack.c.bf16 %v5847_v58, %v5839_v19  ;;  %v5848_v55 = vmax.f32 %v5720_v23, 0.0  ;;  %v5192_v11 = vadd.f32 %v5191_v2, %v5079_v16  ;;  %v5081_v38 = vadd.f32 %v5080_v40, %v15428_v46  ;;  %v15643_v18 = vld [vmem:[#allocation9 + $0xae8] sm:$0xff] }
 0x34e   :  { %9666 = vmatprep.subr.bf16.mxu1 %v12896_v30  ;;  %v5082_v13 = vpop.f32.mrf.mxu0  ;;  %v5195_v59 = vpop.f32.mrf.mxu1  ;;  %v13104_v5 = vcombine.high %v15617_v6, %v15619_v32  ;;  %v5727_v8 = vadd.f32 %v15477_v0, %v5190_v61  ;;  %v12880_v46 = vcombine.high %v15623_v29, %v15625_v36  ;;  %v15653_v19 = vld [vmem:[#allocation9 + $0x7e8] sm:$0xff]  ;;  %v13095_v61 = vcombine.low %v15641_v56, %v15643_v18 }
 0x34f   :  { %18015 = vst [vmem:[#allocation88_spill] sm:$0xff] %v15621_v53  ;;  %v15630_v9 = vpack.c.bf16 %v5848_v55, %v5840_v31  ;;  %v5083_v54 = vadd.f32 %v5082_v13, %v4970_v17  ;;  %v5194_v27 = vadd.f32 %v5193_v21, %v5081_v38  ;;  %v5728_v30 = vadd.f32 %v15484_v45, %v5192_v11  ;;  %v18017_v31 = vld [vmem:[#allocation69_spill] sm:$0xff]  ;;  %v18018_v38 = vld [vmem:[#allocation70_spill] sm:$0xff]  ;;  %v18019_v13 = vld [vmem:[#allocation71_spill] sm:$0xff] }
 0x350   :  { %9788 = vmatpush2.bf16.msra.mxu0 %v13119_v14  ;;  %v5086_v51 = vpop.f32.mrf.mxu0  ;;  %v5199_v43 = vpop.f32.mrf.mxu1  ;;  %v13103_v14 = vcombine.low %v15617_v6, %v15619_v32  ;;  %v5855_v47 = vmax.f32 %v5727_v8, 0.0  ;;  %v13096_v40 = vcombine.high %v15641_v56, %v15643_v18  ;;  %v15664_v6 = vld [vmem:[#allocation9 + $0xaa8] sm:$0xff] }
 0x351   :  { %18016 = vst [vmem:[#allocation89_spill] sm:$0xff] %v15630_v9  ;;  %9667 = vmatpush1.bf16.msra.mxu1 %v12895_v7  ;;  %9789 = vmatprep.subr.bf16.mxu0 %v13112_v37  ;;  %v5196_v33 = vadd.f32 %v5195_v59, %v5083_v54  ;;  %v5087_v1 = vadd.f32 %v5086_v51, %v15435_v4  ;;  %v15651_v7 = vld [vmem:[#allocation9 + $0x7c8] sm:$0xff]  ;;  %v5856_v32 = vmax.f32 %v5728_v30, 0.0 }
 0x352   :  { %9626 = vmatmul.mubr.bf16.gmra.mxu0 %v17969_v35  ;;  %9492 = vmatprep.mubr.bf16.mxu1 %v15630_v9  ;;  %v5735_v62 = vadd.f32 %v15477_v0, %v5194_v27  ;;  %v5088_v42 = vpop.f32.mrf.mxu0  ;;  %v12879_v4 = vcombine.low %v15623_v29, %v15625_v36  ;;  %v5201_v2 = vpop.f32.mrf.mxu1  ;;  %v15662_v37 = vld [vmem:[#allocation9 + $0xa88] sm:$0xff]  ;;  %v13000_v21 = vcombine.high %v15651_v7, %v15653_v19  ;;  %v6067_v35 = vld [vmem:[#allocation9 + $0x2d0] sm:$0xff] }
 0x353   :  { %9635 = vmatprep.mubr.bf16.mxu0 %v17972_v34  ;;  %9668 = vmatprep.subr.bf16.mxu1 %v12888_v10  ;;  %v5736_v58 = vadd.f32 %v15484_v45, %v5196_v33  ;;  %v5200_v23 = vadd.f32 %v5199_v43, %v5087_v1  ;;  %v5089_v16 = vadd.f32 %v5088_v42, %v15438_v39  ;;  %v15669_v29 = vld [vmem:[#allocation9 + $0x788] sm:$0xff]  ;;  %v6071_v9 = vld [vmem:[#allocation9 + $0x2f0] sm:$0xff] }
 0x354   :  { %9790 = vmatpush2.bf16.msra.mxu0 %v13111_v57  ;;  %9493 = vmatmul.mubr.bf16.gmra.mxu1 %v15621_v53  ;;  %v5863_v28 = vmax.f32 %v5735_v62, 0.0  ;;  %v5090_v17 = vpop.f32.mrf.mxu0  ;;  %v5203_v11 = vpop.f32.mrf.mxu1  ;;  %v15671_v36 = vld [vmem:[#allocation9 + $0x7a8] sm:$0xff]  ;;  %v4980_v57 = vadd.f32 %v18019_v13, %v18018_v38  ;;  %v13087_v56 = vcombine.low %v15662_v37, %v15664_v6 }
 0x355   :  { %9669 = vmatpush1.bf16.msra.mxu1 %v12887_v12  ;;  %9791 = vmatprep.subr.bf16.mxu0 %v13104_v5  ;;  %v5864_v39 = vmax.f32 %v5736_v58, 0.0  ;;  %v5091_v55 = vadd.f32 %v5090_v17, %v18017_v31  ;;  %v5202_v54 = vadd.f32 %v5201_v2, %v5089_v16  ;;  %v12999_v12 = vcombine.low %v15651_v7, %v15653_v19  ;;  %v15684_v30 = vld [vmem:[#allocation9 + $0xa48] sm:$0xff] }
 0x356   :  { %9670 = vmatprep.subr.bf16.mxu1 %v12880_v46  ;;  %v15675_v10 = vpack.c.bf16 %v5863_v28, %v5855_v47  ;;  %v5092_v59 = vpop.f32.mrf.mxu0  ;;  %v5743_v8 = vadd.f32 %v15477_v0, %v5200_v23  ;;  %v5205_v51 = vpop.f32.mrf.mxu1  ;;  %v13088_v46 = vcombine.high %v15662_v37, %v15664_v6  ;;  %v15686_v33 = vld [vmem:[#allocation9 + $0xa68] sm:$0xff]  ;;  %v12992_v18 = vcombine.high %v15669_v29, %v15671_v36  ;;  %v18024_v47 = vld [vmem:[#allocation38_spill] sm:$0xff] }
 0x357   :  { %v15679_v5 = vpack.c.bf16 %v5864_v39, %v5856_v32  ;;  %v5204_v27 = vadd.f32 %v5203_v11, %v5091_v55  ;;  %v5093_v1 = vadd.f32 %v5092_v59, %v4980_v57  ;;  %v18022_v42 = vld [vmem:[#allocation72_spill] sm:$0xff]  ;;  %v18023_v19 = vld [vmem:[#allocation35_spill] sm:$0xff]  ;;  %v5744_v16 = vadd.f32 %v15484_v45, %v5202_v54  ;;  %v18025_v32 = vld [vmem:[#allocation73_spill] sm:$0xff] }
 0x358   :  { %18020 = vst [vmem:[#allocation69_spill] sm:$0xff] %v15675_v10  ;;  %9792 = vmatpush2.bf16.msra.mxu0 %v13103_v14  ;;  %v5096_v43 = vpop.f32.mrf.mxu0  ;;  %v5209_v7 = vpop.f32.mrf.mxu1  ;;  %v15698_v58 = vld [vmem:[#allocation9 + $0x748] sm:$0xff]  ;;  %v13080_v17 = vcombine.high %v15684_v30, %v15686_v33 }
 0x359   :  { %18021 = vst [vmem:[#allocation70_spill] sm:$0xff] %v15679_v5  ;;  %9671 = vmatpush1.bf16.msra.mxu1 %v12879_v4  ;;  %9793 = vmatprep.subr.bf16.mxu0 %v13096_v40  ;;  %v5751_v62 = vadd.f32 %v15477_v0, %v5204_v27  ;;  %v5097_v14 = vadd.f32 %v5096_v43, %v18022_v42  ;;  %v15700_v23 = vld [vmem:[#allocation9 + $0x768] sm:$0xff]  ;;  %v5871_v40 = vmax.f32 %v5743_v8, 0.0  ;;  %v18029_v8 = vld [vmem:[#allocation74_spill] sm:$0xff] }
 0x35a   :  { %9636 = vmatmul.mubr.bf16.gmra.mxu0 %v18023_v19  ;;  %9502 = vmatprep.mubr.bf16.mxu1 %v15679_v5  ;;  %v12991_v4 = vcombine.low %v15669_v29, %v15671_v36  ;;  %v5206_v2 = vadd.f32 %v5205_v51, %v5093_v1  ;;  %v5098_v28 = vpop.f32.mrf.mxu0  ;;  %v5211_v31 = vpop.f32.mrf.mxu1  ;;  %v15708_v55 = vld [vmem:[#allocation9 + $0xa08] sm:$0xff]  ;;  %v13079_v36 = vcombine.low %v15684_v30, %v15686_v33  ;;  %v6087_v19 = vld [vmem:[#allocation9 + $0x370] sm:$0xff] }
 0x35b   :  { %9645 = vmatprep.mubr.bf16.mxu0 %v18024_v47  ;;  %9672 = vmatprep.subr.bf16.mxu1 %v13000_v21  ;;  %v5879_v37 = vmax.f32 %v5751_v62, 0.0  ;;  %v5210_v6 = vadd.f32 %v5209_v7, %v5097_v14  ;;  %v5099_v39 = vadd.f32 %v5098_v28, %v18025_v32  ;;  %v15710_v11 = vld [vmem:[#allocation9 + $0xa28] sm:$0xff]  ;;  %v12983_v33 = vcombine.low %v15698_v58, %v15700_v23  ;;  %v6489_v28 = vld [vmem:[#allocation11] sm:$0xff]  ;;  %v6083_v47 = vld [vmem:[#allocation9 + $0x350] sm:$0xff] }
 0x35c   :  { %9794 = vmatpush2.bf16.msra.mxu0 %v13095_v61  ;;  %9503 = vmatmul.mubr.bf16.gmra.mxu1 %v15675_v10  ;;  %v5752_v29 = vadd.f32 %v15484_v45, %v5206_v2  ;;  %v5100_v21 = vpop.f32.mrf.mxu0  ;;  %v12984_v61 = vcombine.high %v15698_v58, %v15700_v23  ;;  %v18026_v38 = vld [vmem:[#allocation75_spill] sm:$0xff]  ;;  %v18027_v13 = vld [vmem:[#allocation76_spill] sm:$0xff]  ;;  %v5213_v51 = vpop.f32.mrf.mxu1  ;;  %v13072_v62 = vcombine.high %v15708_v55, %v15710_v11 }
 0x35d   :  { %9673 = vmatpush2.bf16.msra.mxu1 %v12999_v12  ;;  %9795 = vmatprep.subr.bf16.mxu0 %v13088_v46  ;;  %v4990_v57 = vadd.f32 %v18027_v13, %v18026_v38  ;;  %v15719_v54 = vpack.c.bf16 %v5879_v37, %v5871_v40  ;;  %v5212_v59 = vadd.f32 %v5211_v31, %v5099_v39  ;;  %v15722_v1 = vld [vmem:[#allocation9 + $0x708] sm:$0xff]  ;;  %v5872_v46 = vmax.f32 %v5744_v16, 0.0  ;;  %v15733_v40 = vld [vmem:[#allocation9 + $0x1d0] sm:$0xff] }
 0x35e   :  { %v5101_v27 = vadd.f32 %v5100_v21, %v18029_v8  ;;  %9674 = vmatprep.subr.bf16.mxu1 %v12992_v18  ;;  %v15724_v12 = vld [vmem:[#allocation9 + $0x728] sm:$0xff]  ;;  %v5880_v43 = vmax.f32 %v5752_v29, 0.0  ;;  %v5102_v30 = vpop.f32.mrf.mxu0  ;;  %v5759_v42 = vadd.f32 %v15477_v0, %v5210_v6  ;;  %v5215_v2 = vpop.f32.mrf.mxu1  ;;  %v13071_v18 = vcombine.low %v15708_v55, %v15710_v11  ;;  %v15735_v16 = vld [vmem:[#allocation9 + $0x1f0] sm:$0xff] }
 0x35f   :  { %18028 = vst [vmem:[#allocation71_spill] sm:$0xff] %v15719_v54  ;;  %v5103_v7 = vadd.f32 %v5102_v30, %v4990_v57  ;;  %v5760_v58 = vadd.f32 %v15484_v45, %v5212_v59  ;;  %v18031_v39 = vld [vmem:[#allocation77_spill] sm:$0xff]  ;;  %v15745_v29 = vld [vmem:[#allocation9 + $0x6c8] sm:$0xff]  ;;  %v12975_v38 = vcombine.low %v15722_v1, %v15724_v12  ;;  %v18034_v13 = vsub.s32 0, %v14393_v20 }
 0x360   :  { %v5214_v14 = vadd.f32 %v5213_v51, %v5101_v27  ;;  %9796 = vmatpush2.bf16.msra.mxu0 %v13087_v56  ;;  %v15737_v37 = vpack.c.bf16 %v5880_v43, %v5872_v46  ;;  %v5106_v23 = vpop.f32.mrf.mxu0  ;;  %v12976_v56 = vcombine.high %v15722_v1, %v15724_v12  ;;  %v5219_v55 = vpop.f32.mrf.mxu1  ;;  %v18032_v11 = vld [vmem:[#allocation37_spill] sm:$0xff]  ;;  %v15747_v21 = vld [vmem:[#allocation9 + $0x6e8] sm:$0xff]  ;;  %v12810_v59 = vcombine.high %v15733_v40, %v15735_v16  ;;  %v18035_v51 = vld [vmem:[#allocation78_spill] sm:$0xff] }
 0x361   :  { %9675 = vmatpush2.bf16.msra.mxu1 %v12991_v4  ;;  %9797 = vmatprep.subr.bf16.mxu0 %v13080_v17  ;;  %v5216_v32 = vadd.f32 %v5215_v2, %v5103_v7  ;;  %v5107_v31 = vadd.f32 %v5106_v23, %v18031_v39  ;;  %v18033_v4 = vld [vmem:[#allocation61_spill] sm:$0xff]  ;;  %v15755_v57 = vrot.slane %v6489_v28, %v18034_v13  ;;  %v18036_v30 = vld [vmem:[#allocation80_spill] sm:$0xff]  ;;  %v18039_v13 = vld [vmem:[#allocation79_spill] sm:$0xff] }
 0x362   :  { %18030 = vst [vmem:[#allocation72_spill] sm:$0xff] %v15737_v37  ;;  %v5767_v6 = vadd.f32 %v15477_v0, %v5214_v14  ;;  %9646 = vmatmul.mubr.bf16.gmra.mxu0 %v18032_v11  ;;  %9676 = vmatprep.subr.bf16.mxu1 %v12984_v61  ;;  %v5108_v17 = vpop.f32.mrf.mxu0  ;;  %v5887_v61 = vmax.f32 %v5759_v42, 0.0  ;;  %v5221_v43 = vpop.f32.mrf.mxu1  ;;  %v18037_v14 = vld [vmem:[#allocation81_spill] sm:$0xff]  ;;  %v12968_v2 = vcombine.high %v15745_v29, %v15747_v21  ;;  %v5888_v42 = vmax.f32 %v5760_v58, 0.0  ;;  %v6386_v11 = vld [vmem:[#allocation9 + $0xcc8] sm:$0xff] }
 0x363   :  { %9512 = vmatprep.mubr.bf16.mxu1 %v15737_v37  ;;  %9801 = vmatprep.mubr.bf16.mxu0 %v18033_v4  ;;  %v5768_v27 = vadd.f32 %v15484_v45, %v5216_v32  ;;  %v5109_v46 = vadd.f32 %v5108_v17, %v18035_v51  ;;  %v5000_v1 = vadd.f32 %v18037_v14, %v18036_v30  ;;  %v6027_v39 = vld [vmem:[#allocation9 + $0x190] sm:$0xff]  ;;  %v18041_v58 = vsub.s32 1, %v14393_v20  ;;  %v6370_v5 = vld [vmem:[#allocation9 + $0xc48] sm:$0xff] }
 0x364   :  { %v5895_v8 = vmax.f32 %v5767_v6, 0.0  ;;  %9798 = vmatpush2.bf16.msra.mxu0 %v13079_v36  ;;  %9513 = vmatmul.mubr.bf16.gmra.mxu1 %v15719_v54  ;;  %v5220_v12 = vadd.f32 %v5219_v55, %v5107_v31  ;;  %v5110_v7 = vpop.f32.mrf.mxu0  ;;  %v5223_v32 = vpop.f32.mrf.mxu1  ;;  %v6031_v17 = vld [vmem:[#allocation9 + $0x1b0] sm:$0xff]  ;;  %v18059_v53 = vld [vmem:[#allocation43_spill] sm:$0xff] }
 0x365   :  { %9677 = vmatpush2.bf16.msra.mxu1 %v12983_v33  ;;  %9799 = vmatprep.subr.bf16.mxu0 %v13072_v62  ;;  %v5896_v6 = vmax.f32 %v5768_v27, 0.0  ;;  %v5222_v36 = vadd.f32 %v5221_v43, %v5109_v46  ;;  %v5111_v51 = vadd.f32 %v5110_v7, %v18039_v13  ;;  %v12809_v33 = vcombine.low %v15733_v40, %v15735_v16  ;;  %v6190_v27 = vld [vmem:[#allocation9 + $0x6a8] sm:$0xff]  ;;  %v5995_v20 = vld [vmem:[#allocation9 + $0x90] sm:$0xff] }
 0x366   :  { %v15766_v23 = vpack.c.bf16 %v5895_v8, %v5887_v61  ;;  %9678 = vmatprep.subr.bf16.mxu1 %v12976_v56  ;;  %v5112_v54 = vpop.f32.mrf.mxu0  ;;  %v5225_v55 = vpop.f32.mrf.mxu1  ;;  %v15775_v61 = vrot.slane %v6489_v28, %v18041_v58  ;;  %v12967_v56 = vcombine.low %v15745_v29, %v15747_v21  ;;  %v6186_v8 = vld [vmem:[#allocation9 + $0x688] sm:$0xff]  ;;  %v5775_v46 = vadd.f32 %v15477_v0, %v5220_v12  ;;  %v6019_v28 = vld [vmem:[#allocation9 + $0x150] sm:$0xff] }
 0x367   :  { %v15771_v31 = vpack.c.bf16 %v5896_v6, %v5888_v42  ;;  %v5113_v62 = vadd.f32 %v5112_v54, %v5000_v1  ;;  %v5224_v43 = vadd.f32 %v5223_v32, %v5111_v51  ;;  %v12802_v40 = vcombine.high %v6027_v39, %v6031_v17  ;;  %v6023_v29 = vld [vmem:[#allocation9 + $0x170] sm:$0xff]  ;;  %v18043_v6 = vld [vmem:[#allocation30_spill] sm:$0xff]  ;;  %v6182_v13 = vld [vmem:[#allocation9 + $0x668] sm:$0xff] }
 0x368   :  { %18038 = vst [vmem:[#allocation73_spill] sm:$0xff] %v15766_v23  ;;  %9800 = vmatpush2.bf16.msra.mxu0 %v13071_v18  ;;  %v9125_v30 = vpop.f32.mrf.mxu0  ;;  %v5776_v18 = vadd.f32 %v15484_v45, %v5222_v36  ;;  %v9238_v14 = vpop.f32.mrf.mxu1  ;;  %v18042_v1 = vld [vmem:[#allocation60_spill] sm:$0xff]  ;;  %v12960_v7 = vcombine.high %v6186_v8, %v6190_v27  ;;  %v5903_v51 = vmax.f32 %v5775_v46, 0.0  ;;  %v18055_v37 = vld [vmem:[#allocation41_spill] sm:$0xff] }
 0x369   :  { %18040 = vst [vmem:[#allocation75_spill] sm:$0xff] %v15771_v31  ;;  %9679 = vmatpush2.bf16.msra.mxu1 %v12975_v38  ;;  %9995 = vmatprep.subr.bf16.mxu0 %v12810_v59  ;;  %v5226_v54 = vadd.f32 %v5225_v55, %v5113_v62  ;;  %v9126_v16 = vadd.f32 %v9125_v30, %v15755_v57  ;;  %v6011_v30 = vld [vmem:[#allocation9 + $0x110] sm:$0xff] }
 0x36a   :  { %9522 = vmatprep.mubr.bf16.mxu1 %v15771_v31  ;;  %9680 = vmatprep.subr.bf16.mxu1 %v12968_v2  ;;  %v5783_v21 = vadd.f32 %v15477_v0, %v5224_v43  ;;  %v9127_v12 = vpop.f32.mrf.mxu0  ;;  %v12801_v38 = vcombine.low %v6027_v39, %v6031_v17  ;;  %v9240_v32 = vpop.f32.mrf.mxu1  ;;  %v6178_v2 = vld [vmem:[#allocation9 + $0x648] sm:$0xff]  ;;  %v12959_v39 = vcombine.low %v6186_v8, %v6190_v27  ;;  %v5904_v55 = vmax.f32 %v5776_v18, 0.0  ;;  %v6099_v31 = vld [vmem:[#allocation9 + $0x3d0] sm:$0xff] }
 0x36b   :  { %9802 = vmatmul.mubr.bf16.vlgmr.msra.gmra.mxu0 %v18042_v1  ;;  %v5784_v59 = vadd.f32 %v15484_v45, %v5226_v54  ;;  %v15786_v42 = vadd.f32 %v9238_v14, %v9126_v16  ;;  %v9128_v36 = vadd.f32 %v9127_v12, %v15775_v61  ;;  %v12794_v17 = vcombine.high %v6019_v28, %v6023_v29  ;;  %v6015_v54 = vld [vmem:[#allocation9 + $0x130] sm:$0xff]  ;;  %v6174_v18 = vld [vmem:[#allocation9 + $0x628] sm:$0xff] }
 0x36c   :  { %9811 = vmatprep.mubr.bf16.mxu0 %v18043_v6  ;;  %9996 = vmatpush1.bf16.msra.mxu0 %v12809_v33  ;;  %v5911_v62 = vmax.f32 %v5783_v21, 0.0  ;;  %v9129_v0 = vpop.f32.mrf.mxu0  ;;  %v9242_v43 = vpop.f32.mrf.mxu1  ;;  %v12952_v14 = vcombine.high %v6178_v2, %v6182_v13  ;;  %v18051_v6 = vld [vmem:[#allocation39_spill] sm:$0xff]  ;;  %v6103_v4 = vld [vmem:[#allocation9 + $0x3f0] sm:$0xff] }
 0x36d   :  { %9523 = vmatmul.mubr.bf16.gmra.mxu1 %v15766_v23  ;;  %9997 = vmatprep.subr.bf16.mxu0 %v12802_v40  ;;  %v5912_v45 = vmax.f32 %v5784_v59, 0.0  ;;  %v15791_v58 = vadd.f32 %v9240_v32, %v9128_v36  ;;  %v9130_v33 = vadd.f32 %v9129_v0, %v15755_v57  ;;  %v12793_v40 = vcombine.low %v6019_v28, %v6023_v29  ;;  %v18046_v0 = vld [vmem:[#allocation28_spill] sm:$0xff]  ;;  %v18047_v29 = vld [vmem:[#allocation63_spill] sm:$0xff] }
 0x36e   :  { %9681 = vmatpush2.bf16.msra.mxu1 %v12967_v56  ;;  %v15794_v16 = vpack.c.bf16 %v5911_v62, %v5903_v51  ;;  %v15796_v46 = vpop.f32.mrf.mxu0  ;;  %v15802_v27 = vpop.f32.mrf.mxu1  ;;  %v6170_v56 = vld [vmem:[#allocation9 + $0x608] sm:$0xff]  ;;  %v12786_v59 = vcombine.high %v6011_v30, %v6015_v54  ;;  %v6003_v51 = vld [vmem:[#allocation9 + $0xd0] sm:$0xff] }
 0x36f   :  { %9682 = vmatprep.subr.bf16.mxu1 %v12960_v7  ;;  %v15798_v21 = vpack.c.bf16 %v5912_v45, %v5904_v55  ;;  %v15800_v8 = vadd.f32 %v9242_v43, %v9130_v33  ;;  %v12951_v7 = vcombine.low %v6178_v2, %v6182_v13  ;;  %v6007_v62 = vld [vmem:[#allocation9 + $0xf0] sm:$0xff]  ;;  %v12944_v55 = vcombine.high %v6170_v56, %v6174_v18  ;;  %v6418_v33 = vld [vmem:[#allocation9 + $0xdc8] sm:$0xff] }
 0x370   :  { %18044 = vst [vmem:[#allocation76_spill] sm:$0xff] %v15794_v16  ;;  %9998 = vmatpush1.bf16.msra.mxu0 %v12801_v38  ;;  %v9135_v12 = vpop.f32.mrf.mxu0  ;;  %v9248_v32 = vpop.f32.mrf.mxu1  ;;  %v12785_v45 = vcombine.low %v6011_v30, %v6015_v54  ;;  %v6422_v43 = vld [vmem:[#allocation9 + $0xde8] sm:$0xff]  ;;  %v12778_v13 = vcombine.high %v6003_v51, %v6007_v62 }
 0x371   :  { %18045 = vst [vmem:[#allocation74_spill] sm:$0xff] %v15798_v21  ;;  %9999 = vmatprep.subr.bf16.mxu0 %v12794_v17  ;;  %v9136_v36 = vadd.f32 %v9135_v12, %v15755_v57  ;;  %9532 = vmatprep.mubr.bf16.mxu1 %v15798_v21  ;;  %v13192_v30 = vcombine.high %v6418_v33, %v6422_v43  ;;  %v5991_v21 = vld [vmem:[#allocation9 + $0x70] sm:$0xff]  ;;  %v6402_v23 = vld [vmem:[#allocation9 + $0xd48] sm:$0xff] }
 0x372   :  { %9683 = vmatpush2.bf16.msra.mxu1 %v12959_v39  ;;  %v9137_v38 = vpop.f32.mrf.mxu0  ;;  %v9250_v17 = vpop.f32.mrf.mxu1 }
 0x373   :  { %9812 = vmatmul.mubr.bf16.gmra.mxu0 %v18046_v0  ;;  %9684 = vmatprep.subr.bf16.mxu1 %v12952_v14  ;;  %v15807_v28 = vadd.f32 %v9248_v32, %v9136_v36  ;;  %v9138_v39 = vadd.f32 %v9137_v38, %v15775_v61  ;;  %v18048_v14 = vld [vmem:[#allocation40_spill] sm:$0xff] }
 0x374   :  { %9821 = vmatprep.mubr.bf16.mxu0 %v18047_v29  ;;  %10000 = vmatpush1.bf16.msra.mxu0 %v12793_v40  ;;  %v9139_v2 = vpop.f32.mrf.mxu0  ;;  %v9252_v32 = vpop.f32.mrf.mxu1  ;;  %v12943_v40 = vcombine.low %v6170_v56, %v6174_v18  ;;  %v5999_v38 = vld [vmem:[#allocation9 + $0xb0] sm:$0xff] }
 0x375   :  { %9533 = vmatmul.mubr.bf16.gmra.mxu1 %v15794_v16  ;;  %10001 = vmatprep.subr.bf16.mxu0 %v12786_v59  ;;  %v15812_v12 = vadd.f32 %v9250_v17, %v9138_v39  ;;  %v9140_v36 = vadd.f32 %v9139_v2, %v15755_v57  ;;  %v12777_v39 = vcombine.low %v6003_v51, %v6007_v62  ;;  %v6410_v17 = vld [vmem:[#allocation9 + $0xd88] sm:$0xff]  ;;  %v5987_v0 = vld [vmem:[#allocation9 + $0x50] sm:$0xff] }
 0x376   :  { %9685 = vmatpush2.bf16.msra.mxu1 %v12951_v7  ;;  %9688 = vmatprep.mubr.bf16.mxu1 %v18048_v14  ;;  %v15816_v29 = vpop.f32.mrf.mxu0  ;;  %v15820_v59 = vpop.f32.mrf.mxu1  ;;  %v6414_v7 = vld [vmem:[#allocation9 + $0xda8] sm:$0xff]  ;;  %v12770_v14 = vcombine.high %v5995_v20, %v5999_v38  ;;  %v13191_v2 = vcombine.low %v6418_v33, %v6422_v43  ;;  %v18050_v51 = vld [vmem:[#allocation65_spill] sm:$0xff]  ;;  %v12762_v43 = vcombine.high %v5987_v0, %v5991_v21 }
 0x377   :  { %9686 = vmatprep.subr.bf16.mxu1 %v12944_v55  ;;  %v15818_v54 = vadd.f32 %v9252_v32, %v9140_v36  ;;  %v18049_v55 = vld [vmem:[#allocation62_spill] sm:$0xff] }
 0x378   :  { %10002 = vmatpush1.bf16.msra.mxu0 %v12785_v45  ;;  %v9145_v16 = vpop.f32.mrf.mxu0  ;;  %v9258_v18 = vpop.f32.mrf.mxu1  ;;  %v13184_v45 = vcombine.high %v6410_v17, %v6414_v7 }
 0x379   :  { %10003 = vmatprep.subr.bf16.mxu0 %v12778_v13  ;;  %v9146_v56 = vadd.f32 %v9145_v16, %v15755_v57  ;;  %v6406_v16 = vld [vmem:[#allocation9 + $0xd68] sm:$0xff] }
 0x37a   :  { %9687 = vmatpush2.bf16.msra.mxu1 %v12943_v40  ;;  %v9147_v36 = vpop.f32.mrf.mxu0  ;;  %v9260_v13 = vpop.f32.mrf.mxu1  ;;  %v12769_v40 = vcombine.low %v5995_v20, %v5999_v38  ;;  %v13176_v20 = vcombine.high %v6402_v23, %v6406_v16 }
 0x37b   :  { %9822 = vmatmul.mubr.bf16.gmra.mxu0 %v18049_v55  ;;  %9882 = vmatprep.subr.bf16.mxu1 %v13192_v30  ;;  %v15824_v32 = vadd.f32 %v9258_v18, %v9146_v56  ;;  %v9148_v62 = vadd.f32 %v9147_v36, %v15775_v61  ;;  %v18052_v30 = vld [vmem:[#allocation42_spill] sm:$0xff]  ;;  %v5983_v36 = vld [vmem:[#allocation9 + $0x30] sm:$0xff] }
 0x37c   :  { %9831 = vmatprep.mubr.bf16.mxu0 %v18050_v51  ;;  %10004 = vmatpush1.bf16.msra.mxu0 %v12777_v39  ;;  %v9149_v33 = vpop.f32.mrf.mxu0  ;;  %v9262_v18 = vpop.f32.mrf.mxu1  ;;  %v13183_v39 = vcombine.low %v6410_v17, %v6414_v7  ;;  %v5979_v51 = vld [vmem:[#allocation9 + $0x10] sm:$0xff] }
 0x37d   :  { %9689 = vmatmul.mubr.bf16.vlgmr.msra.gmra.mxu1 %v18051_v6  ;;  %10005 = vmatprep.subr.bf16.mxu0 %v12770_v14  ;;  %v15829_v55 = vadd.f32 %v9260_v13, %v9148_v62  ;;  %v9150_v56 = vadd.f32 %v9149_v33, %v15755_v57  ;;  %v12761_v62 = vcombine.low %v5987_v0, %v5991_v21  ;;  %v6394_v13 = vld [vmem:[#allocation9 + $0xd08] sm:$0xff] }
 0x37e   :  { %9698 = vmatprep.mubr.bf16.mxu1 %v18052_v30  ;;  %9883 = vmatpush1.bf16.msra.mxu1 %v13191_v2  ;;  %v15833_v1 = vpop.f32.mrf.mxu0  ;;  %v15837_v14 = vpop.f32.mrf.mxu1  ;;  %v6398_v6 = vld [vmem:[#allocation9 + $0xd28] sm:$0xff]  ;;  %v12754_v2 = vcombine.high %v5979_v51, %v5983_v36  ;;  %v13175_v33 = vcombine.low %v6402_v23, %v6406_v16  ;;  %v12874_v16 = vcombine.high %v6099_v31, %v6103_v4 }
 0x37f   :  { %9884 = vmatprep.subr.bf16.mxu1 %v13184_v45  ;;  %v15835_v38 = vadd.f32 %v9262_v18, %v9150_v56  ;;  %v18053_v45 = vld [vmem:[#allocation64_spill] sm:$0xff] }
 0x380   :  { %10006 = vmatpush1.bf16.msra.mxu0 %v12769_v40  ;;  %v9155_v30 = vpop.f32.mrf.mxu0  ;;  %v9268_v7 = vpop.f32.mrf.mxu1  ;;  %v13168_v40 = vcombine.high %v6394_v13, %v6398_v6  ;;  %v18054_v21 = vld [vmem:[#allocation56_spill] sm:$0xff] }
 0x381   :  { %10007 = vmatprep.subr.bf16.mxu0 %v12762_v43  ;;  %v9156_v17 = vadd.f32 %v9155_v30, %v15755_v57  ;;  %v6390_v30 = vld [vmem:[#allocation9 + $0xce8] sm:$0xff] }
 0x382   :  { %9885 = vmatpush1.bf16.msra.mxu1 %v13183_v39  ;;  %v9157_v56 = vpop.f32.mrf.mxu0  ;;  %v9270_v43 = vpop.f32.mrf.mxu1  ;;  %v12753_v39 = vcombine.low %v5979_v51, %v5983_v36  ;;  %v13160_v51 = vcombine.high %v6386_v11, %v6390_v30 }
 0x383   :  { %9832 = vmatmul.mubr.bf16.gmra.mxu0 %v18053_v45  ;;  %9886 = vmatprep.subr.bf16.mxu1 %v13176_v20  ;;  %v15841_v18 = vadd.f32 %v9268_v7, %v9156_v17  ;;  %v9158_v0 = vadd.f32 %v9157_v56, %v15775_v61  ;;  %v18056_v20 = vld [vmem:[#allocation44_spill] sm:$0xff] }
 0x384   :  { %9841 = vmatprep.mubr.bf16.mxu0 %v18054_v21  ;;  %10008 = vmatpush1.bf16.msra.mxu0 %v12761_v62  ;;  %v9159_v23 = vpop.f32.mrf.mxu0  ;;  %v9272_v7 = vpop.f32.mrf.mxu1  ;;  %v13167_v62 = vcombine.low %v6394_v13, %v6398_v6  ;;  %v6091_v21 = vld [vmem:[#allocation9 + $0x390] sm:$0xff] }
 0x385   :  { %9699 = vmatmul.mubr.bf16.gmra.mxu1 %v18055_v37  ;;  %10009 = vmatprep.subr.bf16.mxu0 %v12754_v2  ;;  %v15846_v45 = vadd.f32 %v9270_v43, %v9158_v0  ;;  %v9160_v17 = vadd.f32 %v9159_v23, %v15755_v57  ;;  %v6095_v56 = vld [vmem:[#allocation9 + $0x3b0] sm:$0xff]  ;;  %v12873_v0 = vcombine.low %v6099_v31, %v6103_v4  ;;  %v6378_v43 = vld [vmem:[#allocation9 + $0xc88] sm:$0xff]  ;;  %v18058_v4 = vld [vmem:[#allocation58_spill] sm:$0xff] }
 0x386   :  { %9708 = vmatprep.mubr.bf16.mxu1 %v18056_v20  ;;  %9887 = vmatpush1.bf16.msra.mxu1 %v13175_v33  ;;  %v15850_v10 = vpop.f32.mrf.mxu0  ;;  %v15854_v2 = vpop.f32.mrf.mxu1  ;;  %v6382_v37 = vld [vmem:[#allocation9 + $0xca8] sm:$0xff]  ;;  %v12866_v33 = vcombine.high %v6091_v21, %v6095_v56  ;;  %v13159_v23 = vcombine.low %v6386_v11, %v6390_v30  ;;  %v12858_v30 = vcombine.high %v6083_v47, %v6087_v19 }
 0x387   :  { %9888 = vmatprep.subr.bf16.mxu1 %v13168_v40  ;;  %v15852_v36 = vadd.f32 %v9272_v7, %v9160_v17  ;;  %v18057_v40 = vld [vmem:[#allocation55_spill] sm:$0xff] }
 0x388   :  { %10010 = vmatpush1.bf16.msra.mxu0 %v12753_v39  ;;  %v9165_v20 = vpop.f32.mrf.mxu0  ;;  %v9278_v13 = vpop.f32.mrf.mxu1  ;;  %v13152_v39 = vcombine.high %v6378_v43, %v6382_v37 }
 0x389   :  { %10011 = vmatprep.subr.bf16.mxu0 %v12874_v16  ;;  %v9166_v6 = vadd.f32 %v9165_v20, %v15755_v57  ;;  %v6374_v20 = vld [vmem:[#allocation9 + $0xc68] sm:$0xff] }
 0x38a   :  { %9889 = vmatpush1.bf16.msra.mxu1 %v13167_v62  ;;  %v9167_v17 = vpop.f32.mrf.mxu0  ;;  %v9280_v16 = vpop.f32.mrf.mxu1  ;;  %v12865_v62 = vcombine.low %v6091_v21, %v6095_v56  ;;  %v13144_v21 = vcombine.high %v6370_v5, %v6374_v20 }
 0x38b   :  { %9842 = vmatmul.mubr.bf16.gmra.mxu0 %v18057_v40  ;;  %9890 = vmatprep.subr.bf16.mxu1 %v13160_v51  ;;  %v15858_v7 = vadd.f32 %v9278_v13, %v9166_v6  ;;  %v9168_v31 = vadd.f32 %v9167_v17, %v15775_v61  ;;  %v18060_v51 = vld [vmem:[#allocation46_spill] sm:$0xff]  ;;  %v6079_v17 = vld [vmem:[#allocation9 + $0x330] sm:$0xff] }
 0x38c   :  { %9851 = vmatprep.mubr.bf16.mxu0 %v18058_v4  ;;  %10012 = vmatpush2.bf16.msra.mxu0 %v12873_v0  ;;  %v9169_v11 = vpop.f32.mrf.mxu0  ;;  %v9282_v13 = vpop.f32.mrf.mxu1  ;;  %v13151_v0 = vcombine.low %v6378_v43, %v6382_v37  ;;  %v6075_v4 = vld [vmem:[#allocation9 + $0x310] sm:$0xff] }
 0x38d   :  { %9709 = vmatmul.mubr.bf16.gmra.mxu1 %v18059_v53  ;;  %10013 = vmatprep.subr.bf16.mxu0 %v12866_v33  ;;  %v15863_v40 = vadd.f32 %v9280_v16, %v9168_v31  ;;  %v9170_v6 = vadd.f32 %v9169_v11, %v15755_v57  ;;  %v12857_v31 = vcombine.low %v6083_v47, %v6087_v19  ;;  %v6362_v16 = vld [vmem:[#allocation9 + $0xc08] sm:$0xff]  ;;  %v18065_v19 = vld [vmem:[#allocation66_spill] sm:$0xff] }
 0x38e   :  { %9718 = vmatprep.mubr.bf16.mxu1 %v18060_v51  ;;  %9891 = vmatpush1.bf16.msra.mxu1 %v13159_v23  ;;  %v15867_v34 = vpop.f32.mrf.mxu0  ;;  %v15871_v33 = vpop.f32.mrf.mxu1  ;;  %v6366_v53 = vld [vmem:[#allocation9 + $0xc28] sm:$0xff]  ;;  %v12850_v23 = vcombine.high %v6075_v4, %v6079_v17  ;;  %v13143_v11 = vcombine.low %v6370_v5, %v6374_v20  ;;  %v12842_v20 = vcombine.high %v6067_v35, %v6071_v9 }
 0x38f   :  { %9892 = vmatprep.subr.bf16.mxu1 %v13152_v39  ;;  %v15869_v56 = vadd.f32 %v9282_v13, %v9170_v6  ;;  %18062 = vst [vmem:[#allocation78_spill] sm:$0xff] %v15871_v33  ;;  %v18063_v39 = vld [vmem:[#allocation57_spill] sm:$0xff] }
 0x390   :  { %10014 = vmatpush2.bf16.msra.mxu0 %v12865_v62  ;;  %v9175_v51 = vpop.f32.mrf.mxu0  ;;  %v9288_v43 = vpop.f32.mrf.mxu1  ;;  %v13136_v62 = vcombine.high %v6362_v16, %v6366_v53  ;;  %v18066_v33 = vld [vmem:[#allocation45_spill] sm:$0xff] }
 0x391   :  { %18061 = vst [vmem:[#allocation77_spill] sm:$0xff] %v15869_v56  ;;  %10015 = vmatprep.subr.bf16.mxu0 %v12858_v30  ;;  %v9176_v37 = vadd.f32 %v9175_v51, %v15755_v57  ;;  %v6482_v56 = vld [vmem:[#allocation9 + $0xfc8] sm:$0xff] }
 0x392   :  { %9893 = vmatpush1.bf16.msra.mxu1 %v13151_v0  ;;  %v9177_v6 = vpop.f32.mrf.mxu0  ;;  %v9290_v30 = vpop.f32.mrf.mxu1  ;;  %v12849_v0 = vcombine.low %v6075_v4, %v6079_v17  ;;  %v6486_v51 = vld [vmem:[#allocation9 + $0xfe8] sm:$0xff] }
 0x393   :  { %9852 = vmatmul.mubr.bf16.gmra.mxu0 %v18063_v39  ;;  %9894 = vmatprep.subr.bf16.mxu1 %v13144_v21  ;;  %v15875_v13 = vadd.f32 %v9288_v43, %v9176_v37  ;;  %v9178_v47 = vadd.f32 %v9177_v6, %v15775_v61  ;;  %v18068_v21 = vld [vmem:[#allocation48_spill] sm:$0xff]  ;;  %v13256_v4 = vcombine.high %v6482_v56, %v6486_v51 }
 0x394   :  { %9861 = vmatprep.mubr.bf16.mxu0 %v18065_v19  ;;  %10016 = vmatpush2.bf16.msra.mxu0 %v12857_v31  ;;  %v9179_v5 = vpop.f32.mrf.mxu0  ;;  %v9292_v43 = vpop.f32.mrf.mxu1  ;;  %v13135_v31 = vcombine.low %v6362_v16, %v6366_v53  ;;  %v6059_v19 = vld [vmem:[#allocation9 + $0x290] sm:$0xff] }
 0x395   :  { %18064 = vst [vmem:[#allocation80_spill] sm:$0xff] %v15875_v13  ;;  %9719 = vmatmul.mubr.bf16.gmra.mxu1 %v18066_v33  ;;  %10017 = vmatprep.subr.bf16.mxu0 %v12850_v23  ;;  %v15880_v39 = vadd.f32 %v9290_v30, %v9178_v47  ;;  %v9180_v37 = vadd.f32 %v9179_v5, %v15755_v57  ;;  %v6063_v6 = vld [vmem:[#allocation9 + $0x2b0] sm:$0xff]  ;;  %v6474_v30 = vld [vmem:[#allocation9 + $0xf88] sm:$0xff] }
 0x396   :  { %9728 = vmatprep.mubr.bf16.mxu1 %v18068_v21  ;;  %9895 = vmatpush1.bf16.msra.mxu1 %v13143_v11  ;;  %v15884_v13 = vpop.f32.mrf.mxu0  ;;  %v15888_v23 = vpop.f32.mrf.mxu1  ;;  %v12841_v47 = vcombine.low %v6067_v35, %v6071_v9  ;;  %v6478_v33 = vld [vmem:[#allocation9 + $0xfa8] sm:$0xff]  ;;  %v12834_v11 = vcombine.high %v6059_v19, %v6063_v6  ;;  %v13255_v5 = vcombine.low %v6482_v56, %v6486_v51 }
 0x397   :  { %18067 = vst [vmem:[#allocation81_spill] sm:$0xff] %v15880_v39  ;;  %18069 = vst [vmem:[#allocation79_spill] sm:$0xff] %v15884_v13  ;;  %9896 = vmatprep.subr.bf16.mxu1 %v13136_v62  ;;  %v15886_v17 = vadd.f32 %v9292_v43, %v9180_v37  ;;  %v6051_v39 = vld [vmem:[#allocation9 + $0x250] sm:$0xff]  ;;  %v18072_v62 = vld [vmem:[#allocation59_spill] sm:$0xff] }
 0x398   :  { %10018 = vmatpush2.bf16.msra.mxu0 %v12849_v0  ;;  %18071 = vst [vmem:[#allocation91_spill] sm:$0xff] %v15888_v23  ;;  %v6055_v13 = vld [vmem:[#allocation9 + $0x270] sm:$0xff]  ;;  %v13248_v0 = vcombine.high %v6474_v30, %v6478_v33  ;;  %v18075_v23 = vld [vmem:[#allocation47_spill] sm:$0xff] }
 0x399   :  { %18070 = vst [vmem:[#allocation90_spill] sm:$0xff] %v15886_v17  ;;  %10019 = vmatprep.subr.bf16.mxu0 %v12842_v20  ;;  %v18074_v35 = vld [vmem:[#allocation68_spill] sm:$0xff]  ;;  %v12826_v51 = vcombine.high %v6051_v39, %v6055_v13 }
 0x39a   :  { %v9185_v21 = vpop.f32.mrf.mxu0  ;;  %9897 = vmatpush1.bf16.msra.mxu1 %v13135_v31  ;;  %v12833_v31 = vcombine.low %v6059_v19, %v6063_v6  ;;  %v6466_v17 = vld [vmem:[#allocation9 + $0xf48] sm:$0xff] }
 0x39b   :  { %v9186_v53 = vadd.f32 %v9185_v21, %v15755_v57  ;;  %v9298_v16 = vpop.f32.mrf.mxu1  ;;  %9862 = vmatmul.mubr.bf16.gmra.mxu0 %v18072_v62  ;;  %9898 = vmatprep.subr.bf16.mxu1 %v13256_v4  ;;  %v6470_v21 = vld [vmem:[#allocation9 + $0xf68] sm:$0xff]  ;;  %v18077_v4 = vld [vmem:[#allocation50_spill] sm:$0xff] }
 0x39c   :  { %v9187_v37 = vpop.f32.mrf.mxu0  ;;  %9871 = vmatprep.mubr.bf16.mxu0 %v18074_v35  ;;  %10020 = vmatpush2.bf16.msra.mxu0 %v12841_v47  ;;  %v13247_v47 = vcombine.low %v6474_v30, %v6478_v33  ;;  %v6043_v35 = vld [vmem:[#allocation9 + $0x210] sm:$0xff]  ;;  %v13240_v19 = vcombine.high %v6466_v17, %v6470_v21 }
 0x39d   :  { %v15892_v43 = vadd.f32 %v9298_v16, %v9186_v53  ;;  %v9188_v9 = vadd.f32 %v9187_v37, %v15775_v61  ;;  %v9300_v20 = vpop.f32.mrf.mxu1  ;;  %9729 = vmatmul.mubr.bf16.gmra.mxu1 %v18075_v23  ;;  %10021 = vmatprep.subr.bf16.mxu0 %v12834_v11  ;;  %v6047_v37 = vld [vmem:[#allocation9 + $0x230] sm:$0xff]  ;;  %v6462_v23 = vld [vmem:[#allocation9 + $0xf28] sm:$0xff] }
 0x39e   :  { %v9189_v56 = vpop.f32.mrf.mxu0  ;;  %9738 = vmatprep.mubr.bf16.mxu1 %v18077_v4  ;;  %9899 = vmatpush2.bf16.msra.mxu1 %v13255_v5  ;;  %v12818_v5 = vcombine.high %v6043_v35, %v6047_v37 }
 0x39f   :  { %18073 = vst [vmem:[#allocation92_spill] sm:$0xff] %v15892_v43  ;;  %v15897_v62 = vadd.f32 %v9300_v20, %v9188_v9  ;;  %v9190_v53 = vadd.f32 %v9189_v56, %v15755_v57  ;;  %v9302_v16 = vpop.f32.mrf.mxu1  ;;  %9900 = vmatprep.subr.bf16.mxu1 %v13248_v0  ;;  %v12825_v9 = vcombine.low %v6051_v39, %v6055_v13  ;;  %v6458_v20 = vld [vmem:[#allocation9 + $0xf08] sm:$0xff]  ;;  %v18083_v39 = vld [vmem:[#allocation26_spill] sm:$0xff] }
 0x3a0   :  { %v15901_v43 = vpop.f32.mrf.mxu0  ;;  %10022 = vmatpush2.bf16.msra.mxu0 %v12833_v31  ;;  %v13239_v56 = vcombine.low %v6466_v17, %v6470_v21  ;;  %v18081_v0 = vld [vmem:[#allocation67_spill] sm:$0xff]  ;;  %v13232_v31 = vcombine.high %v6458_v20, %v6462_v23 }
 0x3a1   :  { %18076 = vst [vmem:[#allocation93_spill] sm:$0xff] %v15897_v62  ;;  %18078 = vst [vmem:[#allocation94_spill] sm:$0xff] %v15901_v43  ;;  %v15903_v6 = vadd.f32 %v9302_v16, %v9190_v53  ;;  %v15905_v11 = vpop.f32.mrf.mxu1  ;;  %10023 = vmatprep.subr.bf16.mxu0 %v12826_v51  ;;  %v6291_v62 = vld [vmem:[#allocation9 + $0x9d0] sm:$0xff] }
 0x3a2   :  { %18080 = vst [vmem:[#allocation96_spill] sm:$0xff] %v15905_v11  ;;  %v9195_v4 = vpop.f32.mrf.mxu0  ;;  %9901 = vmatpush2.bf16.msra.mxu1 %v13247_v47  ;;  %v6295_v43 = vld [vmem:[#allocation9 + $0x9f0] sm:$0xff]  ;;  %v12817_v47 = vcombine.low %v6043_v35, %v6047_v37 }
 0x3a3   :  { %18079 = vst [vmem:[#allocation95_spill] sm:$0xff] %v15903_v6  ;;  %v9196_v33 = vadd.f32 %v9195_v4, %v15755_v57  ;;  %v9308_v30 = vpop.f32.mrf.mxu1  ;;  %9872 = vmatmul.mubr.bf16.gmra.mxu0 %v18081_v0  ;;  %9902 = vmatprep.subr.bf16.mxu1 %v13240_v19  ;;  %v6450_v6 = vld [vmem:[#allocation9 + $0xec8] sm:$0xff]  ;;  %v18084_v11 = vld [vmem:[#allocation49_spill] sm:$0xff]  ;;  %v13066_v21 = vcombine.high %v6291_v62, %v6295_v43 }
 0x3a4   :  { %v9197_v53 = vpop.f32.mrf.mxu0  ;;  %10024 = vmatpush2.bf16.msra.mxu0 %v12825_v9  ;;  %10027 = vmatprep.mubr.bf16.mxu0 %v18083_v39  ;;  %v6454_v4 = vld [vmem:[#allocation9 + $0xee8] sm:$0xff]  ;;  %v6287_v39 = vld [vmem:[#allocation9 + $0x9b0] sm:$0xff] }
 0x3a5   :  { %v15909_v16 = vadd.f32 %v9308_v30, %v9196_v33  ;;  %v9198_v13 = vadd.f32 %v9197_v53, %v15775_v61  ;;  %v9310_v51 = vpop.f32.mrf.mxu1  ;;  %9739 = vmatmul.mubr.bf16.gmra.mxu1 %v18084_v11  ;;  %10025 = vmatprep.subr.bf16.mxu0 %v12818_v5  ;;  %v18085_v19 = vld [vmem:[#allocation52_spill] sm:$0xff]  ;;  %v13231_v33 = vcombine.low %v6458_v20, %v6462_v23 }
 0x3a6   :  { %v9199_v17 = vpop.f32.mrf.mxu0  ;;  %9748 = vmatprep.mubr.bf16.mxu1 %v18085_v19  ;;  %9903 = vmatpush2.bf16.msra.mxu1 %v13239_v56  ;;  %v6283_v30 = vld [vmem:[#allocation9 + $0x990] sm:$0xff]  ;;  %v13224_v35 = vcombine.high %v6450_v6, %v6454_v4  ;;  %v13065_v5 = vcombine.low %v6291_v62, %v6295_v43  ;;  %v6442_v11 = vld [vmem:[#allocation9 + $0xe88] sm:$0xff]  ;;  %v13223_v19 = vcombine.low %v6450_v6, %v6454_v4 }
 0x3a7   :  { %18082 = vst [vmem:[#allocation97_spill] sm:$0xff] %v15909_v16  ;;  %v15914_v0 = vadd.f32 %v9310_v51, %v9198_v13  ;;  %v9200_v9 = vadd.f32 %v9199_v17, %v15755_v57  ;;  %v9312_v53 = vpop.f32.mrf.mxu1  ;;  %9904 = vmatprep.subr.bf16.mxu1 %v13232_v31  ;;  %v6446_v13 = vld [vmem:[#allocation9 + $0xea8] sm:$0xff]  ;;  %v13058_v51 = vcombine.high %v6283_v30, %v6287_v39  ;;  %v6275_v57 = vld [vmem:[#allocation9 + $0x950] sm:$0xff] }
 0x3a8   :  { %v15918_v16 = vpop.f32.mrf.mxu0  ;;  %10026 = vmatpush2.bf16.msra.mxu0 %v12817_v47  ;;  %v6279_v23 = vld [vmem:[#allocation9 + $0x970] sm:$0xff]  ;;  %v9132_v20 = vadd.f32 %v15796_v46, %v15775_v61  ;;  %v13216_v47 = vcombine.high %v6442_v11, %v6446_v13  ;;  %v18087_v62 = vld [vmem:[#allocation27_spill] sm:$0xff] }
 0x3a9   :  { %v15920_v37 = vadd.f32 %v9312_v53, %v9200_v9  ;;  %10221 = vmatprep.subr.bf16.mxu0 %v13066_v21  ;;  %v18086_v31 = vld [vmem:[#allocation25_spill] sm:$0xff]  ;;  %v13057_v21 = vcombine.low %v6283_v30, %v6287_v39  ;;  %v6434_v9 = vld [vmem:[#allocation9 + $0xe48] sm:$0xff]  ;;  %v13050_v46 = vcombine.high %v6275_v57, %v6279_v23 }
 0x3aa   :  { %9905 = vmatpush2.bf16.msra.mxu1 %v13231_v33  ;;  %v9351_v56 = vpop.f32.mrf.mxu0  ;;  %v6438_v33 = vld [vmem:[#allocation9 + $0xe68] sm:$0xff] }
 0x3ab   :  { %v15925_v17 = vadd.f32 %v9351_v56, %v15786_v42  ;;  %10028 = vmatmul.mubr.bf16.vlgmr.msra.gmra.mxu0 %v18086_v31  ;;  %9906 = vmatprep.subr.bf16.mxu1 %v13224_v35  ;;  %v18089_v4 = vld [vmem:[#allocation51_spill] sm:$0xff]  ;;  %v18090_v42 = vld [vmem:[#allocation54_spill] sm:$0xff]  ;;  %v13215_v35 = vcombine.low %v6442_v11, %v6446_v13  ;;  %v6267_v56 = vld [vmem:[#allocation9 + $0x910] sm:$0xff]  ;;  %v13208_v30 = vcombine.high %v6434_v9, %v6438_v33 }
 0x3ac   :  { %10037 = vmatprep.mubr.bf16.mxu0 %v18087_v62  ;;  %10222 = vmatpush1.bf16.msra.mxu0 %v13065_v5  ;;  %v9353_v43 = vpop.f32.mrf.mxu0  ;;  %v6271_v31 = vld [vmem:[#allocation9 + $0x930] sm:$0xff]  ;;  %v9245_v5 = vadd.f32 %v15802_v27, %v9132_v20  ;;  %v13207_v13 = vcombine.low %v6434_v9, %v6438_v33 }
 0x3ad   :  { %v15930_v6 = vadd.f32 %v9353_v43, %v15791_v58  ;;  %9749 = vmatmul.mubr.bf16.gmra.mxu1 %v18089_v4  ;;  %10223 = vmatprep.subr.bf16.mxu0 %v13058_v51  ;;  %v13049_v43 = vcombine.low %v6275_v57, %v6279_v23  ;;  %v6426_v4 = vld [vmem:[#allocation9 + $0xe08] sm:$0xff]  ;;  %v13041_v20 = vcombine.low %v6267_v56, %v6271_v31  ;;  %v18091_v33 = vld [vmem:[#allocation53_spill] sm:$0xff] }
 0x3ae   :  { %9758 = vmatprep.mubr.bf16.mxu1 %v18090_v42  ;;  %9907 = vmatpush2.bf16.msra.mxu1 %v13223_v19  ;;  %v9355_v53 = vpop.f32.mrf.mxu0  ;;  %v6430_v51 = vld [vmem:[#allocation9 + $0xe28] sm:$0xff]  ;;  %v13042_v19 = vcombine.high %v6267_v56, %v6271_v31  ;;  %v6259_v42 = vld [vmem:[#allocation9 + $0x8d0] sm:$0xff] }
 0x3af   :  { %18088 = vst [vmem:[#allocation98_spill] sm:$0xff] %v15930_v6  ;;  %v15936_v39 = vadd.f32 %v9355_v53, %v15800_v8  ;;  %9908 = vmatprep.subr.bf16.mxu1 %v13216_v47  ;;  %v6263_v6 = vld [vmem:[#allocation9 + $0x8f0] sm:$0xff]  ;;  %v9142_v8 = vadd.f32 %v15816_v29, %v15775_v61  ;;  %v13200_v57 = vcombine.high %v6426_v4, %v6430_v51 }
 0x3b0   :  { %10224 = vmatpush1.bf16.msra.mxu0 %v13057_v21  ;;  %v9357_v58 = vpop.f32.mrf.mxu0  ;;  %v6163_v47 = vld [vmem:[#allocation9 + $0x5d0] sm:$0xff]  ;;  %v13034_v29 = vcombine.high %v6259_v42, %v6263_v6 }
 0x3b1   :  { %v15938_v62 = vadd.f32 %v9357_v58, %v9245_v5  ;;  %10225 = vmatprep.subr.bf16.mxu0 %v13050_v46  ;;  %v6167_v21 = vld [vmem:[#allocation9 + $0x5f0] sm:$0xff]  ;;  %v13199_v46 = vcombine.low %v6426_v4, %v6430_v51  ;;  %v9255_v5 = vadd.f32 %v15820_v59, %v9142_v8 }
 0x3b2   :  { %9909 = vmatpush2.bf16.msra.mxu1 %v13215_v35  ;;  %v9361_v11 = vpop.f32.mrf.mxu0  ;;  %v6251_v53 = vld [vmem:[#allocation9 + $0x890] sm:$0xff]  ;;  %v12938_v56 = vcombine.high %v6163_v47, %v6167_v21  ;;  %v12937_v51 = vcombine.low %v6163_v47, %v6167_v21 }
 0x3b3   :  { %v15943_v27 = vadd.f32 %v9361_v11, %v15807_v28  ;;  %10038 = vmatmul.mubr.bf16.gmra.mxu0 %v14518_v44  ;;  %9910 = vmatprep.subr.bf16.mxu1 %v13208_v30  ;;  %v6255_v35 = vld [vmem:[#allocation9 + $0x8b0] sm:$0xff]  ;;  %v13033_v30 = vcombine.low %v6259_v42, %v6263_v6 }
 0x3b4   :  { %10047 = vmatprep.mubr.bf16.mxu0 %v14558_v24  ;;  %10226 = vmatpush1.bf16.msra.mxu0 %v13049_v43  ;;  %v9363_v23 = vpop.f32.mrf.mxu0  ;;  %v6155_v58 = vld [vmem:[#allocation9 + $0x590] sm:$0xff]  ;;  %v13026_v11 = vcombine.high %v6251_v53, %v6255_v35  ;;  %v13025_v8 = vcombine.low %v6251_v53, %v6255_v35 }
 0x3b5   :  { %v15948_v9 = vadd.f32 %v9363_v23, %v15812_v12  ;;  %9759 = vmatmul.mubr.bf16.gmra.mxu1 %v18091_v33  ;;  %10227 = vmatprep.subr.bf16.mxu0 %v13042_v19  ;;  %v6159_v43 = vld [vmem:[#allocation9 + $0x5b0] sm:$0xff] }
 0x3b6   :  { %9911 = vmatpush2.bf16.msra.mxu1 %v13207_v13  ;;  %9914 = vmatprep.mubr.bf16.mxu1 %v15504_v22  ;;  %v9365_v28 = vpop.f32.mrf.mxu0  ;;  %v6243_v13 = vld [vmem:[#allocation9 + $0x850] sm:$0xff]  ;;  %v12930_v6 = vcombine.high %v6155_v58, %v6159_v43  ;;  %v12929_v21 = vcombine.low %v6155_v58, %v6159_v43 }
 0x3b7   :  { %v15954_v31 = vadd.f32 %v9365_v28, %v15818_v54  ;;  %9912 = vmatprep.subr.bf16.mxu1 %v13200_v57  ;;  %v6247_v23 = vld [vmem:[#allocation9 + $0x870] sm:$0xff]  ;;  %v9152_v54 = vadd.f32 %v15833_v1, %v15775_v61 }
 0x3b8   :  { %10228 = vmatpush1.bf16.msra.mxu0 %v13041_v20  ;;  %v9367_v12 = vpop.f32.mrf.mxu0  ;;  %v6147_v57 = vld [vmem:[#allocation9 + $0x550] sm:$0xff]  ;;  %v13018_v1 = vcombine.high %v6243_v13, %v6247_v23 }
 0x3b9   :  { %v15956_v19 = vadd.f32 %v9367_v12, %v9255_v5  ;;  %10229 = vmatprep.subr.bf16.mxu0 %v13034_v29  ;;  %v6151_v20 = vld [vmem:[#allocation9 + $0x570] sm:$0xff]  ;;  %v13017_v5 = vcombine.low %v6243_v13, %v6247_v23 }
 0x3ba   :  { %9913 = vmatpush2.bf16.msra.mxu1 %v13199_v46  ;;  %v9371_v4 = vpop.f32.mrf.mxu0  ;;  %v6235_v29 = vld [vmem:[#allocation9 + $0x810] sm:$0xff]  ;;  %v9265_v46 = vadd.f32 %v15837_v14, %v9152_v54  ;;  %v12922_v35 = vcombine.high %v6147_v57, %v6151_v20  ;;  %v12921_v43 = vcombine.low %v6147_v57, %v6151_v20 }
 0x3bb   :  { %v15961_v59 = vadd.f32 %v9371_v4, %v15824_v32  ;;  %10048 = vmatmul.mubr.bf16.gmra.mxu0 %v17956_v63  ;;  %10108 = vmatprep.subr.bf16.mxu1 %v12938_v56  ;;  %v6239_v28 = vld [vmem:[#allocation9 + $0x830] sm:$0xff] }
 0x3bc   :  { %10057 = vmatprep.mubr.bf16.mxu0 %v17957_v26  ;;  %10230 = vmatpush1.bf16.msra.mxu0 %v13033_v30  ;;  %v9373_v42 = vpop.f32.mrf.mxu0  ;;  %v6139_v56 = vld [vmem:[#allocation9 + $0x510] sm:$0xff]  ;;  %v13009_v54 = vcombine.low %v6235_v29, %v6239_v28 }
 0x3bd   :  { %v15966_v47 = vadd.f32 %v9373_v42, %v15829_v55  ;;  %9915 = vmatmul.mubr.bf16.vlgmr.msra.gmra.mxu1 %v15497_v50  ;;  %10231 = vmatprep.subr.bf16.mxu0 %v13026_v11  ;;  %v6143_v12 = vld [vmem:[#allocation9 + $0x530] sm:$0xff]  ;;  %v13010_v11 = vcombine.high %v6235_v29, %v6239_v28  ;;  %v6100_v50 = vld [vmem:[#allocation9 + $0x3d8] sm:$0xff] }
 0x3be   :  { %9924 = vmatprep.mubr.bf16.mxu1 %v15542_v15  ;;  %10109 = vmatpush1.bf16.msra.mxu1 %v12937_v51  ;;  %v9375_v32 = vpop.f32.mrf.mxu0  ;;  %v6355_v4 = vld [vmem:[#allocation9 + $0xbd0] sm:$0xff]  ;;  %v12914_v13 = vcombine.high %v6139_v56, %v6143_v12  ;;  %v12913_v57 = vcombine.low %v6139_v56, %v6143_v12  ;;  %v18140_v15 = vld [vmem:[#allocation98_spill] sm:$0xff] }
 0x3bf   :  { %v15972_v53 = vadd.f32 %v9375_v32, %v15835_v38  ;;  %10110 = vmatprep.subr.bf16.mxu1 %v12930_v6  ;;  %v6359_v51 = vld [vmem:[#allocation9 + $0xbf0] sm:$0xff]  ;;  %v9162_v38 = vadd.f32 %v15850_v10, %v15775_v61 }
 0x3c0   :  { %10232 = vmatpush1.bf16.msra.mxu0 %v13025_v8  ;;  %v9377_v55 = vpop.f32.mrf.mxu0  ;;  %v6131_v6 = vld [vmem:[#allocation9 + $0x4d0] sm:$0xff]  ;;  %v13130_v10 = vcombine.high %v6355_v4, %v6359_v51  ;;  %v13129_v28 = vcombine.low %v6355_v4, %v6359_v51 }
 0x3c1   :  { %v15974_v30 = vadd.f32 %v9377_v55, %v9265_v46  ;;  %10233 = vmatprep.subr.bf16.mxu0 %v13018_v1  ;;  %v6135_v42 = vld [vmem:[#allocation9 + $0x4f0] sm:$0xff]  ;;  %v9275_v32 = vadd.f32 %v15854_v2, %v9162_v38 }
 0x3c2   :  { %10111 = vmatpush1.bf16.msra.mxu1 %v12929_v21  ;;  %v9381_v58 = vpop.f32.mrf.mxu0  ;;  %v6347_v20 = vld [vmem:[#allocation9 + $0xb90] sm:$0xff]  ;;  %v12906_v29 = vcombine.high %v6131_v6, %v6135_v42  ;;  %v12905_v12 = vcombine.low %v6131_v6, %v6135_v42 }
 0x3c3   :  { %v15979_v14 = vadd.f32 %v9381_v58, %v15841_v18  ;;  %10058 = vmatmul.mubr.bf16.gmra.mxu0 %v17960_v60  ;;  %10112 = vmatprep.subr.bf16.mxu1 %v12922_v35  ;;  %v6351_v1 = vld [vmem:[#allocation9 + $0xbb0] sm:$0xff]  ;;  %v6040_v60 = vld [vmem:[#allocation9 + $0x1f8] sm:$0xff] }
 0x3c4   :  { %10067 = vmatprep.mubr.bf16.mxu0 %v17961_v49  ;;  %10234 = vmatpush1.bf16.msra.mxu0 %v13017_v5  ;;  %v9383_v23 = vpop.f32.mrf.mxu0  ;;  %v6123_v46 = vld [vmem:[#allocation9 + $0x490] sm:$0xff]  ;;  %v13122_v5 = vcombine.high %v6347_v20, %v6351_v1  ;;  %v13121_v51 = vcombine.low %v6347_v20, %v6351_v1 }
 0x3c5   :  { %v15984_v8 = vadd.f32 %v9383_v23, %v15846_v45  ;;  %9925 = vmatmul.mubr.bf16.gmra.mxu1 %v15534_v3  ;;  %10235 = vmatprep.subr.bf16.mxu0 %v13010_v11  ;;  %v6127_v35 = vld [vmem:[#allocation9 + $0x4b0] sm:$0xff]  ;;  %v18112_v3 = vld [vmem:[#allocation95_spill] sm:$0xff] }
 0x3c6   :  { %9934 = vmatprep.mubr.bf16.mxu1 %v15590_v41  ;;  %10113 = vmatpush1.bf16.msra.mxu1 %v12921_v43  ;;  %v9385_v18 = vpop.f32.mrf.mxu0  ;;  %v6339_v11 = vld [vmem:[#allocation9 + $0xb50] sm:$0xff]  ;;  %v12898_v43 = vcombine.high %v6123_v46, %v6127_v35  ;;  %v12897_v6 = vcombine.low %v6123_v46, %v6127_v35 }
 0x3c7   :  { %v15990_v21 = vadd.f32 %v9385_v18, %v15852_v36  ;;  %10114 = vmatprep.subr.bf16.mxu1 %v12914_v13  ;;  %v6343_v58 = vld [vmem:[#allocation9 + $0xb70] sm:$0xff]  ;;  %v9172_v36 = vadd.f32 %v15867_v34, %v15775_v61  ;;  %v18093_v18 = vld [vmem:[#allocation78_spill] sm:$0xff] }
 0x3c8   :  { %10236 = vmatpush1.bf16.msra.mxu0 %v13009_v54  ;;  %v9387_v45 = vpop.f32.mrf.mxu0  ;;  %v6115_v38 = vld [vmem:[#allocation9 + $0x450] sm:$0xff]  ;;  %v13114_v34 = vcombine.high %v6339_v11, %v6343_v58 }
 0x3c9   :  { %v15992_v55 = vadd.f32 %v9387_v45, %v9275_v32  ;;  %10237 = vmatprep.subr.bf16.mxu0 %v13130_v10  ;;  %v6119_v13 = vld [vmem:[#allocation9 + $0x470] sm:$0xff] }
 0x3ca   :  { %10115 = vmatpush1.bf16.msra.mxu1 %v12913_v57  ;;  %v9391_v56 = vpop.f32.mrf.mxu0  ;;  %v6331_v42 = vld [vmem:[#allocation9 + $0xb10] sm:$0xff]  ;;  %v9285_v57 = vadd.f32 %v18093_v18, %v9172_v36  ;;  %v12890_v1 = vcombine.high %v6115_v38, %v6119_v13  ;;  %v12889_v35 = vcombine.low %v6115_v38, %v6119_v13  ;;  %v18095_v36 = vld [vmem:[#allocation79_spill] sm:$0xff] }
 0x3cb   :  { %v15997_v2 = vadd.f32 %v9391_v56, %v15858_v7  ;;  %10068 = vmatmul.mubr.bf16.gmra.mxu0 %v17964_v25  ;;  %10116 = vmatprep.subr.bf16.mxu1 %v12906_v29  ;;  %v18092_v7 = vld [vmem:[#allocation89_spill] sm:$0xff]  ;;  %v13113_v29 = vcombine.low %v6339_v11, %v6343_v58  ;;  %v18096_v18 = vld [vmem:[#allocation80_spill] sm:$0xff] }
 0x3cc   :  { %10077 = vmatprep.mubr.bf16.mxu0 %v17965_v48  ;;  %10238 = vmatpush2.bf16.msra.mxu0 %v13129_v28  ;;  %v9393_v4 = vpop.f32.mrf.mxu0  ;;  %v6335_v10 = vld [vmem:[#allocation9 + $0xb30] sm:$0xff] }
 0x3cd   :  { %v16002_v23 = vadd.f32 %v9393_v4, %v15863_v40  ;;  %9935 = vmatmul.mubr.bf16.gmra.mxu1 %v15576_v52  ;;  %10239 = vmatprep.subr.bf16.mxu0 %v13122_v5  ;;  %v18094_v32 = vld [vmem:[#allocation77_spill] sm:$0xff]  ;;  %v13106_v56 = vcombine.high %v6331_v42, %v6335_v10  ;;  %v18098_v58 = vld [vmem:[#allocation36_spill] sm:$0xff]  ;;  %v18103_v52 = vld [vmem:[#allocation90_spill] sm:$0xff] }
 0x3ce   :  { %9944 = vmatprep.mubr.bf16.mxu1 %v18092_v7  ;;  %10117 = vmatpush1.bf16.msra.mxu1 %v12905_v12  ;;  %v9395_v54 = vpop.f32.mrf.mxu0  ;;  %v6107_v45 = vld [vmem:[#allocation9 + $0x410] sm:$0xff] }
 0x3cf   :  { %v16008_v20 = vadd.f32 %v9395_v54, %v18094_v32  ;;  %10118 = vmatprep.subr.bf16.mxu1 %v12898_v43  ;;  %v6111_v28 = vld [vmem:[#allocation9 + $0x430] sm:$0xff]  ;;  %v9182_v54 = vadd.f32 %v18095_v36, %v15775_v61 }
 0x3d0   :  { %10240 = vmatpush2.bf16.msra.mxu0 %v13121_v51  ;;  %v9397_v40 = vpop.f32.mrf.mxu0  ;;  %v6323_v12 = vld [vmem:[#allocation9 + $0xad0] sm:$0xff]  ;;  %v12882_v11 = vcombine.high %v6107_v45, %v6111_v28 }
 0x3d1   :  { %v16010_v5 = vadd.f32 %v9397_v40, %v9285_v57  ;;  %10241 = vmatprep.subr.bf16.mxu0 %v13114_v34  ;;  %v6327_v4 = vld [vmem:[#allocation9 + $0xaf0] sm:$0xff]  ;;  %v13105_v57 = vcombine.low %v6331_v42, %v6335_v10 }
 0x3d2   :  { %10119 = vmatpush1.bf16.msra.mxu1 %v12897_v6  ;;  %v9401_v46 = vpop.f32.mrf.mxu0  ;;  %v18097_v51 = vld [vmem:[#allocation33_spill] sm:$0xff]  ;;  %v18100_v40 = vld [vmem:[#allocation88_spill] sm:$0xff]  ;;  %v13098_v36 = vcombine.high %v6323_v12, %v6327_v4 }
 0x3d3   :  { %v16015_v43 = vadd.f32 %v9401_v46, %v18096_v18  ;;  %10078 = vmatmul.mubr.bf16.gmra.mxu0 %v18097_v51  ;;  %10120 = vmatprep.subr.bf16.mxu1 %v12890_v1  ;;  %v6227_v6 = vld [vmem:[#allocation9 + $0x7d0] sm:$0xff]  ;;  %v18101_v46 = vld [vmem:[#allocation70_spill] sm:$0xff]  ;;  %v12881_v1 = vcombine.low %v6107_v45, %v6111_v28 }
 0x3d4   :  { %10087 = vmatprep.mubr.bf16.mxu0 %v18098_v58  ;;  %10242 = vmatpush2.bf16.msra.mxu0 %v13113_v29  ;;  %v9403_v34 = vpop.f32.mrf.mxu0  ;;  %v6231_v32 = vld [vmem:[#allocation9 + $0x7f0] sm:$0xff]  ;;  %v18102_v58 = vld [vmem:[#allocation91_spill] sm:$0xff] }
 0x3d5   :  { %v18099_v38 = vld [vmem:[#allocation81_spill] sm:$0xff]  ;;  %9945 = vmatmul.mubr.bf16.gmra.mxu1 %v18100_v40  ;;  %10243 = vmatprep.subr.bf16.mxu0 %v13106_v56  ;;  %v9295_v29 = vadd.f32 %v18102_v58, %v9182_v54  ;;  %v13002_v10 = vcombine.high %v6227_v6, %v6231_v32  ;;  %v13001_v28 = vcombine.low %v6227_v6, %v6231_v32  ;;  %v18104_v54 = vld [vmem:[#allocation94_spill] sm:$0xff]  ;;  %v18105_v58 = vld [vmem:[#allocation92_spill] sm:$0xff] }
 0x3d6   :  { %v16020_v13 = vadd.f32 %v9403_v34, %v18099_v38  ;;  %9954 = vmatprep.mubr.bf16.mxu1 %v18101_v46  ;;  %10121 = vmatpush1.bf16.msra.mxu1 %v12889_v35  ;;  %v9405_v18 = vpop.f32.mrf.mxu0  ;;  %v6315_v51 = vld [vmem:[#allocation9 + $0xa90] sm:$0xff]  ;;  %v13097_v38 = vcombine.low %v6323_v12, %v6327_v4  ;;  %v18107_v4 = vld [vmem:[#allocation38_spill] sm:$0xff] }
 0x3d7   :  { %v6319_v7 = vld [vmem:[#allocation9 + $0xab0] sm:$0xff]  ;;  %v16026_v42 = vadd.f32 %v9405_v18, %v18103_v52  ;;  %10122 = vmatprep.subr.bf16.mxu1 %v12882_v11  ;;  %v9192_v52 = vadd.f32 %v18104_v54, %v15775_v61 }
 0x3d8   :  { %10244 = vmatpush2.bf16.msra.mxu0 %v13105_v57  ;;  %v9407_v34 = vpop.f32.mrf.mxu0  ;;  %v6219_v40 = vld [vmem:[#allocation9 + $0x790] sm:$0xff]  ;;  %v13090_v35 = vcombine.high %v6315_v51, %v6319_v7  ;;  %v18106_v57 = vld [vmem:[#allocation35_spill] sm:$0xff]  ;;  %v13089_v18 = vcombine.low %v6315_v51, %v6319_v7 }
 0x3d9   :  { %v6223_v56 = vld [vmem:[#allocation9 + $0x7b0] sm:$0xff]  ;;  %v16028_v48 = vadd.f32 %v9407_v34, %v9295_v29  ;;  %10245 = vmatprep.subr.bf16.mxu0 %v13098_v36 }
 0x3da   :  { %10123 = vmatpush1.bf16.msra.mxu1 %v12881_v1  ;;  %v9411_v45 = vpop.f32.mrf.mxu0  ;;  %v6307_v46 = vld [vmem:[#allocation9 + $0xa50] sm:$0xff]  ;;  %v12994_v12 = vcombine.high %v6219_v40, %v6223_v56 }
 0x3db   :  { %v6311_v25 = vld [vmem:[#allocation9 + $0xa70] sm:$0xff]  ;;  %v16033_v11 = vadd.f32 %v9411_v45, %v18105_v58  ;;  %10088 = vmatmul.mubr.bf16.gmra.mxu0 %v18106_v57  ;;  %10124 = vmatprep.subr.bf16.mxu1 %v13002_v10  ;;  %v12993_v10 = vcombine.low %v6219_v40, %v6223_v56 }
 0x3dc   :  { %10097 = vmatprep.mubr.bf16.mxu0 %v18107_v4  ;;  %10246 = vmatpush2.bf16.msra.mxu0 %v13097_v38  ;;  %v9413_v36 = vpop.f32.mrf.mxu0  ;;  %v6211_v1 = vld [vmem:[#allocation9 + $0x750] sm:$0xff]  ;;  %v13082_v54 = vcombine.high %v6307_v46, %v6311_v25 }
 0x3dd   :  { %v6215_v29 = vld [vmem:[#allocation9 + $0x770] sm:$0xff]  ;;  %10247 = vmatprep.subr.bf16.mxu0 %v13090_v35 }
 0x3de   :  { %v18108_v6 = vld [vmem:[#allocation93_spill] sm:$0xff]  ;;  %v18110_v45 = vld [vmem:[#allocation72_spill] sm:$0xff]  ;;  %10125 = vmatpush2.bf16.msra.mxu1 %v13001_v28  ;;  %v9415_v58 = vpop.f32.mrf.mxu0  ;;  %v12986_v51 = vcombine.high %v6211_v1, %v6215_v29  ;;  %v12985_v56 = vcombine.low %v6211_v1, %v6215_v29  ;;  %v18116_v29 = vld [vmem:[#allocation71_spill] sm:$0xff] }
 0x3df   :  { %v16038_v32 = vadd.f32 %v9413_v36, %v18108_v6  ;;  %v18109_v34 = vld [vmem:[#allocation69_spill] sm:$0xff]  ;;  %v18111_v4 = vld [vmem:[#allocation96_spill] sm:$0xff]  ;;  %v16044_v7 = vadd.f32 %v9415_v58, %v18112_v3  ;;  %10126 = vmatprep.subr.bf16.mxu1 %v12994_v12  ;;  %v13081_v6 = vcombine.low %v6307_v46, %v6311_v25  ;;  %v9202_v3 = vadd.f32 %v15918_v16, %v15775_v61  ;;  %v9314_v16 = vpop.f32.mrf.mxu1 }
 0x3e0   :  { %9955 = vmatmul.mubr.bf16.gmra.mxu1 %v18109_v34  ;;  %v6299_v57 = vld [vmem:[#allocation9 + $0xa10] sm:$0xff]  ;;  %v9305_v38 = vadd.f32 %v18111_v4, %v9192_v52  ;;  %10248 = vmatpush2.bf16.msra.mxu0 %v13089_v18  ;;  %v9417_v36 = vpop.f32.mrf.mxu0 }
 0x3e1   :  { %9964 = vmatprep.mubr.bf16.mxu1 %v18110_v45  ;;  %v6303_v41 = vld [vmem:[#allocation9 + $0xa30] sm:$0xff]  ;;  %10249 = vmatprep.subr.bf16.mxu0 %v13082_v54  ;;  %v6036_v45 = vld [vmem:[#allocation9 + $0x1d8] sm:$0xff] }
 0x3e2   :  { %v6203_v34 = vld [vmem:[#allocation9 + $0x710] sm:$0xff]  ;;  %v16046_v49 = vadd.f32 %v9417_v36, %v9305_v38  ;;  %v13074_v28 = vcombine.high %v6299_v57, %v6303_v41  ;;  %10127 = vmatpush2.bf16.msra.mxu1 %v12993_v10  ;;  %v9421_v40 = vpop.f32.mrf.mxu0  ;;  %v13073_v54 = vcombine.low %v6299_v57, %v6303_v41  ;;  %v12812_v61 = vcombine.high %v6036_v45, %v6040_v60  ;;  %v18117_v38 = vld [vmem:[#allocation75_spill] sm:$0xff] }
 0x3e3   :  { %v6207_v35 = vld [vmem:[#allocation9 + $0x730] sm:$0xff]  ;;  %10128 = vmatprep.subr.bf16.mxu1 %v12986_v51 }
 0x3e4   :  { %v18113_v52 = vld [vmem:[#allocation97_spill] sm:$0xff]  ;;  %v12978_v25 = vcombine.high %v6203_v34, %v6207_v35  ;;  %10250 = vmatpush2.bf16.msra.mxu0 %v13081_v6  ;;  %v9423_v18 = vpop.f32.mrf.mxu0  ;;  %v12977_v36 = vcombine.low %v6203_v34, %v6207_v35 }
 0x3e5   :  { %v16051_v12 = vadd.f32 %v9421_v40, %v18113_v52  ;;  %v18114_v4 = vld [vmem:[#allocation37_spill] sm:$0xff]  ;;  %v16056_v1 = vadd.f32 %v9423_v18, %v15914_v0  ;;  %10251 = vmatprep.subr.bf16.mxu0 %v13074_v28  ;;  %v9315_v52 = vadd.f32 %v9314_v16, %v9202_v3  ;;  %v12811_v18 = vcombine.low %v6036_v45, %v6040_v60  ;;  %v18118_v16 = vld [vmem:[#allocation60_spill] sm:$0xff] }
 0x3e6   :  { %10098 = vmatmul.mubr.bf16.gmra.mxu0 %v18114_v4  ;;  %v18115_v46 = vld [vmem:[#allocation61_spill] sm:$0xff]  ;;  %10129 = vmatpush2.bf16.msra.mxu1 %v12985_v56  ;;  %v9425_v51 = vpop.f32.mrf.mxu0 }
 0x3e7   :  { %10253 = vmatprep.mubr.bf16.mxu0 %v18115_v46  ;;  %v6195_v58 = vld [vmem:[#allocation9 + $0x6d0] sm:$0xff]  ;;  %v6028_v6 = vld [vmem:[#allocation9 + $0x198] sm:$0xff]  ;;  %v16061_v41 = vadd.f32 %v9425_v51, %v15920_v37  ;;  %10130 = vmatprep.subr.bf16.mxu1 %v12978_v25 }
 0x3e8   :  { %v6199_v10 = vld [vmem:[#allocation9 + $0x6f0] sm:$0xff]  ;;  %9965 = vmatmul.mubr.bf16.gmra.mxu1 %v18116_v29  ;;  %v6032_v40 = vld [vmem:[#allocation9 + $0x1b8] sm:$0xff]  ;;  %10252 = vmatpush2.bf16.msra.mxu0 %v13073_v54  ;;  %v9427_v0 = vpop.f32.mrf.mxu0 }
 0x3e9   :  { %9974 = vmatprep.mubr.bf16.mxu1 %v18117_v38  ;;  %v12970_v57 = vcombine.high %v6195_v58, %v6199_v10  ;;  %v6187_v29 = vld [vmem:[#allocation9 + $0x690] sm:$0xff]  ;;  %v16063_v46 = vadd.f32 %v9427_v0, %v9315_v52  ;;  %10447 = vmatprep.subr.bf16.mxu0 %v12812_v61  ;;  %v12804_v38 = vcombine.high %v6028_v6, %v6032_v40  ;;  %v6020_v35 = vld [vmem:[#allocation9 + $0x158] sm:$0xff] }
 0x3ea   :  { %v6191_v28 = vld [vmem:[#allocation9 + $0x6b0] sm:$0xff]  ;;  %10131 = vmatpush2.bf16.msra.mxu1 %v12977_v36  ;;  %v16065_v56 = vpop.f32.mrf.mxu0  ;;  %v12969_v34 = vcombine.low %v6195_v58, %v6199_v10  ;;  %v6024_v3 = vld [vmem:[#allocation9 + $0x178] sm:$0xff]  ;;  %v12803_v45 = vcombine.low %v6028_v6, %v6032_v40 }
 0x3eb   :  { %10132 = vmatprep.subr.bf16.mxu1 %v12970_v57  ;;  %v12962_v37 = vcombine.high %v6187_v29, %v6191_v28  ;;  %v18119_v25 = vld [vmem:[#allocation30_spill] sm:$0xff]  ;;  %v6179_v54 = vld [vmem:[#allocation9 + $0x650] sm:$0xff]  ;;  %v12796_v36 = vcombine.high %v6020_v35, %v6024_v3  ;;  %v12961_v10 = vcombine.low %v6187_v29, %v6191_v28  ;;  %v12795_v6 = vcombine.low %v6020_v35, %v6024_v3  ;;  %v18127_v28 = vld [vmem:[#allocation63_spill] sm:$0xff] }
 0x3ec   :  { %v16069_v60 = vpop.f32.mrf.mxu0  ;;  %v6183_v51 = vld [vmem:[#allocation9 + $0x670] sm:$0xff]  ;;  %v18122_v52 = vld [vmem:[#allocation74_spill] sm:$0xff] }
 0x3ed   :  { %18120 = vst [vmem:[#allocation78_spill] sm:$0xff] %v16069_v60  ;;  %v18121_v61 = vld [vmem:[#allocation73_spill] sm:$0xff]  ;;  %v18142_v60 = vld [vmem:[#allocation64_spill] sm:$0xff] }
 0x3ee   :  { %10254 = vmatmul.mubr.bf16.vlgmr.msra.gmra.mxu0 %v18118_v16  ;;  %10133 = vmatpush2.bf16.msra.mxu1 %v12969_v34  ;;  %v16073_v58 = vpop.f32.mrf.mxu0  ;;  %v6012_v57 = vld [vmem:[#allocation9 + $0x118] sm:$0xff]  ;;  %v6171_v40 = vld [vmem:[#allocation9 + $0x610] sm:$0xff] }
 0x3ef   :  { %10263 = vmatprep.mubr.bf16.mxu0 %v18119_v25  ;;  %10448 = vmatpush1.bf16.msra.mxu0 %v12811_v18  ;;  %18123 = vst [vmem:[#allocation77_spill] sm:$0xff] %v16073_v58  ;;  %v6016_v0 = vld [vmem:[#allocation9 + $0x138] sm:$0xff]  ;;  %v12954_v25 = vcombine.high %v6179_v54, %v6183_v51  ;;  %v6175_v16 = vld [vmem:[#allocation9 + $0x630] sm:$0xff] }
 0x3f0   :  { %9975 = vmatmul.mubr.bf16.gmra.mxu1 %v18121_v61  ;;  %10449 = vmatprep.subr.bf16.mxu0 %v12804_v38  ;;  %v16075_v18 = vpop.f32.mrf.mxu0  ;;  %v12788_v61 = vcombine.high %v6012_v57, %v6016_v0  ;;  %v6004_v34 = vld [vmem:[#allocation9 + $0xd8] sm:$0xff]  ;;  %v18126_v58 = vld [vmem:[#allocation28_spill] sm:$0xff]  ;;  %v12946_v29 = vcombine.high %v6171_v40, %v6175_v16  ;;  %v12787_v35 = vcombine.low %v6012_v57, %v6016_v0 }
 0x3f1   :  { %9984 = vmatprep.mubr.bf16.mxu1 %v18122_v52  ;;  %10134 = vmatprep.subr.bf16.mxu1 %v12962_v37  ;;  %18124 = vst [vmem:[#allocation79_spill] sm:$0xff] %v16075_v18  ;;  %v12953_v52 = vcombine.low %v6179_v54, %v6183_v51  ;;  %v6008_v4 = vld [vmem:[#allocation9 + $0xf8] sm:$0xff]  ;;  %v6419_v3 = vld [vmem:[#allocation9 + $0xdd0] sm:$0xff] }
 0x3f2   :  { %10135 = vmatpush2.bf16.msra.mxu1 %v12961_v10  ;;  %v16077_v38 = vpop.f32.mrf.mxu0  ;;  %v12780_v10 = vcombine.high %v6004_v34, %v6008_v4  ;;  %v18130_v54 = vld [vmem:[#allocation40_spill] sm:$0xff]  ;;  %v12779_v57 = vcombine.low %v6004_v34, %v6008_v4  ;;  %v5992_v18 = vld [vmem:[#allocation9 + $0x78] sm:$0xff] }
 0x3f3   :  { %10450 = vmatpush1.bf16.msra.mxu0 %v12803_v45  ;;  %18125 = vst [vmem:[#allocation80_spill] sm:$0xff] %v16077_v38  ;;  %10136 = vmatprep.subr.bf16.mxu1 %v12954_v25  ;;  %v6423_v45 = vld [vmem:[#allocation9 + $0xdf0] sm:$0xff]  ;;  %v5996_v25 = vld [vmem:[#allocation9 + $0x98] sm:$0xff] }
 0x3f4   :  { %10451 = vmatprep.subr.bf16.mxu0 %v12796_v36  ;;  %v16081_v37 = vpop.f32.mrf.mxu0  ;;  %v18129_v36 = vld [vmem:[#allocation76_spill] sm:$0xff]  ;;  %v6000_v38 = vld [vmem:[#allocation9 + $0xb8] sm:$0xff] }
 0x3f5   :  { %18128 = vst [vmem:[#allocation81_spill] sm:$0xff] %v16081_v37  ;;  %v6411_v0 = vld [vmem:[#allocation9 + $0xd90] sm:$0xff]  ;;  %v12771_v4 = vcombine.low %v5996_v25, %v6000_v38 }
 0x3f6   :  { %10264 = vmatmul.mubr.bf16.gmra.mxu0 %v18126_v58  ;;  %10137 = vmatpush2.bf16.msra.mxu1 %v12953_v52  ;;  %v16085_v51 = vpop.f32.mrf.mxu0  ;;  %v12945_v58 = vcombine.low %v6171_v40, %v6175_v16  ;;  %v6415_v37 = vld [vmem:[#allocation9 + $0xdb0] sm:$0xff]  ;;  %v13193_v52 = vcombine.low %v6419_v3, %v6423_v45 }
 0x3f7   :  { %10273 = vmatprep.mubr.bf16.mxu0 %v18127_v28  ;;  %10452 = vmatpush1.bf16.msra.mxu0 %v12795_v6  ;;  %18131 = vst [vmem:[#allocation91_spill] sm:$0xff] %v16085_v51  ;;  %v13194_v28 = vcombine.high %v6419_v3, %v6423_v45  ;;  %v18134_v51 = vld [vmem:[#allocation62_spill] sm:$0xff]  ;;  %v13186_v16 = vcombine.high %v6411_v0, %v6415_v37  ;;  %v18135_v40 = vld [vmem:[#allocation65_spill] sm:$0xff] }
 0x3f8   :  { %9985 = vmatmul.mubr.bf16.gmra.mxu1 %v18129_v36  ;;  %10453 = vmatprep.subr.bf16.mxu0 %v12788_v61  ;;  %v16087_v6 = vpop.f32.mrf.mxu0  ;;  %v12772_v36 = vcombine.high %v5996_v25, %v6000_v38  ;;  %v6403_v34 = vld [vmem:[#allocation9 + $0xd50] sm:$0xff]  ;;  %v18138_v45 = vld [vmem:[#allocation42_spill] sm:$0xff] }
 0x3f9   :  { %10140 = vmatprep.mubr.bf16.mxu1 %v18130_v54  ;;  %10138 = vmatprep.subr.bf16.mxu1 %v12946_v29  ;;  %18132 = vst [vmem:[#allocation90_spill] sm:$0xff] %v16087_v6  ;;  %v5988_v54 = vld [vmem:[#allocation9 + $0x58] sm:$0xff]  ;;  %v18137_v6 = vld [vmem:[#allocation39_spill] sm:$0xff] }
 0x3fa   :  { %10139 = vmatpush2.bf16.msra.mxu1 %v12945_v58  ;;  %v16089_v61 = vpop.f32.mrf.mxu0  ;;  %v9464_v29 = vpop.f32.mrf.mxu1  ;;  %v12764_v3 = vcombine.high %v5988_v54, %v5992_v18 }
 0x3fb   :  { %10454 = vmatpush1.bf16.msra.mxu0 %v12787_v35  ;;  %18133 = vst [vmem:[#allocation94_spill] sm:$0xff] %v16089_v61  ;;  %10334 = vmatprep.subr.bf16.mxu1 %v13194_v28  ;;  %v9465_v58 = vadd.f32 %v9464_v29, %v15925_v17  ;;  %v5984_v61 = vld [vmem:[#allocation9 + $0x38] sm:$0xff]  ;;  %v12763_v29 = vcombine.low %v5988_v54, %v5992_v18  ;;  %v18143_v54 = vld [vmem:[#allocation56_spill] sm:$0xff] }
 0x3fc   :  { %10455 = vmatprep.subr.bf16.mxu0 %v12780_v10  ;;  %v16093_v35 = vpop.f32.mrf.mxu0  ;;  %v6407_v10 = vld [vmem:[#allocation9 + $0xd70] sm:$0xff]  ;;  %v9466_v28 = vpop.f32.mrf.mxu1 }
 0x3fd   :  { %18136 = vst [vmem:[#allocation92_spill] sm:$0xff] %v16093_v35  ;;  %v9467_v35 = vadd.f32 %v9466_v28, %v18140_v15  ;;  %v13178_v38 = vcombine.high %v6403_v34, %v6407_v10  ;;  %v6104_v15 = vld [vmem:[#allocation9 + $0x3f8] sm:$0xff] }
 0x3fe   :  { %10274 = vmatmul.mubr.bf16.gmra.mxu0 %v18134_v51  ;;  %v16098_v51 = vpop.f32.mrf.mxu0  ;;  %v9468_v25 = vpop.f32.mrf.mxu1 }
 0x3ff   :  { %10283 = vmatprep.mubr.bf16.mxu0 %v18135_v40  ;;  %10456 = vmatpush1.bf16.msra.mxu0 %v12779_v57  ;;  %18139 = vst [vmem:[#allocation93_spill] sm:$0xff] %v16098_v51  ;;  %v13185_v40 = vcombine.low %v6411_v0, %v6415_v37  ;;  %v5980_v57 = vld [vmem:[#allocation9 + $0x18] sm:$0xff]  ;;  %v13177_v0 = vcombine.low %v6403_v34, %v6407_v10 }
 0x400   :  { %10141 = vmatmul.mubr.bf16.vlgmr.msra.gmra.mxu1 %v18137_v6  ;;  %10457 = vmatprep.subr.bf16.mxu0 %v12772_v36  ;;  %v16101_v17 = vpop.f32.mrf.mxu0  ;;  %v6395_v36 = vld [vmem:[#allocation9 + $0xd10] sm:$0xff]  ;;  %v9470_v51 = vpop.f32.mrf.mxu1 }
 0x401   :  { %10150 = vmatprep.mubr.bf16.mxu1 %v18138_v45  ;;  %10335 = vmatpush1.bf16.msra.mxu1 %v13193_v52  ;;  %v6399_v6 = vld [vmem:[#allocation9 + $0xd30] sm:$0xff]  ;;  %v9469_v45 = vadd.f32 %v9468_v25, %v15936_v39  ;;  %v12756_v52 = vcombine.high %v5980_v57, %v5984_v61 }
 0x402   :  { %10336 = vmatprep.subr.bf16.mxu1 %v13186_v16  ;;  %v16104_v37 = vpop.f32.mrf.mxu0  ;;  %v10899_v16 = vmax.f32 %v9465_v58, 0.0  ;;  %v13170_v18 = vcombine.high %v6395_v36, %v6399_v6  ;;  %v9474_v39 = vpop.f32.mrf.mxu1  ;;  %v6387_v25 = vld [vmem:[#allocation9 + $0xcd0] sm:$0xff] }
 0x403   :  { %10458 = vmatpush1.bf16.msra.mxu0 %v12771_v4  ;;  %18141 = vst [vmem:[#allocation96_spill] sm:$0xff] %v16104_v37  ;;  %v10907_v28 = vmax.f32 %v9469_v45, 0.0  ;;  %v9471_v4 = vadd.f32 %v9470_v51, %v15938_v62  ;;  %v6391_v37 = vld [vmem:[#allocation9 + $0xcf0] sm:$0xff]  ;;  %v9475_v58 = vadd.f32 %v9474_v39, %v15943_v27  ;;  %v12876_v62 = vcombine.high %v6100_v50, %v6104_v15 }
 0x404   :  { %10459 = vmatprep.subr.bf16.mxu0 %v12764_v3  ;;  %v16109_v3 = vpop.f32.mrf.mxu0  ;;  %v18145_v45 = vld [vmem:[#allocation41_spill] sm:$0xff]  ;;  %v10900_v51 = vmax.f32 %v9467_v35, 0.0 }
 0x405   :  { %10337 = vmatpush1.bf16.msra.mxu1 %v13185_v40  ;;  %v12755_v40 = vcombine.low %v5980_v57, %v5984_v61  ;;  %v16111_v34 = vpack.c.bf16 %v10907_v28, %v10899_v16  ;;  %v10908_v10 = vmax.f32 %v9471_v4, 0.0  ;;  %v6092_v61 = vld [vmem:[#allocation9 + $0x398] sm:$0xff]  ;;  %v13162_v28 = vcombine.high %v6387_v25, %v6391_v37  ;;  %v6379_v39 = vld [vmem:[#allocation9 + $0xc90] sm:$0xff] }
 0x406   :  { %10284 = vmatmul.mubr.bf16.gmra.mxu0 %v18142_v60  ;;  %10338 = vmatprep.subr.bf16.mxu1 %v13178_v38  ;;  %v18146_v38 = vld [vmem:[#allocation44_spill] sm:$0xff]  ;;  %v13169_v60 = vcombine.low %v6395_v36, %v6399_v6  ;;  %v6096_v57 = vld [vmem:[#allocation9 + $0x3b8] sm:$0xff] }
 0x407   :  { %10293 = vmatprep.mubr.bf16.mxu0 %v18143_v54  ;;  %10460 = vmatpush1.bf16.msra.mxu0 %v12763_v29  ;;  %18144 = vst [vmem:[#allocation95_spill] sm:$0xff] %v16111_v34  ;;  %v9476_v29 = vpop.f32.mrf.mxu1  ;;  %v16116_v54 = vpop.f32.mrf.mxu0  ;;  %v6383_v35 = vld [vmem:[#allocation9 + $0xcb0] sm:$0xff]  ;;  %v16121_v34 = vpack.c.bf16 %v10908_v10, %v10900_v51  ;;  %v18150_v10 = vld [vmem:[#allocation58_spill] sm:$0xff] }
 0x408   :  { %10151 = vmatmul.mubr.bf16.gmra.mxu1 %v18145_v45  ;;  %10461 = vmatprep.subr.bf16.mxu0 %v12756_v52  ;;  %v9477_v16 = vadd.f32 %v9476_v29, %v15948_v9  ;;  %v12875_v52 = vcombine.low %v6100_v50, %v6104_v15  ;;  %v13161_v9 = vcombine.low %v6387_v25, %v6391_v37  ;;  %v6088_v29 = vld [vmem:[#allocation9 + $0x378] sm:$0xff]  ;;  %v18149_v50 = vld [vmem:[#allocation55_spill] sm:$0xff]  ;;  %v6371_v51 = vld [vmem:[#allocation9 + $0xc50] sm:$0xff] }
 0x409   :  { %10160 = vmatprep.mubr.bf16.mxu1 %v18146_v38  ;;  %10339 = vmatpush1.bf16.msra.mxu1 %v13177_v0  ;;  %v9478_v27 = vpop.f32.mrf.mxu1  ;;  %v16119_v4 = vpop.f32.mrf.mxu0  ;;  %18148 = vst [vmem:[#allocation98_spill] sm:$0xff] %v16121_v34  ;;  %v12868_v38 = vcombine.high %v6092_v61, %v6096_v57  ;;  %v13154_v15 = vcombine.high %v6379_v39, %v6383_v35 }
 0x40a   :  { %10340 = vmatprep.subr.bf16.mxu1 %v13170_v18  ;;  %18147 = vst [vmem:[#allocation97_spill] sm:$0xff] %v16119_v4  ;;  %v9479_v0 = vadd.f32 %v9478_v27, %v15954_v31  ;;  %v6084_v18 = vld [vmem:[#allocation9 + $0x358] sm:$0xff]  ;;  %v6375_v27 = vld [vmem:[#allocation9 + $0xc70] sm:$0xff] }
 0x40b   :  { %10462 = vmatpush1.bf16.msra.mxu0 %v12755_v40  ;;  %v9480_v6 = vpop.f32.mrf.mxu1  ;;  %v16124_v36 = vpop.f32.mrf.mxu0  ;;  %v10915_v40 = vmax.f32 %v9475_v58, 0.0 }
 0x40c   :  { %10463 = vmatprep.subr.bf16.mxu0 %v12876_v62  ;;  %v10923_v45 = vmax.f32 %v9479_v0, 0.0  ;;  %v9481_v4 = vadd.f32 %v9480_v6, %v15956_v19  ;;  %v18152_v0 = vld [vmem:[#allocation43_spill] sm:$0xff]  ;;  %v12860_v19 = vcombine.high %v6084_v18, %v6088_v29  ;;  %v18153_v6 = vld [vmem:[#allocation46_spill] sm:$0xff] }
 0x40d   :  { %10341 = vmatpush1.bf16.msra.mxu1 %v13169_v60  ;;  %v9484_v31 = vpop.f32.mrf.mxu1  ;;  %v16129_v62 = vpop.f32.mrf.mxu0  ;;  %v12867_v60 = vcombine.low %v6092_v61, %v6096_v57  ;;  %v6076_v61 = vld [vmem:[#allocation9 + $0x318] sm:$0xff] }
 0x40e   :  { %10294 = vmatmul.mubr.bf16.gmra.mxu0 %v18149_v50  ;;  %10342 = vmatprep.subr.bf16.mxu1 %v13162_v28  ;;  %v16131_v37 = vpack.c.bf16 %v10923_v45, %v10915_v40  ;;  %v10924_v25 = vmax.f32 %v9481_v4, 0.0  ;;  %v9485_v58 = vadd.f32 %v9484_v31, %v15961_v59  ;;  %v10916_v28 = vmax.f32 %v9477_v16, 0.0  ;;  %v6080_v57 = vld [vmem:[#allocation9 + $0x338] sm:$0xff]  ;;  %v6363_v31 = vld [vmem:[#allocation9 + $0xc10] sm:$0xff] }
 0x40f   :  { %10303 = vmatprep.mubr.bf16.mxu0 %v18150_v10  ;;  %10464 = vmatpush2.bf16.msra.mxu0 %v12875_v52  ;;  %v9486_v52 = vpop.f32.mrf.mxu1  ;;  %v16136_v34 = vpop.f32.mrf.mxu0  ;;  %v13153_v10 = vcombine.low %v6379_v39, %v6383_v35  ;;  %v13146_v4 = vcombine.high %v6371_v51, %v6375_v27  ;;  %v6367_v16 = vld [vmem:[#allocation9 + $0xc30] sm:$0xff] }
 0x410   :  { %18151 = vst [vmem:[#allocation99_spill] sm:$0xff] %v16131_v37  ;;  %10161 = vmatmul.mubr.bf16.gmra.mxu1 %v18152_v0  ;;  %10465 = vmatprep.subr.bf16.mxu0 %v12868_v38  ;;  %v9487_v45 = vadd.f32 %v9486_v52, %v15966_v47  ;;  %v12859_v38 = vcombine.low %v6084_v18, %v6088_v29  ;;  %v6072_v52 = vld [vmem:[#allocation9 + $0x2f8] sm:$0xff] }
 0x411   :  { %10170 = vmatprep.mubr.bf16.mxu1 %v18153_v6  ;;  %10343 = vmatpush1.bf16.msra.mxu1 %v13161_v9  ;;  %v9488_v59 = vpop.f32.mrf.mxu1  ;;  %v16139_v40 = vpop.f32.mrf.mxu0  ;;  %v16141_v37 = vpack.c.bf16 %v10924_v25, %v10916_v28  ;;  %v12852_v6 = vcombine.high %v6076_v61, %v6080_v57  ;;  %v13145_v47 = vcombine.low %v6371_v51, %v6375_v27  ;;  %v18155_v18 = vld [vmem:[#allocation57_spill] sm:$0xff]  ;;  %v18156_v25 = vld [vmem:[#allocation66_spill] sm:$0xff] }
 0x412   :  { %10344 = vmatprep.subr.bf16.mxu1 %v13154_v15  ;;  %v9489_v9 = vadd.f32 %v9488_v59, %v15972_v53  ;;  %v6068_v15 = vld [vmem:[#allocation9 + $0x2d8] sm:$0xff]  ;;  %v13138_v29 = vcombine.high %v6363_v31, %v6367_v16  ;;  %v6483_v28 = vld [vmem:[#allocation9 + $0xfd0] sm:$0xff] }
 0x413   :  { %10466 = vmatpush2.bf16.msra.mxu0 %v12867_v60  ;;  %18154 = vst [vmem:[#allocation100_spill] sm:$0xff] %v16141_v37  ;;  %v9490_v39 = vpop.f32.mrf.mxu1  ;;  %v16144_v35 = vpop.f32.mrf.mxu0  ;;  %v10931_v60 = vmax.f32 %v9485_v58, 0.0  ;;  %v6487_v59 = vld [vmem:[#allocation9 + $0xff0] sm:$0xff] }
 0x414   :  { %10467 = vmatprep.subr.bf16.mxu0 %v12860_v19  ;;  %v10939_v0 = vmax.f32 %v9489_v9, 0.0  ;;  %v9491_v50 = vadd.f32 %v9490_v39, %v15974_v30  ;;  %v18158_v9 = vld [vmem:[#allocation45_spill] sm:$0xff]  ;;  %v12844_v30 = vcombine.high %v6068_v15, %v6072_v52  ;;  %v18159_v39 = vld [vmem:[#allocation48_spill] sm:$0xff] }
 0x415   :  { %10345 = vmatpush1.bf16.msra.mxu1 %v13153_v10  ;;  %v9494_v53 = vpop.f32.mrf.mxu1  ;;  %v16149_v19 = vpop.f32.mrf.mxu0  ;;  %v12851_v10 = vcombine.low %v6076_v61, %v6080_v57  ;;  %v6060_v61 = vld [vmem:[#allocation9 + $0x298] sm:$0xff] }
 0x416   :  { %10304 = vmatmul.mubr.bf16.gmra.mxu0 %v18155_v18  ;;  %10346 = vmatprep.subr.bf16.mxu1 %v13146_v4  ;;  %v16151_v51 = vpack.c.bf16 %v10939_v0, %v10931_v60  ;;  %v10940_v27 = vmax.f32 %v9491_v50, 0.0  ;;  %v9495_v58 = vadd.f32 %v9494_v53, %v15979_v14  ;;  %v10932_v4 = vmax.f32 %v9487_v45, 0.0  ;;  %v6064_v57 = vld [vmem:[#allocation9 + $0x2b8] sm:$0xff]  ;;  %v6475_v53 = vld [vmem:[#allocation9 + $0xf90] sm:$0xff] }
 0x417   :  { %10313 = vmatprep.mubr.bf16.mxu0 %v18156_v25  ;;  %10468 = vmatpush2.bf16.msra.mxu0 %v12859_v38  ;;  %v9496_v38 = vpop.f32.mrf.mxu1  ;;  %v16156_v37 = vpop.f32.mrf.mxu0  ;;  %v13137_v25 = vcombine.low %v6363_v31, %v6367_v16  ;;  %v13258_v50 = vcombine.high %v6483_v28, %v6487_v59  ;;  %v6479_v45 = vld [vmem:[#allocation9 + $0xfb0] sm:$0xff] }
 0x418   :  { %18157 = vst [vmem:[#allocation101_spill] sm:$0xff] %v16151_v51  ;;  %10171 = vmatmul.mubr.bf16.gmra.mxu1 %v18158_v9  ;;  %10469 = vmatprep.subr.bf16.mxu0 %v12852_v6  ;;  %v9497_v0 = vadd.f32 %v9496_v38, %v15984_v8  ;;  %v12843_v6 = vcombine.low %v6068_v15, %v6072_v52  ;;  %v6056_v38 = vld [vmem:[#allocation9 + $0x278] sm:$0xff]  ;;  %v18161_v15 = vld [vmem:[#allocation59_spill] sm:$0xff] }
 0x419   :  { %10180 = vmatprep.mubr.bf16.mxu1 %v18159_v39  ;;  %10347 = vmatpush1.bf16.msra.mxu1 %v13145_v47  ;;  %v9498_v14 = vpop.f32.mrf.mxu1  ;;  %v16159_v60 = vpop.f32.mrf.mxu0  ;;  %v16161_v51 = vpack.c.bf16 %v10940_v27, %v10932_v4  ;;  %v12836_v39 = vcombine.high %v6060_v61, %v6064_v57  ;;  %v13257_v8 = vcombine.low %v6483_v28, %v6487_v59  ;;  %v18162_v27 = vld [vmem:[#allocation68_spill] sm:$0xff] }
 0x41a   :  { %10348 = vmatprep.subr.bf16.mxu1 %v13138_v29  ;;  %v9499_v47 = vadd.f32 %v9498_v14, %v15990_v21  ;;  %v6052_v29 = vld [vmem:[#allocation9 + $0x258] sm:$0xff]  ;;  %v13250_v52 = vcombine.high %v6475_v53, %v6479_v45  ;;  %v6467_v4 = vld [vmem:[#allocation9 + $0xf50] sm:$0xff] }
 0x41b   :  { %10470 = vmatpush2.bf16.msra.mxu0 %v12851_v10  ;;  %18160 = vst [vmem:[#allocation102_spill] sm:$0xff] %v16161_v51  ;;  %v9500_v31 = vpop.f32.mrf.mxu1  ;;  %v16164_v16 = vpop.f32.mrf.mxu0  ;;  %v10947_v10 = vmax.f32 %v9495_v58, 0.0  ;;  %v6471_v14 = vld [vmem:[#allocation9 + $0xf70] sm:$0xff] }
 0x41c   :  { %10471 = vmatprep.subr.bf16.mxu0 %v12844_v30  ;;  %v10955_v9 = vmax.f32 %v9499_v47, 0.0  ;;  %v9501_v18 = vadd.f32 %v9500_v31, %v15992_v55  ;;  %v18164_v47 = vld [vmem:[#allocation47_spill] sm:$0xff]  ;;  %v12828_v55 = vcombine.high %v6052_v29, %v6056_v38  ;;  %v18165_v31 = vld [vmem:[#allocation50_spill] sm:$0xff] }
 0x41d   :  { %10349 = vmatpush1.bf16.msra.mxu1 %v13137_v25  ;;  %v9504_v21 = vpop.f32.mrf.mxu1  ;;  %v16169_v30 = vpop.f32.mrf.mxu0  ;;  %v12835_v25 = vcombine.low %v6060_v61, %v6064_v57  ;;  %v6044_v61 = vld [vmem:[#allocation9 + $0x218] sm:$0xff] }
 0x41e   :  { %10314 = vmatmul.mubr.bf16.gmra.mxu0 %v18161_v15  ;;  %10350 = vmatprep.subr.bf16.mxu1 %v13258_v50  ;;  %v16171_v28 = vpack.c.bf16 %v10955_v9, %v10947_v10  ;;  %v10956_v59 = vmax.f32 %v9501_v18, 0.0  ;;  %v9505_v58 = vadd.f32 %v9504_v21, %v15997_v2  ;;  %v10948_v50 = vmax.f32 %v9497_v0, 0.0  ;;  %v6048_v57 = vld [vmem:[#allocation9 + $0x238] sm:$0xff]  ;;  %v6459_v21 = vld [vmem:[#allocation9 + $0xf10] sm:$0xff] }
 0x41f   :  { %10323 = vmatprep.mubr.bf16.mxu0 %v18162_v27  ;;  %10472 = vmatpush2.bf16.msra.mxu0 %v12843_v6  ;;  %v9506_v6 = vpop.f32.mrf.mxu1  ;;  %v16176_v51 = vpop.f32.mrf.mxu0  ;;  %v13249_v27 = vcombine.low %v6475_v53, %v6479_v45  ;;  %v13242_v18 = vcombine.high %v6467_v4, %v6471_v14  ;;  %v6463_v0 = vld [vmem:[#allocation9 + $0xf30] sm:$0xff] }
 0x420   :  { %18163 = vst [vmem:[#allocation103_spill] sm:$0xff] %v16171_v28  ;;  %10181 = vmatmul.mubr.bf16.gmra.mxu1 %v18164_v47  ;;  %10473 = vmatprep.subr.bf16.mxu0 %v12836_v39  ;;  %v9507_v9 = vadd.f32 %v9506_v6, %v16002_v23  ;;  %v12827_v39 = vcombine.low %v6052_v29, %v6056_v38  ;;  %v6296_v6 = vld [vmem:[#allocation9 + $0x9f8] sm:$0xff]  ;;  %v18167_v29 = vld [vmem:[#allocation67_spill] sm:$0xff] }
 0x421   :  { %10190 = vmatprep.mubr.bf16.mxu1 %v18165_v31  ;;  %10351 = vmatpush2.bf16.msra.mxu1 %v13257_v8  ;;  %v9508_v2 = vpop.f32.mrf.mxu1  ;;  %v16179_v10 = vpop.f32.mrf.mxu0  ;;  %v16181_v28 = vpack.c.bf16 %v10956_v59, %v10948_v50  ;;  %v12820_v31 = vcombine.high %v6044_v61, %v6048_v57  ;;  %v13241_v23 = vcombine.low %v6467_v4, %v6471_v14  ;;  %v18168_v59 = vld [vmem:[#allocation26_spill] sm:$0xff]  ;;  %v6451_v50 = vld [vmem:[#allocation9 + $0xed0] sm:$0xff] }
 0x422   :  { %10352 = vmatprep.subr.bf16.mxu1 %v13250_v52  ;;  %v9509_v8 = vadd.f32 %v9508_v2, %v16008_v20  ;;  %v6292_v52 = vld [vmem:[#allocation9 + $0x9d8] sm:$0xff]  ;;  %v13234_v38 = vcombine.high %v6459_v21, %v6463_v0  ;;  %v6455_v2 = vld [vmem:[#allocation9 + $0xef0] sm:$0xff] }
 0x423   :  { %10474 = vmatpush2.bf16.msra.mxu0 %v12835_v25  ;;  %18166 = vst [vmem:[#allocation104_spill] sm:$0xff] %v16181_v28  ;;  %v9510_v53 = vpop.f32.mrf.mxu1  ;;  %v16184_v45 = vpop.f32.mrf.mxu0  ;;  %v10963_v25 = vmax.f32 %v9505_v58, 0.0  ;;  %v13233_v28 = vcombine.low %v6459_v21, %v6463_v0  ;;  %v13225_v0 = vcombine.low %v6451_v50, %v6455_v2 }
 0x424   :  { %10475 = vmatprep.subr.bf16.mxu0 %v12828_v55  ;;  %v10971_v47 = vmax.f32 %v9509_v8, 0.0  ;;  %v9511_v15 = vadd.f32 %v9510_v53, %v16010_v5  ;;  %v18170_v8 = vld [vmem:[#allocation49_spill] sm:$0xff]  ;;  %v13068_v5 = vcombine.high %v6292_v52, %v6296_v6  ;;  %v18171_v53 = vld [vmem:[#allocation52_spill] sm:$0xff] }
 0x425   :  { %10353 = vmatpush2.bf16.msra.mxu1 %v13249_v27  ;;  %v9514_v20 = vpop.f32.mrf.mxu1  ;;  %v16189_v55 = vpop.f32.mrf.mxu0  ;;  %v12819_v27 = vcombine.low %v6044_v61, %v6048_v57  ;;  %v6284_v61 = vld [vmem:[#allocation9 + $0x998] sm:$0xff] }
 0x426   :  { %10324 = vmatmul.mubr.bf16.gmra.mxu0 %v18167_v29  ;;  %10354 = vmatprep.subr.bf16.mxu1 %v13242_v18  ;;  %v16191_v4 = vpack.c.bf16 %v10971_v47, %v10963_v25  ;;  %v10972_v14 = vmax.f32 %v9511_v15, 0.0  ;;  %v9515_v58 = vadd.f32 %v9514_v20, %v16015_v43  ;;  %v10964_v18 = vmax.f32 %v9507_v9, 0.0  ;;  %v6288_v57 = vld [vmem:[#allocation9 + $0x9b8] sm:$0xff]  ;;  %v6443_v20 = vld [vmem:[#allocation9 + $0xe90] sm:$0xff] }
 0x427   :  { %10476 = vmatpush2.bf16.msra.mxu0 %v12827_v39  ;;  %10479 = vmatprep.mubr.bf16.mxu0 %v18168_v59  ;;  %v9516_v39 = vpop.f32.mrf.mxu1  ;;  %v16196_v59 = vpop.f32.mrf.mxu0  ;;  %v13226_v15 = vcombine.high %v6451_v50, %v6455_v2  ;;  %v6447_v9 = vld [vmem:[#allocation9 + $0xeb0] sm:$0xff] }
 0x428   :  { %18169 = vst [vmem:[#allocation26_spill] sm:$0xff] %v16191_v4  ;;  %10191 = vmatmul.mubr.bf16.gmra.mxu1 %v18170_v8  ;;  %10477 = vmatprep.subr.bf16.mxu0 %v12820_v31  ;;  %v9517_v47 = vadd.f32 %v9516_v39, %v16020_v13  ;;  %v13067_v31 = vcombine.low %v6292_v52, %v6296_v6  ;;  %v6276_v8 = vld [vmem:[#allocation9 + $0x958] sm:$0xff] }
 0x429   :  { %10200 = vmatprep.mubr.bf16.mxu1 %v18171_v53  ;;  %10355 = vmatpush2.bf16.msra.mxu1 %v13241_v23  ;;  %v9518_v43 = vpop.f32.mrf.mxu1  ;;  %v16199_v25 = vpop.f32.mrf.mxu0  ;;  %v16201_v4 = vpack.c.bf16 %v10972_v14, %v10964_v18  ;;  %v13060_v53 = vcombine.high %v6284_v61, %v6288_v57  ;;  %v6280_v13 = vld [vmem:[#allocation9 + $0x978] sm:$0xff]  ;;  %v13218_v6 = vcombine.high %v6443_v20, %v6447_v9  ;;  %v18174_v14 = vld [vmem:[#allocation27_spill] sm:$0xff] }
 0x42a   :  { %10356 = vmatprep.subr.bf16.mxu1 %v13234_v38  ;;  %v9519_v23 = vadd.f32 %v9518_v43, %v16026_v42  ;;  %v10979_v38 = vmax.f32 %v9515_v58, 0.0  ;;  %v18173_v52 = vld [vmem:[#allocation25_spill] sm:$0xff]  ;;  %v13059_v42 = vcombine.low %v6284_v61, %v6288_v57  ;;  %v10980_v18 = vmax.f32 %v9517_v47, 0.0 }
 0x42b   :  { %10478 = vmatpush2.bf16.msra.mxu0 %v12819_v27  ;;  %18172 = vst [vmem:[#allocation105_spill] sm:$0xff] %v16201_v4  ;;  %v9520_v21 = vpop.f32.mrf.mxu1  ;;  %v16205_v29 = vpop.f32.mrf.mxu0  ;;  %v6268_v61 = vld [vmem:[#allocation9 + $0x918] sm:$0xff] }
 0x42c   :  { %10673 = vmatprep.subr.bf16.mxu0 %v13068_v5  ;;  %v10987_v39 = vmax.f32 %v9519_v23, 0.0  ;;  %v9521_v27 = vadd.f32 %v9520_v21, %v16028_v48  ;;  %v6435_v5 = vld [vmem:[#allocation9 + $0xe50] sm:$0xff]  ;;  %v18176_v48 = vld [vmem:[#allocation51_spill] sm:$0xff]  ;;  %v13052_v23 = vcombine.high %v6276_v8, %v6280_v13  ;;  %v18177_v21 = vld [vmem:[#allocation54_spill] sm:$0xff] }
 0x42d   :  { %10357 = vmatpush2.bf16.msra.mxu1 %v13233_v28  ;;  %v6439_v28 = vld [vmem:[#allocation9 + $0xe70] sm:$0xff]  ;;  %v9524_v58 = vpop.f32.mrf.mxu1  ;;  %v16211_v43 = vpop.f32.mrf.mxu0  ;;  %v6272_v57 = vld [vmem:[#allocation9 + $0x938] sm:$0xff] }
 0x42e   :  { %10480 = vmatmul.mubr.bf16.vlgmr.msra.gmra.mxu0 %v18173_v52  ;;  %10358 = vmatprep.subr.bf16.mxu1 %v13226_v15  ;;  %v16209_v50 = vpack.c.bf16 %v10987_v39, %v10979_v38  ;;  %v10988_v2 = vmax.f32 %v9521_v27, 0.0  ;;  %v9525_v15 = vadd.f32 %v9524_v58, %v16033_v11  ;;  %v13210_v38 = vcombine.high %v6435_v5, %v6439_v28  ;;  %v6260_v4 = vld [vmem:[#allocation9 + $0x8d8] sm:$0xff] }
 0x42f   :  { %10489 = vmatprep.mubr.bf16.mxu0 %v18174_v14  ;;  %10674 = vmatpush1.bf16.msra.mxu0 %v13067_v31  ;;  %v13217_v31 = vcombine.low %v6443_v20, %v6447_v9  ;;  %v9526_v52 = vpop.f32.mrf.mxu1  ;;  %v16216_v47 = vpop.f32.mrf.mxu0  ;;  %v6427_v14 = vld [vmem:[#allocation9 + $0xe10] sm:$0xff]  ;;  %v13044_v20 = vcombine.high %v6268_v61, %v6272_v57 }
 0x430   :  { %18175 = vst [vmem:[#allocation25_spill] sm:$0xff] %v16209_v50  ;;  %10201 = vmatmul.mubr.bf16.gmra.mxu1 %v18176_v48  ;;  %10675 = vmatprep.subr.bf16.mxu0 %v13060_v53  ;;  %v16218_v39 = vpack.c.bf16 %v10988_v2, %v10980_v18  ;;  %v9527_v27 = vadd.f32 %v9526_v52, %v16038_v32  ;;  %v6431_v50 = vld [vmem:[#allocation9 + $0xe30] sm:$0xff] }
 0x431   :  { %10210 = vmatprep.mubr.bf16.mxu1 %v18177_v21  ;;  %10359 = vmatpush2.bf16.msra.mxu1 %v13225_v0  ;;  %v13051_v53 = vcombine.low %v6276_v8, %v6280_v13  ;;  %v9528_v11 = vpop.f32.mrf.mxu1  ;;  %v16221_v58 = vpop.f32.mrf.mxu0  ;;  %v13209_v0 = vcombine.low %v6435_v5, %v6439_v28  ;;  %v13202_v32 = vcombine.high %v6427_v14, %v6431_v50  ;;  %v10995_v8 = vmax.f32 %v9525_v15, 0.0  ;;  %v16231_v5 = vld [vmem:[#allocation9 + $0x5f8] sm:$0xff] }
 0x432   :  { %10360 = vmatprep.subr.bf16.mxu1 %v13218_v6  ;;  %18178 = vst [vmem:[#allocation27_spill] sm:$0xff] %v16218_v39  ;;  %v9529_v9 = vadd.f32 %v9528_v11, %v16044_v7  ;;  %v6264_v6 = vld [vmem:[#allocation9 + $0x8f8] sm:$0xff]  ;;  %v13043_v2 = vcombine.low %v6268_v61, %v6272_v57  ;;  %v10996_v15 = vmax.f32 %v9527_v27, 0.0 }
 0x433   :  { %10676 = vmatpush1.bf16.msra.mxu0 %v13059_v42  ;;  %v9530_v21 = vpop.f32.mrf.mxu1  ;;  %v16224_v18 = vpop.f32.mrf.mxu0  ;;  %v16229_v7 = vld [vmem:[#allocation9 + $0x5d8] sm:$0xff] }
 0x434   :  { %10677 = vmatprep.subr.bf16.mxu0 %v13052_v23  ;;  %v11003_v13 = vmax.f32 %v9529_v9, 0.0  ;;  %v9531_v42 = vadd.f32 %v9530_v21, %v16046_v49  ;;  %v6252_v21 = vld [vmem:[#allocation9 + $0x898] sm:$0xff] }
 0x435   :  { %10361 = vmatpush2.bf16.msra.mxu1 %v13217_v31  ;;  %v9534_v28 = vpop.f32.mrf.mxu1  ;;  %v16233_v23 = vpop.f32.mrf.mxu0  ;;  %v13036_v31 = vcombine.high %v6260_v4, %v6264_v6  ;;  %v6256_v61 = vld [vmem:[#allocation9 + $0x8b8] sm:$0xff] }
 0x436   :  { %10490 = vmatmul.mubr.bf16.gmra.mxu0 %v14518_v44  ;;  %10362 = vmatprep.subr.bf16.mxu1 %v13210_v38  ;;  %v13201_v44 = vcombine.low %v6427_v14, %v6431_v50  ;;  %v16236_v52 = vpack.c.bf16 %v11003_v13, %v10995_v8  ;;  %v11004_v49 = vmax.f32 %v9531_v42, 0.0  ;;  %v13962_v50 = vld [vmem:[#allocation11] sm:$0xff]  ;;  %v18180_v14 = vld [vmem:[#allocation24_spill] sm:$0xff]  ;;  %v6156_v9 = vld [vmem:[#allocation9 + $0x598] sm:$0xff] }
 0x437   :  { %10499 = vmatprep.mubr.bf16.mxu0 %v14558_v24  ;;  %10678 = vmatpush1.bf16.msra.mxu0 %v13051_v53  ;;  %v9535_v24 = vadd.f32 %v9534_v28, %v16051_v12  ;;  %v9536_v57 = vpop.f32.mrf.mxu1  ;;  %v16240_v38 = vpop.f32.mrf.mxu0  ;;  %v12940_v53 = vcombine.high %v16229_v7, %v16231_v5  ;;  %v18181_v27 = vsub.s32 2, %v18180_v14  ;;  %v13035_v12 = vcombine.low %v6260_v4, %v6264_v6  ;;  %v16260_v4 = vld [vmem:[#allocation9 + $0x858] sm:$0xff] }
 0x438   :  { %10211 = vmatmul.mubr.bf16.gmra.mxu1 %v18091_v33  ;;  %10679 = vmatprep.subr.bf16.mxu0 %v13044_v20  ;;  %18179 = vst [vmem:[#allocation106_spill] sm:$0xff] %v16236_v52  ;;  %v9537_v20 = vadd.f32 %v9536_v57, %v16056_v1  ;;  %v16249_v8 = vpack.c.bf16 %v11004_v49, %v10996_v15  ;;  %v18183_v13 = vsub.s32 3, %v18180_v14  ;;  %v6248_v6 = vld [vmem:[#allocation9 + $0x878] sm:$0xff] }
 0x439   :  { %10363 = vmatpush2.bf16.msra.mxu1 %v13209_v0  ;;  %10366 = vmatprep.mubr.bf16.mxu1 %v15504_v22  ;;  %v16246_v11 = vrot.slane %v13962_v50, %v18181_v27  ;;  %v6160_v0 = vld [vmem:[#allocation9 + $0x5b8] sm:$0xff]  ;;  %v16255_v28 = vpop.f32.mrf.mxu0  ;;  %v13028_v52 = vcombine.high %v6252_v21, %v6256_v61  ;;  %v12939_v1 = vcombine.low %v16229_v7, %v16231_v5 }
 0x43a   :  { %10364 = vmatprep.subr.bf16.mxu1 %v13202_v32  ;;  %18182 = vst [vmem:[#allocation107_spill] sm:$0xff] %v16249_v8  ;;  %v16253_v42 = vrot.slane %v13962_v50, %v18183_v13  ;;  %v9538_v32 = vpop.f32.mrf.mxu1  ;;  %v13027_v49 = vcombine.low %v6252_v21, %v6256_v61  ;;  %v12932_v57 = vcombine.high %v6156_v9, %v6160_v0  ;;  %v11011_v50 = vmax.f32 %v9535_v24, 0.0  ;;  %v6148_v7 = vld [vmem:[#allocation9 + $0x558] sm:$0xff] }
 0x43b   :  { %10680 = vmatpush1.bf16.msra.mxu0 %v13043_v2  ;;  %v9539_v27 = vadd.f32 %v9538_v32, %v16061_v41  ;;  %v16262_v15 = vpop.f32.mrf.mxu0  ;;  %v6152_v5 = vld [vmem:[#allocation9 + $0x578] sm:$0xff]  ;;  %v12931_v61 = vcombine.low %v6156_v9, %v6160_v0  ;;  %v11012_v24 = vmax.f32 %v9537_v20, 0.0 }
 0x43c   :  { %10681 = vmatprep.subr.bf16.mxu0 %v13036_v31  ;;  %v9540_v2 = vpop.f32.mrf.mxu1  ;;  %v9578_v31 = vadd.f32 %v16065_v56, %v16246_v11  ;;  %v18184_v13 = vld [vmem:[#allocation78_spill] sm:$0xff]  ;;  %v13020_v56 = vcombine.high %v16260_v4, %v6248_v6  ;;  %v18188_v9 = vld [vmem:[#allocation77_spill] sm:$0xff] }
 0x43d   :  { %10365 = vmatpush2.bf16.msra.mxu1 %v13201_v44  ;;  %v11019_v41 = vmax.f32 %v9539_v27, 0.0  ;;  %v9541_v44 = vadd.f32 %v9540_v2, %v16063_v46  ;;  %v9580_v32 = vadd.f32 %v18184_v13, %v16253_v42  ;;  %v18185_v21 = vld [vmem:[#allocation82_spill] sm:$0xff]  ;;  %v9582_v0 = vadd.f32 %v18188_v9, %v16246_v11 }
 0x43e   :  { %10500 = vmatmul.mubr.bf16.gmra.mxu0 %v17956_v63  ;;  %10560 = vmatprep.subr.bf16.mxu1 %v12940_v53  ;;  %v9690_v8 = vpop.f32.mrf.mxu1  ;;  %v16271_v63 = vpop.f32.mrf.mxu0  ;;  %v6236_v27 = vld [vmem:[#allocation9 + $0x818] sm:$0xff]  ;;  %v12923_v9 = vcombine.low %v6148_v7, %v6152_v5 }
 0x43f   :  { %10509 = vmatprep.mubr.bf16.mxu0 %v17957_v26  ;;  %10682 = vmatpush1.bf16.msra.mxu0 %v13035_v12  ;;  %v16275_v53 = vpack.c.bf16 %v11019_v41, %v11011_v50  ;;  %v11020_v46 = vmax.f32 %v9541_v44, 0.0  ;;  %v9691_v26 = vadd.f32 %v9690_v8, %v9578_v31  ;;  %v18187_v12 = vld [vmem:[#allocation85_spill] sm:$0xff] }
 0x440   :  { %10367 = vmatmul.mubr.bf16.vlgmr.msra.gmra.mxu1 %v18185_v21  ;;  %10683 = vmatprep.subr.bf16.mxu0 %v13028_v52  ;;  %v6240_v2 = vld [vmem:[#allocation9 + $0x838] sm:$0xff]  ;;  %v9692_v13 = vpop.f32.mrf.mxu1  ;;  %v16278_v39 = vpop.f32.mrf.mxu0  ;;  %v13019_v21 = vcombine.low %v16260_v4, %v6248_v6  ;;  %v12924_v52 = vcombine.high %v6148_v7, %v6152_v5  ;;  %v18190_v4 = vld [vmem:[#allocation79_spill] sm:$0xff] }
 0x441   :  { %18186 = vst [vmem:[#allocation78_spill] sm:$0xff] %v16275_v53  ;;  %10376 = vmatprep.mubr.bf16.mxu1 %v18187_v12  ;;  %10561 = vmatpush1.bf16.msra.mxu1 %v12939_v1  ;;  %v9693_v20 = vadd.f32 %v9692_v13, %v9580_v32  ;;  %v6140_v50 = vld [vmem:[#allocation9 + $0x518] sm:$0xff]  ;;  %v16284_v8 = vadd.f32 %v16205_v29, %v9691_v26 }
 0x442   :  { %10562 = vmatprep.subr.bf16.mxu1 %v12932_v57  ;;  %v6144_v41 = vld [vmem:[#allocation9 + $0x538] sm:$0xff]  ;;  %v16286_v1 = vpack.c.bf16 %v11020_v46, %v11012_v24  ;;  %v9694_v31 = vpop.f32.mrf.mxu1  ;;  %v16288_v44 = vpop.f32.mrf.mxu0  ;;  %v13012_v57 = vcombine.high %v6236_v27, %v6240_v2  ;;  %v9584_v6 = vadd.f32 %v18190_v4, %v16253_v42  ;;  %v13011_v46 = vcombine.low %v6236_v27, %v6240_v2 }
 0x443   :  { %10684 = vmatpush1.bf16.msra.mxu0 %v13027_v49  ;;  %v9695_v53 = vadd.f32 %v9694_v31, %v9582_v0  ;;  %v6356_v32 = vld [vmem:[#allocation9 + $0xbd8] sm:$0xff]  ;;  %v16293_v13 = vadd.f32 %v16211_v43, %v9693_v20  ;;  %v18193_v0 = vld [vmem:[#allocation32_spill] sm:$0xff]  ;;  %v12915_v27 = vcombine.low %v6140_v50, %v6144_v41 }
 0x444   :  { %18189 = vst [vmem:[#allocation77_spill] sm:$0xff] %v16286_v1  ;;  %10685 = vmatprep.subr.bf16.mxu0 %v13020_v56  ;;  %v6360_v49 = vld [vmem:[#allocation9 + $0xbf8] sm:$0xff]  ;;  %v9696_v29 = vpop.f32.mrf.mxu1  ;;  %v16295_v26 = vpop.f32.mrf.mxu0  ;;  %v12916_v56 = vcombine.high %v6140_v50, %v6144_v41  ;;  %v18192_v1 = vld [vmem:[#allocation80_spill] sm:$0xff]  ;;  %v18197_v50 = vld [vmem:[#allocation91_spill] sm:$0xff] }
 0x445   :  { %10563 = vmatpush1.bf16.msra.mxu1 %v12931_v61  ;;  %v18191_v24 = vld [vmem:[#allocation29_spill] sm:$0xff]  ;;  %v9588_v12 = vadd.f32 %v18192_v1, %v16246_v11  ;;  %v9697_v4 = vadd.f32 %v9696_v29, %v9584_v6  ;;  %v16302_v43 = vadd.f32 %v16216_v47, %v9695_v53  ;;  %v18194_v31 = vld [vmem:[#allocation84_spill] sm:$0xff]  ;;  %v13132_v2 = vcombine.high %v6356_v32, %v6360_v49  ;;  %v18196_v29 = vld [vmem:[#allocation87_spill] sm:$0xff] }
 0x446   :  { %10510 = vmatmul.mubr.bf16.gmra.mxu0 %v18191_v24  ;;  %10564 = vmatprep.subr.bf16.mxu1 %v12924_v52  ;;  %v6132_v7 = vld [vmem:[#allocation9 + $0x4d8] sm:$0xff]  ;;  %v9700_v61 = vpop.f32.mrf.mxu1  ;;  %v16304_v20 = vpop.f32.mrf.mxu0  ;;  %v9592_v41 = vadd.f32 %v18197_v50, %v16246_v11 }
 0x447   :  { %10519 = vmatprep.mubr.bf16.mxu0 %v18193_v0  ;;  %10686 = vmatpush1.bf16.msra.mxu0 %v13019_v21  ;;  %v6136_v5 = vld [vmem:[#allocation9 + $0x4f8] sm:$0xff]  ;;  %v9701_v6 = vadd.f32 %v9700_v61, %v9588_v12  ;;  %v16311_v47 = vadd.f32 %v16221_v58, %v9697_v4 }
 0x448   :  { %10377 = vmatmul.mubr.bf16.gmra.mxu1 %v18194_v31  ;;  %10687 = vmatprep.subr.bf16.mxu0 %v13012_v57  ;;  %v18195_v52 = vld [vmem:[#allocation81_spill] sm:$0xff]  ;;  %v9702_v53 = vpop.f32.mrf.mxu1  ;;  %v16313_v0 = vpop.f32.mrf.mxu0  ;;  %v12908_v31 = vcombine.high %v6132_v7, %v6136_v5  ;;  %v18198_v4 = vld [vmem:[#allocation90_spill] sm:$0xff]  ;;  %v12907_v33 = vcombine.low %v6132_v7, %v6136_v5 }
 0x449   :  { %v9590_v1 = vadd.f32 %v18195_v52, %v16253_v42  ;;  %10386 = vmatprep.mubr.bf16.mxu1 %v18196_v29  ;;  %10565 = vmatpush1.bf16.msra.mxu1 %v12923_v9  ;;  %v6348_v21 = vld [vmem:[#allocation9 + $0xb98] sm:$0xff]  ;;  %v13131_v52 = vcombine.low %v6356_v32, %v6360_v49  ;;  %v16318_v9 = vadd.f32 %v16224_v18, %v9701_v6  ;;  %v18199_v18 = vld [vmem:[#allocation31_spill] sm:$0xff] }
 0x44a   :  { %v6352_v24 = vld [vmem:[#allocation9 + $0xbb8] sm:$0xff]  ;;  %10566 = vmatprep.subr.bf16.mxu1 %v12916_v56  ;;  %v9704_v29 = vpop.f32.mrf.mxu1  ;;  %v16320_v14 = vpop.f32.mrf.mxu0  ;;  %v9594_v56 = vadd.f32 %v18198_v4, %v16253_v42 }
 0x44b   :  { %v9703_v57 = vadd.f32 %v9702_v53, %v9590_v1  ;;  %10688 = vmatpush1.bf16.msra.mxu0 %v13011_v46  ;;  %v6124_v12 = vld [vmem:[#allocation9 + $0x498] sm:$0xff]  ;;  %v13124_v58 = vcombine.high %v6348_v21, %v6352_v24  ;;  %v9705_v22 = vadd.f32 %v9704_v29, %v9592_v41  ;;  %v13123_v6 = vcombine.low %v6348_v21, %v6352_v24  ;;  %v18204_v24 = vld [vmem:[#allocation92_spill] sm:$0xff] }
 0x44c   :  { %v6128_v61 = vld [vmem:[#allocation9 + $0x4b8] sm:$0xff]  ;;  %10689 = vmatprep.subr.bf16.mxu0 %v13132_v2  ;;  %v9706_v49 = vpop.f32.mrf.mxu1  ;;  %v16327_v46 = vpop.f32.mrf.mxu0 }
 0x44d   :  { %10567 = vmatpush1.bf16.msra.mxu1 %v12915_v27  ;;  %v6340_v50 = vld [vmem:[#allocation9 + $0xb58] sm:$0xff]  ;;  %v16325_v32 = vadd.f32 %v16233_v23, %v9703_v57  ;;  %v12900_v2 = vcombine.high %v6124_v12, %v6128_v61  ;;  %v9707_v4 = vadd.f32 %v9706_v49, %v9594_v56  ;;  %v16334_v23 = vadd.f32 %v16240_v38, %v9705_v22 }
 0x44e   :  { %v6344_v1 = vld [vmem:[#allocation9 + $0xb78] sm:$0xff]  ;;  %10520 = vmatmul.mubr.bf16.gmra.mxu0 %v18199_v18  ;;  %10568 = vmatprep.subr.bf16.mxu1 %v12908_v31  ;;  %v9710_v27 = vpop.f32.mrf.mxu1  ;;  %v16336_v41 = vpop.f32.mrf.mxu0  ;;  %v12899_v31 = vcombine.low %v6124_v12, %v6128_v61  ;;  %v9600_v18 = vadd.f32 %v18204_v24, %v16253_v42 }
 0x44f   :  { %v18200_v53 = vld [vmem:[#allocation94_spill] sm:$0xff]  ;;  %10690 = vmatpush2.bf16.msra.mxu0 %v13131_v52  ;;  %18202 = vst [vmem:[#allocation79_spill] sm:$0xff] %v16334_v23  ;;  %v13116_v21 = vcombine.high %v6340_v50, %v6344_v1  ;;  %v18205_v49 = vld [vmem:[#allocation89_spill] sm:$0xff]  ;;  %v16343_v22 = vadd.f32 %v16255_v28, %v9707_v4  ;;  %v13115_v24 = vcombine.low %v6340_v50, %v6344_v1 }
 0x450   :  { %v9598_v48 = vadd.f32 %v18200_v53, %v16246_v11  ;;  %v18201_v29 = vld [vmem:[#allocation34_spill] sm:$0xff]  ;;  %10691 = vmatprep.subr.bf16.mxu0 %v13124_v58  ;;  %v9712_v38 = vpop.f32.mrf.mxu1  ;;  %v18207_v12 = vld [vmem:[#allocation93_spill] sm:$0xff] }
 0x451   :  { %10529 = vmatprep.mubr.bf16.mxu0 %v18201_v29  ;;  %v6116_v7 = vld [vmem:[#allocation9 + $0x458] sm:$0xff]  ;;  %10569 = vmatpush1.bf16.msra.mxu1 %v12907_v33  ;;  %18206 = vst [vmem:[#allocation29_spill] sm:$0xff] %v16343_v22  ;;  %v16345_v29 = vpop.f32.mrf.mxu0  ;;  %v9602_v61 = vadd.f32 %v18207_v12, %v16246_v11  ;;  %v9713_v58 = vadd.f32 %v9712_v38, %v9600_v18  ;;  %v18210_v38 = vld [vmem:[#allocation96_spill] sm:$0xff] }
 0x452   :  { %v6120_v5 = vld [vmem:[#allocation9 + $0x478] sm:$0xff]  ;;  %v9711_v56 = vadd.f32 %v9710_v27, %v9598_v48  ;;  %10570 = vmatprep.subr.bf16.mxu1 %v12900_v2  ;;  %v9604_v2 = vadd.f32 %v16101_v17, %v16253_v42 }
 0x453   :  { %v18203_v57 = vld [vmem:[#allocation86_spill] sm:$0xff]  ;;  %10692 = vmatpush2.bf16.msra.mxu0 %v13123_v6  ;;  %v16352_v23 = vpop.f32.mrf.mxu0  ;;  %v12891_v22 = vcombine.low %v6116_v7, %v6120_v5  ;;  %v16357_v50 = vadd.f32 %v16271_v63, %v9713_v58  ;;  %v18212_v58 = vld [vmem:[#allocation88_spill] sm:$0xff] }
 0x454   :  { %10387 = vmatmul.mubr.bf16.gmra.mxu1 %v18203_v57  ;;  %v6332_v52 = vld [vmem:[#allocation9 + $0xb18] sm:$0xff]  ;;  %v12892_v57 = vcombine.high %v6116_v7, %v6120_v5  ;;  %v16350_v33 = vadd.f32 %v16262_v15, %v9711_v56  ;;  %10693 = vmatprep.subr.bf16.mxu0 %v13116_v21 }
 0x455   :  { %10396 = vmatprep.mubr.bf16.mxu1 %v18205_v49  ;;  %v6336_v53 = vld [vmem:[#allocation9 + $0xb38] sm:$0xff]  ;;  %v9714_v49 = vpop.f32.mrf.mxu1  ;;  %10571 = vmatpush1.bf16.msra.mxu1 %v12899_v31  ;;  %v16359_v6 = vpop.f32.mrf.mxu0 }
 0x456   :  { %v6108_v48 = vld [vmem:[#allocation9 + $0x418] sm:$0xff]  ;;  %18208 = vst [vmem:[#allocation80_spill] sm:$0xff] %v16350_v33  ;;  %v13108_v28 = vcombine.high %v6332_v52, %v6336_v53  ;;  %v9715_v4 = vadd.f32 %v9714_v49, %v9602_v61  ;;  %10572 = vmatprep.subr.bf16.mxu1 %v12892_v57  ;;  %v13107_v56 = vcombine.low %v6332_v52, %v6336_v53  ;;  %v18211_v49 = vld [vmem:[#allocation36_spill] sm:$0xff] }
 0x457   :  { %v6112_v27 = vld [vmem:[#allocation9 + $0x438] sm:$0xff]  ;;  %v9716_v1 = vpop.f32.mrf.mxu1  ;;  %v9608_v33 = vadd.f32 %v18210_v38, %v16246_v11  ;;  %10694 = vmatpush2.bf16.msra.mxu0 %v13115_v24  ;;  %v16368_v61 = vpop.f32.mrf.mxu0  ;;  %v9610_v53 = vadd.f32 %v16109_v3, %v16253_v42 }
 0x458   :  { %v6324_v12 = vld [vmem:[#allocation9 + $0xad8] sm:$0xff]  ;;  %v12884_v21 = vcombine.high %v6108_v48, %v6112_v27  ;;  %v9717_v17 = vadd.f32 %v9716_v1, %v9604_v2  ;;  %v16366_v63 = vadd.f32 %v16278_v39, %v9715_v4  ;;  %10695 = vmatprep.subr.bf16.mxu0 %v13108_v28  ;;  %v12883_v57 = vcombine.low %v6108_v48, %v6112_v27 }
 0x459   :  { %v6328_v18 = vld [vmem:[#allocation9 + $0xaf8] sm:$0xff]  ;;  %v9720_v31 = vpop.f32.mrf.mxu1  ;;  %10573 = vmatpush1.bf16.msra.mxu1 %v12891_v22  ;;  %v16377_v38 = vpop.f32.mrf.mxu0  ;;  %v9612_v48 = vadd.f32 %v16116_v54, %v16246_v11 }
 0x45a   :  { %v18209_v15 = vld [vmem:[#allocation33_spill] sm:$0xff]  ;;  %v13100_v52 = vcombine.high %v6324_v12, %v6328_v18  ;;  %v9721_v2 = vadd.f32 %v9720_v31, %v9608_v33  ;;  %v18213_v1 = vld [vmem:[#allocation70_spill] sm:$0xff]  ;;  %v16375_v39 = vadd.f32 %v16288_v44, %v9717_v17  ;;  %10574 = vmatprep.subr.bf16.mxu1 %v12884_v21  ;;  %v13099_v3 = vcombine.low %v6324_v12, %v6328_v18 }
 0x45b   :  { %10530 = vmatmul.mubr.bf16.gmra.mxu0 %v18209_v15  ;;  %v6228_v7 = vld [vmem:[#allocation9 + $0x7d8] sm:$0xff]  ;;  %v9722_v4 = vpop.f32.mrf.mxu1 }
 0x45c   :  { %10539 = vmatprep.mubr.bf16.mxu0 %v18211_v49  ;;  %v6232_v5 = vld [vmem:[#allocation9 + $0x7f8] sm:$0xff]  ;;  %10397 = vmatmul.mubr.bf16.gmra.mxu1 %v18212_v58  ;;  %18214 = vst [vmem:[#allocation32_spill] sm:$0xff] %v16375_v39  ;;  %v9723_v27 = vadd.f32 %v9722_v4, %v9610_v53  ;;  %v16382_v22 = vadd.f32 %v16295_v26, %v9721_v2  ;;  %v18216_v26 = vld [vmem:[#allocation35_spill] sm:$0xff] }
 0x45d   :  { %10406 = vmatprep.mubr.bf16.mxu1 %v18213_v1  ;;  %v6316_v24 = vld [vmem:[#allocation9 + $0xa98] sm:$0xff]  ;;  %v13004_v49 = vcombine.high %v6228_v7, %v6232_v5  ;;  %10696 = vmatpush2.bf16.msra.mxu0 %v13107_v56  ;;  %v9724_v31 = vpop.f32.mrf.mxu1  ;;  %v16384_v1 = vpop.f32.mrf.mxu0  ;;  %v13003_v39 = vcombine.low %v6228_v7, %v6232_v5  ;;  %v9618_v4 = vadd.f32 %v16124_v36, %v16246_v11 }
 0x45e   :  { %v6320_v15 = vld [vmem:[#allocation9 + $0xab8] sm:$0xff]  ;;  %10697 = vmatprep.subr.bf16.mxu0 %v13100_v52  ;;  %v9725_v58 = vadd.f32 %v9724_v31, %v9612_v48  ;;  %10575 = vmatpush1.bf16.msra.mxu1 %v12883_v57  ;;  %v16389_v12 = vadd.f32 %v16304_v20, %v9723_v27  ;;  %v9620_v36 = vadd.f32 %v16129_v62, %v16253_v42 }
 0x45f   :  { %v6220_v33 = vld [vmem:[#allocation9 + $0x798] sm:$0xff]  ;;  %v13092_v44 = vcombine.high %v6316_v24, %v6320_v15  ;;  %v9726_v18 = vpop.f32.mrf.mxu1  ;;  %v16391_v56 = vpop.f32.mrf.mxu0  ;;  %10576 = vmatprep.subr.bf16.mxu1 %v13004_v49  ;;  %v13091_v2 = vcombine.low %v6316_v24, %v6320_v15 }
 0x460   :  { %v6224_v28 = vld [vmem:[#allocation9 + $0x7b8] sm:$0xff]  ;;  %v16398_v20 = vadd.f32 %v16313_v0, %v9725_v58 }
 0x461   :  { %v18215_v17 = vld [vmem:[#allocation97_spill] sm:$0xff]  ;;  %v12996_v52 = vcombine.high %v6220_v33, %v6224_v28  ;;  %v18217_v48 = vld [vmem:[#allocation38_spill] sm:$0xff]  ;;  %10698 = vmatpush2.bf16.msra.mxu0 %v13099_v3  ;;  %v9730_v57 = vpop.f32.mrf.mxu1  ;;  %v16400_v27 = vpop.f32.mrf.mxu0  ;;  %v12995_v24 = vcombine.low %v6220_v33, %v6224_v28  ;;  %v9622_v33 = vadd.f32 %v16136_v34, %v16246_v11 }
 0x462   :  { %v9614_v21 = vadd.f32 %v18215_v17, %v16253_v42  ;;  %v6308_v54 = vld [vmem:[#allocation9 + $0xa58] sm:$0xff]  ;;  %10699 = vmatprep.subr.bf16.mxu0 %v13092_v44  ;;  %v9731_v49 = vadd.f32 %v9730_v57, %v9618_v4  ;;  %10577 = vmatpush2.bf16.msra.mxu1 %v13003_v39 }
 0x463   :  { %v6312_v53 = vld [vmem:[#allocation9 + $0xa78] sm:$0xff]  ;;  %10540 = vmatmul.mubr.bf16.gmra.mxu0 %v18216_v26  ;;  %v9732_v58 = vpop.f32.mrf.mxu1  ;;  %v16409_v26 = vpop.f32.mrf.mxu0  ;;  %10578 = vmatprep.subr.bf16.mxu1 %v12996_v52  ;;  %v9624_v52 = vadd.f32 %v16139_v40, %v16253_v42 }
 0x464   :  { %v9727_v17 = vadd.f32 %v9726_v18, %v9614_v21  ;;  %10549 = vmatprep.mubr.bf16.mxu0 %v18217_v48  ;;  %v6212_v7 = vld [vmem:[#allocation9 + $0x758] sm:$0xff]  ;;  %v13084_v15 = vcombine.high %v6308_v54, %v6312_v53  ;;  %v18219_v21 = vld [vmem:[#allocation72_spill] sm:$0xff]  ;;  %v9733_v28 = vadd.f32 %v9732_v58, %v9620_v36  ;;  %v13083_v62 = vcombine.low %v6308_v54, %v6312_v53 }
 0x465   :  { %v6216_v5 = vld [vmem:[#allocation9 + $0x778] sm:$0xff]  ;;  %10700 = vmatpush2.bf16.msra.mxu0 %v13091_v2  ;;  %v16414_v39 = vadd.f32 %v16327_v46, %v9731_v49  ;;  %v9734_v57 = vpop.f32.mrf.mxu1 }
 0x466   :  { %v18218_v31 = vld [vmem:[#allocation69_spill] sm:$0xff]  ;;  %v16407_v0 = vadd.f32 %v16320_v14, %v9727_v17  ;;  %v12988_v48 = vcombine.high %v6212_v7, %v6216_v5  ;;  %10701 = vmatprep.subr.bf16.mxu0 %v13084_v15  ;;  %v9735_v17 = vadd.f32 %v9734_v57, %v9622_v33  ;;  %10579 = vmatpush2.bf16.msra.mxu1 %v12995_v24  ;;  %v18222_v33 = vld [vmem:[#allocation71_spill] sm:$0xff] }
 0x467   :  { %10407 = vmatmul.mubr.bf16.gmra.mxu1 %v18218_v31  ;;  %v6300_v3 = vld [vmem:[#allocation9 + $0xa18] sm:$0xff]  ;;  %v12987_v31 = vcombine.low %v6212_v7, %v6216_v5  ;;  %v16421_v34 = vadd.f32 %v16336_v41, %v9733_v28  ;;  %v9736_v54 = vpop.f32.mrf.mxu1  ;;  %v9628_v15 = vadd.f32 %v16144_v35, %v16246_v11  ;;  %v9630_v35 = vadd.f32 %v16149_v19, %v16253_v42  ;;  %v18223_v28 = vld [vmem:[#allocation75_spill] sm:$0xff] }
 0x468   :  { %10416 = vmatprep.mubr.bf16.mxu1 %v18219_v21  ;;  %v6304_v18 = vld [vmem:[#allocation9 + $0xa38] sm:$0xff]  ;;  %v16416_v21 = vpop.f32.mrf.mxu0  ;;  %10580 = vmatprep.subr.bf16.mxu1 %v12988_v48  ;;  %v9737_v49 = vadd.f32 %v9736_v54, %v9624_v52  ;;  %v16430_v41 = vadd.f32 %v16345_v29, %v9735_v17  ;;  %v13681_v19 = vld [vmem:[#allocation12 + $0x38] sm:$0xff]  }
 0x469   :  { %v6204_v44 = vld [vmem:[#allocation9 + $0x718] sm:$0xff]  ;;  %v13076_v14 = vcombine.high %v6300_v3, %v6304_v18  ;;  %v13075_v46 = vcombine.low %v6300_v3, %v6304_v18  ;;  %10702 = vmatpush2.bf16.msra.mxu0 %v13083_v62  ;;  %v9740_v5 = vpop.f32.mrf.mxu1  ;;  %v13680_v18 = vld [vmem:[#allocation12 + $0x78] sm:$0xff]  }
 0x46a   :  { %v6208_v4 = vld [vmem:[#allocation9 + $0x738] sm:$0xff]  ;;  %v16423_v53 = vpop.f32.mrf.mxu0  ;;  %v9741_v48 = vadd.f32 %v9740_v5, %v9628_v15  ;;  %10581 = vmatpush2.bf16.msra.mxu1 %v12987_v31  ;;  %v16439_v62 = vadd.f32 %v16352_v23, %v9737_v49  ;;  %v18224_v5 = vld [vmem:[#allocation60_spill] sm:$0xff] }
 0x46b   :  { %v18220_v2 = vld [vmem:[#allocation37_spill] sm:$0xff]  ;;  %v12980_v36 = vcombine.high %v6204_v44, %v6208_v4  ;;  %10703 = vmatprep.subr.bf16.mxu0 %v13076_v14  ;;  %v12979_v3 = vcombine.low %v6204_v44, %v6208_v4  ;;  %v9742_v29 = vpop.f32.mrf.mxu1  ;;  %v9632_v14 = vadd.f32 %v16156_v37, %v16246_v11 }
 0x46c   :  { %10550 = vmatmul.mubr.bf16.gmra.mxu0 %v18220_v2  ;;  %v18221_v40 = vld [vmem:[#allocation61_spill] sm:$0xff]  ;;  %v16432_v58 = vpop.f32.mrf.mxu0  ;;  %v9743_v44 = vadd.f32 %v9742_v29, %v9630_v35  ;;  %v16446_v54 = vadd.f32 %v16359_v6, %v9741_v48  ;;  %v18225_v48 = vld [vmem:[#allocation30_spill] sm:$0xff] }
 0x46d   :  { %10705 = vmatprep.mubr.bf16.mxu0 %v18221_v40  ;;  %v6196_v24 = vld [vmem:[#allocation9 + $0x6d8] sm:$0xff]  ;;  %10582 = vmatprep.subr.bf16.mxu1 %v12980_v36  ;;  %v9744_v31 = vpop.f32.mrf.mxu1  ;;  %v9634_v36 = vadd.f32 %v16159_v60, %v16253_v42 }
 0x46e   :  { %v6200_v7 = vld [vmem:[#allocation9 + $0x6f8] sm:$0xff]  ;;  %v16441_v57 = vpop.f32.mrf.mxu0  ;;  %10704 = vmatpush2.bf16.msra.mxu0 %v13075_v46  ;;  %v9745_v15 = vadd.f32 %v9744_v31, %v9632_v14  ;;  %10583 = vmatpush2.bf16.msra.mxu1 %v12979_v3  ;;  %v16453_v37 = vadd.f32 %v16368_v61, %v9743_v44  ;;  %v13684_v44 = vld [vmem:[#allocation12 + $0x68] sm:$0xff]  }
 0x46f   :  { %10417 = vmatmul.mubr.bf16.gmra.mxu1 %v18222_v33  ;;  %v12972_v52 = vcombine.high %v6196_v24, %v6200_v7  ;;  %v6188_v4 = vld [vmem:[#allocation9 + $0x698] sm:$0xff]  ;;  %13326 = vmatprep.subr.bf16.mxu0 %v13680_v18  ;;  %v12971_v49 = vcombine.low %v6196_v24, %v6200_v7  ;;  %v9746_v46 = vpop.f32.mrf.mxu1  ;;  %v9638_v18 = vadd.f32 %v16164_v16, %v16246_v11 }
 0x470   :  { %10426 = vmatprep.mubr.bf16.mxu1 %v18223_v28  ;;  %v6192_v17 = vld [vmem:[#allocation9 + $0x6b8] sm:$0xff]  ;;  %v16448_v2 = vpop.f32.mrf.mxu0  ;;  %v9747_v35 = vadd.f32 %v9746_v46, %v9634_v36  ;;  %v16462_v61 = vadd.f32 %v16377_v38, %v9745_v15  ;;  %v9640_v16 = vadd.f32 %v16169_v30, %v16253_v42  ;;  %v13685_v30 = vld [vmem:[#allocation12 + $0x28] sm:$0xff]  }
 0x471   :  { %v13682_v23 = vld [vmem:[#allocation12 + $0x70] sm:$0xff]   ;;  %10584 = vmatprep.subr.bf16.mxu1 %v12972_v52  ;;  %v12964_v6 = vcombine.high %v6188_v4, %v6192_v17  ;;  %v9750_v7 = vpop.f32.mrf.mxu1  ;;  %v12963_v52 = vcombine.low %v6188_v4, %v6192_v17  ;;  %v9642_v4 = vadd.f32 %v16176_v51, %v16246_v11 }
 0x472   :  { %v16455_v40 = vpop.f32.mrf.mxu0  ;;  %v6180_v60 = vld [vmem:[#allocation9 + $0x658] sm:$0xff]  ;;  %v9751_v31 = vadd.f32 %v9750_v7, %v9638_v18  ;;  %10585 = vmatpush2.bf16.msra.mxu1 %v12971_v49 }
 0x473   :  { %v6184_v29 = vld [vmem:[#allocation9 + $0x678] sm:$0xff]  ;;  %v9752_v38 = vpop.f32.mrf.mxu1  ;;  %10586 = vmatprep.subr.bf16.mxu1 %v12964_v6  ;;  %v9644_v6 = vadd.f32 %v16179_v10, %v16253_v42 }
 0x474   :  { %10706 = vmatmul.mubr.bf16.vlgmr.msra.gmra.mxu0 %v18224_v5  ;;  %v13683_v24 = vld [vmem:[#allocation12 + $0x30] sm:$0xff]   ;;  %v16464_v3 = vpop.f32.mrf.mxu0  ;;  %v12956_v46 = vcombine.high %v6180_v60, %v6184_v29  ;;  %v9753_v17 = vadd.f32 %v9752_v38, %v9640_v16  ;;  %v16478_v18 = vadd.f32 %v16391_v56, %v9751_v31  ;;  %v12955_v7 = vcombine.low %v6180_v60, %v6184_v29  ;;  %v18229_v38 = vld [vmem:[#allocation28_spill] sm:$0xff] }
 0x475   :  { %10715 = vmatprep.mubr.bf16.mxu0 %v18225_v48  ;;  %13327 = vmatpush3.bf16.msra.mxu0 %v13681_v19  ;;  %v18226_v14 = vld [vmem:[#allocation73_spill] sm:$0xff]  ;;  %v18227_v36 = vld [vmem:[#allocation74_spill] sm:$0xff]  ;;  %v16471_v19 = vadd.f32 %v16384_v1, %v9747_v35  ;;  %v9754_v49 = vpop.f32.mrf.mxu1  ;;  %v13686_v1 = vld [vmem:[#allocation12 + $0x60] sm:$0xff]  }
 0x476   :  { %13328 = vmatprep.subr.bf16.mxu0 %v13682_v23  ;;  %v16473_v15 = vpop.f32.mrf.mxu0  ;;  %v6172_v23 = vld [vmem:[#allocation9 + $0x618] sm:$0xff]  ;;  %v9755_v35 = vadd.f32 %v9754_v49, %v9642_v4  ;;  %10587 = vmatpush2.bf16.msra.mxu1 %v12963_v52  ;;  %v16485_v51 = vadd.f32 %v16400_v27, %v9753_v17  ;;  %v13687_v60 = vld [vmem:[#allocation12 + $0x20] sm:$0xff]   ;;  %v13688_v49 = vld [vmem:[#allocation12 + $0x58] sm:$0xff]  }
 0x477   :  { %10427 = vmatmul.mubr.bf16.gmra.mxu1 %v18226_v14  ;;  %v6176_v5 = vld [vmem:[#allocation9 + $0x638] sm:$0xff]  ;;  %v9756_v16 = vpop.f32.mrf.mxu1  ;;  %10588 = vmatprep.subr.bf16.mxu1 %v12956_v46  ;;  %v18231_v17 = vld [vmem:[#allocation76_spill] sm:$0xff] }
 0x478   :  { %10436 = vmatprep.mubr.bf16.mxu1 %v18227_v36  ;;  %v16480_v48 = vpop.f32.mrf.mxu0  ;;  %v12948_v56 = vcombine.high %v6172_v23, %v6176_v5  ;;  %v9757_v31 = vadd.f32 %v9756_v16, %v9644_v6  ;;  %v6420_v10 = vld [vmem:[#allocation9 + $0xdd8] sm:$0xff]  ;;  %v16494_v27 = vadd.f32 %v16409_v26, %v9755_v35  ;;  %v12947_v46 = vcombine.low %v6172_v23, %v6176_v5 }
 0x479   :  { %13329 = vmatpush3.bf16.msra.mxu0 %v13683_v24  ;;  %18228 = vst [vmem:[#allocation81_spill] sm:$0xff] %v16480_v48  ;;  %v18230_v48 = vld [vmem:[#allocation63_spill] sm:$0xff]  ;;  %v6424_v4 = vld [vmem:[#allocation9 + $0xdf8] sm:$0xff]  ;;  %v9760_v29 = vpop.f32.mrf.mxu1  ;;  %v9652_v23 = vadd.f32 %v16196_v59, %v16246_v11 }
 0x47a   :  { %13330 = vmatprep.subr.bf16.mxu0 %v13684_v44  ;;  %v16487_v24 = vpop.f32.mrf.mxu0  ;;  %v9648_v44 = vadd.f32 %v16184_v45, %v16246_v11  ;;  %v9650_v45 = vadd.f32 %v16189_v55, %v16253_v42  ;;  %10589 = vmatpush2.bf16.msra.mxu1 %v12955_v7  ;;  %v13196_v16 = vcombine.high %v6420_v10, %v6424_v4  ;;  %v13689_v55 = vld [vmem:[#allocation12 + $0x18] sm:$0xff]  }
 0x47b   :  { %v9762_v26 = vpop.f32.mrf.mxu1  ;;  %10590 = vmatprep.subr.bf16.mxu1 %v12948_v56  ;;  %v9654_v56 = vadd.f32 %v16199_v25, %v16253_v42  ;;  %v13691_v25 = vld [vmem:[#allocation12 + $0x10] sm:$0xff]  }
 0x47c   :  { %10716 = vmatmul.mubr.bf16.gmra.mxu0 %v18229_v38  ;;  %v16496_v52 = vpop.f32.mrf.mxu0  ;;  %v9761_v6 = vadd.f32 %v9760_v29, %v9648_v44  ;;  %v9763_v5 = vadd.f32 %v9762_v26, %v9650_v45  ;;  %v6416_v38 = vld [vmem:[#allocation9 + $0xdb8] sm:$0xff] }
 0x47d   :  { %10725 = vmatprep.mubr.bf16.mxu0 %v18230_v48  ;;  %13331 = vmatpush3.bf16.msra.mxu0 %v13685_v30  ;;  %v18232_v48 = vld [vmem:[#allocation40_spill] sm:$0xff]  ;;  %v16503_v30 = vadd.f32 %v16416_v21, %v9757_v31  ;;  %v9764_v44 = vpop.f32.mrf.mxu1  ;;  %v13690_v21 = vld [vmem:[#allocation12 + $0x50] sm:$0xff]  }
 0x47e   :  { %13332 = vmatprep.subr.bf16.mxu0 %v13686_v1  ;;  %v16505_v35 = vpop.f32.mrf.mxu0  ;;  %v6412_v1 = vld [vmem:[#allocation9 + $0xd98] sm:$0xff]  ;;  %v16510_v7 = vadd.f32 %v16423_v53, %v9761_v6  ;;  %v9765_v31 = vadd.f32 %v9764_v44, %v9652_v23  ;;  %10591 = vmatpush2.bf16.msra.mxu1 %v12947_v46  ;;  %v16517_v59 = vadd.f32 %v16432_v58, %v9763_v5  ;;  %v13692_v46 = vld [vmem:[#allocation12 + $0x48] sm:$0xff]  }
 0x47f   :  { %10437 = vmatmul.mubr.bf16.gmra.mxu1 %v18231_v17  ;;  %18233 = vst [vmem:[#allocation91_spill] sm:$0xff] %v16505_v35  ;;  %v9766_v11 = vpop.f32.mrf.mxu1  ;;  %v18235_v45 = vld [vmem:[#allocation62_spill] sm:$0xff]  ;;  %10786 = vmatprep.subr.bf16.mxu1 %v13196_v16  ;;  %v13188_v53 = vcombine.high %v6412_v1, %v6416_v38  ;;  %v18236_v26 = vld [vmem:[#allocation65_spill] sm:$0xff]  ;;  %v13187_v5 = vcombine.low %v6412_v1, %v6416_v38 }
 0x480   :  { %10592 = vmatprep.mubr.bf16.mxu1 %v18232_v48  ;;  %v16512_v29 = vpop.f32.mrf.mxu0  ;;  %v13195_v48 = vcombine.low %v6420_v10, %v6424_v4  ;;  %v9767_v6 = vadd.f32 %v9766_v11, %v9654_v56  ;;  %v16524_v42 = vadd.f32 %v16441_v57, %v9765_v31  ;;  %v18237_v4 = vld [vmem:[#allocation39_spill] sm:$0xff]  ;;  %v18238_v23 = vld [vmem:[#allocation42_spill] sm:$0xff] }
 0x481   :  { %13333 = vmatpush3.bf16.msra.mxu0 %v13687_v60  ;;  %18234 = vst [vmem:[#allocation90_spill] sm:$0xff] %v16512_v29  ;;  %v6408_v29 = vld [vmem:[#allocation9 + $0xd78] sm:$0xff]  ;;  %v9916_v10 = vpop.f32.mrf.mxu1 }
 0x482   :  { %13334 = vmatprep.subr.bf16.mxu0 %v13688_v49  ;;  %v16519_v60 = vpop.f32.mrf.mxu0  ;;  %v6404_v49 = vld [vmem:[#allocation9 + $0xd58] sm:$0xff]  ;;  %v9917_v16 = vadd.f32 %v9916_v10, %v16284_v8  ;;  %v16532_v44 = vadd.f32 %v16448_v2, %v9767_v6 }
 0x483   :  { %v13180_v57 = vcombine.high %v6404_v49, %v6408_v29  ;;  %v6396_v11 = vld [vmem:[#allocation9 + $0xd18] sm:$0xff]  ;;  %v13179_v2 = vcombine.low %v6404_v49, %v6408_v29 }
 0x484   :  { %10726 = vmatmul.mubr.bf16.gmra.mxu0 %v18235_v45  ;;  %v16526_v58 = vpop.f32.mrf.mxu0  ;;  %v6400_v45 = vld [vmem:[#allocation9 + $0xd38] sm:$0xff]  ;;  %v10901_v10 = vmax.f32 %v9917_v16, 0.0 }
 0x485   :  { %10735 = vmatprep.mubr.bf16.mxu0 %v18236_v26  ;;  %13335 = vmatpush3.bf16.msra.mxu0 %v13689_v55  ;;  %v9918_v55 = vpop.f32.mrf.mxu1  ;;  %v18243_v29 = vld [vmem:[#allocation41_spill] sm:$0xff]  ;;  %v13171_v49 = vcombine.low %v6396_v11, %v6400_v45 }
 0x486   :  { %13336 = vmatprep.subr.bf16.mxu0 %v13690_v21  ;;  %v16534_v56 = vpop.f32.mrf.mxu0  ;;  %v9919_v31 = vadd.f32 %v9918_v55, %v16293_v13  ;;  %v13693_v21 = vld [vmem:[#allocation12 + $0x8] sm:$0xff]   ;;  %v13172_v13 = vcombine.high %v6396_v11, %v6400_v45  ;;  %v6388_v55 = vld [vmem:[#allocation9 + $0xcd8] sm:$0xff] }
 0x487   :  { %10593 = vmatmul.mubr.bf16.vlgmr.msra.gmra.mxu1 %v18237_v4  ;;  %18239 = vst [vmem:[#allocation31_spill] sm:$0xff] %v16534_v56  ;;  %v9920_v26 = vpop.f32.mrf.mxu1  ;;  %v6384_v11 = vld [vmem:[#allocation9 + $0xcb8] sm:$0xff] }
 0x488   :  { %10602 = vmatprep.mubr.bf16.mxu1 %v18238_v23  ;;  %10787 = vmatpush1.bf16.msra.mxu1 %v13195_v48  ;;  %v16537_v8 = vpop.f32.mrf.mxu0  ;;  %v13694_v48 = vld [vmem:[#allocation12 + $0x40] sm:$0xff]   ;;  %v9921_v1 = vadd.f32 %v9920_v26, %v16302_v43  ;;  %v13704_v26 = vld [vmem:[#allocation12 + $0x178] sm:$0xff]   ;;  %v6364_v35 = vld [vmem:[#allocation9 + $0xc18] sm:$0xff] }
 0x489   :  { %10788 = vmatprep.subr.bf16.mxu1 %v13188_v53  ;;  %13337 = vmatpush3.bf16.msra.mxu0 %v13691_v25  ;;  %18240 = vst [vmem:[#allocation94_spill] sm:$0xff] %v16537_v8  ;;  %v9922_v38 = vpop.f32.mrf.mxu1  ;;  %v18241_v53 = vld [vmem:[#allocation64_spill] sm:$0xff] }
 0x48a   :  { %13338 = vmatprep.subr.bf16.mxu0 %v13692_v46  ;;  %v16540_v6 = vpop.f32.mrf.mxu0  ;;  %v10909_v4 = vmax.f32 %v9921_v1, 0.0  ;;  %v9923_v25 = vadd.f32 %v9922_v38, %v16311_v47  ;;  %v18242_v23 = vld [vmem:[#allocation56_spill] sm:$0xff]  ;;  %v6392_v46 = vld [vmem:[#allocation9 + $0xcf8] sm:$0xff] }
 0x48b   :  { %v13695_v8 = vld [vmem:[#allocation12] sm:$0xff]   ;;  %v9926_v43 = vpop.f32.mrf.mxu1 }
 0x48c   :  { %10789 = vmatpush1.bf16.msra.mxu1 %v13187_v5  ;;  %10736 = vmatmul.mubr.bf16.gmra.mxu0 %v18241_v53  ;;  %v16545_v5 = vpop.f32.mrf.mxu0  ;;  %v16548_v53 = vpack.c.bf16 %v10909_v4, %v10901_v10  ;;  %v10910_v16 = vmax.f32 %v9923_v25, 0.0  ;;  %v9927_v47 = vadd.f32 %v9926_v43, %v16318_v9  ;;  %v18245_v1 = vld [vmem:[#allocation44_spill] sm:$0xff]  ;;  %v18248_v9 = vld [vmem:[#allocation79_spill] sm:$0xff] }
 0x48d   :  { %10790 = vmatprep.subr.bf16.mxu1 %v13180_v57  ;;  %10745 = vmatprep.mubr.bf16.mxu0 %v18242_v23  ;;  %v10902_v57 = vmax.f32 %v9919_v31, 0.0  ;;  %v9928_v38 = vpop.f32.mrf.mxu1  ;;  %v13164_v23 = vcombine.high %v6388_v55, %v6392_v46 }
 0x48e   :  { %13339 = vmatpush3.bf16.msra.mxu0 %v13693_v21  ;;  %18244 = vst [vmem:[#allocation34_spill] sm:$0xff] %v16548_v53  ;;  %v16552_v21 = vpop.f32.mrf.mxu0  ;;  %v9929_v56 = vadd.f32 %v9928_v38, %v16325_v32  ;;  %v10917_v43 = vmax.f32 %v9927_v47, 0.0  ;;  %v6372_v38 = vld [vmem:[#allocation9 + $0xc58] sm:$0xff] }
 0x48f   :  { %10603 = vmatmul.mubr.bf16.gmra.mxu1 %v18243_v29  ;;  %13340 = vmatprep.subr.bf16.mxu0 %v13694_v48  ;;  %18246 = vst [vmem:[#allocation92_spill] sm:$0xff] %v16552_v21  ;;  %v6380_v29 = vld [vmem:[#allocation9 + $0xc98] sm:$0xff]  ;;  %v16555_v45 = vpack.c.bf16 %v10910_v16, %v10902_v57  ;;  %v9930_v31 = vpop.f32.mrf.mxu1 }
 0x490   :  { %10612 = vmatprep.mubr.bf16.mxu1 %v18245_v1  ;;  %10791 = vmatpush1.bf16.msra.mxu1 %v13179_v2  ;;  %v16557_v48 = vpop.f32.mrf.mxu0  ;;  %v9931_v10 = vadd.f32 %v9930_v31, %v18248_v9  ;;  %v13163_v2 = vcombine.low %v6388_v55, %v6392_v46  ;;  %v13156_v32 = vcombine.high %v6380_v29, %v6384_v11  ;;  %v18251_v16 = vld [vmem:[#allocation58_spill] sm:$0xff]  ;;  %v10918_v46 = vmax.f32 %v9929_v56, 0.0 }
 0x491   :  { %10792 = vmatprep.subr.bf16.mxu1 %v13172_v13  ;;  %18247 = vst [vmem:[#allocation93_spill] sm:$0xff] %v16557_v48  ;;  %v9932_v4 = vpop.f32.mrf.mxu1  ;;  %v18249_v13 = vld [vmem:[#allocation55_spill] sm:$0xff]  ;;  %v6376_v48 = vld [vmem:[#allocation9 + $0xc78] sm:$0xff]  ;;  %v13155_v55 = vcombine.low %v6380_v29, %v6384_v11 }
 0x492   :  { %13341 = vmatpush3.bf16.msra.mxu0 %v13695_v8  ;;  %v16560_v25 = vpop.f32.mrf.mxu0  ;;  %v10925_v1 = vmax.f32 %v9931_v10, 0.0  ;;  %v18250_v8 = vld [vmem:[#allocation29_spill] sm:$0xff]  ;;  %v18255_v47 = vld [vmem:[#allocation46_spill] sm:$0xff] }
 0x493   :  { %13454 = vmatprep.subr.bf16.mxu0 %v13704_v26  ;;  %v9933_v57 = vadd.f32 %v9932_v4, %v18250_v8  ;;  %v9936_v26 = vpop.f32.mrf.mxu1  ;;  %v13148_v8 = vcombine.high %v6372_v38, %v6376_v48  ;;  %v6368_v53 = vld [vmem:[#allocation9 + $0xc38] sm:$0xff] }
 0x494   :  { %10793 = vmatpush1.bf16.msra.mxu1 %v13171_v49  ;;  %10746 = vmatmul.mubr.bf16.gmra.mxu0 %v18249_v13  ;;  %v16565_v21 = vpop.f32.mrf.mxu0  ;;  %v18252_v49 = vld [vmem:[#allocation43_spill] sm:$0xff]  ;;  %v16568_v31 = vpack.c.bf16 %v10925_v1, %v10917_v43  ;;  %v13147_v43 = vcombine.low %v6372_v38, %v6376_v48  ;;  %v13139_v48 = vcombine.low %v6364_v35, %v6368_v53 }
 0x495   :  { %10794 = vmatprep.subr.bf16.mxu1 %v13164_v23  ;;  %10755 = vmatprep.mubr.bf16.mxu0 %v18251_v16  ;;  %v10926_v9 = vmax.f32 %v9933_v57, 0.0  ;;  %v18254_v23 = vld [vmem:[#allocation80_spill] sm:$0xff]  ;;  %v9938_v10 = vpop.f32.mrf.mxu1  ;;  %v18258_v57 = vld [vmem:[#allocation57_spill] sm:$0xff] }
 0x496   :  { %18253 = vst [vmem:[#allocation33_spill] sm:$0xff] %v16568_v31  ;;  %v9937_v13 = vadd.f32 %v9936_v26, %v18254_v23  ;;  %v16572_v4 = vpop.f32.mrf.mxu0  ;;  %v9939_v16 = vadd.f32 %v9938_v10, %v16357_v50  ;;  %v18259_v23 = vld [vmem:[#allocation32_spill] sm:$0xff]  ;;  %v6488_v10 = vld [vmem:[#allocation9 + $0xff8] sm:$0xff] }
 0x497   :  { %10613 = vmatmul.mubr.bf16.gmra.mxu1 %v18252_v49  ;;  %18256 = vst [vmem:[#allocation96_spill] sm:$0xff] %v16572_v4  ;;  %v16575_v49 = vpack.c.bf16 %v10926_v9, %v10918_v46  ;;  %v9940_v56 = vpop.f32.mrf.mxu1  ;;  %v18260_v46 = vld [vmem:[#allocation66_spill] sm:$0xff] }
 0x498   :  { %10622 = vmatprep.mubr.bf16.mxu1 %v18255_v47  ;;  %10795 = vmatpush1.bf16.msra.mxu1 %v13163_v2  ;;  %v16577_v29 = vpop.f32.mrf.mxu0  ;;  %v9941_v11 = vadd.f32 %v9940_v56, %v16366_v63  ;;  %v10933_v26 = vmax.f32 %v9937_v13, 0.0  ;;  %v6484_v9 = vld [vmem:[#allocation9 + $0xfd8] sm:$0xff]  ;;  %v10934_v38 = vmax.f32 %v9939_v16, 0.0  ;;  %v18262_v13 = vld [vmem:[#allocation48_spill] sm:$0xff] }
 0x499   :  { %10796 = vmatprep.subr.bf16.mxu1 %v13156_v32  ;;  %18257 = vst [vmem:[#allocation36_spill] sm:$0xff] %v16577_v29  ;;  %v9942_v1 = vpop.f32.mrf.mxu1  ;;  %v13140_v32 = vcombine.high %v6364_v35, %v6368_v53  ;;  %v18261_v63 = vld [vmem:[#allocation45_spill] sm:$0xff] }
 0x49a   :  { %v16580_v2 = vpop.f32.mrf.mxu0  ;;  %v10941_v50 = vmax.f32 %v9941_v11, 0.0  ;;  %v9943_v47 = vadd.f32 %v9942_v1, %v18259_v23  ;;  %v6480_v31 = vld [vmem:[#allocation9 + $0xfb8] sm:$0xff] }
 0x49b   :  { %v9946_v29 = vpop.f32.mrf.mxu1 }
 0x49c   :  { %10797 = vmatpush1.bf16.msra.mxu1 %v13155_v55  ;;  %10756 = vmatmul.mubr.bf16.gmra.mxu0 %v18258_v57  ;;  %v16585_v4 = vpop.f32.mrf.mxu0  ;;  %v16588_v55 = vpack.c.bf16 %v10941_v50, %v10933_v26  ;;  %v10942_v56 = vmax.f32 %v9943_v47, 0.0  ;;  %v13260_v57 = vcombine.high %v6484_v9, %v6488_v10  ;;  %v18265_v26 = vld [vmem:[#allocation59_spill] sm:$0xff] }
 0x49d   :  { %10798 = vmatprep.subr.bf16.mxu1 %v13148_v8  ;;  %10765 = vmatprep.mubr.bf16.mxu0 %v18260_v46  ;;  %v9947_v8 = vadd.f32 %v9946_v29, %v16382_v22  ;;  %v9948_v11 = vpop.f32.mrf.mxu1  ;;  %v6476_v46 = vld [vmem:[#allocation9 + $0xf98] sm:$0xff]  ;;  %v13259_v22 = vcombine.low %v6484_v9, %v6488_v10 }
 0x49e   :  { %v16592_v1 = vpop.f32.mrf.mxu0  ;;  %v9949_v23 = vadd.f32 %v9948_v11, %v16389_v12  ;;  %v13251_v9 = vcombine.low %v6476_v46, %v6480_v31 }
 0x49f   :  { %10623 = vmatmul.mubr.bf16.gmra.mxu1 %v18261_v63  ;;  %18263 = vst [vmem:[#allocation97_spill] sm:$0xff] %v16592_v1  ;;  %v16595_v63 = vpack.c.bf16 %v10942_v56, %v10934_v38  ;;  %v9950_v35 = vpop.f32.mrf.mxu1  ;;  %v10949_v50 = vmax.f32 %v9947_v8, 0.0  ;;  %v18266_v38 = vld [vmem:[#allocation68_spill] sm:$0xff]  ;;  %v6468_v56 = vld [vmem:[#allocation9 + $0xf58] sm:$0xff] }
 0x4a0   :  { %10632 = vmatprep.mubr.bf16.mxu1 %v18262_v13  ;;  %10799 = vmatpush1.bf16.msra.mxu1 %v13147_v43  ;;  %v16597_v53 = vpop.f32.mrf.mxu0  ;;  %v9951_v16 = vadd.f32 %v9950_v35, %v16398_v20  ;;  %v6472_v13 = vld [vmem:[#allocation9 + $0xf78] sm:$0xff]  ;;  %v18267_v20 = vld [vmem:[#allocation47_spill] sm:$0xff]  ;;  %v10950_v10 = vmax.f32 %v9949_v23, 0.0 }
 0x4a1   :  { %10800 = vmatprep.subr.bf16.mxu1 %v13140_v32  ;;  %18264 = vst [vmem:[#allocation35_spill] sm:$0xff] %v16597_v53  ;;  %v9952_v29 = vpop.f32.mrf.mxu1  ;;  %v13252_v32 = vcombine.high %v6476_v46, %v6480_v31  ;;  %v18268_v8 = vld [vmem:[#allocation50_spill] sm:$0xff] }
 0x4a2   :  { %v16600_v43 = vpop.f32.mrf.mxu0  ;;  %v10957_v12 = vmax.f32 %v9951_v16, 0.0  ;;  %v9953_v47 = vadd.f32 %v9952_v29, %v16407_v0  ;;  %v13244_v29 = vcombine.high %v6468_v56, %v6472_v13  ;;  %v6464_v1 = vld [vmem:[#allocation9 + $0xf38] sm:$0xff] }
 0x4a3   :  { %v9956_v11 = vpop.f32.mrf.mxu1 }
 0x4a4   :  { %10801 = vmatpush1.bf16.msra.mxu1 %v13139_v48  ;;  %10766 = vmatmul.mubr.bf16.gmra.mxu0 %v18265_v26  ;;  %v16605_v53 = vpop.f32.mrf.mxu0  ;;  %v16608_v48 = vpack.c.bf16 %v10957_v12, %v10949_v50  ;;  %v10958_v35 = vmax.f32 %v9953_v47, 0.0  ;;  %v18271_v12 = vld [vmem:[#allocation67_spill] sm:$0xff] }
 0x4a5   :  { %10802 = vmatprep.subr.bf16.mxu1 %v13260_v57  ;;  %10775 = vmatprep.mubr.bf16.mxu0 %v18266_v38  ;;  %v9957_v57 = vadd.f32 %v9956_v11, %v16414_v39  ;;  %v9958_v0 = vpop.f32.mrf.mxu1  ;;  %v6460_v38 = vld [vmem:[#allocation9 + $0xf18] sm:$0xff]  ;;  %v13243_v39 = vcombine.low %v6468_v56, %v6472_v13 }
 0x4a6   :  { %v16612_v16 = vpop.f32.mrf.mxu0  ;;  %v9959_v26 = vadd.f32 %v9958_v0, %v16421_v34  ;;  %v13235_v56 = vcombine.low %v6460_v38, %v6464_v1 }
 0x4a7   :  { %10633 = vmatmul.mubr.bf16.gmra.mxu1 %v18267_v20  ;;  %18269 = vst [vmem:[#allocation38_spill] sm:$0xff] %v16612_v16  ;;  %v16615_v20 = vpack.c.bf16 %v10958_v35, %v10950_v10  ;;  %v9960_v31 = vpop.f32.mrf.mxu1  ;;  %v10965_v47 = vmax.f32 %v9957_v57, 0.0  ;;  %v18272_v10 = vld [vmem:[#allocation98_spill] sm:$0xff]  ;;  %v18275_v57 = vld [vmem:[#allocation52_spill] sm:$0xff] }
 0x4a8   :  { %10642 = vmatprep.mubr.bf16.mxu1 %v18268_v8  ;;  %10803 = vmatpush2.bf16.msra.mxu1 %v13259_v22  ;;  %v16617_v23 = vpop.f32.mrf.mxu0  ;;  %v9961_v46 = vadd.f32 %v9960_v31, %v16430_v41  ;;  %v6452_v35 = vld [vmem:[#allocation9 + $0xed8] sm:$0xff]  ;;  %v10966_v13 = vmax.f32 %v9959_v26, 0.0 }
 0x4a9   :  { %10804 = vmatprep.subr.bf16.mxu1 %v13252_v32  ;;  %18270 = vst [vmem:[#allocation37_spill] sm:$0xff] %v16617_v23  ;;  %v9962_v50 = vpop.f32.mrf.mxu1  ;;  %v13236_v32 = vcombine.high %v6460_v38, %v6464_v1  ;;  %v6456_v8 = vld [vmem:[#allocation9 + $0xef8] sm:$0xff] }
 0x4aa   :  { %v16620_v22 = vpop.f32.mrf.mxu0  ;;  %v10973_v34 = vmax.f32 %v9961_v46, 0.0  ;;  %v9963_v11 = vadd.f32 %v9962_v50, %v16439_v62  ;;  %v18273_v41 = vld [vmem:[#allocation49_spill] sm:$0xff]  ;;  %v13228_v50 = vcombine.high %v6452_v35, %v6456_v8 }
 0x4ab   :  { %v9966_v0 = vpop.f32.mrf.mxu1  ;;  %v6448_v16 = vld [vmem:[#allocation9 + $0xeb8] sm:$0xff] }
 0x4ac   :  { %10805 = vmatpush2.bf16.msra.mxu1 %v13251_v9  ;;  %10776 = vmatmul.mubr.bf16.gmra.mxu0 %v18271_v12  ;;  %v16625_v23 = vpop.f32.mrf.mxu0  ;;  %v16628_v9 = vpack.c.bf16 %v10973_v34, %v10965_v47  ;;  %v10974_v31 = vmax.f32 %v9963_v11, 0.0  ;;  %v13708_v47 = vld [vmem:[#allocation12 + $0x170] sm:$0xff]  }
 0x4ad   :  { %10806 = vmatprep.subr.bf16.mxu1 %v13244_v29  ;;  %11642 = vmatprep.mubr.bf16.mxu0 %v18272_v10  ;;  %v9967_v29 = vadd.f32 %v9966_v0, %v16446_v54  ;;  %v9968_v62 = vpop.f32.mrf.mxu1  ;;  %v6444_v10 = vld [vmem:[#allocation9 + $0xe98] sm:$0xff] }
 0x4ae   :  { %18274 = vst [vmem:[#allocation61_spill] sm:$0xff] %v16628_v9  ;;  %v16632_v46 = vpop.f32.mrf.mxu0  ;;  %v9969_v12 = vadd.f32 %v9968_v62, %v16453_v37  ;;  %v16635_v1 = vpack.c.bf16 %v10974_v31, %v10966_v13  ;;  %v13220_v37 = vcombine.high %v6444_v10, %v6448_v16  ;;  %v18279_v31 = vld [vmem:[#allocation100_spill] sm:$0xff]  ;;  %v6436_v62 = vld [vmem:[#allocation9 + $0xe58] sm:$0xff] }
 0x4af   :  { %10643 = vmatmul.mubr.bf16.gmra.mxu1 %v18273_v41  ;;  %18276 = vst [vmem:[#allocation71_spill] sm:$0xff] %v16632_v46  ;;  %v13705_v41 = vld [vmem:[#allocation12 + $0x138] sm:$0xff]   ;;  %v9970_v26 = vpop.f32.mrf.mxu1  ;;  %v10981_v0 = vmax.f32 %v9967_v29, 0.0  ;;  %v13709_v46 = vld [vmem:[#allocation12 + $0x130] sm:$0xff]  }
 0x4b0   :  { %10652 = vmatprep.mubr.bf16.mxu1 %v18275_v57  ;;  %10807 = vmatpush2.bf16.msra.mxu1 %v13243_v39  ;;  %v16637_v38 = vpop.f32.mrf.mxu0  ;;  %v9971_v54 = vadd.f32 %v9970_v26, %v16462_v61  ;;  %v13227_v39 = vcombine.low %v6452_v35, %v6456_v8  ;;  %v18280_v35 = vld [vmem:[#allocation51_spill] sm:$0xff]  ;;  %v13219_v8 = vcombine.low %v6444_v10, %v6448_v16  ;;  %v13712_v26 = vld [vmem:[#allocation12 + $0x168] sm:$0xff]   ;;  %v6432_v16 = vld [vmem:[#allocation9 + $0xe38] sm:$0xff] }
 0x4b1   :  { %10808 = vmatprep.subr.bf16.mxu1 %v13236_v32  ;;  %18277 = vst [vmem:[#allocation75_spill] sm:$0xff] %v16637_v38  ;;  %v9972_v34 = vpop.f32.mrf.mxu1  ;;  %v18278_v32 = vld [vmem:[#allocation95_spill] sm:$0xff]  ;;  %v6440_v38 = vld [vmem:[#allocation9 + $0xe78] sm:$0xff]  ;;  %v13713_v10 = vld [vmem:[#allocation12 + $0x128] sm:$0xff]  }
 0x4b2   :  { %v16640_v11 = vpop.f32.mrf.mxu0  ;;  %v10989_v57 = vmax.f32 %v9971_v54, 0.0  ;;  %v9973_v13 = vadd.f32 %v9972_v34, %v16471_v19  ;;  %v18282_v54 = vld [vmem:[#allocation54_spill] sm:$0xff] }
 0x4b3   :  { %v9976_v61 = vpop.f32.mrf.mxu1 }
 0x4b4   :  { %10809 = vmatpush2.bf16.msra.mxu1 %v13235_v56  ;;  %11643 = vmatmul.mubr.bf16.vlgmr.msra.gmra.mxu0 %v18278_v32  ;;  %v16645_v56 = vpop.f32.mrf.mxu0  ;;  %v16648_v32 = vpack.c.bf16 %v10989_v57, %v10981_v0  ;;  %v10990_v29 = vmax.f32 %v9973_v13, 0.0  ;;  %v9977_v19 = vadd.f32 %v9976_v61, %v16478_v18  ;;  %v13716_v18 = vld [vmem:[#allocation12 + $0x160] sm:$0xff]   ;;  %v13211_v57 = vcombine.low %v6436_v62, %v6440_v38 }
 0x4b5   :  { %10810 = vmatprep.subr.bf16.mxu1 %v13228_v50  ;;  %11650 = vmatprep.mubr.bf16.mxu0 %v18279_v31  ;;  %v10982_v50 = vmax.f32 %v9969_v12, 0.0  ;;  %v9978_v34 = vpop.f32.mrf.mxu1  ;;  %v13212_v31 = vcombine.high %v6436_v62, %v6440_v38  ;;  %v18284_v61 = vld [vmem:[#allocation99_spill] sm:$0xff] }
 0x4b6   :  { %13455 = vmatpush3.bf16.msra.mxu0 %v13705_v41  ;;  %18281 = vst [vmem:[#allocation60_spill] sm:$0xff] %v16648_v32  ;;  %v16652_v41 = vpop.f32.mrf.mxu0  ;;  %v9979_v9 = vadd.f32 %v9978_v34, %v16485_v51  ;;  %v13720_v62 = vld [vmem:[#allocation12 + $0x158] sm:$0xff]  }
 0x4b7   :  { %10653 = vmatmul.mubr.bf16.gmra.mxu1 %v18280_v35  ;;  %13456 = vmatprep.subr.bf16.mxu0 %v13708_v47  ;;  %v6428_v35 = vld [vmem:[#allocation9 + $0xe18] sm:$0xff]  ;;  %v16655_v12 = vpack.c.bf16 %v10990_v29, %v10982_v50  ;;  %v9980_v47 = vpop.f32.mrf.mxu1 }
 0x4b8   :  { %10662 = vmatprep.mubr.bf16.mxu1 %v18282_v54  ;;  %10811 = vmatpush2.bf16.msra.mxu1 %v13227_v39  ;;  %v16657_v0 = vpop.f32.mrf.mxu0  ;;  %v9981_v39 = vadd.f32 %v9980_v47, %v16494_v27  ;;  %v13204_v51 = vcombine.high %v6428_v35, %v6432_v16  ;;  %v18285_v29 = vld [vmem:[#allocation102_spill] sm:$0xff]  ;;  %v18286_v27 = vld [vmem:[#allocation53_spill] sm:$0xff]  ;;  %v13203_v38 = vcombine.low %v6428_v35, %v6432_v16 }
 0x4b9   :  { %10812 = vmatprep.subr.bf16.mxu1 %v13220_v37  ;;  %18283 = vst [vmem:[#allocation30_spill] sm:$0xff] %v16655_v12  ;;  %v9982_v13 = vpop.f32.mrf.mxu1  ;;  %v18312_v12 = vld [vmem:[#allocation89_spill] sm:$0xff] }
 0x4ba   :  { %13457 = vmatpush3.bf16.msra.mxu0 %v13709_v46  ;;  %v16660_v37 = vpop.f32.mrf.mxu0  ;;  %v10997_v46 = vmax.f32 %v9977_v19, 0.0  ;;  %v11005_v54 = vmax.f32 %v9981_v39, 0.0  ;;  %v9983_v50 = vadd.f32 %v9982_v13, %v16503_v30  ;;  %v18288_v30 = vld [vmem:[#allocation83_spill] sm:$0xff] }
 0x4bb   :  { %13458 = vmatprep.subr.bf16.mxu0 %v13712_v26  ;;  %v13717_v26 = vld [vmem:[#allocation12 + $0x120] sm:$0xff]   ;;  %v9986_v34 = vpop.f32.mrf.mxu1  ;;  %v13696_v13 = vld [vmem:[#allocation12 + $0xf8] sm:$0xff]  }
 0x4bc   :  { %10813 = vmatpush2.bf16.msra.mxu1 %v13219_v8  ;;  %11651 = vmatmul.mubr.bf16.gmra.mxu0 %v18284_v61  ;;  %v16665_v32 = vpop.f32.mrf.mxu0  ;;  %v10998_v8 = vmax.f32 %v9979_v9, 0.0  ;;  %v16668_v47 = vpack.c.bf16 %v11005_v54, %v10997_v46  ;;  %v9987_v19 = vadd.f32 %v9986_v34, %v16510_v7  ;;  %v16674_v61 = vld [vmem:[#allocation11] sm:$0xff] }
 0x4bd   :  { %10814 = vmatprep.subr.bf16.mxu1 %v13212_v31  ;;  %11658 = vmatprep.mubr.bf16.mxu0 %v18285_v29  ;;  %v11006_v31 = vmax.f32 %v9983_v50, 0.0  ;;  %v9988_v39 = vpop.f32.mrf.mxu1  ;;  %18289 = vst [vmem:[#allocation74_spill] sm:$0xff] %v16674_v61  ;;  %v18290_v29 = vld [vmem:[#allocation24_spill] sm:$0xff]  ;;  %v13722_v50 = vld [vmem:[#allocation12 + $0x150] sm:$0xff]  }
 0x4be   :  { %13459 = vmatpush3.bf16.msra.mxu0 %v13713_v10  ;;  %18287 = vst [vmem:[#allocation73_spill] sm:$0xff] %v16668_v47  ;;  %v16672_v10 = vpop.f32.mrf.mxu0  ;;  %v18291_v35 = vsub.s32 4, %v18290_v29  ;;  %v9989_v9 = vadd.f32 %v9988_v39, %v16517_v59  ;;  %v11013_v39 = vmax.f32 %v9987_v19, 0.0 }
 0x4bf   :  { %10663 = vmatmul.mubr.bf16.gmra.mxu1 %v18286_v27  ;;  %13460 = vmatprep.subr.bf16.mxu0 %v13716_v18  ;;  %v13721_v18 = vld [vmem:[#allocation12 + $0x118] sm:$0xff]   ;;  %v16682_v7 = vpack.c.bf16 %v11006_v31, %v10998_v8  ;;  %v13698_v8 = vld [vmem:[#allocation12 + $0xf0] sm:$0xff]  }
 0x4c0   :  { %10815 = vmatpush2.bf16.msra.mxu1 %v13211_v57  ;;  %10818 = vmatprep.mubr.bf16.mxu1 %v18288_v30  ;;  %v16679_v16 = vrot.slane %v16674_v61, %v18291_v35  ;;  %v18293_v57 = vsub.s32 5, %v18290_v29  ;;  %v16689_v54 = vpop.f32.mrf.mxu0  ;;  %v13697_v27 = vld [vmem:[#allocation12 + $0xb8] sm:$0xff]   ;;  %v11014_v29 = vmax.f32 %v9989_v9, 0.0 }
 0x4c1   :  { %10816 = vmatprep.subr.bf16.mxu1 %v13204_v51  ;;  %18292 = vst [vmem:[#allocation28_spill] sm:$0xff] %v16682_v7  ;;  %v9990_v51 = vpop.f32.mrf.mxu1 }
 0x4c2   :  { %13461 = vmatpush3.bf16.msra.mxu0 %v13717_v26  ;;  %v16687_v46 = vrot.slane %v16674_v61, %v18293_v57  ;;  %v9991_v34 = vadd.f32 %v9990_v51, %v16524_v42  ;;  %v16692_v59 = vpop.f32.mrf.mxu0  ;;  %v18294_v26 = vld [vmem:[#allocation101_spill] sm:$0xff]  ;;  %v10030_v31 = vadd.f32 %v16455_v40, %v16679_v16 }
 0x4c3   :  { %13462 = vmatprep.subr.bf16.mxu0 %v13720_v62  ;;  %v9992_v30 = vpop.f32.mrf.mxu1  ;;  %v18295_v62 = vld [vmem:[#allocation104_spill] sm:$0xff]  ;;  %v13723_v42 = vld [vmem:[#allocation12 + $0x110] sm:$0xff]  }
 0x4c4   :  { %10817 = vmatpush2.bf16.msra.mxu1 %v13203_v38  ;;  %11659 = vmatmul.mubr.bf16.gmra.mxu0 %v18294_v26  ;;  %v11021_v35 = vmax.f32 %v9991_v34, 0.0  ;;  %v9993_v57 = vadd.f32 %v9992_v30, %v16532_v44  ;;  %v10032_v38 = vadd.f32 %v16464_v3, %v16687_v46  ;;  %v16701_v61 = vpop.f32.mrf.mxu0  ;;  %v18296_v26 = vld [vmem:[#allocation82_spill] sm:$0xff]  ;;  %v18298_v44 = vld [vmem:[#allocation85_spill] sm:$0xff] }
 0x4c5   :  { %13390 = vmatprep.subr.bf16.mxu1 %v13696_v13  ;;  %11666 = vmatprep.mubr.bf16.mxu0 %v18295_v62  ;;  %v10142_v51 = vpop.f32.mrf.mxu1  ;;  %v13724_v13 = vld [vmem:[#allocation12 + $0x148] sm:$0xff]  }
 0x4c6   :  { %13463 = vmatpush3.bf16.msra.mxu0 %v13721_v18  ;;  %v16704_v40 = vpack.c.bf16 %v11021_v35, %v11013_v39  ;;  %v11022_v19 = vmax.f32 %v9993_v57, 0.0  ;;  %v16706_v34 = vadd.f32 %v10142_v51, %v10030_v31  ;;  %v13699_v18 = vld [vmem:[#allocation12 + $0xb0] sm:$0xff]   ;;  %v16709_v62 = vpop.f32.mrf.mxu0  ;;  %v13700_v3 = vld [vmem:[#allocation12 + $0xe8] sm:$0xff]   ;;  %v13726_v31 = vld [vmem:[#allocation12 + $0x140] sm:$0xff]  }
 0x4c7   :  { %10819 = vmatmul.mubr.bf16.vlgmr.msra.gmra.mxu1 %v18296_v26  ;;  %13464 = vmatprep.subr.bf16.mxu0 %v13722_v50  ;;  %v10144_v30 = vpop.f32.mrf.mxu1  ;;  %v13725_v50 = vld [vmem:[#allocation12 + $0x108] sm:$0xff]   ;;  %v13727_v51 = vld [vmem:[#allocation12 + $0x100] sm:$0xff]  }
 0x4c8   :  { %18297 = vst [vmem:[#allocation63_spill] sm:$0xff] %v16704_v40  ;;  %10828 = vmatprep.mubr.bf16.mxu1 %v18298_v44  ;;  %13391 = vmatpush3.bf16.msra.mxu1 %v13697_v27  ;;  %v16711_v47 = vadd.f32 %v10144_v30, %v10032_v38  ;;  %v16713_v26 = vpack.c.bf16 %v11022_v19, %v11014_v29  ;;  %v16717_v39 = vpop.f32.mrf.mxu0  ;;  %v13701_v27 = vld [vmem:[#allocation12 + $0xa8] sm:$0xff]   ;;  %v13702_v38 = vld [vmem:[#allocation12 + $0xe0] sm:$0xff]  }
 0x4c9   :  { %13392 = vmatprep.subr.bf16.mxu1 %v13698_v8  ;;  %v16715_v9 = vpop.f32.mrf.mxu1  ;;  %v18300_v8 = vld [vmem:[#allocation103_spill] sm:$0xff]  ;;  %v10040_v29 = vadd.f32 %v16487_v24, %v16679_v16  ;;  %v18303_v44 = vld [vmem:[#allocation84_spill] sm:$0xff] }
 0x4ca   :  { %13465 = vmatpush3.bf16.msra.mxu0 %v13723_v42  ;;  %18299 = vst [vmem:[#allocation76_spill] sm:$0xff] %v16713_v26  ;;  %v16721_v57 = vpop.f32.mrf.mxu0  ;;  %v18301_v42 = vld [vmem:[#allocation105_spill] sm:$0xff] }
 0x4cb   :  { %13466 = vmatprep.subr.bf16.mxu0 %v13724_v13  ;;  %v16719_v35 = vpop.f32.mrf.mxu1 }
 0x4cc   :  { %13393 = vmatpush3.bf16.msra.mxu1 %v13699_v18  ;;  %11667 = vmatmul.mubr.bf16.gmra.mxu0 %v18300_v8  ;;  %v16727_v13 = vpop.f32.mrf.mxu0  ;;  %v10042_v18 = vadd.f32 %v16496_v52, %v16687_v46  ;;  %v13703_v8 = vld [vmem:[#allocation12 + $0xa0] sm:$0xff]   ;;  %v13707_v52 = vld [vmem:[#allocation12 + $0x98] sm:$0xff]  }
 0x4cd   :  { %13394 = vmatprep.subr.bf16.mxu1 %v13700_v3  ;;  %11674 = vmatprep.mubr.bf16.mxu0 %v18301_v42  ;;  %v10152_v19 = vpop.f32.mrf.mxu1  ;;  %18302 = vst [vmem:[#allocation40_spill] sm:$0xff] %v16727_v13  ;;  %v18304_v3 = vld [vmem:[#allocation87_spill] sm:$0xff] }
 0x4ce   :  { %13467 = vmatpush3.bf16.msra.mxu0 %v13725_v50  ;;  %v16732_v30 = vadd.f32 %v10152_v19, %v10040_v29  ;;  %v16735_v40 = vpop.f32.mrf.mxu0  ;;  %v13706_v50 = vld [vmem:[#allocation12 + $0xd8] sm:$0xff]  }
 0x4cf   :  { %10829 = vmatmul.mubr.bf16.gmra.mxu1 %v18303_v44  ;;  %13468 = vmatprep.subr.bf16.mxu0 %v13726_v31  ;;  %v10154_v24 = vpop.f32.mrf.mxu1  ;;  %18305 = vst [vmem:[#allocation62_spill] sm:$0xff] %v16735_v40  ;;  %v13710_v44 = vld [vmem:[#allocation12 + $0xd0] sm:$0xff]  }
 0x4d0   :  { %10838 = vmatprep.mubr.bf16.mxu1 %v18304_v3  ;;  %13395 = vmatpush3.bf16.msra.mxu1 %v13701_v27  ;;  %v16737_v42 = vadd.f32 %v10154_v24, %v10042_v18  ;;  %v16741_v31 = vpop.f32.mrf.mxu0  ;;  %v18308_v27 = vld [vmem:[#allocation26_spill] sm:$0xff]  ;;  %v18309_v18 = vld [vmem:[#allocation27_spill] sm:$0xff] }
 0x4d1   :  { %13396 = vmatprep.subr.bf16.mxu1 %v13702_v38  ;;  %v16739_v26 = vpop.f32.mrf.mxu1  ;;  %18306 = vst [vmem:[#allocation65_spill] sm:$0xff] %v16741_v31  ;;  %v10050_v38 = vadd.f32 %v16519_v60, %v16679_v16  ;;  %v18311_v24 = vld [vmem:[#allocation86_spill] sm:$0xff]  ;;  %v13714_v60 = vld [vmem:[#allocation12 + $0xc8] sm:$0xff]  }
 0x4d2   :  { %13469 = vmatpush3.bf16.msra.mxu0 %v13727_v51  ;;  %v16745_v19 = vpop.f32.mrf.mxu0 }
 0x4d3   :  { %v16743_v29 = vpop.f32.mrf.mxu1  ;;  %18307 = vst [vmem:[#allocation39_spill] sm:$0xff] %v16745_v19 }
 0x4d4   :  { %13397 = vmatpush3.bf16.msra.mxu1 %v13703_v8  ;;  %11675 = vmatmul.mubr.bf16.gmra.mxu0 %v18308_v27  ;;  %v16751_v3 = vpop.f32.mrf.mxu0  ;;  %v10052_v8 = vadd.f32 %v16526_v58, %v16687_v46 }
 0x4d5   :  { %13398 = vmatprep.subr.bf16.mxu1 %v13706_v50  ;;  %11682 = vmatprep.mubr.bf16.mxu0 %v18309_v18  ;;  %v10162_v51 = vpop.f32.mrf.mxu1  ;;  %18310 = vst [vmem:[#allocation42_spill] sm:$0xff] %v16751_v3  ;;  %v13711_v50 = vld [vmem:[#allocation12 + $0x90] sm:$0xff]  }
 0x4d6   :  { %v16756_v7 = vadd.f32 %v10162_v51, %v10050_v38  ;;  %v16759_v19 = vpop.f32.mrf.mxu0  ;;  %v18317_v51 = vld [vmem:[#allocation107_spill] sm:$0xff] }
 0x4d7   :  { %10839 = vmatmul.mubr.bf16.gmra.mxu1 %v18311_v24  ;;  %v10164_v27 = vpop.f32.mrf.mxu1  ;;  %18313 = vst [vmem:[#allocation64_spill] sm:$0xff] %v16759_v19  ;;  %v13715_v24 = vld [vmem:[#allocation12 + $0x88] sm:$0xff]  }
 0x4d8   :  { %10848 = vmatprep.mubr.bf16.mxu1 %v18312_v12  ;;  %13399 = vmatpush3.bf16.msra.mxu1 %v13707_v52  ;;  %v16761_v18 = vadd.f32 %v10164_v27, %v10052_v8  ;;  %v16765_v3 = vpop.f32.mrf.mxu0  ;;  %v18316_v12 = vld [vmem:[#allocation25_spill] sm:$0xff]  ;;  %v13718_v52 = vld [vmem:[#allocation12 + $0xc0] sm:$0xff]  }
 0x4d9   :  { %13400 = vmatprep.subr.bf16.mxu1 %v13710_v44  ;;  %v16763_v31 = vpop.f32.mrf.mxu1  ;;  %18314 = vst [vmem:[#allocation56_spill] sm:$0xff] %v16765_v3  ;;  %v10060_v44 = vadd.f32 %v16540_v6, %v16679_v16  ;;  %v18319_v19 = vld [vmem:[#allocation88_spill] sm:$0xff]  ;;  %v13728_v6 = vld [vmem:[#allocation12 + $0x1f8] sm:$0xff]  }
 0x4da   :  { %v16769_v38 = vpop.f32.mrf.mxu0 }
 0x4db   :  { %v16767_v58 = vpop.f32.mrf.mxu1  ;;  %18315 = vst [vmem:[#allocation41_spill] sm:$0xff] %v16769_v38  ;;  %v18320_v38 = vld [vmem:[#allocation70_spill] sm:$0xff] }
 0x4dc   :  { %13401 = vmatpush3.bf16.msra.mxu1 %v13711_v50  ;;  %11683 = vmatmul.mubr.bf16.gmra.mxu0 %v18316_v12  ;;  %v16775_v27 = vpop.f32.mrf.mxu0  ;;  %v10062_v50 = vadd.f32 %v16545_v5, %v16687_v46 }
 0x4dd   :  { %13402 = vmatprep.subr.bf16.mxu1 %v13714_v60  ;;  %11690 = vmatprep.mubr.bf16.mxu0 %v18317_v51  ;;  %v10172_v8 = vpop.f32.mrf.mxu1  ;;  %18318 = vst [vmem:[#allocation44_spill] sm:$0xff] %v16775_v27  ;;  %v13719_v60 = vld [vmem:[#allocation12 + $0x80] sm:$0xff]  }
 0x4de   :  { %v16780_v3 = vadd.f32 %v10172_v8, %v10060_v44  ;;  %v16783_v40 = vpop.f32.mrf.mxu0  ;;  %v18324_v44 = vld [vmem:[#allocation106_spill] sm:$0xff] }
 0x4df   :  { %10849 = vmatmul.mubr.bf16.gmra.mxu1 %v18319_v19  ;;  %v10174_v12 = vpop.f32.mrf.mxu1  ;;  %18321 = vst [vmem:[#allocation79_spill] sm:$0xff] %v16783_v40 }
 0x4e0   :  { %10858 = vmatprep.mubr.bf16.mxu1 %v18320_v38  ;;  %13403 = vmatpush3.bf16.msra.mxu1 %v13715_v24  ;;  %v16785_v51 = vadd.f32 %v10174_v12, %v10062_v50  ;;  %v16789_v27 = vpop.f32.mrf.mxu0  ;;  %v10070_v24 = vadd.f32 %v16560_v25, %v16679_v16  ;;  %v18325_v38 = vld [vmem:[#allocation77_spill] sm:$0xff] }
 0x4e1   :  { %13404 = vmatprep.subr.bf16.mxu1 %v13718_v52  ;;  %v16787_v13 = vpop.f32.mrf.mxu1  ;;  %18322 = vst [vmem:[#allocation55_spill] sm:$0xff] %v16789_v27  ;;  %v18327_v50 = vld [vmem:[#allocation69_spill] sm:$0xff]  ;;  %v18328_v27 = vld [vmem:[#allocation72_spill] sm:$0xff] }
 0x4e2   :  { %v16793_v5 = vpop.f32.mrf.mxu0 }
 0x4e3   :  { %v16791_v19 = vpop.f32.mrf.mxu1  ;;  %18323 = vst [vmem:[#allocation29_spill] sm:$0xff] %v16793_v5 }
 0x4e4   :  { %13405 = vmatpush3.bf16.msra.mxu1 %v13719_v60  ;;  %11691 = vmatmul.mubr.bf16.gmra.mxu0 %v18324_v44  ;;  %v16799_v8 = vpop.f32.mrf.mxu0  ;;  %v10072_v60 = vadd.f32 %v16565_v21, %v16687_v46  ;;  %v10080_v21 = vadd.f32 %v16580_v2, %v16679_v16 }
 0x4e5   :  { %13518 = vmatprep.subr.bf16.mxu1 %v13728_v6  ;;  %11698 = vmatprep.mubr.bf16.mxu0 %v18325_v38  ;;  %v10182_v52 = vpop.f32.mrf.mxu1  ;;  %18326 = vst [vmem:[#allocation58_spill] sm:$0xff] %v16799_v8 }
 0x4e6   :  { %v16804_v12 = vadd.f32 %v10182_v52, %v10070_v24  ;;  %v16807_v44 = vpop.f32.mrf.mxu0 }
 0x4e7   :  { %10859 = vmatmul.mubr.bf16.gmra.mxu1 %v18327_v50  ;;  %v10184_v5 = vpop.f32.mrf.mxu1  ;;  %18329 = vst [vmem:[#allocation43_spill] sm:$0xff] %v16807_v44  ;;  %v18332_v50 = vld [vmem:[#allocation78_spill] sm:$0xff] }
 0x4e8   :  { %10868 = vmatprep.mubr.bf16.mxu1 %v18328_v27  ;;  %v16809_v6 = vadd.f32 %v10184_v5, %v10072_v60  ;;  %v16813_v38 = vpop.f32.mrf.mxu0  ;;  %v10082_v5 = vadd.f32 %v16585_v4, %v16687_v46 }
 0x4e9   :  { %v16811_v25 = vpop.f32.mrf.mxu1  ;;  %18330 = vst [vmem:[#allocation80_spill] sm:$0xff] %v16813_v38 }
 0x4ea   :  { %v16817_v8 = vpop.f32.mrf.mxu0 }
 0x4eb   :  { %v16815_v40 = vpop.f32.mrf.mxu1  ;;  %18331 = vst [vmem:[#allocation46_spill] sm:$0xff] %v16817_v8 }
 0x4ec   :  { %11699 = vmatmul.mubr.bf16.gmra.mxu0 %v18332_v50  ;;  %v16822_v27 = vpop.f32.mrf.mxu0 }
 0x4ed   :  { %v10192_v24 = vpop.f32.mrf.mxu1  ;;  %18333 = vst [vmem:[#allocation57_spill] sm:$0xff] %v16822_v27 }
 0x4ee   :  { %v16827_v52 = vadd.f32 %v10192_v24, %v10080_v21  ;;  %v16830_v38 = vpop.f32.mrf.mxu0 }
 0x4ef   :  { %10869 = vmatmul.mubr.bf16.gmra.mxu1 %v18222_v33  ;;  %v10194_v60 = vpop.f32.mrf.mxu1  ;;  %18334 = vst [vmem:[#allocation32_spill] sm:$0xff] %v16830_v38  ;;  %v10090_v33 = vadd.f32 %v16600_v43, %v16679_v16 }
 0x4f0   :  { %10878 = vmatprep.mubr.bf16.mxu1 %v18223_v28  ;;  %v16832_v8 = vadd.f32 %v10194_v60, %v10082_v5  ;;  %v16836_v2 = vpop.f32.mrf.mxu0  ;;  %v10092_v28 = vadd.f32 %v16605_v53, %v16687_v46 }
 0x4f1   :  { %v16834_v50 = vpop.f32.mrf.mxu1  ;;  %18335 = vst [vmem:[#allocation66_spill] sm:$0xff] %v16836_v2 }
 0x4f2   :  { %v16840_v27 = vpop.f32.mrf.mxu0 }
 0x4f3   :  { %v16838_v44 = vpop.f32.mrf.mxu1  ;;  %18336 = vst [vmem:[#allocation45_spill] sm:$0xff] %v16840_v27 }
 0x4f4   :  { %v16844_v21 = vpop.f32.mrf.mxu0 }
 0x4f5   :  { %v10202_v4 = vpop.f32.mrf.mxu1  ;;  %18337 = vst [vmem:[#allocation48_spill] sm:$0xff] %v16844_v21 }
 0x4f6   :  { %v16849_v24 = vadd.f32 %v10202_v4, %v10090_v33  ;;  %v16852_v60 = vpop.f32.mrf.mxu0 }
 0x4f7   :  { %10879 = vmatmul.mubr.bf16.gmra.mxu1 %v18226_v14  ;;  %v10204_v5 = vpop.f32.mrf.mxu1  ;;  %18338 = vst [vmem:[#allocation59_spill] sm:$0xff] %v16852_v60  ;;  %v10100_v14 = vadd.f32 %v16620_v22, %v16679_v16 }
 0x4f8   :  { %10888 = vmatprep.mubr.bf16.mxu1 %v18227_v36  ;;  %v16854_v2 = vadd.f32 %v10204_v5, %v10092_v28  ;;  %v16858_v43 = vpop.f32.mrf.mxu0  ;;  %v10102_v36 = vadd.f32 %v16625_v23, %v16687_v46 }
 0x4f9   :  { %v16856_v27 = vpop.f32.mrf.mxu1  ;;  %18339 = vst [vmem:[#allocation68_spill] sm:$0xff] %v16858_v43 }
 0x4fa   :  { %v16862_v21 = vpop.f32.mrf.mxu0 }
 0x4fb   :  { %v16860_v38 = vpop.f32.mrf.mxu1  ;;  %18340 = vst [vmem:[#allocation47_spill] sm:$0xff] %v16862_v21 }
 0x4fc   :  { %v16866_v33 = vpop.f32.mrf.mxu0 }
 0x4fd   :  { %v10212_v53 = vpop.f32.mrf.mxu1  ;;  %18341 = vst [vmem:[#allocation50_spill] sm:$0xff] %v16866_v33  ;;  %v10034_v33 = vadd.f32 %v16473_v15, %v16679_v16  ;;  %v10256_v15 = vadd.f32 %v16640_v11, %v16706_v34  ;;  %v18354_v11 = vld [vmem:[#allocation91_spill] sm:$0xff] }
 0x4fe   :  { %v16871_v4 = vadd.f32 %v10212_v53, %v10100_v14  ;;  %v16874_v5 = vpop.f32.mrf.mxu0  ;;  %v13730_v14 = vld [vmem:[#allocation12 + $0x1f0] sm:$0xff]   ;;  %v10044_v34 = vadd.f32 %v18354_v11, %v16679_v16 }
 0x4ff   :  { %10889 = vmatmul.mubr.bf16.gmra.mxu1 %v18231_v17  ;;  %v10214_v28 = vpop.f32.mrf.mxu1  ;;  %18343 = vst [vmem:[#allocation98_spill] sm:$0xff] %v16874_v5  ;;  %v13729_v17 = vld [vmem:[#allocation12 + $0x1b8] sm:$0xff]   ;;  %v10147_v5 = vadd.f32 %v16715_v9, %v10034_v33  ;;  %v10258_v33 = vadd.f32 %v16645_v56, %v16711_v47  ;;  %v13734_v56 = vld [vmem:[#allocation12 + $0x1e0] sm:$0xff]  }
 0x500   :  { %18342 = vst [vmem:[#allocation67_spill] sm:$0xff] %v16871_v4  ;;  %11739 = vmatprep.mubr.bf16.mxu1 %v16555_v45  ;;  %v16876_v43 = vadd.f32 %v10214_v28, %v10102_v36  ;;  %v16880_v22 = vpop.f32.mrf.mxu0  ;;  %v18349_v45 = vld [vmem:[#allocation81_spill] sm:$0xff] }
 0x501   :  { %v16878_v60 = vpop.f32.mrf.mxu1  ;;  %18346 = vst [vmem:[#allocation95_spill] sm:$0xff] %v16880_v22  ;;  %v10036_v53 = vadd.f32 %v18349_v45, %v16687_v46  ;;  %v13732_v45 = vld [vmem:[#allocation12 + $0x1e8] sm:$0xff]  }
 0x502   :  { %18344 = vst [vmem:[#allocation49_spill] sm:$0xff] %v16876_v43  ;;  %18345 = vst [vmem:[#allocation52_spill] sm:$0xff] %v16878_v60  ;;  %v16886_v23 = vpop.f32.mrf.mxu0  ;;  %v18351_v43 = vld [vmem:[#allocation34_spill] sm:$0xff] }
 0x503   :  { %v16884_v21 = vpop.f32.mrf.mxu1  ;;  %18348 = vst [vmem:[#allocation51_spill] sm:$0xff] %v16886_v23  ;;  %v10149_v22 = vadd.f32 %v16719_v35, %v10036_v53  ;;  %v13731_v23 = vld [vmem:[#allocation12 + $0x1b0] sm:$0xff]  }
 0x504   :  { %18347 = vst [vmem:[#allocation100_spill] sm:$0xff] %v16884_v21  ;;  %v16891_v28 = vpop.f32.mrf.mxu0 }
 0x505   :  { %v10368_v36 = vpop.f32.mrf.mxu1  ;;  %18350 = vst [vmem:[#allocation54_spill] sm:$0xff] %v16891_v28  ;;  %v10262_v53 = vadd.f32 %v16657_v0, %v10149_v22  ;;  %v18356_v22 = vld [vmem:[#allocation33_spill] sm:$0xff] }
 0x506   :  { %v16898_v4 = vpop.f32.mrf.mxu0  ;;  %v10369_v9 = vadd.f32 %v10368_v36, %v10256_v15 }
 0x507   :  { %11740 = vmatmul.mubr.bf16.vlgmr.msra.gmra.mxu1 %v18351_v43  ;;  %v10370_v21 = vpop.f32.mrf.mxu1  ;;  %18352 = vst [vmem:[#allocation99_spill] sm:$0xff] %v16898_v4  ;;  %v10260_v43 = vadd.f32 %v16652_v41, %v10147_v5  ;;  %v13733_v4 = vld [vmem:[#allocation12 + $0x1a8] sm:$0xff]   ;;  %v10157_v41 = vadd.f32 %v16739_v26, %v10044_v34  ;;  %v13735_v26 = vld [vmem:[#allocation12 + $0x1a0] sm:$0xff]   ;;  %v13736_v34 = vld [vmem:[#allocation12 + $0x1d8] sm:$0xff]  }
 0x508   :  { %11747 = vmatprep.mubr.bf16.mxu1 %v16575_v49  ;;  %13519 = vmatpush3.bf16.msra.mxu1 %v13729_v17  ;;  %v16903_v35 = vpop.f32.mrf.mxu0  ;;  %v10371_v49 = vadd.f32 %v10370_v21, %v10258_v33  ;;  %v10903_v47 = vmax.f32 %v10369_v9, 0.0  ;;  %v10266_v21 = vadd.f32 %v16660_v37, %v16732_v30  ;;  %v10268_v30 = vadd.f32 %v16665_v32, %v16737_v42 }
 0x509   :  { %13520 = vmatprep.subr.bf16.mxu1 %v13730_v14  ;;  %v10372_v28 = vpop.f32.mrf.mxu1  ;;  %18353 = vst [vmem:[#allocation102_spill] sm:$0xff] %v16903_v35  ;;  %v18355_v14 = vld [vmem:[#allocation90_spill] sm:$0xff] }
 0x50a   :  { %v10373_v17 = vadd.f32 %v10372_v28, %v10260_v43  ;;  %v10046_v36 = vadd.f32 %v18355_v14, %v16687_v46  ;;  %v16910_v60 = vpop.f32.mrf.mxu0  ;;  %v10904_v33 = vmax.f32 %v10371_v49, 0.0 }
 0x50b   :  { %v10374_v15 = vpop.f32.mrf.mxu1 }
 0x50c   :  { %13521 = vmatpush3.bf16.msra.mxu1 %v13731_v23  ;;  %v10911_v5 = vmax.f32 %v10373_v17, 0.0  ;;  %v10375_v35 = vadd.f32 %v10374_v15, %v10262_v53  ;;  %v16915_v0 = vpop.f32.mrf.mxu0  ;;  %v10159_v23 = vadd.f32 %v16743_v29, %v10046_v36  ;;  %v10270_v17 = vadd.f32 %v16672_v10, %v10157_v41  ;;  %v18357_v29 = vld [vmem:[#allocation31_spill] sm:$0xff]  ;;  %v13738_v10 = vld [vmem:[#allocation12 + $0x1d0] sm:$0xff]  }
 0x50d   :  { %13522 = vmatprep.subr.bf16.mxu1 %v13732_v45  ;;  %v10378_v28 = vpop.f32.mrf.mxu1  ;;  %v10054_v49 = vadd.f32 %v18357_v29, %v16679_v16  ;;  %v13737_v15 = vld [vmem:[#allocation12 + $0x198] sm:$0xff]  }
 0x50e   :  { %v11031_v43 = vpack.c.bf16 %v10911_v5, %v10903_v47  ;;  %v10912_v11 = vmax.f32 %v10375_v35, 0.0  ;;  %v16920_v9 = vpop.f32.mrf.mxu0  ;;  %v10379_v37 = vadd.f32 %v10378_v28, %v10266_v21  ;;  %v10272_v36 = vadd.f32 %v16689_v54, %v10159_v23 }
 0x50f   :  { %11748 = vmatmul.mubr.bf16.gmra.mxu1 %v18356_v22  ;;  %v10380_v45 = vpop.f32.mrf.mxu1  ;;  %v10167_v41 = vadd.f32 %v16763_v31, %v10054_v49  ;;  %v10276_v22 = vadd.f32 %v16692_v59, %v16756_v7  ;;  %v13739_v31 = vld [vmem:[#allocation12 + $0x190] sm:$0xff]   ;;  %v10278_v59 = vadd.f32 %v16701_v61, %v16761_v18 }
 0x510   :  { %11755 = vmatprep.mubr.bf16.mxu1 %v16595_v63  ;;  %13523 = vmatpush3.bf16.msra.mxu1 %v13733_v4  ;;  %v11032_v53 = vpack.c.bf16 %v10912_v11, %v10904_v33  ;;  %v16927_v14 = vpop.f32.mrf.mxu0  ;;  %v10381_v63 = vadd.f32 %v10380_v45, %v10268_v30  ;;  %v10919_v5 = vmax.f32 %v10379_v37, 0.0  ;;  %v13740_v37 = vld [vmem:[#allocation12 + $0x1c8] sm:$0xff]  }
 0x511   :  { %13524 = vmatprep.subr.bf16.mxu1 %v13734_v56  ;;  %v10382_v35 = vpop.f32.mrf.mxu1  ;;  %v18358_v56 = vld [vmem:[#allocation94_spill] sm:$0xff] }
 0x512   :  { %v10383_v4 = vadd.f32 %v10382_v35, %v10270_v17  ;;  %11836 = vmatprep.mubr.bf16.mxu0 %v11032_v53  ;;  %v10056_v47 = vadd.f32 %v18358_v56, %v16687_v46  ;;  %v16932_v42 = vpop.f32.mrf.mxu0  ;;  %v10920_v11 = vmax.f32 %v10381_v63, 0.0  ;;  %v13741_v63 = vld [vmem:[#allocation12 + $0x188] sm:$0xff]  }
 0x513   :  { %v10384_v32 = vpop.f32.mrf.mxu1  ;;  %11837 = vmatmul.mubr.bf16.vlgmr.msra.gmra.mxu0 %v11031_v43 }
 0x514   :  { %13525 = vmatpush3.bf16.msra.mxu1 %v13735_v26  ;;  %v10927_v21 = vmax.f32 %v10383_v4, 0.0  ;;  %v10385_v28 = vadd.f32 %v10384_v32, %v10272_v36  ;;  %v16937_v23 = vpop.f32.mrf.mxu0  ;;  %v10169_v33 = vadd.f32 %v16767_v58, %v10056_v47  ;;  %v18359_v58 = vld [vmem:[#allocation92_spill] sm:$0xff]  ;;  %v18360_v4 = vld [vmem:[#allocation93_spill] sm:$0xff] }
 0x515   :  { %13526 = vmatprep.subr.bf16.mxu1 %v13736_v34  ;;  %v10388_v54 = vpop.f32.mrf.mxu1  ;;  %v10064_v17 = vadd.f32 %v18359_v58, %v16679_v16  ;;  %v10066_v36 = vadd.f32 %v18360_v4, %v16687_v46 }
 0x516   :  { %v11039_v26 = vpack.c.bf16 %v10927_v21, %v10919_v5  ;;  %v10928_v43 = vmax.f32 %v10385_v28, 0.0  ;;  %v16942_v34 = vpop.f32.mrf.mxu0  ;;  %v10389_v7 = vadd.f32 %v10388_v54, %v10276_v22  ;;  %v10282_v35 = vadd.f32 %v16717_v39, %v10169_v33 }
 0x517   :  { %11756 = vmatmul.mubr.bf16.gmra.mxu1 %v16588_v55  ;;  %v10390_v45 = vpop.f32.mrf.mxu1  ;;  %v10280_v55 = vadd.f32 %v16709_v62, %v10167_v41  ;;  %v13742_v62 = vld [vmem:[#allocation12 + $0x1c0] sm:$0xff]   ;;  %v10179_v5 = vadd.f32 %v16791_v19, %v10066_v36 }
 0x518   :  { %11763 = vmatprep.mubr.bf16.mxu1 %v16615_v20  ;;  %13527 = vmatpush3.bf16.msra.mxu1 %v13737_v15  ;;  %v11040_v30 = vpack.c.bf16 %v10928_v43, %v10920_v11  ;;  %v16949_v29 = vpop.f32.mrf.mxu0  ;;  %v10391_v20 = vadd.f32 %v10390_v45, %v10278_v59  ;;  %v10177_v15 = vadd.f32 %v16787_v13, %v10064_v17  ;;  %v10935_v56 = vmax.f32 %v10389_v7, 0.0  ;;  %v13743_v13 = vld [vmem:[#allocation12 + $0x180] sm:$0xff]   ;;  %v18365_v59 = vld [vmem:[#allocation65_spill] sm:$0xff] }
 0x519   :  { %13528 = vmatprep.subr.bf16.mxu1 %v13738_v10  ;;  %v10392_v53 = vpop.f32.mrf.mxu1  ;;  %v10286_v10 = vadd.f32 %v16721_v57, %v16780_v3  ;;  %v18361_v57 = vld [vmem:[#allocation40_spill] sm:$0xff] }
 0x51a   :  { %v10393_v49 = vadd.f32 %v10392_v53, %v10280_v55  ;;  %11844 = vmatprep.mubr.bf16.mxu0 %v11040_v30  ;;  %v10936_v21 = vmax.f32 %v10391_v20, 0.0  ;;  %v10288_v3 = vadd.f32 %v18361_v57, %v16785_v51  ;;  %v18363_v19 = vld [vmem:[#allocation96_spill] sm:$0xff]  ;;  %v10292_v55 = vadd.f32 %v18365_v59, %v10179_v5 }
 0x51b   :  { %v10394_v61 = vpop.f32.mrf.mxu1  ;;  %v16954_v18 = vpop.f32.mrf.mxu0  ;;  %11845 = vmatmul.mubr.bf16.gmra.mxu0 %v11039_v26  ;;  %v18362_v26 = vld [vmem:[#allocation62_spill] sm:$0xff]  ;;  %v18366_v30 = vld [vmem:[#allocation36_spill] sm:$0xff] }
 0x51c   :  { %13529 = vmatpush3.bf16.msra.mxu1 %v13739_v31  ;;  %v10943_v47 = vmax.f32 %v10393_v49, 0.0  ;;  %v10395_v32 = vadd.f32 %v10394_v61, %v10282_v35  ;;  %v10290_v43 = vadd.f32 %v18362_v26, %v10177_v15  ;;  %v10074_v31 = vadd.f32 %v18363_v19, %v16679_v16  ;;  %v18376_v19 = vld [vmem:[#allocation35_spill] sm:$0xff] }
 0x51d   :  { %13530 = vmatprep.subr.bf16.mxu1 %v13740_v37  ;;  %v10398_v39 = vpop.f32.mrf.mxu1  ;;  %v16959_v41 = vpop.f32.mrf.mxu0  ;;  %v10076_v58 = vadd.f32 %v18366_v30, %v16687_v46  ;;  %v18377_v30 = vld [vmem:[#allocation41_spill] sm:$0xff] }
 0x51e   :  { %v11047_v28 = vpack.c.bf16 %v10943_v47, %v10935_v56  ;;  %v10944_v22 = vmax.f32 %v10395_v32, 0.0  ;;  %v10399_v11 = vadd.f32 %v10398_v39, %v10286_v10  ;;  %v10187_v53 = vadd.f32 %v16811_v25, %v10074_v31  ;;  %v18369_v10 = vld [vmem:[#allocation30_spill] sm:$0xff] }
 0x51f   :  { %11764 = vmatmul.mubr.bf16.gmra.mxu1 %v16608_v48  ;;  %v10400_v54 = vpop.f32.mrf.mxu1  ;;  %v16964_v33 = vpop.f32.mrf.mxu0  ;;  %v10189_v15 = vadd.f32 %v16815_v40, %v10076_v58  ;;  %v18374_v40 = vld [vmem:[#allocation97_spill] sm:$0xff]  ;;  %v10086_v31 = vadd.f32 %v18376_v19, %v16687_v46  ;;  %v10306_v58 = vadd.f32 %v18377_v30, %v16827_v52  ;;  %v18382_v52 = vld [vmem:[#allocation79_spill] sm:$0xff] }
 0x520   :  { %11771 = vmatprep.mubr.bf16.mxu1 %v16635_v1  ;;  %13531 = vmatpush3.bf16.msra.mxu1 %v13741_v63  ;;  %v11048_v48 = vpack.c.bf16 %v10944_v22, %v10936_v21  ;;  %v10401_v1 = vadd.f32 %v10400_v54, %v10288_v3  ;;  %v10951_v20 = vmax.f32 %v10399_v11, 0.0  ;;  %v18367_v63 = vld [vmem:[#allocation39_spill] sm:$0xff]  ;;  %v18371_v21 = vld [vmem:[#allocation42_spill] sm:$0xff]  ;;  %v10084_v57 = vadd.f32 %v18374_v40, %v16679_v16  ;;  %v18387_v19 = vld [vmem:[#allocation29_spill] sm:$0xff] }
 0x521   :  { %13532 = vmatprep.subr.bf16.mxu1 %v13742_v62  ;;  %v10402_v45 = vpop.f32.mrf.mxu1  ;;  %v16971_v37 = vpop.f32.mrf.mxu0  ;;  %v10296_v4 = vadd.f32 %v18367_v63, %v16804_v12  ;;  %v18368_v62 = vld [vmem:[#allocation61_spill] sm:$0xff]  ;;  %v18372_v12 = vld [vmem:[#allocation64_spill] sm:$0xff] }
 0x522   :  { %18364 = vst [vmem:[#allocation53_spill] sm:$0xff] %v16971_v37  ;;  %v10403_v7 = vadd.f32 %v10402_v45, %v10290_v43  ;;  %11852 = vmatprep.mubr.bf16.mxu0 %v11048_v48  ;;  %v10952_v56 = vmax.f32 %v10401_v1, 0.0  ;;  %v10300_v22 = vadd.f32 %v18372_v12, %v10187_v53  ;;  %v18375_v43 = vld [vmem:[#allocation56_spill] sm:$0xff] }
 0x523   :  { %v10404_v17 = vpop.f32.mrf.mxu1  ;;  %v16976_v51 = vpop.f32.mrf.mxu0  ;;  %11853 = vmatmul.mubr.bf16.gmra.mxu0 %v11047_v28  ;;  %v10298_v28 = vadd.f32 %v18371_v21, %v16809_v6  ;;  %v10302_v48 = vadd.f32 %v18375_v43, %v10189_v15  ;;  %v10197_v6 = vadd.f32 %v16834_v50, %v10084_v57 }
 0x524   :  { %13533 = vmatpush3.bf16.msra.mxu1 %v13743_v13  ;;  %v10959_v49 = vmax.f32 %v10403_v7, 0.0  ;;  %v10405_v35 = vadd.f32 %v10404_v17, %v10292_v55 }
 0x525   :  { %v16981_v61 = vpop.f32.mrf.mxu0 }
 0x526   :  { %v11055_v47 = vpack.c.bf16 %v10959_v49, %v10951_v20  ;;  %v10960_v32 = vmax.f32 %v10405_v35, 0.0  ;;  %v18378_v20 = vld [vmem:[#allocation60_spill] sm:$0xff]  ;;  %v10199_v49 = vadd.f32 %v16838_v44, %v10086_v31  ;;  %v18384_v44 = vld [vmem:[#allocation38_spill] sm:$0xff]  ;;  %v10316_v31 = vadd.f32 %v18387_v19, %v16849_v24  ;;  %v18391_v24 = vld [vmem:[#allocation43_spill] sm:$0xff] }
 0x527   :  { %v10408_v36 = vpop.f32.mrf.mxu1  ;;  %11772 = vmatmul.mubr.bf16.gmra.mxu1 %v18368_v62  ;;  %v16986_v25 = vpop.f32.mrf.mxu0  ;;  %v10094_v21 = vadd.f32 %v18384_v44, %v16679_v16 }
 0x528   :  { %11779 = vmatprep.mubr.bf16.mxu1 %v18369_v10  ;;  %18370 = vst [vmem:[#allocation83_spill] sm:$0xff] %v16986_v25  ;;  %v10409_v5 = vadd.f32 %v10408_v36, %v10296_v4  ;;  %v11056_v13 = vpack.c.bf16 %v10960_v32, %v10952_v56  ;;  %v18379_v36 = vld [vmem:[#allocation28_spill] sm:$0xff]  ;;  %v10310_v32 = vadd.f32 %v18382_v52, %v10197_v6 }
 0x529   :  { %v10410_v39 = vpop.f32.mrf.mxu1  ;;  %v16991_v11 = vpop.f32.mrf.mxu0  ;;  %v18381_v56 = vld [vmem:[#allocation44_spill] sm:$0xff] }
 0x52a   :  { %18373 = vst [vmem:[#allocation101_spill] sm:$0xff] %v16991_v11  ;;  %v10411_v3 = vadd.f32 %v10410_v39, %v10298_v28  ;;  %11860 = vmatprep.mubr.bf16.mxu0 %v11056_v13  ;;  %v10967_v7 = vmax.f32 %v10409_v5, 0.0 }
 0x52b   :  { %v10412_v54 = vpop.f32.mrf.mxu1  ;;  %11861 = vmatmul.mubr.bf16.gmra.mxu0 %v11055_v47  ;;  %v10308_v47 = vadd.f32 %v18381_v56, %v16832_v8  ;;  %v10207_v8 = vadd.f32 %v16856_v27, %v10094_v21 }
 0x52c   :  { %v10413_v26 = vadd.f32 %v10412_v54, %v10300_v22  ;;  %v16998_v1 = vpop.f32.mrf.mxu0  ;;  %v10968_v35 = vmax.f32 %v10411_v3, 0.0  ;;  %v18385_v22 = vld [vmem:[#allocation55_spill] sm:$0xff]  ;;  %v18386_v54 = vld [vmem:[#allocation37_spill] sm:$0xff] }
 0x52d   :  { %v10414_v45 = vpop.f32.mrf.mxu1  ;;  %v10312_v13 = vadd.f32 %v18385_v22, %v10199_v49  ;;  %v10096_v40 = vadd.f32 %v18386_v54, %v16687_v46 }
 0x52e   :  { %v10975_v59 = vmax.f32 %v10413_v26, 0.0  ;;  %v10415_v55 = vadd.f32 %v10414_v45, %v10302_v48  ;;  %v17003_v53 = vpop.f32.mrf.mxu0 }
 0x52f   :  { %v10418_v17 = vpop.f32.mrf.mxu1  ;;  %11780 = vmatmul.mubr.bf16.gmra.mxu1 %v18378_v20 }
 0x530   :  { %v11063_v63 = vpack.c.bf16 %v10975_v59, %v10967_v7  ;;  %v10976_v4 = vmax.f32 %v10415_v55, 0.0  ;;  %11787 = vmatprep.mubr.bf16.mxu1 %v18379_v36  ;;  %v17008_v50 = vpop.f32.mrf.mxu0  ;;  %v10419_v15 = vadd.f32 %v10418_v17, %v10306_v58  ;;  %v18388_v7 = vld [vmem:[#allocation73_spill] sm:$0xff]  ;;  %v10209_v59 = vadd.f32 %v16860_v38, %v10096_v40  ;;  %v18389_v17 = vld [vmem:[#allocation76_spill] sm:$0xff]  ;;  %v18392_v38 = vld [vmem:[#allocation71_spill] sm:$0xff] }
 0x531   :  { %v10420_v62 = vpop.f32.mrf.mxu1  ;;  %18380 = vst [vmem:[#allocation104_spill] sm:$0xff] %v17008_v50  ;;  %v10104_v56 = vadd.f32 %v18392_v38, %v16679_v16  ;;  %v18396_v40 = vld [vmem:[#allocation67_spill] sm:$0xff] }
 0x532   :  { %v11064_v10 = vpack.c.bf16 %v10976_v4, %v10968_v35  ;;  %v17013_v5 = vpop.f32.mrf.mxu0  ;;  %v10421_v28 = vadd.f32 %v10420_v62, %v10308_v47  ;;  %v10983_v26 = vmax.f32 %v10419_v15, 0.0  ;;  %v18390_v35 = vld [vmem:[#allocation58_spill] sm:$0xff]  ;;  %v10320_v4 = vadd.f32 %v18391_v24, %v10207_v8  ;;  %v18405_v24 = vld [vmem:[#allocation32_spill] sm:$0xff] }
 0x533   :  { %v10422_v39 = vpop.f32.mrf.mxu1  ;;  %18383 = vst [vmem:[#allocation82_spill] sm:$0xff] %v17013_v5 }
 0x534   :  { %v10423_v12 = vadd.f32 %v10422_v39, %v10310_v32  ;;  %11868 = vmatprep.mubr.bf16.mxu0 %v11064_v10  ;;  %v17020_v3 = vpop.f32.mrf.mxu0  ;;  %v10984_v55 = vmax.f32 %v10421_v28, 0.0  ;;  %v18393_v32 = vld [vmem:[#allocation80_spill] sm:$0xff]  ;;  %v18394_v39 = vld [vmem:[#allocation75_spill] sm:$0xff] }
 0x535   :  { %v10424_v57 = vpop.f32.mrf.mxu1  ;;  %11869 = vmatmul.mubr.bf16.gmra.mxu0 %v11063_v63  ;;  %v10318_v63 = vadd.f32 %v18390_v35, %v16854_v2  ;;  %v10322_v10 = vadd.f32 %v18393_v32, %v10209_v59  ;;  %v10106_v44 = vadd.f32 %v18394_v39, %v16687_v46  ;;  %v18395_v2 = vld [vmem:[#allocation52_spill] sm:$0xff]  ;;  %v18404_v35 = vld [vmem:[#allocation57_spill] sm:$0xff] }
 0x536   :  { %v10991_v43 = vmax.f32 %v10423_v12, 0.0  ;;  %v10425_v48 = vadd.f32 %v10424_v57, %v10312_v13  ;;  %v17025_v6 = vpop.f32.mrf.mxu0  ;;  %v10217_v12 = vadd.f32 %v18395_v2, %v10104_v56  ;;  %v18397_v57 = vld [vmem:[#allocation46_spill] sm:$0xff]  ;;  %v18408_v2 = vld [vmem:[#allocation45_spill] sm:$0xff] }
 0x537   :  { %v10428_v45 = vpop.f32.mrf.mxu1  ;;  %11788 = vmatmul.mubr.bf16.gmra.mxu1 %v18388_v7  ;;  %v10326_v16 = vadd.f32 %v18397_v57, %v18396_v40  ;;  %v18400_v7 = vld [vmem:[#allocation24_spill] sm:$0xff] }
 0x538   :  { %v11071_v30 = vpack.c.bf16 %v10991_v43, %v10983_v26  ;;  %v10992_v58 = vmax.f32 %v10425_v48, 0.0  ;;  %11795 = vmatprep.mubr.bf16.mxu1 %v18389_v17  ;;  %v17030_v27 = vpop.f32.mrf.mxu0  ;;  %v10429_v49 = vadd.f32 %v10428_v45, %v10316_v31  ;;  %v18398_v43 = vld [vmem:[#allocation63_spill] sm:$0xff]  ;;  %v18399_v48 = vld [vmem:[#allocation100_spill] sm:$0xff]  ;;  %v18401_v59 = vsub.s32 6, %v18400_v7 }
 0x539   :  { %v10430_v20 = vpop.f32.mrf.mxu1  ;;  %v10219_v19 = vadd.f32 %v18399_v48, %v10106_v44  ;;  %v18409_v40 = vld [vmem:[#allocation48_spill] sm:$0xff] }
 0x53a   :  { %v11072_v36 = vpack.c.bf16 %v10992_v58, %v10984_v55  ;;  %v17035_v15 = vpop.f32.mrf.mxu0  ;;  %v10431_v47 = vadd.f32 %v10430_v20, %v10318_v63  ;;  %v10999_v22 = vmax.f32 %v10429_v49, 0.0  ;;  %v18402_v55 = vld [vmem:[#allocation74_spill] sm:$0xff]  ;;  %v18403_v49 = vld [vmem:[#allocation49_spill] sm:$0xff] }
 0x53b   :  { %v10432_v62 = vpop.f32.mrf.mxu1  ;;  %v10328_v63 = vadd.f32 %v18404_v35, %v18403_v49  ;;  %v18410_v35 = vld [vmem:[#allocation47_spill] sm:$0xff] }
 0x53c   :  { %v10433_v52 = vadd.f32 %v10432_v62, %v10320_v4  ;;  %11876 = vmatprep.mubr.bf16.mxu0 %v11072_v36  ;;  %v17042_v28 = vpop.f32.mrf.mxu0  ;;  %v11000_v46 = vmax.f32 %v10431_v47, 0.0  ;;  %v10330_v4 = vadd.f32 %v18405_v24, %v10217_v12  ;;  %v18406_v62 = vsub.s32 7, %v18400_v7 }
 0x53d   :  { %v10434_v21 = vpop.f32.mrf.mxu1  ;;  %11877 = vmatmul.mubr.bf16.gmra.mxu0 %v11071_v30  ;;  %v17054_v30 = vrot.slane %v18402_v55, %v18401_v59 }
 0x53e   :  { %v11007_v13 = vmax.f32 %v10433_v52, 0.0  ;;  %v10435_v54 = vadd.f32 %v10434_v21, %v10322_v10  ;;  %v17047_v26 = vpop.f32.mrf.mxu0  ;;  %v17064_v38 = vrot.slane %v18402_v55, %v18406_v62  ;;  %v18407_v10 = vld [vmem:[#allocation66_spill] sm:$0xff] }
 0x53f   :  { %v10438_v8 = vpop.f32.mrf.mxu1  ;;  %11796 = vmatmul.mubr.bf16.gmra.mxu1 %v18398_v43  ;;  %v10332_v39 = vadd.f32 %v18407_v10, %v10219_v19  ;;  %v10482_v12 = vadd.f32 %v18408_v2, %v17054_v30 }
 0x540   :  { %v11079_v31 = vpack.c.bf16 %v11007_v13, %v10999_v22  ;;  %v11008_v45 = vmax.f32 %v10435_v54, 0.0  ;;  %v17056_v17 = vpop.f32.mrf.mxu0  ;;  %v10439_v20 = vadd.f32 %v10438_v8, %v10326_v16  ;;  %v10484_v57 = vadd.f32 %v18409_v40, %v17064_v38 }
 0x541   :  { %v10440_v58 = vpop.f32.mrf.mxu1 }
 0x542   :  { %v11080_v36 = vpack.c.bf16 %v11008_v45, %v11000_v46  ;;  %v17066_v47 = vpop.f32.mrf.mxu0  ;;  %v10441_v52 = vadd.f32 %v10440_v58, %v10328_v63  ;;  %v11015_v22 = vmax.f32 %v10439_v20, 0.0  ;;  %v10492_v63 = vadd.f32 %v18410_v35, %v17054_v30 }
 0x543   :  { %v10442_v56 = vpop.f32.mrf.mxu1 }
 0x544   :  { %v10443_v32 = vadd.f32 %v10442_v56, %v10330_v4  ;;  %11884 = vmatprep.mubr.bf16.mxu0 %v11080_v36  ;;  %v17069_v21 = vpop.f32.mrf.mxu0  ;;  %v11016_v43 = vmax.f32 %v10441_v52, 0.0  ;;  %v18411_v36 = vld [vmem:[#allocation50_spill] sm:$0xff] }
 0x545   :  { %v10444_v44 = vpop.f32.mrf.mxu1  ;;  %11885 = vmatmul.mubr.bf16.gmra.mxu0 %v11079_v31  ;;  %v10494_v62 = vadd.f32 %v18411_v36, %v17064_v38 }
 0x546   :  { %v11023_v13 = vmax.f32 %v10443_v32, 0.0  ;;  %v10445_v54 = vadd.f32 %v10444_v44, %v10332_v39  ;;  %v17075_v8 = vpop.f32.mrf.mxu0 }
 0x547   :  { %v10594_v16 = vpop.f32.mrf.mxu1 }
 0x548   :  { %v11087_v48 = vpack.c.bf16 %v11023_v13, %v11015_v22  ;;  %v11024_v46 = vmax.f32 %v10445_v54, 0.0  ;;  %v17077_v19 = vadd.f32 %v10594_v16, %v10482_v12  ;;  %v17079_v7 = vpop.f32.mrf.mxu0  ;;  %v18412_v22 = vld [vmem:[#allocation51_spill] sm:$0xff] }
 0x549   :  { %v10596_v45 = vpop.f32.mrf.mxu1  ;;  %v10502_v13 = vadd.f32 %v18412_v22, %v17054_v30 }
 0x54a   :  { %v17081_v31 = vadd.f32 %v10596_v45, %v10484_v57  ;;  %v11088_v59 = vpack.c.bf16 %v11024_v46, %v11016_v43  ;;  %v17085_v58 = vpop.f32.mrf.mxu0  ;;  %v18413_v57 = vld [vmem:[#allocation54_spill] sm:$0xff] }
 0x54b   :  { %v17083_v55 = vpop.f32.mrf.mxu1  ;;  %v10504_v16 = vadd.f32 %v18413_v57, %v17064_v38 }
 0x54c   :  { %11892 = vmatprep.mubr.bf16.mxu0 %v11088_v59  ;;  %v17089_v49 = vpop.f32.mrf.mxu0 }
 0x54d   :  { %v17087_v20 = vpop.f32.mrf.mxu1  ;;  %11893 = vmatmul.mubr.bf16.gmra.mxu0 %v11087_v48 }
 0x54e   :  { %v17093_v4 = vpop.f32.mrf.mxu0 }
 0x54f   :  { %v10604_v24 = vpop.f32.mrf.mxu1 }
 0x550   :  { %v17097_v56 = vadd.f32 %v10604_v24, %v10492_v63  ;;  %v17099_v32 = vpop.f32.mrf.mxu0  ;;  %v10512_v63 = vadd.f32 %v16910_v60, %v17054_v30  ;;  %v10522_v60 = vadd.f32 %v16932_v42, %v17054_v30  ;;  %v10532_v42 = vadd.f32 %v16954_v18, %v17054_v30 }
 0x551   :  { %v10606_v52 = vpop.f32.mrf.mxu1  ;;  %v10542_v18 = vadd.f32 %v16976_v51, %v17054_v30  ;;  %v10552_v51 = vadd.f32 %v16998_v1, %v17054_v30  ;;  %v18433_v1 = vld [vmem:[#allocation68_spill] sm:$0xff] }
 0x552   :  { %v17101_v10 = vadd.f32 %v10606_v52, %v10494_v62  ;;  %v17105_v44 = vpop.f32.mrf.mxu0  ;;  %v10514_v62 = vadd.f32 %v16915_v0, %v17064_v38  ;;  %v10524_v0 = vadd.f32 %v16937_v23, %v17064_v38  ;;  %v10534_v23 = vadd.f32 %v16959_v41, %v17064_v38 }
 0x553   :  { %v17103_v39 = vpop.f32.mrf.mxu1  ;;  %v10544_v41 = vadd.f32 %v16981_v61, %v17064_v38  ;;  %v10554_v61 = vadd.f32 %v17003_v53, %v17064_v38 }
 0x554   :  { %v17109_v12 = vpop.f32.mrf.mxu0 }
 0x555   :  { %v17107_v2 = vpop.f32.mrf.mxu1 }
 0x556   :  { %v17113_v40 = vpop.f32.mrf.mxu0 }
 0x557   :  { %v10614_v54 = vpop.f32.mrf.mxu1 }
 0x558   :  { %v17117_v43 = vadd.f32 %v10614_v54, %v10502_v13  ;;  %v17121_v45 = vpop.f32.mrf.mxu0 }
 0x559   :  { %v10616_v48 = vpop.f32.mrf.mxu1 }
 0x55a   :  { %v17119_v46 = vadd.f32 %v10616_v48, %v10504_v16  ;;  %v17129_v24 = vpop.f32.mrf.mxu0 }
 0x55b   :  { %v17123_v59 = vpop.f32.mrf.mxu1 }
 0x55c   :  { %v17137_v54 = vpop.f32.mrf.mxu0 }
 0x55d   :  { %v17125_v35 = vpop.f32.mrf.mxu1  ;;  %18414 = vst [vmem:[#allocation85_spill] sm:$0xff] %v17137_v54 }
 0x55e   :  { %v17145_v48 = vpop.f32.mrf.mxu0 }
 0x55f   :  { %v10624_v36 = vpop.f32.mrf.mxu1  ;;  %18415 = vst [vmem:[#allocation103_spill] sm:$0xff] %v17145_v48 }
 0x560   :  { %v17133_v52 = vadd.f32 %v10624_v36, %v10512_v63 }
 0x561   :  { %v10626_v22 = vpop.f32.mrf.mxu1 }
 0x562   :  { %v17135_v13 = vadd.f32 %v10626_v22, %v10514_v62  ;;  %v17153_v22 = vpop.f32.mrf.mxu0 }
 0x563   :  { %v17139_v57 = vpop.f32.mrf.mxu1  ;;  %18416 = vst [vmem:[#allocation105_spill] sm:$0xff] %v17153_v22 }
 0x564   :  { %v17161_v25 = vpop.f32.mrf.mxu0 }
 0x565   :  { %v17141_v16 = vpop.f32.mrf.mxu1  ;;  %18417 = vst [vmem:[#allocation84_spill] sm:$0xff] %v17161_v25 }
 0x567   :  { %v10634_v5 = vpop.f32.mrf.mxu1 }
 0x568   :  { %v17149_v63 = vadd.f32 %v10634_v5, %v10522_v60 }
 0x569   :  { %v10636_v36 = vpop.f32.mrf.mxu1 }
 0x56a   :  { %v17151_v62 = vadd.f32 %v10636_v36, %v10524_v0  ;;  %v17169_v36 = vpop.f32.mrf.mxu0 }
 0x56b   :  { %v17155_v50 = vpop.f32.mrf.mxu1  ;;  %18420 = vst [vmem:[#allocation27_spill] sm:$0xff] %v17169_v36 }
 0x56c   :  { %v17177_v37 = vpop.f32.mrf.mxu0 }
 0x56d   :  { %v17157_v11 = vpop.f32.mrf.mxu1  ;;  %18421 = vst [vmem:[#allocation86_spill] sm:$0xff] %v17177_v37 }
 0x56f   :  { %v10644_v54 = vpop.f32.mrf.mxu1 }
 0x570   :  { %v17165_v5 = vadd.f32 %v10644_v54, %v10532_v42 }
 0x571   :  { %v10646_v60 = vpop.f32.mrf.mxu1 }
 0x572   :  { %18418 = vst [vmem:[#allocation87_spill] sm:$0xff] %v17165_v5  ;;  %v17167_v0 = vadd.f32 %v10646_v60, %v10534_v23  ;;  %v17185_v60 = vpop.f32.mrf.mxu0 }
 0x573   :  { %v17171_v22 = vpop.f32.mrf.mxu1  ;;  %18424 = vst [vmem:[#allocation107_spill] sm:$0xff] %v17185_v60  ;;  %v18431_v60 = vld [vmem:[#allocation59_spill] sm:$0xff] }
 0x574   :  { %18419 = vst [vmem:[#allocation26_spill] sm:$0xff] %v17167_v0  ;;  %v17193_v0 = vpop.f32.mrf.mxu0 }
 0x575   :  { %v17173_v48 = vpop.f32.mrf.mxu1  ;;  %18427 = vst [vmem:[#allocation106_spill] sm:$0xff] %v17193_v0  ;;  %v10488_v0 = vadd.f32 %v18433_v1, %v17064_v38 }
 0x577   :  { %v10654_v25 = vpop.f32.mrf.mxu1 }
 0x578   :  { %v17181_v54 = vadd.f32 %v10654_v25, %v10542_v18 }
 0x579   :  { %v10656_v42 = vpop.f32.mrf.mxu1 }
 0x57a   :  { %18422 = vst [vmem:[#allocation89_spill] sm:$0xff] %v17181_v54  ;;  %v17183_v23 = vadd.f32 %v10656_v42, %v10544_v41  ;;  %v17201_v42 = vpop.f32.mrf.mxu0 }
 0x57b   :  { %v17187_v36 = vpop.f32.mrf.mxu1  ;;  %18430 = vst [vmem:[#allocation72_spill] sm:$0xff] %v17201_v42 }
 0x57c   :  { %18423 = vst [vmem:[#allocation25_spill] sm:$0xff] %v17183_v23  ;;  %18425 = vst [vmem:[#allocation88_spill] sm:$0xff] %v17187_v36  ;;  %v10486_v23 = vadd.f32 %v18431_v60, %v17054_v30  ;;  %v17212_v53 = vpop.f32.mrf.mxu0  ;;  %v10710_v60 = vadd.f32 %v17025_v6, %v17081_v31 }
 0x57d   :  { %v17189_v5 = vpop.f32.mrf.mxu1  ;;  %18434 = vst [vmem:[#allocation81_spill] sm:$0xff] %v17212_v53 }
 0x57e   :  { %18426 = vst [vmem:[#allocation70_spill] sm:$0xff] %v17189_v5  ;;  %v10599_v36 = vadd.f32 %v17083_v55, %v10486_v23  ;;  %v18436_v55 = vld [vmem:[#allocation98_spill] sm:$0xff] }
 0x57f   :  { %v10664_v37 = vpop.f32.mrf.mxu1  ;;  %v10496_v23 = vadd.f32 %v18436_v55, %v17054_v30 }
 0x580   :  { %v17197_v25 = vadd.f32 %v10664_v37, %v10552_v51  ;;  %v10601_v51 = vadd.f32 %v17087_v20, %v10488_v0  ;;  %v18437_v0 = vld [vmem:[#allocation95_spill] sm:$0xff] }
 0x581   :  { %v10666_v18 = vpop.f32.mrf.mxu1 }
 0x582   :  { %18428 = vst [vmem:[#allocation77_spill] sm:$0xff] %v17197_v25  ;;  %v17199_v41 = vadd.f32 %v10666_v18, %v10554_v61  ;;  %v10708_v61 = vadd.f32 %v17020_v3, %v17077_v19  ;;  %v10712_v25 = vadd.f32 %v17030_v27, %v10599_v36  ;;  %v10714_v20 = vadd.f32 %v17035_v15, %v10601_v51 }
 0x583   :  { %v17203_v54 = vpop.f32.mrf.mxu1  ;;  %v10498_v3 = vadd.f32 %v18437_v0, %v17064_v38  ;;  %v10718_v36 = vadd.f32 %v17042_v28, %v17097_v56 }
 0x584   :  { %18429 = vst [vmem:[#allocation69_spill] sm:$0xff] %v17199_v41  ;;  %v17220_v41 = vpop.f32.mrf.mxu0 }
 0x585   :  { %v17207_v5 = vpop.f32.mrf.mxu1  ;;  %18435 = vst [vmem:[#allocation34_spill] sm:$0xff] %v17220_v41 }
 0x586   :  { %18432 = vst [vmem:[#allocation78_spill] sm:$0xff] %v17207_v5  ;;  %v17228_v27 = vpop.f32.mrf.mxu0 }
 0x587   :  { %v10820_v37 = vpop.f32.mrf.mxu1 }
 0x588   :  { %v10821_v42 = vadd.f32 %v10820_v37, %v10708_v61  ;;  %v10609_v37 = vadd.f32 %v17103_v39, %v10496_v23  ;;  %v10720_v39 = vadd.f32 %v17047_v26, %v17101_v10 }
 0x589   :  { %v10822_v18 = vpop.f32.mrf.mxu1 }
 0x58a   :  { %v10823_v53 = vadd.f32 %v10822_v18, %v10710_v60  ;;  %v10905_v61 = vmax.f32 %v10821_v42, 0.0  ;;  %v10611_v18 = vadd.f32 %v17107_v2, %v10498_v3  ;;  %v17236_v42 = vpop.f32.mrf.mxu0 }
 0x58b   :  { %v10824_v1 = vpop.f32.mrf.mxu1 }
 0x58c   :  { %v10825_v5 = vadd.f32 %v10824_v1, %v10712_v25  ;;  %v10906_v25 = vmax.f32 %v10823_v53, 0.0  ;;  %v10724_v2 = vadd.f32 %v17066_v47, %v10611_v18  ;;  %v18439_v53 = vld [vmem:[#allocation102_spill] sm:$0xff] }
 0x58d   :  { %v10826_v19 = vpop.f32.mrf.mxu1  ;;  %v10508_v3 = vadd.f32 %v18439_v53, %v17064_v38 }
 0x58e   :  { %v10913_v6 = vmax.f32 %v10825_v5, 0.0  ;;  %v10827_v31 = vadd.f32 %v10826_v19, %v10714_v20  ;;  %v10722_v5 = vadd.f32 %v17056_v17, %v10609_v37  ;;  %v18438_v20 = vld [vmem:[#allocation99_spill] sm:$0xff]  ;;  %v17244_v37 = vpop.f32.mrf.mxu0 }
 0x58f   :  { %v10830_v41 = vpop.f32.mrf.mxu1  ;;  %v10506_v28 = vadd.f32 %v18438_v20, %v17054_v30 }
 0x590   :  { %v11033_v60 = vpack.c.bf16 %v10913_v6, %v10905_v61  ;;  %v10914_v15 = vmax.f32 %v10827_v31, 0.0  ;;  %v10831_v55 = vadd.f32 %v10830_v41, %v10718_v36  ;;  %v10728_v61 = vadd.f32 %v17069_v21, %v17117_v43 }
 0x591   :  { %v10832_v51 = vpop.f32.mrf.mxu1  ;;  %v10619_v26 = vadd.f32 %v17123_v59, %v10506_v28  ;;  %v10621_v31 = vadd.f32 %v17125_v35, %v10508_v3  ;;  %v10730_v59 = vadd.f32 %v17075_v8, %v17119_v46  ;;  %v10516_v21 = vadd.f32 %v16920_v9, %v17054_v30 }
 0x592   :  { %v11034_v1 = vpack.c.bf16 %v10914_v15, %v10906_v25  ;;  %v10833_v56 = vadd.f32 %v10832_v51, %v10720_v39  ;;  %v10921_v10 = vmax.f32 %v10831_v55, 0.0  ;;  %v10738_v9 = vadd.f32 %v17089_v49, %v17133_v52 }
 0x593   :  { %v10834_v23 = vpop.f32.mrf.mxu1  ;;  %v10734_v35 = vadd.f32 %v17085_v58, %v10621_v31  ;;  %v10629_v8 = vadd.f32 %v17139_v57, %v10516_v21  ;;  %v10740_v57 = vadd.f32 %v17093_v4, %v17135_v13  ;;  %v10526_v49 = vadd.f32 %v16942_v34, %v17054_v30 }
 0x594   :  { %v10835_v0 = vadd.f32 %v10834_v23, %v10722_v5  ;;  %11933 = vmatprep.mubr.bf16.mxu1 %v11034_v1  ;;  %v10922_v36 = vmax.f32 %v10833_v56, 0.0  ;;  %v17252_v1 = vpop.f32.mrf.mxu0  ;;  %v10518_v5 = vadd.f32 %v16927_v14, %v17064_v38  ;;  %v10536_v21 = vadd.f32 %v16964_v33, %v17054_v30 }
 0x595   :  { %v10836_v41 = vpop.f32.mrf.mxu1  ;;  %11934 = vmatmul.mubr.bf16.vlgmr.msra.gmra.mxu1 %v11033_v60  ;;  %v10732_v60 = vadd.f32 %v17079_v7, %v10619_v26  ;;  %v10742_v26 = vadd.f32 %v17099_v32, %v10629_v8  ;;  %v10639_v4 = vadd.f32 %v17155_v50, %v10526_v49  ;;  %v10748_v50 = vadd.f32 %v17109_v12, %v17149_v63 }
 0x596   :  { %v10929_v17 = vmax.f32 %v10835_v0, 0.0  ;;  %v10837_v19 = vadd.f32 %v10836_v41, %v10724_v2  ;;  %v17260_v28 = vpop.f32.mrf.mxu0  ;;  %v10631_v0 = vadd.f32 %v17141_v16, %v10518_v5 }
 0x597   :  { %v10840_v6 = vpop.f32.mrf.mxu1 }
 0x598   :  { %v11041_v47 = vpack.c.bf16 %v10929_v17, %v10921_v10  ;;  %v10930_v18 = vmax.f32 %v10837_v19, 0.0  ;;  %v10841_v51 = vadd.f32 %v10840_v6, %v10728_v61  ;;  %v17268_v10 = vpop.f32.mrf.mxu0  ;;  %v10744_v16 = vadd.f32 %v17105_v44, %v10631_v0  ;;  %v18442_v0 = vld [vmem:[#allocation103_spill] sm:$0xff] }
 0x599   :  { %v10842_v25 = vpop.f32.mrf.mxu1  ;;  %v10528_v61 = vadd.f32 %v16949_v29, %v17064_v38  ;;  %v10750_v29 = vadd.f32 %v17113_v40, %v17151_v62  ;;  %v18440_v40 = vld [vmem:[#allocation53_spill] sm:$0xff]  ;;  %v10649_v62 = vadd.f32 %v17171_v22, %v10536_v21 }
 0x59a   :  { %v11042_v15 = vpack.c.bf16 %v10930_v18, %v10922_v36  ;;  %v10843_v43 = vadd.f32 %v10842_v25, %v10730_v59  ;;  %v10937_v46 = vmax.f32 %v10841_v51, 0.0  ;;  %v17276_v36 = vpop.f32.mrf.mxu0  ;;  %v10752_v59 = vadd.f32 %v17121_v45, %v10639_v4  ;;  %v18448_v4 = vld [vmem:[#allocation101_spill] sm:$0xff] }
 0x59b   :  { %v10844_v55 = vpop.f32.mrf.mxu1  ;;  %v10641_v34 = vadd.f32 %v17157_v11, %v10528_v61  ;;  %v10538_v45 = vadd.f32 %v18440_v40, %v17064_v38  ;;  %v18451_v21 = vld [vmem:[#allocation25_spill] sm:$0xff] }
 0x59c   :  { %v10845_v39 = vadd.f32 %v10844_v55, %v10732_v60  ;;  %11941 = vmatprep.mubr.bf16.mxu1 %v11042_v15  ;;  %v10938_v2 = vmax.f32 %v10843_v43, 0.0  ;;  %v17282_v60 = vpop.f32.mrf.mxu0 }
 0x59d   :  { %v10846_v23 = vpop.f32.mrf.mxu1  ;;  %11942 = vmatmul.mubr.bf16.gmra.mxu1 %v11041_v47  ;;  %v10651_v33 = vadd.f32 %v17173_v48, %v10538_v45  ;;  %v18454_v45 = vld [vmem:[#allocation89_spill] sm:$0xff] }
 0x59e   :  { %v10945_v7 = vmax.f32 %v10845_v39, 0.0  ;;  %v10847_v20 = vadd.f32 %v10846_v23, %v10734_v35  ;;  %v10754_v39 = vadd.f32 %v17129_v24, %v10641_v34  ;;  %v17292_v8 = vpop.f32.mrf.mxu0 }
 0x59f   :  { %v10850_v56 = vpop.f32.mrf.mxu1 }
 0x5a0   :  { %v11049_v58 = vpack.c.bf16 %v10945_v7, %v10937_v46  ;;  %v10946_v53 = vmax.f32 %v10847_v20, 0.0  ;;  %v10851_v41 = vadd.f32 %v10850_v56, %v10738_v9  ;;  %v18441_v56 = vld [vmem:[#allocation26_spill] sm:$0xff] }
 0x5a1   :  { %v10852_v3 = vpop.f32.mrf.mxu1 }
 0x5a2   :  { %v11050_v14 = vpack.c.bf16 %v10946_v53, %v10938_v2  ;;  %v10853_v52 = vadd.f32 %v10852_v3, %v10740_v57  ;;  %v10953_v13 = vmax.f32 %v10851_v41, 0.0  ;;  %v10760_v2 = vadd.f32 %v18442_v0, %v18441_v56  ;;  %v17298_v3 = vpop.f32.mrf.mxu0  ;;  %v18445_v41 = vld [vmem:[#allocation85_spill] sm:$0xff]  ;;  %v18458_v0 = vld [vmem:[#allocation82_spill] sm:$0xff] }
 0x5a3   :  { %v10854_v17 = vpop.f32.mrf.mxu1 }
 0x5a4   :  { %v10855_v19 = vadd.f32 %v10854_v17, %v10742_v26  ;;  %11949 = vmatprep.mubr.bf16.mxu1 %v11050_v14  ;;  %v10954_v18 = vmax.f32 %v10853_v52, 0.0  ;;  %v18444_v14 = vld [vmem:[#allocation87_spill] sm:$0xff]  ;;  %v17308_v34 = vpop.f32.mrf.mxu0 }
 0x5a5   :  { %v10856_v6 = vpop.f32.mrf.mxu1  ;;  %11950 = vmatmul.mubr.bf16.gmra.mxu1 %v11049_v58  ;;  %v18443_v58 = vld [vmem:[#allocation105_spill] sm:$0xff]  ;;  %v10758_v57 = vadd.f32 %v18445_v41, %v18444_v14  ;;  %v18446_v17 = vld [vmem:[#allocation83_spill] sm:$0xff] }
 0x5a6   :  { %v10961_v32 = vmax.f32 %v10855_v19, 0.0  ;;  %v10857_v31 = vadd.f32 %v10856_v6, %v10744_v16  ;;  %v10762_v53 = vadd.f32 %v18443_v58, %v10649_v62  ;;  %v10546_v48 = vadd.f32 %v18446_v17, %v17054_v30  ;;  %v18447_v19 = vld [vmem:[#allocation84_spill] sm:$0xff]  ;;  %v18455_v62 = vld [vmem:[#allocation27_spill] sm:$0xff] }
 0x5a7   :  { %v10860_v47 = vpop.f32.mrf.mxu1  ;;  %v10764_v16 = vadd.f32 %v18447_v19, %v10651_v33  ;;  %v18460_v19 = vld [vmem:[#allocation69_spill] sm:$0xff] }
 0x5a8   :  { %v11057_v25 = vpack.c.bf16 %v10961_v32, %v10953_v13  ;;  %v10962_v15 = vmax.f32 %v10857_v31, 0.0  ;;  %v10861_v35 = vadd.f32 %v10860_v47, %v10748_v50  ;;  %v10548_v13 = vadd.f32 %v18448_v4, %v17064_v38  ;;  %v18449_v32 = vld [vmem:[#allocation88_spill] sm:$0xff] }
 0x5a9   :  { %v10862_v51 = vpop.f32.mrf.mxu1  ;;  %v10659_v31 = vadd.f32 %v18449_v32, %v10546_v48  ;;  %v18464_v32 = vld [vmem:[#allocation72_spill] sm:$0xff] }
 0x5aa   :  { %v11058_v44 = vpack.c.bf16 %v10962_v15, %v10954_v18  ;;  %v10863_v11 = vadd.f32 %v10862_v51, %v10750_v29  ;;  %v10969_v20 = vmax.f32 %v10861_v35, 0.0  ;;  %v18450_v15 = vld [vmem:[#allocation70_spill] sm:$0xff] }
 0x5ab   :  { %v10864_v55 = vpop.f32.mrf.mxu1  ;;  %v10661_v51 = vadd.f32 %v18450_v15, %v10548_v13  ;;  %v18463_v13 = vld [vmem:[#allocation77_spill] sm:$0xff] }
 0x5ac   :  { %v10865_v43 = vadd.f32 %v10864_v55, %v10752_v59  ;;  %11957 = vmatprep.mubr.bf16.mxu1 %v11058_v44  ;;  %v10970_v46 = vmax.f32 %v10863_v11, 0.0  ;;  %v18452_v11 = vld [vmem:[#allocation86_spill] sm:$0xff] }
 0x5ad   :  { %v10866_v5 = vpop.f32.mrf.mxu1  ;;  %11958 = vmatmul.mubr.bf16.gmra.mxu1 %v11057_v25 }
 0x5ae   :  { %v10867_v23 = vadd.f32 %v10866_v5, %v10754_v39  ;;  %v10977_v12 = vmax.f32 %v10865_v43, 0.0  ;;  %v10770_v43 = vadd.f32 %v18452_v11, %v18451_v21  ;;  %v18453_v39 = vld [vmem:[#allocation107_spill] sm:$0xff]  ;;  %v17314_v5 = vpop.f32.mrf.mxu0 }
 0x5af   :  { %v10870_v63 = vpop.f32.mrf.mxu1  ;;  %v10772_v35 = vadd.f32 %v18453_v39, %v10659_v31  ;;  %v10778_v31 = vadd.f32 %v18464_v32, %v18463_v13 }
 0x5b0   :  { %v10978_v7 = vmax.f32 %v10867_v23, 0.0  ;;  %v11065_v22 = vpack.c.bf16 %v10977_v12, %v10969_v20  ;;  %v10871_v61 = vadd.f32 %v10870_v63, %v10758_v57  ;;  %v10768_v23 = vadd.f32 %v18455_v62, %v18454_v45  ;;  %v18456_v63 = vld [vmem:[#allocation104_spill] sm:$0xff]  ;;  %v18457_v20 = vld [vmem:[#allocation106_spill] sm:$0xff] }
 0x5b1   :  { %v10872_v9 = vpop.f32.mrf.mxu1  ;;  %v10556_v33 = vadd.f32 %v18456_v63, %v17054_v30  ;;  %v18459_v57 = vld [vmem:[#allocation78_spill] sm:$0xff] }
 0x5b2   :  { %v11066_v24 = vpack.c.bf16 %v10978_v7, %v10970_v46  ;;  %v10873_v49 = vadd.f32 %v10872_v9, %v10760_v2  ;;  %v10985_v59 = vmax.f32 %v10871_v61, 0.0  ;;  %v10774_v9 = vadd.f32 %v18457_v20, %v10661_v51 }
 0x5b3   :  { %v10874_v26 = vpop.f32.mrf.mxu1  ;;  %v10558_v2 = vadd.f32 %v18458_v0, %v17064_v38  ;;  %v10669_v58 = vadd.f32 %v17203_v54, %v10556_v33 }
 0x5b4   :  { %v10875_v52 = vadd.f32 %v10874_v26, %v10762_v53  ;;  %11965 = vmatprep.mubr.bf16.mxu1 %v11066_v24  ;;  %v10986_v44 = vmax.f32 %v10873_v49, 0.0 }
 0x5b5   :  { %v10876_v6 = vpop.f32.mrf.mxu1  ;;  %11966 = vmatmul.mubr.bf16.gmra.mxu1 %v11065_v22  ;;  %v17324_v22 = vpop.f32.mrf.mxu0  ;;  %v10671_v30 = vadd.f32 %v18459_v57, %v10558_v2 }
 0x5b6   :  { %v10877_v47 = vadd.f32 %v10876_v6, %v10764_v16  ;;  %v10993_v18 = vmax.f32 %v10875_v52, 0.0  ;;  %v18461_v16 = vld [vmem:[#allocation81_spill] sm:$0xff]  ;;  %v18462_v6 = vld [vmem:[#allocation34_spill] sm:$0xff] }
 0x5b7   :  { %v10880_v25 = vpop.f32.mrf.mxu1  ;;  %v10780_v61 = vadd.f32 %v18461_v16, %v18460_v19  ;;  %v10782_v4 = vadd.f32 %v18462_v6, %v10669_v58  ;;  %v17330_v38 = vpop.f32.mrf.mxu0  ;;  %v10784_v15 = vadd.f32 %v17228_v27, %v10671_v30 }
 0x5b8   :  { %v10994_v29 = vmax.f32 %v10877_v47, 0.0  ;;  %v11073_v40 = vpack.c.bf16 %v10993_v18, %v10985_v59  ;;  %v10881_v24 = vadd.f32 %v10880_v25, %v10768_v23 }
 0x5b9   :  { %v10882_v50 = vpop.f32.mrf.mxu1  ;;  %v17335_v59 = vpop.f32.mrf.mxu0 }
 0x5ba   :  { %v11074_v55 = vpack.c.bf16 %v10994_v29, %v10986_v44  ;;  %v10883_v46 = vadd.f32 %v10882_v50, %v10770_v43  ;;  %v11001_v48 = vmax.f32 %v10881_v24, 0.0 }
 0x5bb   :  { %v10884_v12 = vpop.f32.mrf.mxu1  ;;  %v17337_v39 = vpop.f32.mrf.mxu0 }
 0x5bc   :  { %v10885_v7 = vadd.f32 %v10884_v12, %v10772_v35  ;;  %11973 = vmatprep.mubr.bf16.mxu1 %v11074_v55  ;;  %v11002_v26 = vmax.f32 %v10883_v46, 0.0 }
 0x5bd   :  { %v10886_v56 = vpop.f32.mrf.mxu1  ;;  %11974 = vmatmul.mubr.bf16.gmra.mxu1 %v11073_v40  ;;  %v17339_v40 = vpop.f32.mrf.mxu0 }
 0x5be   :  { %v10887_v53 = vadd.f32 %v10886_v56, %v10774_v9  ;;  %v11009_v14 = vmax.f32 %v10885_v7, 0.0 }
 0x5bf   :  { %v10890_v41 = vpop.f32.mrf.mxu1  ;;  %v17341_v45 = vpop.f32.mrf.mxu0 }
 0x5c0   :  { %v11010_v17 = vmax.f32 %v10887_v53, 0.0  ;;  %v11081_v54 = vpack.c.bf16 %v11009_v14, %v11001_v48  ;;  %v10891_v51 = vadd.f32 %v10890_v41, %v10778_v31 }
 0x5c1   :  { %v10892_v49 = vpop.f32.mrf.mxu1  ;;  %v17343_v27 = vpop.f32.mrf.mxu0 }
 0x5c2   :  { %v11082_v52 = vpack.c.bf16 %v11010_v17, %v11002_v26  ;;  %v10893_v18 = vadd.f32 %v10892_v49, %v10780_v61  ;;  %v11017_v11 = vmax.f32 %v10891_v51, 0.0 }
 0x5c3   :  { %v10894_v47 = vpop.f32.mrf.mxu1  ;;  %v17347_v23 = vpop.f32.mrf.mxu0 }
 0x5c4   :  { %v10895_v25 = vadd.f32 %v10894_v47, %v10782_v4  ;;  %11981 = vmatprep.mubr.bf16.mxu1 %v11082_v52  ;;  %v11018_v55 = vmax.f32 %v10893_v18, 0.0  ;;  %18465 = vst [vmem:[#allocation91_spill] sm:$0xff] %v17347_v23 }
 0x5c5   :  { %v10896_v44 = vpop.f32.mrf.mxu1  ;;  %11982 = vmatmul.mubr.bf16.gmra.mxu1 %v11081_v54  ;;  %v17349_v63 = vpop.f32.mrf.mxu0 }
 0x5c6   :  { %v10897_v29 = vadd.f32 %v10896_v44, %v10784_v15  ;;  %v11025_v50 = vmax.f32 %v10895_v25, 0.0  ;;  %18466 = vst [vmem:[#allocation90_spill] sm:$0xff] %v17349_v63 }
 0x5c7   :  { %v17345_v62 = vpop.f32.mrf.mxu1  ;;  %v17353_v46 = vpop.f32.mrf.mxu0 }
 0x5c8   :  { %v11026_v21 = vmax.f32 %v10897_v29, 0.0  ;;  %v11089_v35 = vpack.c.bf16 %v11025_v50, %v11017_v11  ;;  %18467 = vst [vmem:[#allocation33_spill] sm:$0xff] %v17353_v46 }
 0x5c9   :  { %v13407_v12 = vpop.f32.mrf.mxu1  ;;  %v17357_v20 = vpop.f32.mrf.mxu0 }
 0x5ca   :  { %v11090_v43 = vpack.c.bf16 %v11026_v21, %v11018_v55  ;;  %18468 = vst [vmem:[#allocation31_spill] sm:$0xff] %v17357_v20 }
 0x5cb   :  { %v17351_v33 = vpop.f32.mrf.mxu1  ;;  %v17361_v24 = vpop.f32.mrf.mxu0 }
 0x5cc   :  { %11989 = vmatprep.mubr.bf16.mxu1 %v11090_v43  ;;  %18469 = vst [vmem:[#allocation94_spill] sm:$0xff] %v17361_v24 }
 0x5cd   :  { %11990 = vmatmul.mubr.bf16.gmra.mxu1 %v11089_v35  ;;  %v17355_v7 = vpop.f32.mrf.mxu1  ;;  %v17365_v0 = vpop.f32.mrf.mxu0 }
 0x5ce   :  { %18470 = vst [vmem:[#allocation92_spill] sm:$0xff] %v17365_v0 }
 0x5cf   :  { %v17359_v9 = vpop.f32.mrf.mxu1  ;;  %v17369_v58 = vpop.f32.mrf.mxu0 }
 0x5d0   :  { %18471 = vst [vmem:[#allocation93_spill] sm:$0xff] %v17369_v58 }
 0x5d1   :  { %v17363_v56 = vpop.f32.mrf.mxu1  ;;  %v17373_v14 = vpop.f32.mrf.mxu0 }
 0x5d2   :  { %18472 = vst [vmem:[#allocation40_spill] sm:$0xff] %v17373_v14 }
 0x5d3   :  { %v17367_v2 = vpop.f32.mrf.mxu1  ;;  %v17377_v57 = vpop.f32.mrf.mxu0 }
 0x5d4   :  { %18473 = vst [vmem:[#allocation62_spill] sm:$0xff] %v17377_v57 }
 0x5d5   :  { %v17371_v53 = vpop.f32.mrf.mxu1  ;;  %v17381_v26 = vpop.f32.mrf.mxu0 }
 0x5d6   :  { %18474 = vst [vmem:[#allocation96_spill] sm:$0xff] %v17381_v26 }
 0x5d7   :  { %v17375_v41 = vpop.f32.mrf.mxu1  ;;  %v17385_v48 = vpop.f32.mrf.mxu0 }
 0x5d8   :  { %18475 = vst [vmem:[#allocation65_spill] sm:$0xff] %v17385_v48 }
 0x5d9   :  { %v17379_v30 = vpop.f32.mrf.mxu1  ;;  %v17389_v52 = vpop.f32.mrf.mxu0 }
 0x5da   :  { %18476 = vst [vmem:[#allocation36_spill] sm:$0xff] %v17389_v52 }
 0x5db   :  { %v17383_v17 = vpop.f32.mrf.mxu1  ;;  %v17393_v16 = vpop.f32.mrf.mxu0 }
 0x5dc   :  { %18477 = vst [vmem:[#allocation39_spill] sm:$0xff] %v17393_v16 }
 0x5dd   :  { %v17387_v49 = vpop.f32.mrf.mxu1  ;;  %v17397_v6 = vpop.f32.mrf.mxu0 }
 0x5de   :  { %18478 = vst [vmem:[#allocation61_spill] sm:$0xff] %v17397_v6 }
 0x5df   :  { %v17391_v19 = vpop.f32.mrf.mxu1  ;;  %v13470_v54 = vpop.f32.mrf.mxu0 }
 0x5e1   :  { %v17395_v61 = vpop.f32.mrf.mxu1  ;;  %v13471_v32 = vpop.f32.mrf.mxu0 }
 0x5e3   :  { %v17399_v4 = vpop.f32.mrf.mxu1  ;;  %v13473_v47 = vpop.f32.mrf.mxu0 }
 0x5e5   :  { %v17401_v13 = vpop.f32.mrf.mxu1  ;;  %v13474_v25 = vpop.f32.mrf.mxu0 }
 0x5e6   :  { %v13475_v23 = vadd.f32 %v13474_v25, %v13473_v47 }
 0x5e7   :  { %v17403_v31 = vpop.f32.mrf.mxu1  ;;  %v13476_v51 = vpop.f32.mrf.mxu0 }
 0x5e9   :  { %v17405_v18 = vpop.f32.mrf.mxu1  ;;  %v13477_v29 = vpop.f32.mrf.mxu0 }
 0x5eb   :  { %v17407_v15 = vpop.f32.mrf.mxu1  ;;  %v17413_v55 = vpop.f32.mrf.mxu0 }
 0x5ec   :  { %18479 = vst [vmem:[#allocation30_spill] sm:$0xff] %v17407_v15  ;;  %v18494_v15 = vlaneseq }
 0x5ed   :  { %v17409_v44 = vpop.f32.mrf.mxu1  ;;  %v13480_v11 = vpop.f32.mrf.mxu0 }
 0x5ee   :  { %18480 = vst [vmem:[#allocation42_spill] sm:$0xff] %v17409_v44  ;;  %v13472_v44 = vadd.f32 %v13471_v32, %v13470_v54  ;;  %v17464_v63 = vand.u32 127, %v18494_v15  ;;  %v13478_v15 = vadd.f32 %v13477_v29, %v13476_v51  ;;  %v13481_v29 = vadd.f32 %v13480_v11, %v17413_v55 }
 0x5ef   :  { %v17411_v50 = vpop.f32.mrf.mxu1  ;;  %v17419_v35 = vpop.f32.mrf.mxu0  ;;  %v13359_v55 = vadd.f32 %v17324_v22, %v17314_v5  ;;  %v13423_v5 = vadd.f32 %v17387_v49, %v17383_v17 }
 0x5f0   :  { %18481 = vst [vmem:[#allocation64_spill] sm:$0xff] %v17411_v50  ;;  %vm12000_vm0 = vcmp.lt.s32.totalorder %v17464_v63, 8 }
 0x5f1   :  { %v17415_v21 = vpop.f32.mrf.mxu1  ;;  %v17423_v16 = vpop.f32.mrf.mxu0 }
 0x5f2   :  { %18482 = vst [vmem:[#allocation97_spill] sm:$0xff] %v17415_v21 }
 0x5f3   :  { %v17417_v43 = vpop.f32.mrf.mxu1  ;;  %v17427_v48 = vpop.f32.mrf.mxu0 }
 0x5f4   :  { %18483 = vst [vmem:[#allocation56_spill] sm:$0xff] %v17417_v43 }
 0x5f5   :  { %v17421_v6 = vpop.f32.mrf.mxu1  ;;  %v17431_v57 = vpop.f32.mrf.mxu0 }
 0x5f6   :  { %18484 = vst [vmem:[#allocation35_spill] sm:$0xff] %v17421_v6 }
 0x5f7   :  { %v17425_v52 = vpop.f32.mrf.mxu1  ;;  %v17435_v58 = vpop.f32.mrf.mxu0 }
 0x5f8   :  { %18485 = vst [vmem:[#allocation41_spill] sm:$0xff] %v17425_v52 }
 0x5f9   :  { %v17429_v26 = vpop.f32.mrf.mxu1  ;;  %v17439_v43 = vpop.f32.mrf.mxu0 }
 0x5fa   :  { %18486 = vst [vmem:[#allocation60_spill] sm:$0xff] %v17429_v26  ;;  %v13344_v26 = vadd.f32 %v17244_v37, %v17236_v42 }
 0x5fb   :  { %v17433_v14 = vpop.f32.mrf.mxu1  ;;  %v17443_v6 = vpop.f32.mrf.mxu0 }
 0x5fc   :  { %18487 = vst [vmem:[#allocation28_spill] sm:$0xff] %v17433_v14  ;;  %v17453_v14 = vld [vmem:[#allocation14] ss:$0 sm:$0xff] }
 0x5fd   :  { %v17437_v0 = vpop.f32.mrf.mxu1  ;;  %v17447_v52 = vpop.f32.mrf.mxu0 }
 0x5fe   :  { %18488 = vst [vmem:[#allocation44_spill] sm:$0xff] %v17437_v0  ;;  %v13408_v0 = vadd.f32 %v13407_v12, %v17345_v62  ;;  %v13350_v62 = vadd.f32 %v17276_v36, %v17268_v10  ;;  %v13353_v10 = vadd.f32 %v17292_v8, %v17282_v60  ;;  %v13356_v8 = vadd.f32 %v17308_v34, %v17298_v3 }
 0x5ff   :  { %v17441_v24 = vpop.f32.mrf.mxu1  ;;  %v17455_v20 = vpop.f32.mrf.mxu0 }
 0x600   :  { %18489 = vst [vmem:[#allocation79_spill] sm:$0xff] %v17441_v24  ;;  %18492 = vst [vmem:[#allocation37_spill] sm:$0xff] %v17455_v20  ;;  %v11645_v24 = vadd.f32 %v13344_v26, %v17453_v14  ;;  %v13411_v20 = vadd.f32 %v17355_v7, %v17351_v33  ;;  %v11653_v33 = vadd.f32 %v13350_v62, %v17453_v14 }
 0x601   :  { %v17445_v21 = vpop.f32.mrf.mxu1  ;;  %v11656_v60 = vadd.f32 %v13353_v10, %v17453_v14  ;;  %v11661_v34 = vadd.f32 %v13356_v8, %v17453_v14 }
 0x602   :  { %18490 = vst [vmem:[#allocation38_spill] sm:$0xff] %v17445_v21  ;;  %v13347_v21 = vadd.f32 %v17260_v28, %v17252_v1  ;;  %v11742_v37 = vadd.f32 %v13408_v0, %v11645_v24  ;;  %v13414_v24 = vadd.f32 %v17363_v56, %v17359_v9  ;;  %v13417_v9 = vadd.f32 %v17371_v53, %v17367_v2 }
 0x603   :  { %v17449_v50 = vpop.f32.mrf.mxu1  ;;  %v13420_v53 = vadd.f32 %v17379_v30, %v17375_v41 }
 0x604   :  { %18491 = vst [vmem:[#allocation55_spill] sm:$0xff] %v17449_v50  ;;  %v17466_v50 = vpop.f32.mrf.mxu0  ;;  %v11648_v26 = vadd.f32 %v13347_v21, %v17453_v14  ;;  %v11753_v2 = vadd.f32 %v13417_v9, %v11656_v60 }
 0x605   :  { %v17458_v46 = vpop.f32.mrf.mxu1  ;;  %v11758_v30 = vadd.f32 %v13420_v53, %v11661_v34 }
 0x606   :  { %18493 = vst [vmem:[#allocation29_spill] sm:$0xff] %v17458_v46  ;;  %v11839_v46 = vadd.f32 %v13472_v44, %v11742_v37  ;;  %v17474_v28 = vpop.f32.mrf.mxu0  ;;  %v11745_v32 = vadd.f32 %v13411_v20, %v11648_v26  ;;  %v13484_v26 = vadd.f32 %v17423_v16, %v17419_v35  ;;  %v13362_v16 = vadd.f32 %v17335_v59, %v17330_v38 }
 0x607   :  { %v13426_v38 = vadd.f32 %v17395_v61, %v17391_v19  ;;  %v18497_v34 = vld [vmem:[#allocation37_spill] sm:$0xff] }
 0x608   :  { %v11842_v7 = vadd.f32 %v13475_v23, %v11745_v32  ;;  %v17485_v44 = vpop.f32.mrf.mxu0 }
 0x60a   :  { %v17498_v37 = vpop.f32.mrf.mxu0 }
 0x60c   :  { %v17512_v32 = vpop.f32.mrf.mxu0 }
 0x655   :  { %v13534_v42 = vpop.f32.mrf.mxu1 }
 0x657   :  { %v13535_v12 = vpop.f32.mrf.mxu1 }
 0x658   :  { %v13536_v1 = vadd.f32 %v13535_v12, %v13534_v42  ;;  %v11850_v12 = vadd.f32 %v13481_v29, %v11753_v2  ;;  %v18495_v2 = vld [vmem:[#allocation91_spill] sm:$0xff] }
 0x659   :  { %v13537_v54 = vpop.f32.mrf.mxu1 }
 0x65a   :  { %v11936_v0 = vadd.f32 %v13536_v1, %v11839_v46  ;;  %v11750_v46 = vadd.f32 %v13414_v24, %v11653_v33  ;;  %v11664_v24 = vadd.f32 %v13359_v55, %v17453_v14  ;;  %v13487_v33 = vadd.f32 %v17431_v57, %v17427_v48 }
 0x65b   :  { %v13538_v36 = vpop.f32.mrf.mxu1  ;;  %v13365_v57 = vadd.f32 %v17339_v40, %v17337_v39  ;;  %v13429_v39 = vadd.f32 %v17401_v13, %v17399_v4  ;;  %v13496_v55 = vadd.f32 %v17466_v50, %v18497_v34 }
 0x65c   :  { %v13539_v47 = vadd.f32 %v13538_v36, %v13537_v54  ;;  %v17483_v25 = vsel %vm12000_vm0, %v11936_v0, -1e+30  ;;  %12177 = vst [vmem:[#allocation15] sm:$0xff] %v11936_v0  ;;  %v11847_v51 = vadd.f32 %v13478_v15, %v11750_v46  ;;  %v11855_v0 = vadd.f32 %v13484_v26, %v11758_v30 }
 0x65d   :  { %v13540_v20 = vpop.f32.mrf.mxu1  ;;  %12017 = vmax.xlane.f32.xlu0 %v17483_v25  ;;  %v11761_v49 = vadd.f32 %v13423_v5, %v11664_v24  ;;  %v11669_v15 = vadd.f32 %v13362_v16, %v17453_v14  ;;  %v11672_v60 = vadd.f32 %v13365_v57, %v17453_v14  ;;  %v18500_v24 = vld [vmem:[#allocation33_spill] sm:$0xff]  ;;  %v18501_v16 = vld [vmem:[#allocation31_spill] sm:$0xff] }
 0x65e   :  { %v11939_v56 = vadd.f32 %v13539_v47, %v11842_v7  ;;  %v17526_v7 = vpop.f32.mrf.mxu0  ;;  %v13374_v50 = vadd.f32 %v18501_v16, %v18500_v24  ;;  %v18503_v57 = vld [vmem:[#allocation97_spill] sm:$0xff] }
 0x65f   :  { %v13541_v23 = vpop.f32.mrf.mxu1  ;;  %v11858_v47 = vadd.f32 %v13487_v33, %v11761_v49  ;;  %v11766_v61 = vadd.f32 %v13426_v38, %v11669_v15  ;;  %v11769_v13 = vadd.f32 %v13429_v39, %v11672_v60  ;;  %v13499_v33 = vadd.f32 %v17485_v44, %v17474_v28  ;;  %v18502_v15 = vld [vmem:[#allocation64_spill] sm:$0xff] }
 0x660   :  { %v13542_v21 = vadd.f32 %v13541_v23, %v13540_v20  ;;  %v17496_v42 = vsel %vm12000_vm0, %v11939_v56, -1e+30  ;;  %12178 = vst [vmem:[#allocation15 + $0x8] sm:$0xff] %v11939_v56  ;;  %v13490_v20 = vadd.f32 %v17439_v43, %v17435_v58  ;;  %v17540_v56 = vpop.f32.mrf.mxu0  ;;  %v13368_v58 = vadd.f32 %v17343_v27, %v17341_v45 }
 0x661   :  { %v13543_v62 = vpop.f32.mrf.mxu1  ;;  %12019 = vmax.xlane.f32.xlu0 %v17496_v42  ;;  %v13493_v23 = vadd.f32 %v17447_v52, %v17443_v6  ;;  %v13432_v45 = vadd.f32 %v17405_v18, %v17403_v31  ;;  %v18496_v52 = vld [vmem:[#allocation90_spill] sm:$0xff]  ;;  %v13502_v39 = vadd.f32 %v17512_v32, %v17498_v37 }
 0x662   :  { %v11944_v3 = vadd.f32 %v13542_v21, %v11847_v51  ;;  %v11863_v8 = vadd.f32 %v13490_v20, %v11766_v61  ;;  %v17554_v21 = vpop.f32.mrf.mxu0  ;;  %v13371_v6 = vadd.f32 %v18496_v52, %v18495_v2  ;;  %v18498_v18 = vld [vmem:[#allocation30_spill] sm:$0xff]  ;;  %v11685_v20 = vadd.f32 %v13374_v50, %v17453_v14 }
 0x663   :  { %v13544_v11 = vpop.f32.mrf.mxu1  ;;  %v13505_v52 = vadd.f32 %v17540_v56, %v17526_v7 }
 0x664   :  { %v13545_v1 = vadd.f32 %v13544_v11, %v13543_v62  ;;  %v17510_v54 = vsel %vm12000_vm0, %v11944_v3, -1e+30  ;;  %12179 = vst [vmem:[#allocation15 + $0x10] sm:$0xff] %v11944_v3  ;;  %v11677_v62 = vadd.f32 %v13368_v58, %v17453_v14  ;;  %v11866_v3 = vadd.f32 %v13493_v23, %v11769_v13  ;;  %v13507_v26 = vpop.f32.mrf.mxu0  ;;  %v18506_v23 = vld [vmem:[#allocation56_spill] sm:$0xff] }
 0x665   :  { %v13546_v41 = vpop.f32.mrf.mxu1  ;;  %12021 = vmax.xlane.f32.xlu1 %v17510_v54  ;;  %v13508_v24 = vadd.f32 %v13507_v26, %v17554_v21 }
 0x666   :  { %v11947_v22 = vadd.f32 %v13545_v1, %v11850_v12  ;;  %v11774_v31 = vadd.f32 %v13432_v45, %v11677_v62  ;;  %v13509_v49 = vpop.f32.mrf.mxu0  ;;  %v18509_v62 = vld [vmem:[#allocation40_spill] sm:$0xff] }
 0x667   :  { %v13547_v35 = vpop.f32.mrf.mxu1 }
 0x668   :  { %v13548_v10 = vadd.f32 %v13547_v35, %v13546_v41  ;;  %v17524_v36 = vsel %vm12000_vm0, %v11947_v22, -1e+30  ;;  %12180 = vst [vmem:[#allocation15 + $0x18] sm:$0xff] %v11947_v22  ;;  %v18499_v41 = vld [vmem:[#allocation42_spill] sm:$0xff]  ;;  %v11680_v22 = vadd.f32 %v13371_v6, %v17453_v14  ;;  %v13510_v58 = vpop.f32.mrf.mxu0 }
 0x669   :  { %v13549_v17 = vpop.f32.mrf.mxu1  ;;  %12023 = vmax.xlane.f32.xlu1 %v17524_v36  ;;  %v13435_v30 = vadd.f32 %v18499_v41, %v18498_v18 }
 0x66a   :  { %v11952_v59 = vadd.f32 %v13548_v10, %v11855_v0  ;;  %v11871_v0 = vadd.f32 %v13496_v55, %v11774_v31 }
 0x66b   :  { %v13550_v48 = vpop.f32.mrf.mxu1 }
 0x66c   :  { %v13551_v46 = vadd.f32 %v13550_v48, %v13549_v17  ;;  %v17538_v9 = vsel %vm12000_vm0, %v11952_v59, -1e+30  ;;  %12181 = vst [vmem:[#allocation15 + $0x20] sm:$0xff] %v11952_v59  ;;  %v11777_v59 = vadd.f32 %v13435_v30, %v11680_v22  ;;  %v13438_v48 = vadd.f32 %v18503_v57, %v18502_v15  ;;  %v18512_v30 = vld [vmem:[#allocation62_spill] sm:$0xff] }
 0x66d   :  { %v13552_v19 = vpop.f32.mrf.mxu1  ;;  %12025 = vmax.xlane.f32.xlu0 %v17538_v9 }
 0x66e   :  { %v11955_v40 = vadd.f32 %v13551_v46, %v11858_v47  ;;  %v18504_v46 = vld [vmem:[#allocation94_spill] sm:$0xff]  ;;  %v11874_v61 = vadd.f32 %v13499_v33, %v11777_v59 }
 0x66f   :  { %v13553_v43 = vpop.f32.mrf.mxu1 }
 0x670   :  { %v13554_v51 = vadd.f32 %v13553_v43, %v13552_v19  ;;  %v17552_v29 = vsel %vm12000_vm0, %v11955_v40, -1e+30  ;;  %12182 = vst [vmem:[#allocation15 + $0x28] sm:$0xff] %v11955_v40  ;;  %v18505_v19 = vld [vmem:[#allocation92_spill] sm:$0xff] }
 0x671   :  { %v13555_v4 = vpop.f32.mrf.mxu1  ;;  %12027 = vmax.xlane.f32.xlu1 %v17552_v29  ;;  %v13377_v28 = vadd.f32 %v18505_v19, %v18504_v46  ;;  %v13511_v46 = vadd.f32 %v13510_v58, %v13509_v49 }
 0x672   :  { %v11960_v27 = vadd.f32 %v13554_v51, %v11863_v8  ;;  %v11782_v8 = vadd.f32 %v13438_v48, %v11685_v20  ;;  %v18507_v51 = vld [vmem:[#allocation35_spill] sm:$0xff]  ;;  %v18516_v48 = vld [vmem:[#allocation65_spill] sm:$0xff] }
 0x673   :  { %v13556_v53 = vpop.f32.mrf.mxu1  ;;  %v11688_v45 = vadd.f32 %v13377_v28, %v17453_v14 }
 0x674   :  { %v13557_v11 = vadd.f32 %v13556_v53, %v13555_v4  ;;  %v17566_v12 = vsel %vm12000_vm0, %v11960_v27, -1e+30  ;;  %12183 = vst [vmem:[#allocation15 + $0x30] sm:$0xff] %v11960_v27  ;;  %v13441_v4 = vadd.f32 %v18507_v51, %v18506_v23  ;;  %v18508_v27 = vld [vmem:[#allocation93_spill] sm:$0xff]  ;;  %v11879_v2 = vadd.f32 %v13502_v39, %v11782_v8 }
 0x675   :  { %v13558_v1 = vpop.f32.mrf.mxu1  ;;  %12029 = vmax.xlane.f32.xlu0 %v17566_v12  ;;  %v13380_v37 = vadd.f32 %v18509_v62, %v18508_v27 }
 0x676   :  { %v11963_v5 = vadd.f32 %v13557_v11, %v11866_v3  ;;  %v13512_v3 = vpop.f32.mrf.mxu0  ;;  %v11785_v55 = vadd.f32 %v13441_v4, %v11688_v45  ;;  %v18510_v11 = vld [vmem:[#allocation41_spill] sm:$0xff]  ;;  %v18520_v4 = vld [vmem:[#allocation39_spill] sm:$0xff] }
 0x677   :  { %v13559_v35 = vpop.f32.mrf.mxu1  ;;  %v11693_v41 = vadd.f32 %v13380_v37, %v17453_v14 }
 0x678   :  { %v13560_v10 = vadd.f32 %v13559_v35, %v13558_v1  ;;  %v17578_v17 = vsel %vm12000_vm0, %v11963_v5, -1e+30  ;;  %12184 = vst [vmem:[#allocation15 + $0x38] sm:$0xff] %v11963_v5  ;;  %v18511_v1 = vld [vmem:[#allocation60_spill] sm:$0xff]  ;;  %v11882_v22 = vadd.f32 %v13505_v52, %v11785_v55  ;;  %v13513_v35 = vpop.f32.mrf.mxu0 }
 0x679   :  { %v13561_v38 = vpop.f32.mrf.mxu1  ;;  %12031 = vmax.xlane.f32.xlu1 %v17578_v17  ;;  %v13444_v31 = vadd.f32 %v18511_v1, %v18510_v11  ;;  %v18513_v5 = vld [vmem:[#allocation96_spill] sm:$0xff]  ;;  %v13514_v27 = vadd.f32 %v13513_v35, %v13512_v3 }
 0x67a   :  { %v11968_v47 = vadd.f32 %v13560_v10, %v11871_v0  ;;  %v13383_v7 = vadd.f32 %v18513_v5, %v18512_v30  ;;  %v18514_v10 = vld [vmem:[#allocation28_spill] sm:$0xff] }
 0x67b   :  { %v13562_v44 = vpop.f32.mrf.mxu1  ;;  %v11790_v33 = vadd.f32 %v13444_v31, %v11693_v41 }
 0x67c   :  { %v13563_v40 = vadd.f32 %v13562_v44, %v13561_v38  ;;  %v17590_v60 = vsel %vm12000_vm0, %v11968_v47, -1e+30  ;;  %12185 = vst [vmem:[#allocation15 + $0x40] sm:$0xff] %v11968_v47  ;;  %v18515_v38 = vld [vmem:[#allocation44_spill] sm:$0xff]  ;;  %v11696_v57 = vadd.f32 %v13383_v7, %v17453_v14  ;;  %v13515_v44 = vpop.f32.mrf.mxu0 }
 0x67d   :  { %v13564_v43 = vpop.f32.mrf.mxu1  ;;  %12033 = vmax.xlane.f32.xlu0 %v17590_v60  ;;  %v13447_v59 = vadd.f32 %v18515_v38, %v18514_v10  ;;  %v18517_v47 = vld [vmem:[#allocation36_spill] sm:$0xff]  ;;  %v11887_v20 = vadd.f32 %v13508_v24, %v11790_v33 }
 0x67e   :  { %v11971_v13 = vadd.f32 %v13563_v40, %v11874_v61  ;;  %v13386_v21 = vadd.f32 %v18517_v47, %v18516_v48  ;;  %v18518_v40 = vld [vmem:[#allocation79_spill] sm:$0xff] }
 0x67f   :  { %v13565_v32 = vpop.f32.mrf.mxu1  ;;  %v11793_v39 = vadd.f32 %v13447_v59, %v11696_v57 }
 0x680   :  { %v13566_v6 = vadd.f32 %v13565_v32, %v13564_v43  ;;  %v17602_v53 = vsel %vm12000_vm0, %v11971_v13, -1e+30  ;;  %12186 = vst [vmem:[#allocation15 + $0x48] sm:$0xff] %v11971_v13  ;;  %v18519_v43 = vld [vmem:[#allocation38_spill] sm:$0xff]  ;;  %v11701_v51 = vadd.f32 %v13386_v21, %v17453_v14  ;;  %v18521_v13 = vld [vmem:[#allocation61_spill] sm:$0xff]  ;;  %v13516_v32 = vpop.f32.mrf.mxu0 }
 0x681   :  { %v13567_v34 = vpop.f32.mrf.mxu1  ;;  %12035 = vmax.xlane.f32.xlu1 %v17602_v53  ;;  %v13450_v8 = vadd.f32 %v18519_v43, %v18518_v40  ;;  %v13389_v49 = vadd.f32 %v18521_v13, %v18520_v4  ;;  %v11890_v45 = vadd.f32 %v13511_v46, %v11793_v39  ;;  %v13517_v3 = vadd.f32 %v13516_v32, %v13515_v44 }
 0x682   :  { %v11976_v18 = vadd.f32 %v13566_v6, %v11879_v2  ;;  %v18522_v6 = vld [vmem:[#allocation55_spill] sm:$0xff] }
 0x683   :  { %v13568_v56 = vpop.f32.mrf.mxu1  ;;  %v11798_v52 = vadd.f32 %v13450_v8, %v11701_v51  ;;  %v11704_v1 = vadd.f32 %v13389_v49, %v17453_v14 }
 0x684   :  { %v13569_v16 = vadd.f32 %v13568_v56, %v13567_v34  ;;  %v17613_v50 = vsel %vm12000_vm0, %v11976_v18, -1e+30  ;;  %12187 = vst [vmem:[#allocation15 + $0x50] sm:$0xff] %v11976_v18  ;;  %v18523_v34 = vld [vmem:[#allocation29_spill] sm:$0xff] }
 0x685   :  { %v13570_v0 = vpop.f32.mrf.mxu1  ;;  %12037 = vmax.xlane.f32.xlu0 %v17613_v50  ;;  %v13453_v55 = vadd.f32 %v18523_v34, %v18522_v6  ;;  %v11895_v18 = vadd.f32 %v13514_v27, %v11798_v52 }
 0x686   :  { %v11979_v15 = vadd.f32 %v13569_v16, %v11882_v22 }
 0x687   :  { %v13571_v26 = vpop.f32.mrf.mxu1  ;;  %v11801_v7 = vadd.f32 %v13453_v55, %v11704_v1 }
 0x688   :  { %v13572_v19 = vadd.f32 %v13571_v26, %v13570_v0  ;;  %v17623_v28 = vsel %vm12000_vm0, %v11979_v15, -1e+30  ;;  %12188 = vst [vmem:[#allocation15 + $0x58] sm:$0xff] %v11979_v15 }
 0x689   :  { %v13573_v61 = vpop.f32.mrf.mxu1  ;;  %12039 = vmax.xlane.f32.xlu1 %v17623_v28  ;;  %v11898_v24 = vadd.f32 %v13517_v3, %v11801_v7 }
 0x68a   :  { %v11984_v23 = vadd.f32 %v13572_v19, %v11887_v20 }
 0x68b   :  { %v13574_v58 = vpop.f32.mrf.mxu1 }
 0x68c   :  { %v13575_v62 = vadd.f32 %v13574_v58, %v13573_v61  ;;  %v17633_v37 = vsel %vm12000_vm0, %v11984_v23, -1e+30  ;;  %12189 = vst [vmem:[#allocation15 + $0x60] sm:$0xff] %v11984_v23 }
 0x68d   :  { %v13576_v2 = vpop.f32.mrf.mxu1  ;;  %12041 = vmax.xlane.f32.xlu0 %v17633_v37 }
 0x68e   :  { %v11987_v11 = vadd.f32 %v13575_v62, %v11890_v45 }
 0x68f   :  { %v13577_v31 = vpop.f32.mrf.mxu1 }
 0x690   :  { %v13578_v41 = vadd.f32 %v13577_v31, %v13576_v2  ;;  %v17641_v30 = vsel %vm12000_vm0, %v11987_v11, -1e+30  ;;  %12190 = vst [vmem:[#allocation15 + $0x68] sm:$0xff] %v11987_v11 }
 0x691   :  { %v13579_v5 = vpop.f32.mrf.mxu1  ;;  %12043 = vmax.xlane.f32.xlu1 %v17641_v30 }
 0x692   :  { %v11992_v56 = vadd.f32 %v13578_v41, %v11895_v18 }
 0x693   :  { %v13580_v22 = vpop.f32.mrf.mxu1 }
 0x694   :  { %v13581_v16 = vadd.f32 %v13580_v22, %v13579_v5  ;;  %v17646_v14 = vsel %vm12000_vm0, %v11992_v56, -1e+30  ;;  %12191 = vst [vmem:[#allocation15 + $0x70] sm:$0xff] %v11992_v56 }
 0x695   :  { %12045 = vmax.xlane.f32.xlu0 %v17646_v14 }
 0x696   :  { %v11995_v35 = vadd.f32 %v13581_v16, %v11898_v24 }
 0x698   :  { %v17651_v0 = vsel %vm12000_vm0, %v11995_v35, -1e+30  ;;  %12192 = vst [vmem:[#allocation15 + $0x78] sm:$0xff] %v11995_v35 }
 0x699   :  { %12047 = vmax.xlane.f32.xlu1 %v17651_v0 }
 0x6e6   :  { %v12018_v33 = vpop.xlane.xlu0 %12017 }
 0x6e7   :  { %v12049_v10 = vsub.f32 %v17483_v25, %v12018_v33 }
 0x6e9   :  { %v12065_v38 = vmul.f32 1.442695, %v12049_v10 }
 0x6ea   :  { %v12020_v59 = vpop.xlane.xlu0 %12019 }
 0x6eb   :  { %13744 = vpow2.f32 %v12065_v38  ;;  %v12050_v15 = vsub.f32 %v17496_v42, %v12020_v59 }
 0x6ed   :  { %v12067_v57 = vmul.f32 1.442695, %v12050_v15 }
 0x6ee   :  { %v12022_v48 = vpop.xlane.xlu1 %12021 }
 0x6ef   :  { %13746 = vpow2.f32 %v12067_v57  ;;  %v12051_v47 = vsub.f32 %v17510_v54, %v12022_v48 }
 0x6f1   :  { %v12069_v21 = vmul.f32 1.442695, %v12051_v47 }
 0x6f2   :  { %v12024_v26 = vpop.xlane.xlu1 %12023 }
 0x6f3   :  { %13748 = vpow2.f32 %v12069_v21  ;;  %v12052_v20 = vsub.f32 %v17524_v36, %v12024_v26 }
 0x6f5   :  { %v12071_v46 = vmul.f32 1.442695, %v12052_v20 }
 0x6f6   :  { %v12026_v19 = vpop.xlane.xlu0 %12025 }
 0x6f7   :  { %13750 = vpow2.f32 %v12071_v46  ;;  %v12053_v25 = vsub.f32 %v17538_v9, %v12026_v19 }
 0x6f8   :  { %v13745_v44 = vpop.eup %13744 }
 0x6f9   :  { %v12073_v61 = vmul.f32 1.442695, %v12053_v25  ;;  %v17661_v42 = vsel %vm12000_vm0, %v13745_v44, 0.0 }
 0x6fa   :  { %v12028_v39 = vpop.xlane.xlu1 %12027  ;;  %12113 = vadd.xlane.f32.xlu0 %v17661_v42 }
 0x6fb   :  { %13752 = vpow2.f32 %v12073_v61  ;;  %v12054_v54 = vsub.f32 %v17552_v29, %v12028_v39 }
 0x6fc   :  { %v13747_v40 = vpop.eup %13746 }
 0x6fd   :  { %v12075_v43 = vmul.f32 1.442695, %v12054_v54  ;;  %v17667_v36 = vsel %vm12000_vm0, %v13747_v40, 0.0 }
 0x6fe   :  { %v12030_v8 = vpop.xlane.xlu0 %12029  ;;  %12115 = vadd.xlane.f32.xlu1 %v17667_v36 }
 0x6ff   :  { %13754 = vpow2.f32 %v12075_v43  ;;  %v12055_v9 = vsub.f32 %v17566_v12, %v12030_v8 }
 0x700   :  { %v13749_v23 = vpop.eup %13748 }
 0x701   :  { %v12077_v51 = vmul.f32 1.442695, %v12055_v9  ;;  %v17673_v4 = vsel %vm12000_vm0, %v13749_v23, 0.0 }
 0x702   :  { %v12032_v13 = vpop.xlane.xlu1 %12031  ;;  %12117 = vadd.xlane.f32.xlu0 %v17673_v4 }
 0x703   :  { %13756 = vpow2.f32 %v12077_v51  ;;  %v12056_v29 = vsub.f32 %v17578_v17, %v12032_v13 }
 0x704   :  { %v13751_v49 = vpop.eup %13750 }
 0x705   :  { %v12079_v58 = vmul.f32 1.442695, %v12056_v29  ;;  %v17679_v45 = vsel %vm12000_vm0, %v13751_v49, 0.0 }
 0x706   :  { %v12034_v27 = vpop.xlane.xlu0 %12033  ;;  %12119 = vadd.xlane.f32.xlu1 %v17679_v45 }
 0x707   :  { %13758 = vpow2.f32 %v12079_v58  ;;  %v12057_v12 = vsub.f32 %v17590_v60, %v12034_v27 }
 0x708   :  { %v13753_v62 = vpop.eup %13752 }
 0x709   :  { %v12081_v32 = vmul.f32 1.442695, %v12057_v12  ;;  %v17685_v2 = vsel %vm12000_vm0, %v13753_v62, 0.0 }
 0x70a   :  { %v12036_v52 = vpop.xlane.xlu1 %12035  ;;  %12121 = vadd.xlane.f32.xlu0 %v17685_v2 }
 0x70b   :  { %13760 = vpow2.f32 %v12081_v32  ;;  %v12058_v17 = vsub.f32 %v17602_v53, %v12036_v52 }
 0x70c   :  { %v13755_v6 = vpop.eup %13754 }
 0x70d   :  { %v12083_v34 = vmul.f32 1.442695, %v12058_v17  ;;  %v17691_v55 = vsel %vm12000_vm0, %v13755_v6, 0.0 }
 0x70e   :  { %v12038_v11 = vpop.xlane.xlu0 %12037  ;;  %12123 = vadd.xlane.f32.xlu1 %v17691_v55 }
 0x70f   :  { %13762 = vpow2.f32 %v12083_v34  ;;  %v12059_v60 = vsub.f32 %v17613_v50, %v12038_v11 }
 0x710   :  { %v13757_v1 = vpop.eup %13756 }
 0x711   :  { %v12085_v31 = vmul.f32 1.442695, %v12059_v60  ;;  %v17697_v18 = vsel %vm12000_vm0, %v13757_v1, 0.0 }
 0x712   :  { %v12040_v3 = vpop.xlane.xlu1 %12039  ;;  %12125 = vadd.xlane.f32.xlu0 %v17697_v18 }
 0x713   :  { %13764 = vpow2.f32 %v12085_v31  ;;  %v12060_v53 = vsub.f32 %v17623_v28, %v12040_v3 }
 0x714   :  { %v13759_v41 = vpop.eup %13758 }
 0x715   :  { %v12087_v5 = vmul.f32 1.442695, %v12060_v53  ;;  %v17703_v7 = vsel %vm12000_vm0, %v13759_v41, 0.0 }
 0x716   :  { %v12042_v56 = vpop.xlane.xlu0 %12041  ;;  %12127 = vadd.xlane.f32.xlu1 %v17703_v7 }
 0x717   :  { %13766 = vpow2.f32 %v12087_v5  ;;  %v12061_v50 = vsub.f32 %v17633_v37, %v12042_v56 }
 0x718   :  { %v13761_v22 = vpop.eup %13760 }
 0x719   :  { %v12089_v24 = vmul.f32 1.442695, %v12061_v50  ;;  %v17709_v16 = vsel %vm12000_vm0, %v13761_v22, 0.0 }
 0x71a   :  { %v12044_v35 = vpop.xlane.xlu1 %12043  ;;  %12129 = vadd.xlane.f32.xlu0 %v17709_v16 }
 0x71b   :  { %13768 = vpow2.f32 %v12089_v24  ;;  %v12062_v28 = vsub.f32 %v17641_v30, %v12044_v35 }
 0x71c   :  { %v13763_v33 = vpop.eup %13762 }
 0x71d   :  { %v12091_v10 = vmul.f32 1.442695, %v12062_v28  ;;  %v17715_v38 = vsel %vm12000_vm0, %v13763_v33, 0.0 }
 0x71e   :  { %12131 = vadd.xlane.f32.xlu1 %v17715_v38  ;;  %v12046_v37 = vpop.xlane.xlu0 %12045 }
 0x71f   :  { %13770 = vpow2.f32 %v12091_v10  ;;  %v12063_v59 = vsub.f32 %v17646_v14, %v12046_v37 }
 0x720   :  { %v13765_v15 = vpop.eup %13764 }
 0x721   :  { %v12093_v57 = vmul.f32 1.442695, %v12063_v59  ;;  %v17721_v48 = vsel %vm12000_vm0, %v13765_v15, 0.0 }
 0x722   :  { %v12048_v47 = vpop.xlane.xlu1 %12047  ;;  %12133 = vadd.xlane.f32.xlu0 %v17721_v48 }
 0x723   :  { %13772 = vpow2.f32 %v12093_v57  ;;  %v12064_v30 = vsub.f32 %v17651_v0, %v12048_v47 }
 0x724   :  { %v13767_v21 = vpop.eup %13766 }
 0x725   :  { %v12095_v26 = vmul.f32 1.442695, %v12064_v30  ;;  %v17727_v20 = vsel %vm12000_vm0, %v13767_v21, 0.0 }
 0x726   :  { %12135 = vadd.xlane.f32.xlu1 %v17727_v20 }
 0x727   :  { %13774 = vpow2.f32 %v12095_v26 }
 0x728   :  { %v13769_v14 = vpop.eup %13768 }
 0x729   :  { %v17732_v46 = vsel %vm12000_vm0, %v13769_v14, 0.0 }
 0x72a   :  { %12137 = vadd.xlane.f32.xlu0 %v17732_v46 }
 0x72c   :  { %v13771_v19 = vpop.eup %13770 }
 0x72d   :  { %v17737_v0 = vsel %vm12000_vm0, %v13771_v19, 0.0 }
 0x72e   :  { %12139 = vadd.xlane.f32.xlu1 %v17737_v0 }
 0x730   :  { %v13773_v25 = vpop.eup %13772 }
 0x731   :  { %v17742_v44 = vsel %vm12000_vm0, %v13773_v25, 0.0 }
 0x732   :  { %12141 = vadd.xlane.f32.xlu0 %v17742_v44 }
 0x734   :  { %v13775_v61 = vpop.eup %13774 }
 0x735   :  { %v17747_v39 = vsel %vm12000_vm0, %v13775_v61, 0.0 }
 0x736   :  { %12143 = vadd.xlane.f32.xlu1 %v17747_v39 }
 0x737   :  { %14115 = shalt.err (!%p14112_p11)
}
 0x738   :  { %s14171_s20 = smov 128   ;;  %s14172_s21 = smov 8  }
 0x739   :  { %12220 = dma.vmem_to_hbm [thread:$0]  %s12215_s6, 2048, %s17785_s7, [#allocation5], %s14171_s20, %s14171_s20, %s14172_s21  }
 0x73a   :  { %s14173_s7 = smov [#allocation16]  }
 0x73b   :  { %s12226_s24 = sshll.u32 %s14173_s7, 4  ;;  %s12227_s24 = int_to_ptr.vmem [resolvable:$true] %s12226_s24 }
 0x73c   :  { %s14124_s25 = scalar_lea.vmem %s12227_s24, 2048  ;;  %p14129_p13 = scmp.lt.s32.totalorder %s12227_s24, %s12227_s24 }
 0x73d   :  { %p14125_p12 = scmp.ne.s32.totalorder %s12227_s24, %s14124_s25  ;;  %p14130_p0 = scmp.lt.s32.totalorder %s14124_s25, %s14124_s25 }
 0x73f   :  { %p14131_p1 = por %p14130_p0, %p14129_p13 }
 0x741   :  { %p14132_p2 = pnand %p14131_p1, %p14125_p12 }
 0x783   :  { %v12114_v63 = vpop.xlane.xlu0 %12113 }
 0x784   :  { %13776 = vrcp.f32 %v12114_v63 }
 0x787   :  { %v12116_v54 = vpop.xlane.xlu1 %12115 }
 0x788   :  { %13778 = vrcp.f32 %v12116_v54 }
 0x78b   :  { %v12118_v40 = vpop.xlane.xlu0 %12117 }
 0x78c   :  { %13780 = vrcp.f32 %v12118_v40 }
 0x78f   :  { %v12120_v43 = vpop.xlane.xlu1 %12119 }
 0x790   :  { %13782 = vrcp.f32 %v12120_v43 }
 0x791   :  { %v13777_v8 = vpop.eup %13776 }
 0x792   :  { %v12161_v9 = vmul.f32 %v13777_v8, %v17661_v42 }
 0x793   :  { %v12122_v23 = vpop.xlane.xlu0 %12121 }
 0x794   :  { %12193 = vst [vmem:[#allocation16] sm:$0xff] %v12161_v9  ;;  %13784 = vrcp.f32 %v12122_v23 }
 0x795   :  { %v13779_v51 = vpop.eup %13778 }
 0x796   :  { %v12162_v13 = vmul.f32 %v13779_v51, %v17667_v36 }
 0x797   :  { %v12124_v29 = vpop.xlane.xlu1 %12123 }
 0x798   :  { %12194 = vst [vmem:[#allocation16 + $0x8] sm:$0xff] %v12162_v13  ;;  %13786 = vrcp.f32 %v12124_v29 }
 0x799   :  { %v13781_v49 = vpop.eup %13780 }
 0x79a   :  { %v12163_v58 = vmul.f32 %v13781_v49, %v17673_v4 }
 0x79b   :  { %v12126_v27 = vpop.xlane.xlu0 %12125 }
 0x79c   :  { %12195 = vst [vmem:[#allocation16 + $0x10] sm:$0xff] %v12163_v58  ;;  %13788 = vrcp.f32 %v12126_v27 }
 0x79d   :  { %v13783_v12 = vpop.eup %13782 }
 0x79e   :  { %v12164_v62 = vmul.f32 %v13783_v12, %v17679_v45 }
 0x79f   :  { %v12128_v32 = vpop.xlane.xlu1 %12127 }
 0x7a0   :  { %12196 = vst [vmem:[#allocation16 + $0x18] sm:$0xff] %v12164_v62  ;;  %13790 = vrcp.f32 %v12128_v32 }
 0x7a1   :  { %v13785_v42 = vpop.eup %13784 }
 0x7a2   :  { %v12165_v52 = vmul.f32 %v13785_v42, %v17685_v2 }
 0x7a3   :  { %v12130_v17 = vpop.xlane.xlu0 %12129 }
 0x7a4   :  { %12197 = vst [vmem:[#allocation16 + $0x20] sm:$0xff] %v12165_v52  ;;  %13792 = vrcp.f32 %v12130_v17 }
 0x7a5   :  { %v13787_v36 = vpop.eup %13786 }
 0x7a6   :  { %v12166_v6 = vmul.f32 %v13787_v36, %v17691_v55 }
 0x7a7   :  { %v12132_v34 = vpop.xlane.xlu1 %12131 }
 0x7a8   :  { %12198 = vst [vmem:[#allocation16 + $0x28] sm:$0xff] %v12166_v6  ;;  %13794 = vrcp.f32 %v12132_v34 }
 0x7a9   :  { %v13789_v4 = vpop.eup %13788 }
 0x7aa   :  { %v12167_v11 = vmul.f32 %v13789_v4, %v17697_v18 }
 0x7ab   :  { %v12134_v60 = vpop.xlane.xlu0 %12133 }
 0x7ac   :  { %12199 = vst [vmem:[#allocation16 + $0x30] sm:$0xff] %v12167_v11  ;;  %13796 = vrcp.f32 %v12134_v60 }
 0x7ad   :  { %v13791_v45 = vpop.eup %13790 }
 0x7ae   :  { %v12168_v1 = vmul.f32 %v13791_v45, %v17703_v7 }
 0x7af   :  { %v12136_v31 = vpop.xlane.xlu1 %12135 }
 0x7b0   :  { %12200 = vst [vmem:[#allocation16 + $0x38] sm:$0xff] %v12168_v1  ;;  %13798 = vrcp.f32 %v12136_v31 }
 0x7b1   :  { %v13793_v2 = vpop.eup %13792 }
 0x7b2   :  { %v12169_v3 = vmul.f32 %v13793_v2, %v17709_v16 }
 0x7b3   :  { %v12138_v53 = vpop.xlane.xlu0 %12137 }
 0x7b4   :  { %12201 = vst [vmem:[#allocation16 + $0x40] sm:$0xff] %v12169_v3  ;;  %13800 = vrcp.f32 %v12138_v53 }
 0x7b5   :  { %v13795_v55 = vpop.eup %13794 }
 0x7b6   :  { %v12170_v41 = vmul.f32 %v13795_v55, %v17715_v38 }
 0x7b7   :  { %v12140_v5 = vpop.xlane.xlu1 %12139 }
 0x7b8   :  { %12202 = vst [vmem:[#allocation16 + $0x48] sm:$0xff] %v12170_v41  ;;  %13802 = vrcp.f32 %v12140_v5 }
 0x7b9   :  { %v13797_v18 = vpop.eup %13796 }
 0x7ba   :  { %v12171_v56 = vmul.f32 %v13797_v18, %v17721_v48 }
 0x7bb   :  { %v12142_v50 = vpop.xlane.xlu0 %12141 }
 0x7bc   :  { %12203 = vst [vmem:[#allocation16 + $0x50] sm:$0xff] %v12171_v56  ;;  %13804 = vrcp.f32 %v12142_v50 }
 0x7bd   :  { %v13799_v7 = vpop.eup %13798 }
 0x7be   :  { %v12172_v22 = vmul.f32 %v13799_v7, %v17727_v20 }
 0x7bf   :  { %v12144_v24 = vpop.xlane.xlu1 %12143 }
 0x7c0   :  { %12204 = vst [vmem:[#allocation16 + $0x58] sm:$0xff] %v12172_v22  ;;  %13806 = vrcp.f32 %v12144_v24 }
 0x7c1   :  { %v13801_v16 = vpop.eup %13800 }
 0x7c2   :  { %v12173_v35 = vmul.f32 %v13801_v16, %v17732_v46 }
 0x7c4   :  { %12205 = vst [vmem:[#allocation16 + $0x60] sm:$0xff] %v12173_v35 }
 0x7c5   :  { %v13803_v28 = vpop.eup %13802 }
 0x7c6   :  { %v12174_v33 = vmul.f32 %v13803_v28, %v17737_v0 }
 0x7c8   :  { %12206 = vst [vmem:[#allocation16 + $0x68] sm:$0xff] %v12174_v33 }
 0x7c9   :  { %v13805_v10 = vpop.eup %13804 }
 0x7ca   :  { %v12175_v38 = vmul.f32 %v13805_v10, %v17742_v44 }
 0x7cc   :  { %12207 = vst [vmem:[#allocation16 + $0x70] sm:$0xff] %v12175_v38 }
 0x7cd   :  { %v13807_v37 = vpop.eup %13806 }
 0x7ce   :  { %v12176_v59 = vmul.f32 %v13807_v37, %v17747_v39 }
 0x7d0   :  { %12208 = vst [vmem:[#allocation16 + $0x78] sm:$0xff] %v12176_v59 }
 0x7d1   :  { %14135 = shalt.err (!%p14132_p2)
}
 0x7d2   :  { %12232 = dma.vmem_to_hbm [thread:$0]  %s12227_s24, 2048, %s17786_s8, [#allocation17], %s14171_s20, %s14171_s20, %s14172_s21  }
 0x7d3   :  { %14152 = dma.done.wait [#allocation5], 2048  }
 0x7d4   :  { %14153 = vsyncadd [#allocation5], 4294965248 }
 0x7d5   :  { %14154 = dma.done.wait [#allocation17], 2048  }
 0x7d6   :  { %14155 = vsyncadd [#allocation17], 4294965248 }
 0x7d7   :  { %12239 = vsyncpa [#allocation4], 1 }
 0x7d8   :  { %12240 = vsyncpa [#allocation7], 1 }
 0x7d9   :  { %12241 = vsyncpa [#allocation10], 1 }
 0x7da   :  { %12242 = vsyncpa [#allocation13], 1 }
 0x7db   :  { %12243 = vsyncpa [#allocation5], 1 }
 0x7dc   :  { %12244 = vsyncpa [#allocation17], 1 }

</bundles_post_ra>
